<compile_context>
chip_gen: v7x
topology: tpu7x:2x2x1
jax: 0.10.0
libtpu: 0.0.40
codegen_flags: <defaults>
</compile_context>

<pallas_src>
import jax
import jax.numpy as jnp
from jax.experimental import pallas as pl
from jax.experimental.pallas import tpu as pltpu


OUT_LANES = 128   # lane-dense padded channel dim for the tail / output store
ROWPAD = 8        # zero rows appended so 3x3 tap slices never run off the end


def _tensorcores_per_chip():
    """Crude generation probe: only v7x has 2 TensorCores per chip."""
    try:
        kind = jax.devices()[0].device_kind.lower()
    except Exception:
        return 1
    return 2 if "v7" in kind else 1


# ------------------------------ Pallas kernel -------------------------------

def _make_fused_generator_kernel(nlayers, ker, width, chans, mo_list, nb):
    """Whole-Generator kernel; processes `nb` batch elements per grid step.

    chans[li]   = (cin_padded, cout_padded) as seen inside the kernel
    mo_list[li] = output rows per batch element (= Ho_l * width)
    """

    def kernel(*refs):
        x_ref, y_ref = refs[0], refs[1]
        w_refs = refs[2:2 + nlayers]
        b_ref = refs[2 + nlayers]
        o_ref = refs[3 + nlayers]

        h = x_ref[...]                                    # (nb, Mi0, Cin0) f32
        for li in range(nlayers):
            cin, cout = chans[li]
            mo = mo_list[li]

            # layout-preserving im2col: 9 sublane-offset taps, accumulated.
            acc = None
            for kh in range(ker):
                for kw in range(ker):
                    off = kh * width + kw
                    tap = h[:, off:off + mo, :].reshape(nb * mo, cin)
                    w_tap = w_refs[li][kh * ker + kw]      # (cin, cout)
                    d = jnp.dot(tap, w_tap,
                                preferred_element_type=jnp.float32)
                    acc = d if acc is None else acc + d

            acc = acc + b_ref[li:li + 1, :cout]            # folded BN bias

            if li < nlayers - 1:
                acc = jnp.where(acc >= 0.0, acc, 0.2 * acc)   # LeakyReLU(0.2)
                h = acc.reshape(nb, mo, cout)
                # keep next layer's tap slices in bounds (finite zeros, never
                # stale VMEM); garbage positions never feed valid outputs.
                h = jnp.concatenate(
                    [h, jnp.zeros((nb, ROWPAD, cout), jnp.float32)], axis=1)
            else:
                acc = jnp.tanh(acc)                        # pads stay 0
                out = acc.reshape(nb, mo, cout) + y_ref[...]
                o_ref[...] = out                           # unmasked, lane-dense

    return kernel


# --------------------------- parameter plumbing -----------------------------

def build_channel_plan(nc_im, nfc, min_nfc, num_layer):
    """Replicates Generator.__init__ channel bookkeeping."""
    chans = [(nc_im, nfc)]                               # head
    N = nfc
    for i in range(num_layer - 2):                       # body
        N = int(nfc / (2 ** (i + 1)))
        chans.append((max(2 * N, min_nfc), max(N, min_nfc)))
    chans.append((max(N, min_nfc), nc_im))               # tail
    return chans


def init_params(key, nc_im, nfc, min_nfc, ker_size, num_layer):
    """Returns per-layer (folded_weight (KH,KW,Cin,Cout), bias (Cout,))."""
    chans = build_channel_plan(nc_im, nfc, min_nfc, num_layer)
    eps = 1e-5
    params = []
    for li, (cin, cout) in enumerate(chans):
        key, k_w, k_b, k_g = jax.random.split(key, 4)
        w = 0.02 * jax.random.normal(k_w, (ker_size, ker_size, cin, cout),
                                     jnp.float32)
        b = 0.02 * jax.random.normal(k_b, (cout,), jnp.float32)
        if li == len(chans) - 1:                          # tail: no BN
            w_f, bias = w, b
        else:
            # BatchNorm (eval): gamma ~ N(1, 0.02), beta = 0, mean = 0, var = 1
            gamma = 1.0 + 0.02 * jax.random.normal(k_g, (cout,), jnp.float32)
            beta = jnp.zeros((cout,), jnp.float32)
            s = gamma / jnp.sqrt(1.0 + eps)
            w_f = w * s[None, None, None, :]              # fold scale into conv
            bias = b * s + beta
        params.append((w_f, bias))
    return params


# ------------------------------- forward ------------------------------------

@jax.jit
def generator_forward(params, x_nchw, y_nchw):
    nlayers = len(params)
    ker = params[0][0].shape[0]
    nc_out = params[-1][0].shape[3]
    N, _, H, W = x_nchw.shape

    ho = H - nlayers * (ker - 1)
    wo = W - nlayers * (ker - 1)
    crop = (y_nchw.shape[2] - ho) // 2            # matches int((y.H - x.H)/2)

    # ---------------- layout plumbing in plain JAX (free) -------------------
    x = jnp.transpose(x_nchw, (0, 2, 3, 1))       # NHWC (channels on lanes)
    y = jnp.transpose(y_nchw, (0, 2, 3, 1))

    cin0 = x.shape[-1]
    cin0_pad = max(8, cin0)
    x_flat = jnp.pad(x.reshape(N, H * W, cin0),
                     ((0, 0), (0, ROWPAD), (0, cin0_pad - cin0)))

    # residual: pre-crop, pad width back to W and channels to 128 lanes,
    # flatten -> aligned unmasked add inside the kernel.
    y_c = y[:, crop:crop + ho, crop:crop + wo, :]
    y_pad = jnp.pad(y_c, ((0, 0), (0, 0), (0, W - wo),
                          (0, OUT_LANES - nc_out)))
    y_flat = y_pad.reshape(N, ho * W, OUT_LANES)

    # weights: (ker,ker,cin,cout) -> (ker*ker, cin_pad, cout_pad), BN folded.
    w_list, chans, mo_list = [], [], []
    for li, (w, _) in enumerate(params):
        cin, cout = w.shape[2], w.shape[3]
        cin_p = cin0_pad if li == 0 else cin
        cout_p = OUT_LANES if li == nlayers - 1 else cout
        wm = jnp.pad(w.reshape(ker * ker, cin, cout),
                     ((0, 0), (0, cin_p - cin), (0, cout_p - cout)))
        w_list.append(wm)
        chans.append((cin_p, cout_p))
        mo_list.append((H - (li + 1) * (ker - 1)) * W)

    # pack the 5 tiny biases into one lane-dense operand
    b_all = jnp.stack([jnp.pad(b, (0, OUT_LANES - b.shape[0]))
                       for (_, b) in params], axis=0)

    # batching strategy: fold the batch into matmul M on single-TC chips
    # (v5e/v6e); keep a 2-way parallel grid on v7x's two TensorCores.
    nb = 1 if (_tensorcores_per_chip() >= 2 and N > 1) else N
    nsteps = N // nb

    kernel = _make_fused_generator_kernel(nlayers, ker, W, chans, mo_list, nb)

    in_specs = (
        [pl.BlockSpec((nb,) + x_flat.shape[1:], lambda n: (n, 0, 0)),
         pl.BlockSpec((nb,) + y_flat.shape[1:], lambda n: (n, 0, 0))]
        + [pl.BlockSpec(wm.shape, lambda n: (0, 0, 0)) for wm in w_list]
        + [pl.BlockSpec(b_all.shape, lambda n: (0, 0))]
    )

    out = pl.pallas_call(
        kernel,
        out_shape=jax.ShapeDtypeStruct((N, ho * W, OUT_LANES), jnp.float32),
        grid=(nsteps,),
        in_specs=in_specs,
        out_specs=pl.BlockSpec((nb, ho * W, OUT_LANES), lambda n: (n, 0, 0)),
        compiler_params=pltpu.CompilerParams(
            dimension_semantics=("parallel",)),
    )(x_flat, y_flat, *w_list, b_all)

    # strip garbage right-edge columns and lane padding
    out = out.reshape(N, ho, W, OUT_LANES)[:, :, :wo, :nc_out]
    return jnp.transpose(out, (0, 3, 1, 2))               # NHWC -> NCHW


def reference_forward(params, x_nchw, y_nchw):
    """Pure-JAX reference (lax.conv) on the same folded parameters."""
    h = x_nchw
    for li, (w, b) in enumerate(params):
        w_oihw = jnp.transpose(w, (3, 2, 0, 1))
        h = jax.lax.conv_general_dilated(
            h, w_oihw, (1, 1), "VALID",
            dimension_numbers=("NCHW", "OIHW", "NCHW"))
        h = h + b.reshape(1, -1, 1, 1)
        if li < len(params) - 1:
            h = jnp.where(h >= 0, h, 0.2 * h)
        else:
            h = jnp.tanh(h)
    ind = (y_nchw.shape[2] - h.shape[2]) // 2
    y_c = y_nchw[:, :, ind:y_nchw.shape[2] - ind, ind:y_nchw.shape[3] - ind]
    return h + y_c


# --------------------------------- main --------------------------------------

if __name__ == "__main__":
    # SinGAN-ish opt at small sizes: nc_im=3, nfc=16, min_nfc=8, ker=3,
    # padd=0, num_layer=5  ->  5 conv layers, spatial 16 -> 6.
    nc_im, nfc, min_nfc, ker_size, num_layer = 3, 16, 8, 3, 5
    N_batch, H, W = 2, 16, 16

    key = jax.random.PRNGKey(0)
    key, kx, ky, kp = jax.random.split(key, 4)
    x = jax.random.normal(kx, (N_batch, nc_im, H, W), jnp.float32)
    y = jax.random.normal(ky, (N_batch, nc_im, H, W), jnp.float32)

    params = init_params(kp, nc_im, nfc, min_nfc, ker_size, num_layer)

    out = jax.block_until_ready(generator_forward(params, x, y))
    ref = jax.block_until_ready(reference_forward(params, x, y))

    assert out.shape == ref.shape, (out.shape, ref.shape)
    max_err = float(jnp.max(jnp.abs(out - ref)))
    assert bool(jnp.allclose(out, ref, rtol=2e-3, atol=2e-3)), max_err

    print("KERNEL_OK")
</pallas_src>

<mosaic_0001>
module attributes {stable_mosaic.version = 11 : i64} {
  func.func @kernel(%arg0: i32, %arg1: memref<2x264x8xf32, #tpu.memory_space<vmem>>, %arg2: memref<2x96x128xf32, #tpu.memory_space<vmem>>, %arg3: memref<9x8x16xf32, #tpu.memory_space<vmem>>, %arg4: memref<9x16x8xf32, #tpu.memory_space<vmem>>, %arg5: memref<9x8x8xf32, #tpu.memory_space<vmem>>, %arg6: memref<9x8x8xf32, #tpu.memory_space<vmem>>, %arg7: memref<9x8x128xf32, #tpu.memory_space<vmem>>, %arg8: memref<5x128xf32, #tpu.memory_space<vmem>>, %arg9: memref<2x96x128xf32, #tpu.memory_space<vmem>>) attributes {dimension_semantics = [#tpu.dimension_semantics<parallel>], iteration_bounds = array<i64: 1>, scalar_prefetch = 0 : i64, scratch_operands = 0 : i64, tpu.core_type = #tpu.core_type<tc>, window_params = [{transform_indices = @transform_0, window_bounds = array<i64: 2, 264, 8>}, {transform_indices = @transform_1, window_bounds = array<i64: 2, 96, 128>}, {pipeline_mode = #tpu.pipeline_mode<synchronous>, transform_indices = @transform_2, window_bounds = array<i64: 9, 8, 16>}, {pipeline_mode = #tpu.pipeline_mode<synchronous>, transform_indices = @transform_3, window_bounds = array<i64: 9, 16, 8>}, {pipeline_mode = #tpu.pipeline_mode<synchronous>, transform_indices = @transform_4, window_bounds = array<i64: 9, 8, 8>}, {pipeline_mode = #tpu.pipeline_mode<synchronous>, transform_indices = @transform_5, window_bounds = array<i64: 9, 8, 8>}, {pipeline_mode = #tpu.pipeline_mode<synchronous>, transform_indices = @transform_6, window_bounds = array<i64: 9, 8, 128>}, {pipeline_mode = #tpu.pipeline_mode<synchronous>, transform_indices = @transform_7, window_bounds = array<i64: 5, 128>}, {transform_indices = @transform_8, window_bounds = array<i64: 2, 96, 128>}]} {
    %c0 = arith.constant 0 : index
    %c0_0 = arith.constant 0 : index
    %c0_1 = arith.constant 0 : index
    %0 = vector.load %arg1[%c0, %c0_0, %c0_1] : memref<2x264x8xf32, #tpu.memory_space<vmem>>, vector<2x264x8xf32>
    %1 = vector.extract_strided_slice %0 {offsets = [0, 0, 0], sizes = [2, 224, 8], strides = [1, 1, 1]} : vector<2x264x8xf32> to vector<2x224x8xf32>
    %2 = vector.shape_cast %1 : vector<2x224x8xf32> to vector<448x8xf32>
    %c0_2 = arith.constant 0 : index
    %c0_3 = arith.constant 0 : index
    %c0_4 = arith.constant 0 : index
    %3 = vector.load %arg3[%c0_2, %c0_3, %c0_4] : memref<9x8x16xf32, #tpu.memory_space<vmem>>, vector<1x8x16xf32>
    %4 = vector.shape_cast %3 : vector<1x8x16xf32> to vector<8x16xf32>
    %cst = arith.constant dense<0.000000e+00> : vector<448x16xf32>
    %5 = tpu.matmul %2, %4, %cst {dimension_numbers = #tpu.dot_dimension_numbers<[1], [0], [0], [1], [0, 0, 1, 1], [], []>} : vector<448x8xf32>, vector<8x16xf32>, vector<448x16xf32> -> vector<448x16xf32>
    %6 = vector.extract_strided_slice %0 {offsets = [0, 1, 0], sizes = [2, 224, 8], strides = [1, 1, 1]} : vector<2x264x8xf32> to vector<2x224x8xf32>
    %7 = vector.shape_cast %6 : vector<2x224x8xf32> to vector<448x8xf32>
    %c1 = arith.constant 1 : index
    %c0_5 = arith.constant 0 : index
    %c0_6 = arith.constant 0 : index
    %8 = vector.load %arg3[%c1, %c0_5, %c0_6] : memref<9x8x16xf32, #tpu.memory_space<vmem>>, vector<1x8x16xf32>
    %9 = vector.shape_cast %8 : vector<1x8x16xf32> to vector<8x16xf32>
    %cst_7 = arith.constant dense<0.000000e+00> : vector<448x16xf32>
    %10 = tpu.matmul %7, %9, %cst_7 {dimension_numbers = #tpu.dot_dimension_numbers<[1], [0], [0], [1], [0, 0, 1, 1], [], []>} : vector<448x8xf32>, vector<8x16xf32>, vector<448x16xf32> -> vector<448x16xf32>
    %11 = arith.addf %5, %10 : vector<448x16xf32>
    %12 = vector.extract_strided_slice %0 {offsets = [0, 2, 0], sizes = [2, 224, 8], strides = [1, 1, 1]} : vector<2x264x8xf32> to vector<2x224x8xf32>
    %13 = vector.shape_cast %12 : vector<2x224x8xf32> to vector<448x8xf32>
    %c2 = arith.constant 2 : index
    %c0_8 = arith.constant 0 : index
    %c0_9 = arith.constant 0 : index
    %14 = vector.load %arg3[%c2, %c0_8, %c0_9] : memref<9x8x16xf32, #tpu.memory_space<vmem>>, vector<1x8x16xf32>
    %15 = vector.shape_cast %14 : vector<1x8x16xf32> to vector<8x16xf32>
    %cst_10 = arith.constant dense<0.000000e+00> : vector<448x16xf32>
    %16 = tpu.matmul %13, %15, %cst_10 {dimension_numbers = #tpu.dot_dimension_numbers<[1], [0], [0], [1], [0, 0, 1, 1], [], []>} : vector<448x8xf32>, vector<8x16xf32>, vector<448x16xf32> -> vector<448x16xf32>
    %17 = arith.addf %11, %16 : vector<448x16xf32>
    %18 = vector.extract_strided_slice %0 {offsets = [0, 16, 0], sizes = [2, 224, 8], strides = [1, 1, 1]} : vector<2x264x8xf32> to vector<2x224x8xf32>
    %19 = vector.shape_cast %18 : vector<2x224x8xf32> to vector<448x8xf32>
    %c3 = arith.constant 3 : index
    %c0_11 = arith.constant 0 : index
    %c0_12 = arith.constant 0 : index
    %20 = vector.load %arg3[%c3, %c0_11, %c0_12] : memref<9x8x16xf32, #tpu.memory_space<vmem>>, vector<1x8x16xf32>
    %21 = vector.shape_cast %20 : vector<1x8x16xf32> to vector<8x16xf32>
    %cst_13 = arith.constant dense<0.000000e+00> : vector<448x16xf32>
    %22 = tpu.matmul %19, %21, %cst_13 {dimension_numbers = #tpu.dot_dimension_numbers<[1], [0], [0], [1], [0, 0, 1, 1], [], []>} : vector<448x8xf32>, vector<8x16xf32>, vector<448x16xf32> -> vector<448x16xf32>
    %23 = arith.addf %17, %22 : vector<448x16xf32>
    %24 = vector.extract_strided_slice %0 {offsets = [0, 17, 0], sizes = [2, 224, 8], strides = [1, 1, 1]} : vector<2x264x8xf32> to vector<2x224x8xf32>
    %25 = vector.shape_cast %24 : vector<2x224x8xf32> to vector<448x8xf32>
    %c4 = arith.constant 4 : index
    %c0_14 = arith.constant 0 : index
    %c0_15 = arith.constant 0 : index
    %26 = vector.load %arg3[%c4, %c0_14, %c0_15] : memref<9x8x16xf32, #tpu.memory_space<vmem>>, vector<1x8x16xf32>
    %27 = vector.shape_cast %26 : vector<1x8x16xf32> to vector<8x16xf32>
    %cst_16 = arith.constant dense<0.000000e+00> : vector<448x16xf32>
    %28 = tpu.matmul %25, %27, %cst_16 {dimension_numbers = #tpu.dot_dimension_numbers<[1], [0], [0], [1], [0, 0, 1, 1], [], []>} : vector<448x8xf32>, vector<8x16xf32>, vector<448x16xf32> -> vector<448x16xf32>
    %29 = arith.addf %23, %28 : vector<448x16xf32>
    %30 = vector.extract_strided_slice %0 {offsets = [0, 18, 0], sizes = [2, 224, 8], strides = [1, 1, 1]} : vector<2x264x8xf32> to vector<2x224x8xf32>
    %31 = vector.shape_cast %30 : vector<2x224x8xf32> to vector<448x8xf32>
    %c5 = arith.constant 5 : index
    %c0_17 = arith.constant 0 : index
    %c0_18 = arith.constant 0 : index
    %32 = vector.load %arg3[%c5, %c0_17, %c0_18] : memref<9x8x16xf32, #tpu.memory_space<vmem>>, vector<1x8x16xf32>
    %33 = vector.shape_cast %32 : vector<1x8x16xf32> to vector<8x16xf32>
    %cst_19 = arith.constant dense<0.000000e+00> : vector<448x16xf32>
    %34 = tpu.matmul %31, %33, %cst_19 {dimension_numbers = #tpu.dot_dimension_numbers<[1], [0], [0], [1], [0, 0, 1, 1], [], []>} : vector<448x8xf32>, vector<8x16xf32>, vector<448x16xf32> -> vector<448x16xf32>
    %35 = arith.addf %29, %34 : vector<448x16xf32>
    %36 = vector.extract_strided_slice %0 {offsets = [0, 32, 0], sizes = [2, 224, 8], strides = [1, 1, 1]} : vector<2x264x8xf32> to vector<2x224x8xf32>
    %37 = vector.shape_cast %36 : vector<2x224x8xf32> to vector<448x8xf32>
    %c6 = arith.constant 6 : index
    %c0_20 = arith.constant 0 : index
    %c0_21 = arith.constant 0 : index
    %38 = vector.load %arg3[%c6, %c0_20, %c0_21] : memref<9x8x16xf32, #tpu.memory_space<vmem>>, vector<1x8x16xf32>
    %39 = vector.shape_cast %38 : vector<1x8x16xf32> to vector<8x16xf32>
    %cst_22 = arith.constant dense<0.000000e+00> : vector<448x16xf32>
    %40 = tpu.matmul %37, %39, %cst_22 {dimension_numbers = #tpu.dot_dimension_numbers<[1], [0], [0], [1], [0, 0, 1, 1], [], []>} : vector<448x8xf32>, vector<8x16xf32>, vector<448x16xf32> -> vector<448x16xf32>
    %41 = arith.addf %35, %40 : vector<448x16xf32>
    %42 = vector.extract_strided_slice %0 {offsets = [0, 33, 0], sizes = [2, 224, 8], strides = [1, 1, 1]} : vector<2x264x8xf32> to vector<2x224x8xf32>
    %43 = vector.shape_cast %42 : vector<2x224x8xf32> to vector<448x8xf32>
    %c7 = arith.constant 7 : index
    %c0_23 = arith.constant 0 : index
    %c0_24 = arith.constant 0 : index
    %44 = vector.load %arg3[%c7, %c0_23, %c0_24] : memref<9x8x16xf32, #tpu.memory_space<vmem>>, vector<1x8x16xf32>
    %45 = vector.shape_cast %44 : vector<1x8x16xf32> to vector<8x16xf32>
    %cst_25 = arith.constant dense<0.000000e+00> : vector<448x16xf32>
    %46 = tpu.matmul %43, %45, %cst_25 {dimension_numbers = #tpu.dot_dimension_numbers<[1], [0], [0], [1], [0, 0, 1, 1], [], []>} : vector<448x8xf32>, vector<8x16xf32>, vector<448x16xf32> -> vector<448x16xf32>
    %47 = arith.addf %41, %46 : vector<448x16xf32>
    %48 = vector.extract_strided_slice %0 {offsets = [0, 34, 0], sizes = [2, 224, 8], strides = [1, 1, 1]} : vector<2x264x8xf32> to vector<2x224x8xf32>
    %49 = vector.shape_cast %48 : vector<2x224x8xf32> to vector<448x8xf32>
    %c8 = arith.constant 8 : index
    %c0_26 = arith.constant 0 : index
    %c0_27 = arith.constant 0 : index
    %50 = vector.load %arg3[%c8, %c0_26, %c0_27] : memref<9x8x16xf32, #tpu.memory_space<vmem>>, vector<1x8x16xf32>
    %51 = vector.shape_cast %50 : vector<1x8x16xf32> to vector<8x16xf32>
    %cst_28 = arith.constant dense<0.000000e+00> : vector<448x16xf32>
    %52 = tpu.matmul %49, %51, %cst_28 {dimension_numbers = #tpu.dot_dimension_numbers<[1], [0], [0], [1], [0, 0, 1, 1], [], []>} : vector<448x8xf32>, vector<8x16xf32>, vector<448x16xf32> -> vector<448x16xf32>
    %53 = arith.addf %47, %52 : vector<448x16xf32>
    %c0_29 = arith.constant 0 : index
    %c0_30 = arith.constant 0 : index
    %54 = vector.load %arg8[%c0_29, %c0_30] : memref<5x128xf32, #tpu.memory_space<vmem>>, vector<1x16xf32>
    %55 = vector.broadcast %54 : vector<1x16xf32> to vector<448x16xf32>
    %56 = arith.addf %53, %55 : vector<448x16xf32>
    %cst_31 = arith.constant 0.000000e+00 : f32
    %57 = vector.broadcast %cst_31 : f32 to vector<448x16xf32>
    %58 = arith.cmpf oge, %56, %57 : vector<448x16xf32>
    %cst_32 = arith.constant 2.000000e-01 : f32
    %59 = vector.broadcast %cst_32 : f32 to vector<448x16xf32>
    %60 = arith.mulf %59, %56 : vector<448x16xf32>
    %61 = arith.select %58, %56, %60 : vector<448x16xi1>, vector<448x16xf32>
    %62 = vector.shape_cast %61 : vector<448x16xf32> to vector<2x224x16xf32>
    %cst_33 = arith.constant 0.000000e+00 : f32
    %63 = vector.broadcast %cst_33 : f32 to vector<2x8x16xf32>
    %64 = tpu.concatenate %62, %63 in 1 : vector<2x224x16xf32>, vector<2x8x16xf32> -> vector<2x232x16xf32>
    %65 = vector.extract_strided_slice %64 {offsets = [0, 0, 0], sizes = [2, 192, 16], strides = [1, 1, 1]} : vector<2x232x16xf32> to vector<2x192x16xf32>
    %66 = vector.shape_cast %65 : vector<2x192x16xf32> to vector<384x16xf32>
    %c0_34 = arith.constant 0 : index
    %c0_35 = arith.constant 0 : index
    %c0_36 = arith.constant 0 : index
    %67 = vector.load %arg4[%c0_34, %c0_35, %c0_36] : memref<9x16x8xf32, #tpu.memory_space<vmem>>, vector<1x16x8xf32>
    %68 = vector.shape_cast %67 : vector<1x16x8xf32> to vector<16x8xf32>
    %cst_37 = arith.constant dense<0.000000e+00> : vector<384x8xf32>
    %69 = tpu.matmul %66, %68, %cst_37 {dimension_numbers = #tpu.dot_dimension_numbers<[1], [0], [0], [1], [0, 0, 1, 1], [], []>} : vector<384x16xf32>, vector<16x8xf32>, vector<384x8xf32> -> vector<384x8xf32>
    %70 = vector.extract_strided_slice %64 {offsets = [0, 1, 0], sizes = [2, 192, 16], strides = [1, 1, 1]} : vector<2x232x16xf32> to vector<2x192x16xf32>
    %71 = vector.shape_cast %70 : vector<2x192x16xf32> to vector<384x16xf32>
    %c1_38 = arith.constant 1 : index
    %c0_39 = arith.constant 0 : index
    %c0_40 = arith.constant 0 : index
    %72 = vector.load %arg4[%c1_38, %c0_39, %c0_40] : memref<9x16x8xf32, #tpu.memory_space<vmem>>, vector<1x16x8xf32>
    %73 = vector.shape_cast %72 : vector<1x16x8xf32> to vector<16x8xf32>
    %cst_41 = arith.constant dense<0.000000e+00> : vector<384x8xf32>
    %74 = tpu.matmul %71, %73, %cst_41 {dimension_numbers = #tpu.dot_dimension_numbers<[1], [0], [0], [1], [0, 0, 1, 1], [], []>} : vector<384x16xf32>, vector<16x8xf32>, vector<384x8xf32> -> vector<384x8xf32>
    %75 = arith.addf %69, %74 : vector<384x8xf32>
    %76 = vector.extract_strided_slice %64 {offsets = [0, 2, 0], sizes = [2, 192, 16], strides = [1, 1, 1]} : vector<2x232x16xf32> to vector<2x192x16xf32>
    %77 = vector.shape_cast %76 : vector<2x192x16xf32> to vector<384x16xf32>
    %c2_42 = arith.constant 2 : index
    %c0_43 = arith.constant 0 : index
    %c0_44 = arith.constant 0 : index
    %78 = vector.load %arg4[%c2_42, %c0_43, %c0_44] : memref<9x16x8xf32, #tpu.memory_space<vmem>>, vector<1x16x8xf32>
    %79 = vector.shape_cast %78 : vector<1x16x8xf32> to vector<16x8xf32>
    %cst_45 = arith.constant dense<0.000000e+00> : vector<384x8xf32>
    %80 = tpu.matmul %77, %79, %cst_45 {dimension_numbers = #tpu.dot_dimension_numbers<[1], [0], [0], [1], [0, 0, 1, 1], [], []>} : vector<384x16xf32>, vector<16x8xf32>, vector<384x8xf32> -> vector<384x8xf32>
    %81 = arith.addf %75, %80 : vector<384x8xf32>
    %82 = vector.extract_strided_slice %64 {offsets = [0, 16, 0], sizes = [2, 192, 16], strides = [1, 1, 1]} : vector<2x232x16xf32> to vector<2x192x16xf32>
    %83 = vector.shape_cast %82 : vector<2x192x16xf32> to vector<384x16xf32>
    %c3_46 = arith.constant 3 : index
    %c0_47 = arith.constant 0 : index
    %c0_48 = arith.constant 0 : index
    %84 = vector.load %arg4[%c3_46, %c0_47, %c0_48] : memref<9x16x8xf32, #tpu.memory_space<vmem>>, vector<1x16x8xf32>
    %85 = vector.shape_cast %84 : vector<1x16x8xf32> to vector<16x8xf32>
    %cst_49 = arith.constant dense<0.000000e+00> : vector<384x8xf32>
    %86 = tpu.matmul %83, %85, %cst_49 {dimension_numbers = #tpu.dot_dimension_numbers<[1], [0], [0], [1], [0, 0, 1, 1], [], []>} : vector<384x16xf32>, vector<16x8xf32>, vector<384x8xf32> -> vector<384x8xf32>
    %87 = arith.addf %81, %86 : vector<384x8xf32>
    %88 = vector.extract_strided_slice %64 {offsets = [0, 17, 0], sizes = [2, 192, 16], strides = [1, 1, 1]} : vector<2x232x16xf32> to vector<2x192x16xf32>
    %89 = vector.shape_cast %88 : vector<2x192x16xf32> to vector<384x16xf32>
    %c4_50 = arith.constant 4 : index
    %c0_51 = arith.constant 0 : index
    %c0_52 = arith.constant 0 : index
    %90 = vector.load %arg4[%c4_50, %c0_51, %c0_52] : memref<9x16x8xf32, #tpu.memory_space<vmem>>, vector<1x16x8xf32>
    %91 = vector.shape_cast %90 : vector<1x16x8xf32> to vector<16x8xf32>
    %cst_53 = arith.constant dense<0.000000e+00> : vector<384x8xf32>
    %92 = tpu.matmul %89, %91, %cst_53 {dimension_numbers = #tpu.dot_dimension_numbers<[1], [0], [0], [1], [0, 0, 1, 1], [], []>} : vector<384x16xf32>, vector<16x8xf32>, vector<384x8xf32> -> vector<384x8xf32>
    %93 = arith.addf %87, %92 : vector<384x8xf32>
    %94 = vector.extract_strided_slice %64 {offsets = [0, 18, 0], sizes = [2, 192, 16], strides = [1, 1, 1]} : vector<2x232x16xf32> to vector<2x192x16xf32>
    %95 = vector.shape_cast %94 : vector<2x192x16xf32> to vector<384x16xf32>
    %c5_54 = arith.constant 5 : index
    %c0_55 = arith.constant 0 : index
    %c0_56 = arith.constant 0 : index
    %96 = vector.load %arg4[%c5_54, %c0_55, %c0_56] : memref<9x16x8xf32, #tpu.memory_space<vmem>>, vector<1x16x8xf32>
    %97 = vector.shape_cast %96 : vector<1x16x8xf32> to vector<16x8xf32>
    %cst_57 = arith.constant dense<0.000000e+00> : vector<384x8xf32>
    %98 = tpu.matmul %95, %97, %cst_57 {dimension_numbers = #tpu.dot_dimension_numbers<[1], [0], [0], [1], [0, 0, 1, 1], [], []>} : vector<384x16xf32>, vector<16x8xf32>, vector<384x8xf32> -> vector<384x8xf32>
    %99 = arith.addf %93, %98 : vector<384x8xf32>
    %100 = vector.extract_strided_slice %64 {offsets = [0, 32, 0], sizes = [2, 192, 16], strides = [1, 1, 1]} : vector<2x232x16xf32> to vector<2x192x16xf32>
    %101 = vector.shape_cast %100 : vector<2x192x16xf32> to vector<384x16xf32>
    %c6_58 = arith.constant 6 : index
    %c0_59 = arith.constant 0 : index
    %c0_60 = arith.constant 0 : index
    %102 = vector.load %arg4[%c6_58, %c0_59, %c0_60] : memref<9x16x8xf32, #tpu.memory_space<vmem>>, vector<1x16x8xf32>
    %103 = vector.shape_cast %102 : vector<1x16x8xf32> to vector<16x8xf32>
    %cst_61 = arith.constant dense<0.000000e+00> : vector<384x8xf32>
    %104 = tpu.matmul %101, %103, %cst_61 {dimension_numbers = #tpu.dot_dimension_numbers<[1], [0], [0], [1], [0, 0, 1, 1], [], []>} : vector<384x16xf32>, vector<16x8xf32>, vector<384x8xf32> -> vector<384x8xf32>
    %105 = arith.addf %99, %104 : vector<384x8xf32>
    %106 = vector.extract_strided_slice %64 {offsets = [0, 33, 0], sizes = [2, 192, 16], strides = [1, 1, 1]} : vector<2x232x16xf32> to vector<2x192x16xf32>
    %107 = vector.shape_cast %106 : vector<2x192x16xf32> to vector<384x16xf32>
    %c7_62 = arith.constant 7 : index
    %c0_63 = arith.constant 0 : index
    %c0_64 = arith.constant 0 : index
    %108 = vector.load %arg4[%c7_62, %c0_63, %c0_64] : memref<9x16x8xf32, #tpu.memory_space<vmem>>, vector<1x16x8xf32>
    %109 = vector.shape_cast %108 : vector<1x16x8xf32> to vector<16x8xf32>
    %cst_65 = arith.constant dense<0.000000e+00> : vector<384x8xf32>
    %110 = tpu.matmul %107, %109, %cst_65 {dimension_numbers = #tpu.dot_dimension_numbers<[1], [0], [0], [1], [0, 0, 1, 1], [], []>} : vector<384x16xf32>, vector<16x8xf32>, vector<384x8xf32> -> vector<384x8xf32>
    %111 = arith.addf %105, %110 : vector<384x8xf32>
    %112 = vector.extract_strided_slice %64 {offsets = [0, 34, 0], sizes = [2, 192, 16], strides = [1, 1, 1]} : vector<2x232x16xf32> to vector<2x192x16xf32>
    %113 = vector.shape_cast %112 : vector<2x192x16xf32> to vector<384x16xf32>
    %c8_66 = arith.constant 8 : index
    %c0_67 = arith.constant 0 : index
    %c0_68 = arith.constant 0 : index
    %114 = vector.load %arg4[%c8_66, %c0_67, %c0_68] : memref<9x16x8xf32, #tpu.memory_space<vmem>>, vector<1x16x8xf32>
    %115 = vector.shape_cast %114 : vector<1x16x8xf32> to vector<16x8xf32>
    %cst_69 = arith.constant dense<0.000000e+00> : vector<384x8xf32>
    %116 = tpu.matmul %113, %115, %cst_69 {dimension_numbers = #tpu.dot_dimension_numbers<[1], [0], [0], [1], [0, 0, 1, 1], [], []>} : vector<384x16xf32>, vector<16x8xf32>, vector<384x8xf32> -> vector<384x8xf32>
    %117 = arith.addf %111, %116 : vector<384x8xf32>
    %c1_70 = arith.constant 1 : index
    %c0_71 = arith.constant 0 : index
    %118 = vector.load %arg8[%c1_70, %c0_71] : memref<5x128xf32, #tpu.memory_space<vmem>>, vector<1x8xf32>
    %119 = vector.broadcast %118 : vector<1x8xf32> to vector<384x8xf32>
    %120 = arith.addf %117, %119 : vector<384x8xf32>
    %cst_72 = arith.constant 0.000000e+00 : f32
    %121 = vector.broadcast %cst_72 : f32 to vector<384x8xf32>
    %122 = arith.cmpf oge, %120, %121 : vector<384x8xf32>
    %cst_73 = arith.constant 2.000000e-01 : f32
    %123 = vector.broadcast %cst_73 : f32 to vector<384x8xf32>
    %124 = arith.mulf %123, %120 : vector<384x8xf32>
    %125 = arith.select %122, %120, %124 : vector<384x8xi1>, vector<384x8xf32>
    %126 = vector.shape_cast %125 : vector<384x8xf32> to vector<2x192x8xf32>
    %cst_74 = arith.constant 0.000000e+00 : f32
    %127 = vector.broadcast %cst_74 : f32 to vector<2x8x8xf32>
    %128 = tpu.concatenate %126, %127 in 1 : vector<2x192x8xf32>, vector<2x8x8xf32> -> vector<2x200x8xf32>
    %129 = vector.extract_strided_slice %128 {offsets = [0, 0, 0], sizes = [2, 160, 8], strides = [1, 1, 1]} : vector<2x200x8xf32> to vector<2x160x8xf32>
    %130 = vector.shape_cast %129 : vector<2x160x8xf32> to vector<320x8xf32>
    %c0_75 = arith.constant 0 : index
    %c0_76 = arith.constant 0 : index
    %c0_77 = arith.constant 0 : index
    %131 = vector.load %arg5[%c0_75, %c0_76, %c0_77] : memref<9x8x8xf32, #tpu.memory_space<vmem>>, vector<1x8x8xf32>
    %132 = vector.shape_cast %131 : vector<1x8x8xf32> to vector<8x8xf32>
    %cst_78 = arith.constant dense<0.000000e+00> : vector<320x8xf32>
    %133 = tpu.matmul %130, %132, %cst_78 {dimension_numbers = #tpu.dot_dimension_numbers<[1], [0], [0], [1], [0, 0, 1, 1], [], []>} : vector<320x8xf32>, vector<8x8xf32>, vector<320x8xf32> -> vector<320x8xf32>
    %134 = vector.extract_strided_slice %128 {offsets = [0, 1, 0], sizes = [2, 160, 8], strides = [1, 1, 1]} : vector<2x200x8xf32> to vector<2x160x8xf32>
    %135 = vector.shape_cast %134 : vector<2x160x8xf32> to vector<320x8xf32>
    %c1_79 = arith.constant 1 : index
    %c0_80 = arith.constant 0 : index
    %c0_81 = arith.constant 0 : index
    %136 = vector.load %arg5[%c1_79, %c0_80, %c0_81] : memref<9x8x8xf32, #tpu.memory_space<vmem>>, vector<1x8x8xf32>
    %137 = vector.shape_cast %136 : vector<1x8x8xf32> to vector<8x8xf32>
    %cst_82 = arith.constant dense<0.000000e+00> : vector<320x8xf32>
    %138 = tpu.matmul %135, %137, %cst_82 {dimension_numbers = #tpu.dot_dimension_numbers<[1], [0], [0], [1], [0, 0, 1, 1], [], []>} : vector<320x8xf32>, vector<8x8xf32>, vector<320x8xf32> -> vector<320x8xf32>
    %139 = arith.addf %133, %138 : vector<320x8xf32>
    %140 = vector.extract_strided_slice %128 {offsets = [0, 2, 0], sizes = [2, 160, 8], strides = [1, 1, 1]} : vector<2x200x8xf32> to vector<2x160x8xf32>
    %141 = vector.shape_cast %140 : vector<2x160x8xf32> to vector<320x8xf32>
    %c2_83 = arith.constant 2 : index
    %c0_84 = arith.constant 0 : index
    %c0_85 = arith.constant 0 : index
    %142 = vector.load %arg5[%c2_83, %c0_84, %c0_85] : memref<9x8x8xf32, #tpu.memory_space<vmem>>, vector<1x8x8xf32>
    %143 = vector.shape_cast %142 : vector<1x8x8xf32> to vector<8x8xf32>
    %cst_86 = arith.constant dense<0.000000e+00> : vector<320x8xf32>
    %144 = tpu.matmul %141, %143, %cst_86 {dimension_numbers = #tpu.dot_dimension_numbers<[1], [0], [0], [1], [0, 0, 1, 1], [], []>} : vector<320x8xf32>, vector<8x8xf32>, vector<320x8xf32> -> vector<320x8xf32>
    %145 = arith.addf %139, %144 : vector<320x8xf32>
    %146 = vector.extract_strided_slice %128 {offsets = [0, 16, 0], sizes = [2, 160, 8], strides = [1, 1, 1]} : vector<2x200x8xf32> to vector<2x160x8xf32>
    %147 = vector.shape_cast %146 : vector<2x160x8xf32> to vector<320x8xf32>
    %c3_87 = arith.constant 3 : index
    %c0_88 = arith.constant 0 : index
    %c0_89 = arith.constant 0 : index
    %148 = vector.load %arg5[%c3_87, %c0_88, %c0_89] : memref<9x8x8xf32, #tpu.memory_space<vmem>>, vector<1x8x8xf32>
    %149 = vector.shape_cast %148 : vector<1x8x8xf32> to vector<8x8xf32>
    %cst_90 = arith.constant dense<0.000000e+00> : vector<320x8xf32>
    %150 = tpu.matmul %147, %149, %cst_90 {dimension_numbers = #tpu.dot_dimension_numbers<[1], [0], [0], [1], [0, 0, 1, 1], [], []>} : vector<320x8xf32>, vector<8x8xf32>, vector<320x8xf32> -> vector<320x8xf32>
    %151 = arith.addf %145, %150 : vector<320x8xf32>
    %152 = vector.extract_strided_slice %128 {offsets = [0, 17, 0], sizes = [2, 160, 8], strides = [1, 1, 1]} : vector<2x200x8xf32> to vector<2x160x8xf32>
    %153 = vector.shape_cast %152 : vector<2x160x8xf32> to vector<320x8xf32>
    %c4_91 = arith.constant 4 : index
    %c0_92 = arith.constant 0 : index
    %c0_93 = arith.constant 0 : index
    %154 = vector.load %arg5[%c4_91, %c0_92, %c0_93] : memref<9x8x8xf32, #tpu.memory_space<vmem>>, vector<1x8x8xf32>
    %155 = vector.shape_cast %154 : vector<1x8x8xf32> to vector<8x8xf32>
    %cst_94 = arith.constant dense<0.000000e+00> : vector<320x8xf32>
    %156 = tpu.matmul %153, %155, %cst_94 {dimension_numbers = #tpu.dot_dimension_numbers<[1], [0], [0], [1], [0, 0, 1, 1], [], []>} : vector<320x8xf32>, vector<8x8xf32>, vector<320x8xf32> -> vector<320x8xf32>
    %157 = arith.addf %151, %156 : vector<320x8xf32>
    %158 = vector.extract_strided_slice %128 {offsets = [0, 18, 0], sizes = [2, 160, 8], strides = [1, 1, 1]} : vector<2x200x8xf32> to vector<2x160x8xf32>
    %159 = vector.shape_cast %158 : vector<2x160x8xf32> to vector<320x8xf32>
    %c5_95 = arith.constant 5 : index
    %c0_96 = arith.constant 0 : index
    %c0_97 = arith.constant 0 : index
    %160 = vector.load %arg5[%c5_95, %c0_96, %c0_97] : memref<9x8x8xf32, #tpu.memory_space<vmem>>, vector<1x8x8xf32>
    %161 = vector.shape_cast %160 : vector<1x8x8xf32> to vector<8x8xf32>
    %cst_98 = arith.constant dense<0.000000e+00> : vector<320x8xf32>
    %162 = tpu.matmul %159, %161, %cst_98 {dimension_numbers = #tpu.dot_dimension_numbers<[1], [0], [0], [1], [0, 0, 1, 1], [], []>} : vector<320x8xf32>, vector<8x8xf32>, vector<320x8xf32> -> vector<320x8xf32>
    %163 = arith.addf %157, %162 : vector<320x8xf32>
    %164 = vector.extract_strided_slice %128 {offsets = [0, 32, 0], sizes = [2, 160, 8], strides = [1, 1, 1]} : vector<2x200x8xf32> to vector<2x160x8xf32>
    %165 = vector.shape_cast %164 : vector<2x160x8xf32> to vector<320x8xf32>
    %c6_99 = arith.constant 6 : index
    %c0_100 = arith.constant 0 : index
    %c0_101 = arith.constant 0 : index
    %166 = vector.load %arg5[%c6_99, %c0_100, %c0_101] : memref<9x8x8xf32, #tpu.memory_space<vmem>>, vector<1x8x8xf32>
    %167 = vector.shape_cast %166 : vector<1x8x8xf32> to vector<8x8xf32>
    %cst_102 = arith.constant dense<0.000000e+00> : vector<320x8xf32>
    %168 = tpu.matmul %165, %167, %cst_102 {dimension_numbers = #tpu.dot_dimension_numbers<[1], [0], [0], [1], [0, 0, 1, 1], [], []>} : vector<320x8xf32>, vector<8x8xf32>, vector<320x8xf32> -> vector<320x8xf32>
    %169 = arith.addf %163, %168 : vector<320x8xf32>
    %170 = vector.extract_strided_slice %128 {offsets = [0, 33, 0], sizes = [2, 160, 8], strides = [1, 1, 1]} : vector<2x200x8xf32> to vector<2x160x8xf32>
    %171 = vector.shape_cast %170 : vector<2x160x8xf32> to vector<320x8xf32>
    %c7_103 = arith.constant 7 : index
    %c0_104 = arith.constant 0 : index
    %c0_105 = arith.constant 0 : index
    %172 = vector.load %arg5[%c7_103, %c0_104, %c0_105] : memref<9x8x8xf32, #tpu.memory_space<vmem>>, vector<1x8x8xf32>
    %173 = vector.shape_cast %172 : vector<1x8x8xf32> to vector<8x8xf32>
    %cst_106 = arith.constant dense<0.000000e+00> : vector<320x8xf32>
    %174 = tpu.matmul %171, %173, %cst_106 {dimension_numbers = #tpu.dot_dimension_numbers<[1], [0], [0], [1], [0, 0, 1, 1], [], []>} : vector<320x8xf32>, vector<8x8xf32>, vector<320x8xf32> -> vector<320x8xf32>
    %175 = arith.addf %169, %174 : vector<320x8xf32>
    %176 = vector.extract_strided_slice %128 {offsets = [0, 34, 0], sizes = [2, 160, 8], strides = [1, 1, 1]} : vector<2x200x8xf32> to vector<2x160x8xf32>
    %177 = vector.shape_cast %176 : vector<2x160x8xf32> to vector<320x8xf32>
    %c8_107 = arith.constant 8 : index
    %c0_108 = arith.constant 0 : index
    %c0_109 = arith.constant 0 : index
    %178 = vector.load %arg5[%c8_107, %c0_108, %c0_109] : memref<9x8x8xf32, #tpu.memory_space<vmem>>, vector<1x8x8xf32>
    %179 = vector.shape_cast %178 : vector<1x8x8xf32> to vector<8x8xf32>
    %cst_110 = arith.constant dense<0.000000e+00> : vector<320x8xf32>
    %180 = tpu.matmul %177, %179, %cst_110 {dimension_numbers = #tpu.dot_dimension_numbers<[1], [0], [0], [1], [0, 0, 1, 1], [], []>} : vector<320x8xf32>, vector<8x8xf32>, vector<320x8xf32> -> vector<320x8xf32>
    %181 = arith.addf %175, %180 : vector<320x8xf32>
    %c2_111 = arith.constant 2 : index
    %c0_112 = arith.constant 0 : index
    %182 = vector.load %arg8[%c2_111, %c0_112] : memref<5x128xf32, #tpu.memory_space<vmem>>, vector<1x8xf32>
    %183 = vector.broadcast %182 : vector<1x8xf32> to vector<320x8xf32>
    %184 = arith.addf %181, %183 : vector<320x8xf32>
    %cst_113 = arith.constant 0.000000e+00 : f32
    %185 = vector.broadcast %cst_113 : f32 to vector<320x8xf32>
    %186 = arith.cmpf oge, %184, %185 : vector<320x8xf32>
    %cst_114 = arith.constant 2.000000e-01 : f32
    %187 = vector.broadcast %cst_114 : f32 to vector<320x8xf32>
    %188 = arith.mulf %187, %184 : vector<320x8xf32>
    %189 = arith.select %186, %184, %188 : vector<320x8xi1>, vector<320x8xf32>
    %190 = vector.shape_cast %189 : vector<320x8xf32> to vector<2x160x8xf32>
    %cst_115 = arith.constant 0.000000e+00 : f32
    %191 = vector.broadcast %cst_115 : f32 to vector<2x8x8xf32>
    %192 = tpu.concatenate %190, %191 in 1 : vector<2x160x8xf32>, vector<2x8x8xf32> -> vector<2x168x8xf32>
    %193 = vector.extract_strided_slice %192 {offsets = [0, 0, 0], sizes = [2, 128, 8], strides = [1, 1, 1]} : vector<2x168x8xf32> to vector<2x128x8xf32>
    %194 = vector.shape_cast %193 : vector<2x128x8xf32> to vector<256x8xf32>
    %c0_116 = arith.constant 0 : index
    %c0_117 = arith.constant 0 : index
    %c0_118 = arith.constant 0 : index
    %195 = vector.load %arg6[%c0_116, %c0_117, %c0_118] : memref<9x8x8xf32, #tpu.memory_space<vmem>>, vector<1x8x8xf32>
    %196 = vector.shape_cast %195 : vector<1x8x8xf32> to vector<8x8xf32>
    %cst_119 = arith.constant dense<0.000000e+00> : vector<256x8xf32>
    %197 = tpu.matmul %194, %196, %cst_119 {dimension_numbers = #tpu.dot_dimension_numbers<[1], [0], [0], [1], [0, 0, 1, 1], [], []>} : vector<256x8xf32>, vector<8x8xf32>, vector<256x8xf32> -> vector<256x8xf32>
    %198 = vector.extract_strided_slice %192 {offsets = [0, 1, 0], sizes = [2, 128, 8], strides = [1, 1, 1]} : vector<2x168x8xf32> to vector<2x128x8xf32>
    %199 = vector.shape_cast %198 : vector<2x128x8xf32> to vector<256x8xf32>
    %c1_120 = arith.constant 1 : index
    %c0_121 = arith.constant 0 : index
    %c0_122 = arith.constant 0 : index
    %200 = vector.load %arg6[%c1_120, %c0_121, %c0_122] : memref<9x8x8xf32, #tpu.memory_space<vmem>>, vector<1x8x8xf32>
    %201 = vector.shape_cast %200 : vector<1x8x8xf32> to vector<8x8xf32>
    %cst_123 = arith.constant dense<0.000000e+00> : vector<256x8xf32>
    %202 = tpu.matmul %199, %201, %cst_123 {dimension_numbers = #tpu.dot_dimension_numbers<[1], [0], [0], [1], [0, 0, 1, 1], [], []>} : vector<256x8xf32>, vector<8x8xf32>, vector<256x8xf32> -> vector<256x8xf32>
    %203 = arith.addf %197, %202 : vector<256x8xf32>
    %204 = vector.extract_strided_slice %192 {offsets = [0, 2, 0], sizes = [2, 128, 8], strides = [1, 1, 1]} : vector<2x168x8xf32> to vector<2x128x8xf32>
    %205 = vector.shape_cast %204 : vector<2x128x8xf32> to vector<256x8xf32>
    %c2_124 = arith.constant 2 : index
    %c0_125 = arith.constant 0 : index
    %c0_126 = arith.constant 0 : index
    %206 = vector.load %arg6[%c2_124, %c0_125, %c0_126] : memref<9x8x8xf32, #tpu.memory_space<vmem>>, vector<1x8x8xf32>
    %207 = vector.shape_cast %206 : vector<1x8x8xf32> to vector<8x8xf32>
    %cst_127 = arith.constant dense<0.000000e+00> : vector<256x8xf32>
    %208 = tpu.matmul %205, %207, %cst_127 {dimension_numbers = #tpu.dot_dimension_numbers<[1], [0], [0], [1], [0, 0, 1, 1], [], []>} : vector<256x8xf32>, vector<8x8xf32>, vector<256x8xf32> -> vector<256x8xf32>
    %209 = arith.addf %203, %208 : vector<256x8xf32>
    %210 = vector.extract_strided_slice %192 {offsets = [0, 16, 0], sizes = [2, 128, 8], strides = [1, 1, 1]} : vector<2x168x8xf32> to vector<2x128x8xf32>
    %211 = vector.shape_cast %210 : vector<2x128x8xf32> to vector<256x8xf32>
    %c3_128 = arith.constant 3 : index
    %c0_129 = arith.constant 0 : index
    %c0_130 = arith.constant 0 : index
    %212 = vector.load %arg6[%c3_128, %c0_129, %c0_130] : memref<9x8x8xf32, #tpu.memory_space<vmem>>, vector<1x8x8xf32>
    %213 = vector.shape_cast %212 : vector<1x8x8xf32> to vector<8x8xf32>
    %cst_131 = arith.constant dense<0.000000e+00> : vector<256x8xf32>
    %214 = tpu.matmul %211, %213, %cst_131 {dimension_numbers = #tpu.dot_dimension_numbers<[1], [0], [0], [1], [0, 0, 1, 1], [], []>} : vector<256x8xf32>, vector<8x8xf32>, vector<256x8xf32> -> vector<256x8xf32>
    %215 = arith.addf %209, %214 : vector<256x8xf32>
    %216 = vector.extract_strided_slice %192 {offsets = [0, 17, 0], sizes = [2, 128, 8], strides = [1, 1, 1]} : vector<2x168x8xf32> to vector<2x128x8xf32>
    %217 = vector.shape_cast %216 : vector<2x128x8xf32> to vector<256x8xf32>
    %c4_132 = arith.constant 4 : index
    %c0_133 = arith.constant 0 : index
    %c0_134 = arith.constant 0 : index
    %218 = vector.load %arg6[%c4_132, %c0_133, %c0_134] : memref<9x8x8xf32, #tpu.memory_space<vmem>>, vector<1x8x8xf32>
    %219 = vector.shape_cast %218 : vector<1x8x8xf32> to vector<8x8xf32>
    %cst_135 = arith.constant dense<0.000000e+00> : vector<256x8xf32>
    %220 = tpu.matmul %217, %219, %cst_135 {dimension_numbers = #tpu.dot_dimension_numbers<[1], [0], [0], [1], [0, 0, 1, 1], [], []>} : vector<256x8xf32>, vector<8x8xf32>, vector<256x8xf32> -> vector<256x8xf32>
    %221 = arith.addf %215, %220 : vector<256x8xf32>
    %222 = vector.extract_strided_slice %192 {offsets = [0, 18, 0], sizes = [2, 128, 8], strides = [1, 1, 1]} : vector<2x168x8xf32> to vector<2x128x8xf32>
    %223 = vector.shape_cast %222 : vector<2x128x8xf32> to vector<256x8xf32>
    %c5_136 = arith.constant 5 : index
    %c0_137 = arith.constant 0 : index
    %c0_138 = arith.constant 0 : index
    %224 = vector.load %arg6[%c5_136, %c0_137, %c0_138] : memref<9x8x8xf32, #tpu.memory_space<vmem>>, vector<1x8x8xf32>
    %225 = vector.shape_cast %224 : vector<1x8x8xf32> to vector<8x8xf32>
    %cst_139 = arith.constant dense<0.000000e+00> : vector<256x8xf32>
    %226 = tpu.matmul %223, %225, %cst_139 {dimension_numbers = #tpu.dot_dimension_numbers<[1], [0], [0], [1], [0, 0, 1, 1], [], []>} : vector<256x8xf32>, vector<8x8xf32>, vector<256x8xf32> -> vector<256x8xf32>
    %227 = arith.addf %221, %226 : vector<256x8xf32>
    %228 = vector.extract_strided_slice %192 {offsets = [0, 32, 0], sizes = [2, 128, 8], strides = [1, 1, 1]} : vector<2x168x8xf32> to vector<2x128x8xf32>
    %229 = vector.shape_cast %228 : vector<2x128x8xf32> to vector<256x8xf32>
    %c6_140 = arith.constant 6 : index
    %c0_141 = arith.constant 0 : index
    %c0_142 = arith.constant 0 : index
    %230 = vector.load %arg6[%c6_140, %c0_141, %c0_142] : memref<9x8x8xf32, #tpu.memory_space<vmem>>, vector<1x8x8xf32>
    %231 = vector.shape_cast %230 : vector<1x8x8xf32> to vector<8x8xf32>
    %cst_143 = arith.constant dense<0.000000e+00> : vector<256x8xf32>
    %232 = tpu.matmul %229, %231, %cst_143 {dimension_numbers = #tpu.dot_dimension_numbers<[1], [0], [0], [1], [0, 0, 1, 1], [], []>} : vector<256x8xf32>, vector<8x8xf32>, vector<256x8xf32> -> vector<256x8xf32>
    %233 = arith.addf %227, %232 : vector<256x8xf32>
    %234 = vector.extract_strided_slice %192 {offsets = [0, 33, 0], sizes = [2, 128, 8], strides = [1, 1, 1]} : vector<2x168x8xf32> to vector<2x128x8xf32>
    %235 = vector.shape_cast %234 : vector<2x128x8xf32> to vector<256x8xf32>
    %c7_144 = arith.constant 7 : index
    %c0_145 = arith.constant 0 : index
    %c0_146 = arith.constant 0 : index
    %236 = vector.load %arg6[%c7_144, %c0_145, %c0_146] : memref<9x8x8xf32, #tpu.memory_space<vmem>>, vector<1x8x8xf32>
    %237 = vector.shape_cast %236 : vector<1x8x8xf32> to vector<8x8xf32>
    %cst_147 = arith.constant dense<0.000000e+00> : vector<256x8xf32>
    %238 = tpu.matmul %235, %237, %cst_147 {dimension_numbers = #tpu.dot_dimension_numbers<[1], [0], [0], [1], [0, 0, 1, 1], [], []>} : vector<256x8xf32>, vector<8x8xf32>, vector<256x8xf32> -> vector<256x8xf32>
    %239 = arith.addf %233, %238 : vector<256x8xf32>
    %240 = vector.extract_strided_slice %192 {offsets = [0, 34, 0], sizes = [2, 128, 8], strides = [1, 1, 1]} : vector<2x168x8xf32> to vector<2x128x8xf32>
    %241 = vector.shape_cast %240 : vector<2x128x8xf32> to vector<256x8xf32>
    %c8_148 = arith.constant 8 : index
    %c0_149 = arith.constant 0 : index
    %c0_150 = arith.constant 0 : index
    %242 = vector.load %arg6[%c8_148, %c0_149, %c0_150] : memref<9x8x8xf32, #tpu.memory_space<vmem>>, vector<1x8x8xf32>
    %243 = vector.shape_cast %242 : vector<1x8x8xf32> to vector<8x8xf32>
    %cst_151 = arith.constant dense<0.000000e+00> : vector<256x8xf32>
    %244 = tpu.matmul %241, %243, %cst_151 {dimension_numbers = #tpu.dot_dimension_numbers<[1], [0], [0], [1], [0, 0, 1, 1], [], []>} : vector<256x8xf32>, vector<8x8xf32>, vector<256x8xf32> -> vector<256x8xf32>
    %245 = arith.addf %239, %244 : vector<256x8xf32>
    %c3_152 = arith.constant 3 : index
    %c0_153 = arith.constant 0 : index
    %246 = vector.load %arg8[%c3_152, %c0_153] : memref<5x128xf32, #tpu.memory_space<vmem>>, vector<1x8xf32>
    %247 = vector.broadcast %246 : vector<1x8xf32> to vector<256x8xf32>
    %248 = arith.addf %245, %247 : vector<256x8xf32>
    %cst_154 = arith.constant 0.000000e+00 : f32
    %249 = vector.broadcast %cst_154 : f32 to vector<256x8xf32>
    %250 = arith.cmpf oge, %248, %249 : vector<256x8xf32>
    %cst_155 = arith.constant 2.000000e-01 : f32
    %251 = vector.broadcast %cst_155 : f32 to vector<256x8xf32>
    %252 = arith.mulf %251, %248 : vector<256x8xf32>
    %253 = arith.select %250, %248, %252 : vector<256x8xi1>, vector<256x8xf32>
    %254 = vector.shape_cast %253 : vector<256x8xf32> to vector<2x128x8xf32>
    %cst_156 = arith.constant 0.000000e+00 : f32
    %255 = vector.broadcast %cst_156 : f32 to vector<2x8x8xf32>
    %256 = tpu.concatenate %254, %255 in 1 : vector<2x128x8xf32>, vector<2x8x8xf32> -> vector<2x136x8xf32>
    %257 = vector.extract_strided_slice %256 {offsets = [0, 0, 0], sizes = [2, 96, 8], strides = [1, 1, 1]} : vector<2x136x8xf32> to vector<2x96x8xf32>
    %258 = vector.shape_cast %257 : vector<2x96x8xf32> to vector<192x8xf32>
    %c0_157 = arith.constant 0 : index
    %c0_158 = arith.constant 0 : index
    %c0_159 = arith.constant 0 : index
    %259 = vector.load %arg7[%c0_157, %c0_158, %c0_159] : memref<9x8x128xf32, #tpu.memory_space<vmem>>, vector<1x8x128xf32>
    %260 = vector.shape_cast %259 : vector<1x8x128xf32> to vector<8x128xf32>
    %cst_160 = arith.constant dense<0.000000e+00> : vector<192x128xf32>
    %261 = tpu.matmul %258, %260, %cst_160 {dimension_numbers = #tpu.dot_dimension_numbers<[1], [0], [0], [1], [0, 0, 1, 1], [], []>} : vector<192x8xf32>, vector<8x128xf32>, vector<192x128xf32> -> vector<192x128xf32>
    %262 = vector.extract_strided_slice %256 {offsets = [0, 1, 0], sizes = [2, 96, 8], strides = [1, 1, 1]} : vector<2x136x8xf32> to vector<2x96x8xf32>
    %263 = vector.shape_cast %262 : vector<2x96x8xf32> to vector<192x8xf32>
    %c1_161 = arith.constant 1 : index
    %c0_162 = arith.constant 0 : index
    %c0_163 = arith.constant 0 : index
    %264 = vector.load %arg7[%c1_161, %c0_162, %c0_163] : memref<9x8x128xf32, #tpu.memory_space<vmem>>, vector<1x8x128xf32>
    %265 = vector.shape_cast %264 : vector<1x8x128xf32> to vector<8x128xf32>
    %cst_164 = arith.constant dense<0.000000e+00> : vector<192x128xf32>
    %266 = tpu.matmul %263, %265, %cst_164 {dimension_numbers = #tpu.dot_dimension_numbers<[1], [0], [0], [1], [0, 0, 1, 1], [], []>} : vector<192x8xf32>, vector<8x128xf32>, vector<192x128xf32> -> vector<192x128xf32>
    %267 = arith.addf %261, %266 : vector<192x128xf32>
    %268 = vector.extract_strided_slice %256 {offsets = [0, 2, 0], sizes = [2, 96, 8], strides = [1, 1, 1]} : vector<2x136x8xf32> to vector<2x96x8xf32>
    %269 = vector.shape_cast %268 : vector<2x96x8xf32> to vector<192x8xf32>
    %c2_165 = arith.constant 2 : index
    %c0_166 = arith.constant 0 : index
    %c0_167 = arith.constant 0 : index
    %270 = vector.load %arg7[%c2_165, %c0_166, %c0_167] : memref<9x8x128xf32, #tpu.memory_space<vmem>>, vector<1x8x128xf32>
    %271 = vector.shape_cast %270 : vector<1x8x128xf32> to vector<8x128xf32>
    %cst_168 = arith.constant dense<0.000000e+00> : vector<192x128xf32>
    %272 = tpu.matmul %269, %271, %cst_168 {dimension_numbers = #tpu.dot_dimension_numbers<[1], [0], [0], [1], [0, 0, 1, 1], [], []>} : vector<192x8xf32>, vector<8x128xf32>, vector<192x128xf32> -> vector<192x128xf32>
    %273 = arith.addf %267, %272 : vector<192x128xf32>
    %274 = vector.extract_strided_slice %256 {offsets = [0, 16, 0], sizes = [2, 96, 8], strides = [1, 1, 1]} : vector<2x136x8xf32> to vector<2x96x8xf32>
    %275 = vector.shape_cast %274 : vector<2x96x8xf32> to vector<192x8xf32>
    %c3_169 = arith.constant 3 : index
    %c0_170 = arith.constant 0 : index
    %c0_171 = arith.constant 0 : index
    %276 = vector.load %arg7[%c3_169, %c0_170, %c0_171] : memref<9x8x128xf32, #tpu.memory_space<vmem>>, vector<1x8x128xf32>
    %277 = vector.shape_cast %276 : vector<1x8x128xf32> to vector<8x128xf32>
    %cst_172 = arith.constant dense<0.000000e+00> : vector<192x128xf32>
    %278 = tpu.matmul %275, %277, %cst_172 {dimension_numbers = #tpu.dot_dimension_numbers<[1], [0], [0], [1], [0, 0, 1, 1], [], []>} : vector<192x8xf32>, vector<8x128xf32>, vector<192x128xf32> -> vector<192x128xf32>
    %279 = arith.addf %273, %278 : vector<192x128xf32>
    %280 = vector.extract_strided_slice %256 {offsets = [0, 17, 0], sizes = [2, 96, 8], strides = [1, 1, 1]} : vector<2x136x8xf32> to vector<2x96x8xf32>
    %281 = vector.shape_cast %280 : vector<2x96x8xf32> to vector<192x8xf32>
    %c4_173 = arith.constant 4 : index
    %c0_174 = arith.constant 0 : index
    %c0_175 = arith.constant 0 : index
    %282 = vector.load %arg7[%c4_173, %c0_174, %c0_175] : memref<9x8x128xf32, #tpu.memory_space<vmem>>, vector<1x8x128xf32>
    %283 = vector.shape_cast %282 : vector<1x8x128xf32> to vector<8x128xf32>
    %cst_176 = arith.constant dense<0.000000e+00> : vector<192x128xf32>
    %284 = tpu.matmul %281, %283, %cst_176 {dimension_numbers = #tpu.dot_dimension_numbers<[1], [0], [0], [1], [0, 0, 1, 1], [], []>} : vector<192x8xf32>, vector<8x128xf32>, vector<192x128xf32> -> vector<192x128xf32>
    %285 = arith.addf %279, %284 : vector<192x128xf32>
    %286 = vector.extract_strided_slice %256 {offsets = [0, 18, 0], sizes = [2, 96, 8], strides = [1, 1, 1]} : vector<2x136x8xf32> to vector<2x96x8xf32>
    %287 = vector.shape_cast %286 : vector<2x96x8xf32> to vector<192x8xf32>
    %c5_177 = arith.constant 5 : index
    %c0_178 = arith.constant 0 : index
    %c0_179 = arith.constant 0 : index
    %288 = vector.load %arg7[%c5_177, %c0_178, %c0_179] : memref<9x8x128xf32, #tpu.memory_space<vmem>>, vector<1x8x128xf32>
    %289 = vector.shape_cast %288 : vector<1x8x128xf32> to vector<8x128xf32>
    %cst_180 = arith.constant dense<0.000000e+00> : vector<192x128xf32>
    %290 = tpu.matmul %287, %289, %cst_180 {dimension_numbers = #tpu.dot_dimension_numbers<[1], [0], [0], [1], [0, 0, 1, 1], [], []>} : vector<192x8xf32>, vector<8x128xf32>, vector<192x128xf32> -> vector<192x128xf32>
    %291 = arith.addf %285, %290 : vector<192x128xf32>
    %292 = vector.extract_strided_slice %256 {offsets = [0, 32, 0], sizes = [2, 96, 8], strides = [1, 1, 1]} : vector<2x136x8xf32> to vector<2x96x8xf32>
    %293 = vector.shape_cast %292 : vector<2x96x8xf32> to vector<192x8xf32>
    %c6_181 = arith.constant 6 : index
    %c0_182 = arith.constant 0 : index
    %c0_183 = arith.constant 0 : index
    %294 = vector.load %arg7[%c6_181, %c0_182, %c0_183] : memref<9x8x128xf32, #tpu.memory_space<vmem>>, vector<1x8x128xf32>
    %295 = vector.shape_cast %294 : vector<1x8x128xf32> to vector<8x128xf32>
    %cst_184 = arith.constant dense<0.000000e+00> : vector<192x128xf32>
    %296 = tpu.matmul %293, %295, %cst_184 {dimension_numbers = #tpu.dot_dimension_numbers<[1], [0], [0], [1], [0, 0, 1, 1], [], []>} : vector<192x8xf32>, vector<8x128xf32>, vector<192x128xf32> -> vector<192x128xf32>
    %297 = arith.addf %291, %296 : vector<192x128xf32>
    %298 = vector.extract_strided_slice %256 {offsets = [0, 33, 0], sizes = [2, 96, 8], strides = [1, 1, 1]} : vector<2x136x8xf32> to vector<2x96x8xf32>
    %299 = vector.shape_cast %298 : vector<2x96x8xf32> to vector<192x8xf32>
    %c7_185 = arith.constant 7 : index
    %c0_186 = arith.constant 0 : index
    %c0_187 = arith.constant 0 : index
    %300 = vector.load %arg7[%c7_185, %c0_186, %c0_187] : memref<9x8x128xf32, #tpu.memory_space<vmem>>, vector<1x8x128xf32>
    %301 = vector.shape_cast %300 : vector<1x8x128xf32> to vector<8x128xf32>
    %cst_188 = arith.constant dense<0.000000e+00> : vector<192x128xf32>
    %302 = tpu.matmul %299, %301, %cst_188 {dimension_numbers = #tpu.dot_dimension_numbers<[1], [0], [0], [1], [0, 0, 1, 1], [], []>} : vector<192x8xf32>, vector<8x128xf32>, vector<192x128xf32> -> vector<192x128xf32>
    %303 = arith.addf %297, %302 : vector<192x128xf32>
    %304 = vector.extract_strided_slice %256 {offsets = [0, 34, 0], sizes = [2, 96, 8], strides = [1, 1, 1]} : vector<2x136x8xf32> to vector<2x96x8xf32>
    %305 = vector.shape_cast %304 : vector<2x96x8xf32> to vector<192x8xf32>
    %c8_189 = arith.constant 8 : index
    %c0_190 = arith.constant 0 : index
    %c0_191 = arith.constant 0 : index
    %306 = vector.load %arg7[%c8_189, %c0_190, %c0_191] : memref<9x8x128xf32, #tpu.memory_space<vmem>>, vector<1x8x128xf32>
    %307 = vector.shape_cast %306 : vector<1x8x128xf32> to vector<8x128xf32>
    %cst_192 = arith.constant dense<0.000000e+00> : vector<192x128xf32>
    %308 = tpu.matmul %305, %307, %cst_192 {dimension_numbers = #tpu.dot_dimension_numbers<[1], [0], [0], [1], [0, 0, 1, 1], [], []>} : vector<192x8xf32>, vector<8x128xf32>, vector<192x128xf32> -> vector<192x128xf32>
    %309 = arith.addf %303, %308 : vector<192x128xf32>
    %c4_193 = arith.constant 4 : index
    %c0_194 = arith.constant 0 : index
    %310 = vector.load %arg8[%c4_193, %c0_194] : memref<5x128xf32, #tpu.memory_space<vmem>>, vector<1x128xf32>
    %311 = vector.broadcast %310 : vector<1x128xf32> to vector<192x128xf32>
    %312 = arith.addf %309, %311 : vector<192x128xf32>
    %313 = math.tanh %312 : vector<192x128xf32>
    %314 = vector.shape_cast %313 : vector<192x128xf32> to vector<2x96x128xf32>
    %c0_195 = arith.constant 0 : index
    %c0_196 = arith.constant 0 : index
    %c0_197 = arith.constant 0 : index
    %315 = vector.load %arg2[%c0_195, %c0_196, %c0_197] : memref<2x96x128xf32, #tpu.memory_space<vmem>>, vector<2x96x128xf32>
    %316 = arith.addf %314, %315 : vector<2x96x128xf32>
    %c0_198 = arith.constant 0 : index
    %c0_199 = arith.constant 0 : index
    %c0_200 = arith.constant 0 : index
    %317 = vector.load %arg9[%c0_198, %c0_199, %c0_200] : memref<2x96x128xf32, #tpu.memory_space<vmem>>, vector<2x96x128xf32>
    tpu.vector_store %arg9[%c0_198, %c0_199, %c0_200], %316 {strides = array<i32>} : memref<2x96x128xf32, #tpu.memory_space<vmem>>, vector<2x96x128xf32>,
    return
  }
  func.func @transform_0(%arg0: i32) -> (i32, i32, i32) {
    %c0_i32 = arith.constant 0 : i32
    %c0_i32_0 = arith.constant 0 : i32
    %c0_i32_1 = arith.constant 0 : i32
    return %arg0, %c0_i32, %c0_i32_0 : i32, i32, i32
  }
  func.func @transform_1(%arg0: i32) -> (i32, i32, i32) {
    %c0_i32 = arith.constant 0 : i32
    %c0_i32_0 = arith.constant 0 : i32
    %c0_i32_1 = arith.constant 0 : i32
    return %arg0, %c0_i32, %c0_i32_0 : i32, i32, i32
  }
  func.func @transform_2(%arg0: i32) -> (i32, i32, i32) {
    %c0_i32 = arith.constant 0 : i32
    %c0_i32_0 = arith.constant 0 : i32
    %c0_i32_1 = arith.constant 0 : i32
    %c0_i32_2 = arith.constant 0 : i32
    return %c0_i32, %c0_i32_0, %c0_i32_1 : i32, i32, i32
  }
  func.func @transform_3(%arg0: i32) -> (i32, i32, i32) {
    %c0_i32 = arith.constant 0 : i32
    %c0_i32_0 = arith.constant 0 : i32
    %c0_i32_1 = arith.constant 0 : i32
    %c0_i32_2 = arith.constant 0 : i32
    return %c0_i32, %c0_i32_0, %c0_i32_1 : i32, i32, i32
  }
  func.func @transform_4(%arg0: i32) -> (i32, i32, i32) {
    %c0_i32 = arith.constant 0 : i32
    %c0_i32_0 = arith.constant 0 : i32
    %c0_i32_1 = arith.constant 0 : i32
    %c0_i32_2 = arith.constant 0 : i32
    return %c0_i32, %c0_i32_0, %c0_i32_1 : i32, i32, i32
  }
  func.func @transform_5(%arg0: i32) -> (i32, i32, i32) {
    %c0_i32 = arith.constant 0 : i32
    %c0_i32_0 = arith.constant 0 : i32
    %c0_i32_1 = arith.constant 0 : i32
    %c0_i32_2 = arith.constant 0 : i32
    return %c0_i32, %c0_i32_0, %c0_i32_1 : i32, i32, i32
  }
  func.func @transform_6(%arg0: i32) -> (i32, i32, i32) {
    %c0_i32 = arith.constant 0 : i32
    %c0_i32_0 = arith.constant 0 : i32
    %c0_i32_1 = arith.constant 0 : i32
    %c0_i32_2 = arith.constant 0 : i32
    return %c0_i32, %c0_i32_0, %c0_i32_1 : i32, i32, i32
  }
  func.func @transform_7(%arg0: i32) -> (i32, i32) {
    %c0_i32 = arith.constant 0 : i32
    %c0_i32_0 = arith.constant 0 : i32
    %c0_i32_1 = arith.constant 0 : i32
    return %c0_i32, %c0_i32_0 : i32, i32
  }
  func.func @transform_8(%arg0: i32) -> (i32, i32, i32) {
    %c0_i32 = arith.constant 0 : i32
    %c0_i32_0 = arith.constant 0 : i32
    %c0_i32_1 = arith.constant 0 : i32
    return %arg0, %c0_i32, %c0_i32_0 : i32, i32, i32
  }
}

</mosaic_0001>

<bundles_post_ra>
// kernel: generator_forward.1
= control target key start
LH: loop header
LB: loop body
LE: loop exit
PB: predicated region body
PF: predicated region fallthrough
CT: control target
= control target key end

     0   :  { %vm271_vm0 = vcmask 64512   ;;  %vm1186_vm1 = vcmask 1045504   ;;  %vm154_vm2 = vcmask 1046528   ;;  %vm4704_vm5 = vcmask 130048   ;;  %s32399_s2 = inlined_call_operand.vmem [shape: f32[9,8,16], index: 2, kind: input, shape index: {}]   ;;  %s32400_s0 = inlined_call_operand.vmem [shape: f32[2,264,8], index: 0, kind: input, shape index: {}]   ;;  %s32401_s3 = inlined_call_operand.vmem [shape: f32[9,16,8], index: 3, kind: input, shape index: {}]   ;;  %s32402_s7 = inlined_call_operand.vmem [shape: f32[5,128], index: 7, kind: input, shape index: {}]   ;;  %s32403_s4 = inlined_call_operand.vmem [shape: f32[9,8,8], index: 4, kind: input, shape index: {}]   ;;  %s32404_s5 = inlined_call_operand.vmem [shape: f32[9,8,8], index: 5, kind: input, shape index: {}]   ;;  %s32405_s6 = inlined_call_operand.vmem [shape: f32[9,8,128], index: 6, kind: input, shape index: {}]   ;;  %s32406_s1 = inlined_call_operand.vmem [shape: f32[2,96,128], index: 1, kind: input, shape index: {}]   ;;  %s32407_s8 = inlined_call_operand.vmem [shape: f32[2,96,128], index: 8, kind: output, shape index: {}]  }
   0x1   :  { %v25319_v0 = vld [vmem:[%s32399_s2] sm:$0xff]  ;;  %v25329_v2 = vld [vmem:[%s32400_s0 + $0x8] sm:$0xff]  ;;  %v17133_v5 = vld [vmem:[%s32399_s2 + $0x10] sm:$0xff] }
   0x2   :  { %32971 = vst [vmem:[#allocation2_spill] sm:$0xff] %v25319_v0  ;;  %v25324_v1 = vld [vmem:[%s32400_s0] sm:$0xff]  ;;  %32973 = vst [vmem:[#allocation4_spill] sm:$0xff] %v25329_v2  ;;  %20813 = vmatprep.subr.mxu0 %v25319_v0  ;;  %v1188_v4 = vrot.slane %v25329_v2, 2  ;;  %v25342_v6 = vld [vmem:[%s32400_s0 + $0x10] sm:$0xff] }
   0x3   :  { %32972 = vst [vmem:[#allocation3_spill] sm:$0xff] %v25324_v1  ;;  %20815 = vmatprep.mubr.msk.f32.mxu0 %vm271_vm0, %v25324_v1  ;;  %v1187_v3 = vrot.slane %v25324_v1, 2  ;;  %20814 = vmatpush3.msra.mxu0 %v25319_v0  ;;  %v17190_v7 = vld [vmem:[%s32399_s2 + $0x18] sm:$0xff]  ;;  %v1190_v8 = vrot.slane %v25342_v6, 2  ;;  %v25363_v12 = vld [vmem:[%s32400_s0 + $0x20] sm:$0xff]  ;;  %v25368_v13 = vld [vmem:[%s32400_s0 + $0x28] sm:$0xff] }
   0x4   :  { %20816 = vmatmul.mubr.msk.f32.vlgmr.msra.gmra.mrb[0].mxu0 %vm271_vm0, %v25329_v2  ;;  %20899 = vmatprep.subr.mxu0 %v17133_v5  ;;  %v25356_v9 = vld [vmem:[%s32400_s0 + $0x18] sm:$0xff]  ;;  %v1194_v15 = vrot.slane %v25363_v12, 2  ;;  %v1196_v17 = vrot.slane %v25368_v13, 2  ;;  %v25382_v18 = vld [vmem:[%s32400_s0 + $0x30] sm:$0xff]  ;;  %v25403_v24 = vld [vmem:[%s32400_s0 + $0x40] sm:$0xff] }
   0x5   :  { %20900 = vmatpush3.msra.mxu0 %v17133_v5  ;;  %20818 = vmatprep.mubr.msk.f32.mxu0 %vm271_vm0, %v25342_v6  ;;  %v1192_v10 = vrot.slane %v25356_v9, 2  ;;  %v1189_v11 = vsel %vm1186_vm1, %v1187_v3, %v1188_v4  ;;  %v1191_v14 = vsel %vm1186_vm1, %v1188_v4, %v1190_v8  ;;  %v25387_v19 = vld [vmem:[%s32400_s0 + $0x38] sm:$0xff]  ;;  %v1198_v21 = vrot.slane %v25382_v18, 2  ;;  %v25408_v25 = vld [vmem:[%s32400_s0 + $0x48] sm:$0xff]  ;;  %v25425_v30 = vld [vmem:[%s32400_s0 + $0x50] sm:$0xff] }
   0x6   :  { %20985 = vmatprep.subr.mxu0 %v17190_v7  ;;  %v25397_v22 = vsel %vm1186_vm1, %v1194_v15, %v1196_v17  ;;  %v1200_v23 = vrot.slane %v25387_v19, 2  ;;  %v1202_v27 = vrot.slane %v25403_v24, 2  ;;  %v1204_v29 = vrot.slane %v25408_v25, 2  ;;  %v25430_v31 = vld [vmem:[%s32400_s0 + $0x58] sm:$0xff]  ;;  %v25443_v34 = vld [vmem:[%s32399_s2 + $0x20] sm:$0xff]  ;;  %v25458_v38 = vld [vmem:[%s32400_s0 + $0x68] sm:$0xff] }
   0x7   :  { %v25376_v16 = vsel %vm1186_vm1, %v1190_v8, %v1192_v10  ;;  %v25393_v20 = vsel %vm1186_vm1, %v1192_v10, %v1194_v15  ;;  %32976 = vst [vmem:[#allocation7_spill] sm:$0xff] %v25397_v22  ;;  %v25415_v26 = vsel %vm1186_vm1, %v1196_v17, %v1198_v21  ;;  %v1206_v33 = vrot.slane %v25425_v30, 2  ;;  %v25452_v37 = vld [vmem:[%s32400_s0 + $0x60] sm:$0xff]  ;;  %v25475_v43 = vld [vmem:[%s32400_s0 + $0x70] sm:$0xff]  ;;  %v25480_v44 = vld [vmem:[%s32400_s0 + $0x78] sm:$0xff] }
   0x8   :  { %20819 = vmatmul.mubr.msk.f32.gmra.mrb[2].mxu0 %vm271_vm0, %v25356_v9  ;;  %32974 = vst [vmem:[#allocation5_spill] sm:$0xff] %v25376_v16  ;;  %32975 = vst [vmem:[#allocation6_spill] sm:$0xff] %v25393_v20  ;;  %v25419_v28 = vsel %vm1186_vm1, %v1198_v21, %v1200_v23  ;;  %v25437_v32 = vsel %vm1186_vm1, %v1200_v23, %v1202_v27  ;;  %v25446_v35 = vsel %vm1186_vm1, %v1202_v27, %v1204_v29  ;;  %v25497_v49 = vld [vmem:[%s32400_s0 + $0x80] sm:$0xff]  ;;  %v25502_v50 = vld [vmem:[%s32400_s0 + $0x88] sm:$0xff] }
   0x9   :  { %20901 = vmatprep.mubr.msk.f32.mxu0 %vm271_vm0, %v1189_v11  ;;  %32977 = vst [vmem:[#allocation8_spill] sm:$0xff] %v25415_v26  ;;  %32978 = vst [vmem:[#allocation9_spill] sm:$0xff] %v25419_v28  ;;  %v1208_v36 = vrot.slane %v25430_v31, 2  ;;  %v25465_v39 = vsel %vm1186_vm1, %v1204_v29, %v1206_v33  ;;  %v1210_v40 = vrot.slane %v25452_v37, 2  ;;  %v1212_v42 = vrot.slane %v25458_v38, 2  ;;  %v25519_v55 = vld [vmem:[%s32400_s0 + $0x90] sm:$0xff] }
   0xa   :  { %32979 = vst [vmem:[#allocation10_spill] sm:$0xff] %v25437_v32  ;;  %32980 = vst [vmem:[#allocation11_spill] sm:$0xff] %v25446_v35  ;;  %v1214_v46 = vrot.slane %v25475_v43, 2  ;;  %v1216_v48 = vrot.slane %v25480_v44, 2  ;;  %v1218_v52 = vrot.slane %v25497_v49, 2  ;;  %v1220_v54 = vrot.slane %v25502_v50, 2 }
   0xb   :  { %32981 = vst [vmem:[#allocation12_spill] sm:$0xff] %v25465_v39  ;;  %v25469_v41 = vsel %vm1186_vm1, %v1206_v33, %v1208_v36  ;;  %v25487_v45 = vsel %vm1186_vm1, %v1208_v36, %v1210_v40  ;;  %v25491_v47 = vsel %vm1186_vm1, %v1210_v40, %v1212_v42  ;;  %v25524_v56 = vld [vmem:[%s32400_s0 + $0x98] sm:$0xff]  ;;  %v1222_v58 = vrot.slane %v25519_v55, 2  ;;  %v25541_v61 = vld [vmem:[%s32400_s0 + $0xa0] sm:$0xff]  ;;  %v25546_v62 = vld [vmem:[%s32400_s0 + $0xa8] sm:$0xff] }
   0xc   :  { %20902 = vmatmul.mubr.msk.f32.vlgmr.msra.gmra.mrb[0].mxu0 %vm271_vm0, %v1191_v14  ;;  %32982 = vst [vmem:[#allocation13_spill] sm:$0xff] %v25469_v41  ;;  %32983 = vst [vmem:[#allocation14_spill] sm:$0xff] %v25487_v45  ;;  %v25509_v51 = vsel %vm1186_vm1, %v1212_v42, %v1214_v46  ;;  %v25513_v53 = vsel %vm1186_vm1, %v1214_v46, %v1216_v48  ;;  %v25531_v57 = vsel %vm1186_vm1, %v1216_v48, %v1218_v52  ;;  %v25568_v8 = vld [vmem:[%s32400_s0 + $0xb8] sm:$0xff]  ;;  %v25585_v17 = vld [vmem:[%s32400_s0 + $0xc0] sm:$0xff] }
   0xd   :  { %20986 = vmatpush3.msra.mxu0 %v17190_v7  ;;  %20904 = vmatprep.mubr.msk.f32.mxu0 %vm271_vm0, %v25376_v16  ;;  %32984 = vst [vmem:[#allocation15_spill] sm:$0xff] %v25491_v47  ;;  %32985 = vst [vmem:[#allocation16_spill] sm:$0xff] %v25509_v51  ;;  %v25535_v59 = vsel %vm1186_vm1, %v1218_v52, %v1220_v54  ;;  %v1224_v60 = vrot.slane %v25524_v56, 2  ;;  %v25553_v63 = vsel %vm1186_vm1, %v1220_v54, %v1222_v58  ;;  %v25563_v7 = vld [vmem:[%s32400_s0 + $0xb0] sm:$0xff]  ;;  %v25590_v21 = vld [vmem:[%s32400_s0 + $0xc8] sm:$0xff] }
   0xe   :  { %21071 = vmatprep.subr.mxu0 %v25443_v34  ;;  %32986 = vst [vmem:[#allocation17_spill] sm:$0xff] %v25513_v53  ;;  %32987 = vst [vmem:[#allocation18_spill] sm:$0xff] %v25531_v57  ;;  %v1226_v3 = vrot.slane %v25541_v61, 2  ;;  %v1228_v5 = vrot.slane %v25546_v62, 2  ;;  %v1230_v11 = vrot.slane %v25563_v7, 2  ;;  %v1232_v15 = vrot.slane %v25568_v8, 2 }
   0xf   :  { %32988 = vst [vmem:[#allocation19_spill] sm:$0xff] %v25535_v59  ;;  %32989 = vst [vmem:[#allocation20_spill] sm:$0xff] %v25553_v63  ;;  %v25557_v4 = vsel %vm1186_vm1, %v1222_v58, %v1224_v60  ;;  %v1234_v27 = vrot.slane %v25585_v17, 2  ;;  %v1236_v33 = vrot.slane %v25590_v21, 2  ;;  %v25607_v36 = vld [vmem:[%s32400_s0 + $0xd0] sm:$0xff]  ;;  %v25612_v40 = vld [vmem:[%s32400_s0 + $0xd8] sm:$0xff] }
  0x10   :  { %20905 = vmatmul.mubr.msk.f32.gmra.mrb[2].mxu0 %vm271_vm0, %v25393_v20  ;;  %32990 = vst [vmem:[#allocation21_spill] sm:$0xff] %v25557_v4  ;;  %v25575_v10 = vsel %vm1186_vm1, %v1224_v60, %v1226_v3  ;;  %v25579_v14 = vsel %vm1186_vm1, %v1226_v3, %v1228_v5  ;;  %v25597_v23 = vsel %vm1186_vm1, %v1228_v5, %v1230_v11  ;;  %v1238_v46 = vrot.slane %v25607_v36, 2  ;;  %v25629_v54 = vld [vmem:[%s32400_s0 + $0xe0] sm:$0xff]  ;;  %v25634_v58 = vld [vmem:[%s32400_s0 + $0x108] sm:$0xff]  ;;  %v25639_v60 = vld [vmem:[%s32400_s0 + $0x110] sm:$0xff] }
  0x11   :  { %20907 = vmatprep.mubr.msk.f32.mxu0 %vm271_vm0, %v25397_v22  ;;  %32991 = vst [vmem:[#allocation22_spill] sm:$0xff] %v25575_v10  ;;  %32992 = vst [vmem:[#allocation23_spill] sm:$0xff] %v25579_v14  ;;  %v25601_v29 = vsel %vm1186_vm1, %v1230_v11, %v1232_v15  ;;  %v25619_v42 = vsel %vm1186_vm1, %v1232_v15, %v1234_v27  ;;  %v25623_v48 = vsel %vm1186_vm1, %v1234_v27, %v1236_v33  ;;  %v25895_v20 = vld [vmem:[%s32400_s0 + $0x1c8] sm:$0xff]  ;;  %v25917_v16 = vld [vmem:[%s32400_s0 + $0x1d8] sm:$0xff] }
  0x12   :  { %32993 = vst [vmem:[#allocation24_spill] sm:$0xff] %v25597_v23  ;;  %32994 = vst [vmem:[#allocation25_spill] sm:$0xff] %v25601_v29  ;;  %v1240_v52 = vrot.slane %v25612_v40, 2  ;;  %v25646_v3 = vsel %vm1186_vm1, %v1236_v33, %v1238_v46  ;;  %v32418_v5 = vrot.slane %v25629_v54, 2  ;;  %v1244_v15 = vrot.slane %v25634_v58, 2  ;;  %v25939_v1 = vld [vmem:[%s32400_s0 + $0x1e8] sm:$0xff] }
  0x13   :  { %32995 = vst [vmem:[#allocation26_spill] sm:$0xff] %v25619_v42  ;;  %32996 = vst [vmem:[#allocation27_spill] sm:$0xff] %v25623_v48  ;;  %v1245_v27 = vrot.slane %v25639_v60, 2 }
  0x14   :  { %20908 = vmatmul.mubr.msk.f32.gmra.mrb[4].mxu0 %vm271_vm0, %v25415_v26  ;;  %32997 = vst [vmem:[#allocation28_spill] sm:$0xff] %v25629_v54  ;;  %32998 = vst [vmem:[#allocation29_spill] sm:$0xff] %v25634_v58  ;;  %v25650_v11 = vsel %vm1186_vm1, %v1238_v46, %v1240_v52  ;;  %v25671_v33 = vsel %vm1186_vm1, %v1240_v52, %v32418_v5  ;;  %v25873_v26 = vld [vmem:[%s32400_s0 + $0x1b8] sm:$0xff] }
  0x15   :  { %20910 = vmatprep.mubr.msk.f32.mxu0 %vm271_vm0, %v25419_v28  ;;  %32999 = vst [vmem:[#allocation30_spill] sm:$0xff] %v25639_v60  ;;  %33000 = vst [vmem:[#allocation31_spill] sm:$0xff] %v25646_v3  ;;  %v1246_v60 = vsel %vm1186_vm1, %v1244_v15, %v1245_v27 }
  0x16   :  { %33001 = vst [vmem:[#allocation32_spill] sm:$0xff] %v25650_v11  ;;  %33002 = vst [vmem:[#allocation33_spill] sm:$0xff] %v25671_v33 }
  0x17   :  { %33023 = vst [vmem:[#allocation54_spill] sm:$0xff] %v25873_v26  ;;  %33027 = vst [vmem:[#allocation58_spill] sm:$0xff] %v25895_v20 }
  0x18   :  { %20911 = vmatmul.mubr.msk.f32.gmra.mrb[6].mxu0 %vm271_vm0, %v25437_v32  ;;  %v25851_v32 = vld [vmem:[%s32400_s0 + $0x1a8] sm:$0xff]  ;;  %33031 = vst [vmem:[#allocation62_spill] sm:$0xff] %v25917_v16  ;;  %33035 = vst [vmem:[#allocation66_spill] sm:$0xff] %v25939_v1 }
  0x19   :  { %20913 = vmatprep.mubr.msk.f32.mxu0 %vm271_vm0, %v25446_v35  ;;  %33019 = vst [vmem:[#allocation50_spill] sm:$0xff] %v25851_v32 }
  0x1c   :  { %20914 = vmatmul.mubr.msk.f32.gmra.mrb[8].mxu0 %vm271_vm0, %v25465_v39  ;;  %v25829_v39 = vld [vmem:[%s32400_s0 + $0x198] sm:$0xff] }
  0x1d   :  { %20916 = vmatprep.mubr.msk.f32.mxu0 %vm271_vm0, %v25469_v41  ;;  %33016 = vst [vmem:[#allocation47_spill] sm:$0xff] %v25829_v39 }
  0x20   :  { %20917 = vmatmul.mubr.msk.f32.gmra.mrb[10].mxu0 %vm271_vm0, %v25487_v45  ;;  %v25807_v45 = vld [vmem:[%s32400_s0 + $0x188] sm:$0xff] }
  0x21   :  { %20919 = vmatprep.mubr.msk.f32.mxu0 %vm271_vm0, %v25491_v47 }
  0x24   :  { %20920 = vmatmul.mubr.msk.f32.gmra.mrb[12].mxu0 %vm271_vm0, %v25509_v51  ;;  %v25785_v51 = vld [vmem:[%s32400_s0 + $0x178] sm:$0xff] }
  0x25   :  { %20922 = vmatprep.mubr.msk.f32.mxu0 %vm271_vm0, %v25513_v53 }
  0x28   :  { %20923 = vmatmul.mubr.msk.f32.gmra.mrb[14].mxu0 %vm271_vm0, %v25531_v57  ;;  %v25763_v57 = vld [vmem:[%s32400_s0 + $0x168] sm:$0xff] }
  0x29   :  { %20925 = vmatprep.mubr.msk.f32.mxu0 %vm271_vm0, %v25535_v59 }
  0x2c   :  { %20926 = vmatmul.mubr.msk.f32.gmra.mrb[16].mxu0 %vm271_vm0, %v25553_v63  ;;  %v25741_v63 = vld [vmem:[%s32400_s0 + $0x158] sm:$0xff] }
  0x2d   :  { %20928 = vmatprep.mubr.msk.f32.mxu0 %vm271_vm0, %v25557_v4 }
  0x30   :  { %20929 = vmatmul.mubr.msk.f32.gmra.mrb[18].mxu0 %vm271_vm0, %v25575_v10  ;;  %v25719_v10 = vld [vmem:[%s32400_s0 + $0x148] sm:$0xff] }
  0x31   :  { %20931 = vmatprep.mubr.msk.f32.mxu0 %vm271_vm0, %v25579_v14 }
  0x34   :  { %20932 = vmatmul.mubr.msk.f32.gmra.mrb[20].mxu0 %vm271_vm0, %v25597_v23  ;;  %v25698_v23 = vld [vmem:[%s32400_s0 + $0x138] sm:$0xff] }
  0x35   :  { %20934 = vmatprep.mubr.msk.f32.mxu0 %vm271_vm0, %v25601_v29  ;;  %v25657_v29 = vld [vmem:[%s32400_s0 + $0x118] sm:$0xff] }
  0x36   :  { %v1247_v46 = vrot.slane %v25657_v29, 2 }
  0x38   :  { %20935 = vmatmul.mubr.msk.f32.gmra.mrb[22].mxu0 %vm271_vm0, %v25619_v42  ;;  %v25679_v42 = vld [vmem:[%s32400_s0 + $0x128] sm:$0xff]  ;;  %v1248_v52 = vsel %vm1186_vm1, %v1245_v27, %v1247_v46  ;;  %v1255_v27 = vrot.slane %v25698_v23, 2 }
  0x39   :  { %20937 = vmatprep.mubr.msk.f32.mxu0 %vm271_vm0, %v25623_v48  ;;  %v25662_v48 = vld [vmem:[%s32400_s0 + $0x120] sm:$0xff]  ;;  %v1251_v15 = vrot.slane %v25679_v42, 2 }
  0x3a   :  { %v1249_v58 = vrot.slane %v25662_v48, 2 }
  0x3c   :  { %20938 = vmatmul.mubr.msk.f32.gmra.mrb[24].mxu0 %vm271_vm0, %v25646_v3  ;;  %v25692_v5 = vsel %vm1186_vm1, %v1247_v46, %v1249_v58 }
  0x3d   :  { %20940 = vmatprep.mubr.msk.f32.mxu0 %vm271_vm0, %v25650_v11  ;;  %v25684_v11 = vld [vmem:[%s32400_s0 + $0x130] sm:$0xff]  ;;  %33003 = vst [vmem:[#allocation34_spill] sm:$0xff] %v25692_v5 }
  0x3e   :  { %v1253_v3 = vrot.slane %v25684_v11, 2 }
  0x40   :  { %20941 = vmatmul.mubr.msk.f32.gmra.mrb[26].mxu0 %vm271_vm0, %v25671_v33  ;;  %v25703_v33 = vld [vmem:[%s32400_s0 + $0x140] sm:$0xff]  ;;  %v25713_v46 = vsel %vm1186_vm1, %v1251_v15, %v1253_v3 }
  0x41   :  { %20943 = vmatprep.mubr.msk.f32.mxu0 %vm271_vm0, %v1246_v60  ;;  %v25709_v60 = vsel %vm1186_vm1, %v1249_v58, %v1251_v15  ;;  %33005 = vst [vmem:[#allocation36_spill] sm:$0xff] %v25713_v46  ;;  %v1257_v14 = vrot.slane %v25703_v33, 2  ;;  %v25731_v58 = vsel %vm1186_vm1, %v1253_v3, %v1255_v27  ;;  %v1259_v15 = vrot.slane %v25719_v10, 2 }
  0x42   :  { %33004 = vst [vmem:[#allocation35_spill] sm:$0xff] %v25709_v60  ;;  %33006 = vst [vmem:[#allocation37_spill] sm:$0xff] %v25731_v58 }
  0x43   :  { %v25753_v3 = vsel %vm1186_vm1, %v1257_v14, %v1259_v15 }
  0x44   :  { %20944 = vmatmul.mubr.msk.f32.gmra.mrb[28].mxu0 %vm271_vm0, %v1248_v52  ;;  %v25724_v52 = vld [vmem:[%s32400_s0 + $0x150] sm:$0xff]  ;;  %33008 = vst [vmem:[#allocation39_spill] sm:$0xff] %v25753_v3 }
  0x45   :  { %20946 = vmatprep.mubr.msk.f32.mxu0 %vm271_vm0, %v25692_v5  ;;  %v25735_v5 = vsel %vm1186_vm1, %v1255_v27, %v1257_v14  ;;  %v1261_v4 = vrot.slane %v25724_v52, 2  ;;  %v1263_v27 = vrot.slane %v25741_v63, 2 }
  0x46   :  { %33007 = vst [vmem:[#allocation38_spill] sm:$0xff] %v25735_v5 }
  0x47   :  { %v25775_v14 = vsel %vm1186_vm1, %v1261_v4, %v1263_v27 }
  0x48   :  { %20947 = vmatmul.mubr.msk.f32.gmra.mrb[30].mxu0 %vm271_vm0, %v25709_v60  ;;  %v25746_v60 = vld [vmem:[%s32400_s0 + $0x160] sm:$0xff]  ;;  %33010 = vst [vmem:[#allocation41_spill] sm:$0xff] %v25775_v14 }
  0x49   :  { %20949 = vmatprep.mubr.msk.f32.mxu0 %vm271_vm0, %v25713_v46  ;;  %v25757_v46 = vsel %vm1186_vm1, %v1259_v15, %v1261_v4  ;;  %v1265_v59 = vrot.slane %v25746_v60, 2  ;;  %v1267_v15 = vrot.slane %v25763_v57, 2 }
  0x4a   :  { %33009 = vst [vmem:[#allocation40_spill] sm:$0xff] %v25757_v46 }
  0x4b   :  { %v25797_v4 = vsel %vm1186_vm1, %v1265_v59, %v1267_v15 }
  0x4c   :  { %20950 = vmatmul.mubr.msk.f32.gmra.mrb[32].mxu0 %vm271_vm0, %v25731_v58  ;;  %v25768_v58 = vld [vmem:[%s32400_s0 + $0x170] sm:$0xff]  ;;  %33012 = vst [vmem:[#allocation43_spill] sm:$0xff] %v25797_v4 }
  0x4d   :  { %20952 = vmatprep.mubr.msk.f32.mxu0 %vm271_vm0, %v25735_v5  ;;  %v25779_v5 = vsel %vm1186_vm1, %v1263_v27, %v1265_v59  ;;  %v1269_v53 = vrot.slane %v25768_v58, 2  ;;  %v1271_v27 = vrot.slane %v25785_v51, 2 }
  0x4e   :  { %33011 = vst [vmem:[#allocation42_spill] sm:$0xff] %v25779_v5 }
  0x4f   :  { %v25819_v59 = vsel %vm1186_vm1, %v1269_v53, %v1271_v27 }
  0x50   :  { %20953 = vmatmul.mubr.msk.f32.gmra.mrb[34].mxu0 %vm271_vm0, %v25753_v3  ;;  %v25790_v3 = vld [vmem:[%s32400_s0 + $0x180] sm:$0xff]  ;;  %33014 = vst [vmem:[#allocation45_spill] sm:$0xff] %v25819_v59 }
  0x51   :  { %20955 = vmatprep.mubr.msk.f32.mxu0 %vm271_vm0, %v25757_v46  ;;  %v25801_v46 = vsel %vm1186_vm1, %v1267_v15, %v1269_v53  ;;  %v1273_v47 = vrot.slane %v25790_v3, 2  ;;  %v1275_v15 = vrot.slane %v25807_v45, 2 }
  0x52   :  { %33013 = vst [vmem:[#allocation44_spill] sm:$0xff] %v25801_v46 }
  0x53   :  { %v25841_v53 = vsel %vm1186_vm1, %v1273_v47, %v1275_v15 }
  0x54   :  { %20956 = vmatmul.mubr.msk.f32.gmra.mrb[36].mxu0 %vm271_vm0, %v25775_v14  ;;  %v25812_v14 = vld [vmem:[%s32400_s0 + $0x190] sm:$0xff]  ;;  %33017 = vst [vmem:[#allocation48_spill] sm:$0xff] %v25841_v53 }
  0x55   :  { %20958 = vmatprep.mubr.msk.f32.mxu0 %vm271_vm0, %v25779_v5  ;;  %v25823_v5 = vsel %vm1186_vm1, %v1271_v27, %v1273_v47  ;;  %v1277_v41 = vrot.slane %v25812_v14, 2  ;;  %v1279_v27 = vrot.slane %v25829_v39, 2 }
  0x56   :  { %33015 = vst [vmem:[#allocation46_spill] sm:$0xff] %v25823_v5 }
  0x57   :  { %v25863_v47 = vsel %vm1186_vm1, %v1277_v41, %v1279_v27 }
  0x58   :  { %20959 = vmatmul.mubr.msk.f32.gmra.mrb[38].mxu0 %vm271_vm0, %v25797_v4  ;;  %v25834_v4 = vld [vmem:[%s32400_s0 + $0x1a0] sm:$0xff]  ;;  %33021 = vst [vmem:[#allocation52_spill] sm:$0xff] %v25863_v47 }
  0x59   :  { %20961 = vmatprep.mubr.msk.f32.mxu0 %vm271_vm0, %v25801_v46  ;;  %v25845_v46 = vsel %vm1186_vm1, %v1275_v15, %v1277_v41  ;;  %v1281_v35 = vrot.slane %v25834_v4, 2  ;;  %v1283_v15 = vrot.slane %v25851_v32, 2 }
  0x5a   :  { %33018 = vst [vmem:[#allocation49_spill] sm:$0xff] %v25845_v46 }
  0x5b   :  { %v25885_v41 = vsel %vm1186_vm1, %v1281_v35, %v1283_v15 }
  0x5c   :  { %20962 = vmatmul.mubr.msk.f32.gmra.mrb[40].mxu0 %vm271_vm0, %v25819_v59  ;;  %v25856_v59 = vld [vmem:[%s32400_s0 + $0x1b0] sm:$0xff]  ;;  %33025 = vst [vmem:[#allocation56_spill] sm:$0xff] %v25885_v41 }
  0x5d   :  { %20964 = vmatprep.mubr.msk.f32.mxu0 %vm271_vm0, %v25823_v5  ;;  %33020 = vst [vmem:[#allocation51_spill] sm:$0xff] %v25856_v59  ;;  %v25867_v5 = vsel %vm1186_vm1, %v1279_v27, %v1281_v35  ;;  %v1285_v28 = vrot.slane %v25856_v59, 2  ;;  %v1287_v27 = vrot.slane %v25873_v26, 2 }
  0x5e   :  { %33022 = vst [vmem:[#allocation53_spill] sm:$0xff] %v25867_v5 }
  0x5f   :  { %v25907_v35 = vsel %vm1186_vm1, %v1285_v28, %v1287_v27 }
  0x60   :  { %20965 = vmatmul.mubr.msk.f32.gmra.mrb[42].mxu0 %vm271_vm0, %v25841_v53  ;;  %v25878_v53 = vld [vmem:[%s32400_s0 + $0x1c0] sm:$0xff]  ;;  %33029 = vst [vmem:[#allocation60_spill] sm:$0xff] %v25907_v35 }
  0x61   :  { %20967 = vmatprep.mubr.msk.f32.mxu0 %vm271_vm0, %v25845_v46  ;;  %33024 = vst [vmem:[#allocation55_spill] sm:$0xff] %v25878_v53  ;;  %v25889_v46 = vsel %vm1186_vm1, %v1283_v15, %v1285_v28  ;;  %v1289_v22 = vrot.slane %v25878_v53, 2  ;;  %v1291_v15 = vrot.slane %v25895_v20, 2 }
  0x62   :  { %33026 = vst [vmem:[#allocation57_spill] sm:$0xff] %v25889_v46 }
  0x63   :  { %v25929_v28 = vsel %vm1186_vm1, %v1289_v22, %v1291_v15 }
  0x64   :  { %20968 = vmatmul.mubr.msk.f32.gmra.mrb[44].mxu0 %vm271_vm0, %v25863_v47  ;;  %v25900_v47 = vld [vmem:[%s32400_s0 + $0x1d0] sm:$0xff]  ;;  %33033 = vst [vmem:[#allocation64_spill] sm:$0xff] %v25929_v28 }
  0x65   :  { %20970 = vmatprep.mubr.msk.f32.mxu0 %vm271_vm0, %v25867_v5  ;;  %33028 = vst [vmem:[#allocation59_spill] sm:$0xff] %v25900_v47  ;;  %v25911_v5 = vsel %vm1186_vm1, %v1287_v27, %v1289_v22  ;;  %v1293_v0 = vrot.slane %v25900_v47, 2  ;;  %v1295_v27 = vrot.slane %v25917_v16, 2 }
  0x66   :  { %33030 = vst [vmem:[#allocation61_spill] sm:$0xff] %v25911_v5 }
  0x67   :  { %v25946_v22 = vsel %vm1186_vm1, %v1293_v0, %v1295_v27 }
  0x68   :  { %20971 = vmatmul.mubr.msk.f32.gmra.mrb[46].mxu0 %vm271_vm0, %v25885_v41  ;;  %v25922_v41 = vld [vmem:[%s32400_s0 + $0x1e0] sm:$0xff]  ;;  %33036 = vst [vmem:[#allocation67_spill] sm:$0xff] %v25946_v22 }
  0x69   :  { %20973 = vmatprep.mubr.msk.f32.mxu0 %vm271_vm0, %v25889_v46  ;;  %33032 = vst [vmem:[#allocation63_spill] sm:$0xff] %v25922_v41  ;;  %v25933_v46 = vsel %vm1186_vm1, %v1291_v15, %v1293_v0  ;;  %v1297_v2 = vrot.slane %v25922_v41, 2  ;;  %v25968_v0 = vld [vmem:[%s32399_s2 + $0x28] sm:$0xff] }
  0x6a   :  { %33034 = vst [vmem:[#allocation65_spill] sm:$0xff] %v25933_v46 }
  0x6b   :  { %v25950_v15 = vsel %vm1186_vm1, %v1295_v27, %v1297_v2  ;;  %v160_v27 = vrot.slane %v25356_v9, 1 }
  0x6c   :  { %20974 = vmatmul.mubr.msk.f32.gmra.mrb[48].mxu0 %vm271_vm0, %v25907_v35  ;;  %33037 = vst [vmem:[#allocation68_spill] sm:$0xff] %v25950_v15  ;;  %v168_v35 = vrot.slane %v25387_v19, 1 }
  0x6d   :  { %20976 = vmatprep.mubr.msk.f32.mxu0 %vm271_vm0, %v25911_v5  ;;  %v32505_v5 = vrot.slane %v25939_v1, 2 }
  0x70   :  { %20977 = vmatmul.mubr.msk.f32.gmra.mrb[50].mxu0 %vm271_vm0, %v25929_v28  ;;  %v25959_v28 = vsel %vm1186_vm1, %v1297_v2, %v32505_v5  ;;  %v26027_v2 = vld [vmem:[%s32400_s0 + $0xe8] sm:$0xff]  ;;  %v26090_v5 = vld [vmem:[%s32400_s0 + $0x1f0] sm:$0xff] }
  0x71   :  { %20979 = vmatprep.mubr.msk.f32.mxu0 %vm271_vm0, %v25933_v46  ;;  %33038 = vst [vmem:[#allocation69_spill] sm:$0xff] %v25959_v28  ;;  %v166_v46 = vrot.slane %v25382_v18, 1 }
  0x74   :  { %20980 = vmatmul.mubr.msk.f32.gmra.mrb[52].mxu0 %vm271_vm0, %v25946_v22 }
  0x75   :  { %20982 = vmatprep.mubr.msk.f32.mxu0 %vm271_vm0, %v25950_v15 }
  0x78   :  { %20983 = vmatmul.mubr.msk.f32.gmra.mrb[54].mxu0 %vm271_vm0, %v25959_v28  ;;  %v162_v28 = vrot.slane %v25363_v12, 1 }
  0x79   :  { %20987 = vmatprep.mubr.msk.f32.mxu0 %vm271_vm0, %v25342_v6 }
  0x7a   :  { %v26104_v22 = vsel %vm154_vm2, %v160_v27, %v162_v28 }
  0x7c   :  { %20988 = vmatmul.mubr.msk.f32.vlgmr.msra.gmra.mrb[0].mxu0 %vm271_vm0, %v25356_v9  ;;  %v164_v9 = vrot.slane %v25368_v13, 1 }
  0x7d   :  { %21072 = vmatpush3.msra.mxu0 %v25443_v34  ;;  %20990 = vmatprep.mubr.msk.f32.mxu0 %vm271_vm0, %v25363_v12  ;;  %v32516_v34 = vrot.slane %v25342_v6, 1 }
  0x7e   :  { %21157 = vmatprep.subr.mxu0 %v25968_v0  ;;  %v26108_v12 = vsel %vm154_vm2, %v162_v28, %v164_v9  ;;  %v170_v28 = vrot.slane %v25403_v24, 1 }
  0x7f   :  { %v26096_v15 = vsel %vm154_vm2, %v32516_v34, %v160_v27  ;;  %v172_v27 = vrot.slane %v25408_v25, 1  ;;  %v178_v34 = vrot.slane %v25452_v37, 1 }
  0x80   :  { %20991 = vmatmul.mubr.msk.f32.gmra.mrb[2].mxu0 %vm271_vm0, %v25368_v13  ;;  %v26114_v13 = vld [vmem:[%s32399_s2 + $0x30] sm:$0xff] }
  0x81   :  { %20993 = vmatprep.mubr.msk.f32.mxu0 %vm271_vm0, %v25382_v18  ;;  %v26122_v18 = vsel %vm154_vm2, %v164_v9, %v166_v46  ;;  %v174_v9 = vrot.slane %v25425_v30, 1 }
  0x84   :  { %20994 = vmatmul.mubr.msk.f32.gmra.mrb[4].mxu0 %vm271_vm0, %v25387_v19  ;;  %v26126_v19 = vsel %vm154_vm2, %v166_v46, %v168_v35  ;;  %v176_v46 = vrot.slane %v25430_v31, 1 }
  0x85   :  { %20996 = vmatprep.mubr.msk.f32.mxu0 %vm271_vm0, %v25403_v24  ;;  %v26139_v24 = vsel %vm154_vm2, %v170_v28, %v172_v27 }
  0x88   :  { %20997 = vmatmul.mubr.msk.f32.gmra.mrb[6].mxu0 %vm271_vm0, %v25408_v25  ;;  %v26147_v25 = vsel %vm154_vm2, %v172_v27, %v174_v9 }
  0x89   :  { %20999 = vmatprep.mubr.msk.f32.mxu0 %vm271_vm0, %v25425_v30  ;;  %v180_v30 = vrot.slane %v25458_v38, 1 }
  0x8b   :  { %v26163_v27 = vsel %vm154_vm2, %v178_v34, %v180_v30 }
  0x8c   :  { %21000 = vmatmul.mubr.msk.f32.gmra.mrb[8].mxu0 %vm271_vm0, %v25430_v31  ;;  %v26159_v31 = vsel %vm154_vm2, %v176_v46, %v178_v34  ;;  %v190_v34 = vrot.slane %v25519_v55, 1 }
  0x8d   :  { %21002 = vmatprep.mubr.msk.f32.mxu0 %vm271_vm0, %v25452_v37  ;;  %v184_v37 = vrot.slane %v25480_v44, 1 }
  0x90   :  { %21003 = vmatmul.mubr.msk.f32.gmra.mrb[10].mxu0 %vm271_vm0, %v25458_v38 }
  0x91   :  { %21005 = vmatprep.mubr.msk.f32.mxu0 %vm271_vm0, %v25475_v43 }
  0x94   :  { %21006 = vmatmul.mubr.msk.f32.gmra.mrb[12].mxu0 %vm271_vm0, %v25480_v44 }
  0x95   :  { %21008 = vmatprep.mubr.msk.f32.mxu0 %vm271_vm0, %v25497_v49 }
  0x98   :  { %21009 = vmatmul.mubr.msk.f32.gmra.mrb[14].mxu0 %vm271_vm0, %v25502_v50 }
  0x99   :  { %21011 = vmatprep.mubr.msk.f32.mxu0 %vm271_vm0, %v25519_v55  ;;  %v196_v55 = vrot.slane %v25546_v62, 1 }
  0x9c   :  { %21012 = vmatmul.mubr.msk.f32.gmra.mrb[16].mxu0 %vm271_vm0, %v25524_v56 }
  0x9d   :  { %21014 = vmatprep.mubr.msk.f32.mxu0 %vm271_vm0, %v25541_v61 }
  0xa0   :  { %21015 = vmatmul.mubr.msk.f32.gmra.mrb[18].mxu0 %vm271_vm0, %v25546_v62 }
  0xa1   :  { %21017 = vmatprep.mubr.msk.f32.mxu0 %vm271_vm0, %v25563_v7 }
  0xa4   :  { %21018 = vmatmul.mubr.msk.f32.gmra.mrb[20].mxu0 %vm271_vm0, %v25568_v8 }
  0xa5   :  { %21020 = vmatprep.mubr.msk.f32.mxu0 %vm271_vm0, %v25585_v17 }
  0xa8   :  { %21021 = vmatmul.mubr.msk.f32.gmra.mrb[22].mxu0 %vm271_vm0, %v25590_v21 }
  0xa9   :  { %21023 = vmatprep.mubr.msk.f32.mxu0 %vm271_vm0, %v25607_v36 }
  0xac   :  { %21024 = vmatmul.mubr.msk.f32.gmra.mrb[24].mxu0 %vm271_vm0, %v25612_v40 }
  0xad   :  { %21026 = vmatprep.mubr.msk.f32.mxu0 %vm271_vm0, %v25629_v54 }
  0xb0   :  { %21027 = vmatmul.mubr.msk.f32.gmra.mrb[26].mxu0 %vm271_vm0, %v26027_v2 }
  0xb1   :  { %21029 = vmatprep.mubr.msk.f32.mxu0 %vm271_vm0, %v25657_v29 }
  0xb4   :  { %21030 = vmatmul.mubr.msk.f32.gmra.mrb[28].mxu0 %vm271_vm0, %v25662_v48 }
  0xb5   :  { %21032 = vmatprep.mubr.msk.f32.mxu0 %vm271_vm0, %v25679_v42 }
  0xb8   :  { %21033 = vmatmul.mubr.msk.f32.gmra.mrb[30].mxu0 %vm271_vm0, %v25684_v11 }
  0xb9   :  { %21035 = vmatprep.mubr.msk.f32.mxu0 %vm271_vm0, %v25698_v23 }
  0xbc   :  { %21036 = vmatmul.mubr.msk.f32.gmra.mrb[32].mxu0 %vm271_vm0, %v25703_v33 }
  0xbd   :  { %21038 = vmatprep.mubr.msk.f32.mxu0 %vm271_vm0, %v25719_v10 }
  0xc0   :  { %21039 = vmatmul.mubr.msk.f32.gmra.mrb[34].mxu0 %vm271_vm0, %v25724_v52 }
  0xc1   :  { %21041 = vmatprep.mubr.msk.f32.mxu0 %vm271_vm0, %v25741_v63 }
  0xc4   :  { %21042 = vmatmul.mubr.msk.f32.gmra.mrb[36].mxu0 %vm271_vm0, %v25746_v60 }
  0xc5   :  { %21044 = vmatprep.mubr.msk.f32.mxu0 %vm271_vm0, %v25763_v57 }
  0xc8   :  { %21045 = vmatmul.mubr.msk.f32.gmra.mrb[38].mxu0 %vm271_vm0, %v25768_v58 }
  0xc9   :  { %21047 = vmatprep.mubr.msk.f32.mxu0 %vm271_vm0, %v25785_v51 }
  0xcc   :  { %21048 = vmatmul.mubr.msk.f32.gmra.mrb[40].mxu0 %vm271_vm0, %v25790_v3 }
  0xcd   :  { %21050 = vmatprep.mubr.msk.f32.mxu0 %vm271_vm0, %v25807_v45 }
  0xd0   :  { %21051 = vmatmul.mubr.msk.f32.gmra.mrb[42].mxu0 %vm271_vm0, %v25812_v14 }
  0xd1   :  { %21053 = vmatprep.mubr.msk.f32.mxu0 %vm271_vm0, %v25829_v39 }
  0xd4   :  { %21054 = vmatmul.mubr.msk.f32.gmra.mrb[44].mxu0 %vm271_vm0, %v25834_v4 }
  0xd5   :  { %21056 = vmatprep.mubr.msk.f32.mxu0 %vm271_vm0, %v25851_v32 }
  0xd8   :  { %21057 = vmatmul.mubr.msk.f32.gmra.mrb[46].mxu0 %vm271_vm0, %v25856_v59 }
  0xd9   :  { %21059 = vmatprep.mubr.msk.f32.mxu0 %vm271_vm0, %v25873_v26 }
  0xdc   :  { %21060 = vmatmul.mubr.msk.f32.gmra.mrb[48].mxu0 %vm271_vm0, %v25878_v53 }
  0xdd   :  { %21062 = vmatprep.mubr.msk.f32.mxu0 %vm271_vm0, %v25895_v20 }
  0xe0   :  { %21063 = vmatmul.mubr.msk.f32.gmra.mrb[50].mxu0 %vm271_vm0, %v25900_v47 }
  0xe1   :  { %21065 = vmatprep.mubr.msk.f32.mxu0 %vm271_vm0, %v25917_v16 }
  0xe4   :  { %21066 = vmatmul.mubr.msk.f32.gmra.mrb[52].mxu0 %vm271_vm0, %v25922_v41 }
  0xe5   :  { %21068 = vmatprep.mubr.msk.f32.mxu0 %vm271_vm0, %v25939_v1 }
  0xe8   :  { %21069 = vmatmul.mubr.msk.f32.gmra.mrb[54].mxu0 %vm271_vm0, %v26090_v5 }
  0xe9   :  { %21073 = vmatprep.mubr.msk.f32.mxu0 %vm271_vm0, %v26096_v15 }
  0xec   :  { %21074 = vmatmul.mubr.msk.f32.vlgmr.msra.gmra.mrb[0].mxu0 %vm271_vm0, %v26104_v22 }
  0xed   :  { %21158 = vmatpush3.msra.mxu0 %v25968_v0  ;;  %21076 = vmatprep.mubr.msk.f32.mxu0 %vm271_vm0, %v26108_v12  ;;  %v26135_v0 = vsel %vm154_vm2, %v168_v35, %v170_v28  ;;  %v26151_v35 = vsel %vm154_vm2, %v174_v9, %v176_v46  ;;  %v182_v28 = vrot.slane %v25475_v43, 1  ;;  %v186_v9 = vrot.slane %v25497_v49, 1 }
  0xee   :  { %21243 = vmatprep.subr.mxu0 %v26114_v13  ;;  %v188_v43 = vrot.slane %v25502_v50, 1  ;;  %v192_v49 = vrot.slane %v25524_v56, 1 }
  0xef   :  { %v26171_v38 = vsel %vm154_vm2, %v180_v30, %v182_v28  ;;  %v26175_v46 = vsel %vm154_vm2, %v182_v28, %v184_v37  ;;  %v26183_v44 = vsel %vm154_vm2, %v184_v37, %v186_v9  ;;  %v194_v28 = vrot.slane %v25541_v61, 1 }
  0xf0   :  { %21077 = vmatmul.mubr.msk.f32.gmra.mrb[2].mxu0 %vm271_vm0, %v26122_v18  ;;  %v26187_v30 = vsel %vm154_vm2, %v186_v9, %v188_v43  ;;  %v26195_v50 = vsel %vm154_vm2, %v188_v43, %v190_v34  ;;  %v26199_v37 = vsel %vm154_vm2, %v190_v34, %v192_v49  ;;  %v198_v9 = vrot.slane %v25563_v7, 1 }
  0xf1   :  { %21079 = vmatprep.mubr.msk.f32.mxu0 %vm271_vm0, %v26126_v19  ;;  %v26207_v56 = vsel %vm154_vm2, %v192_v49, %v194_v28  ;;  %v26211_v43 = vsel %vm154_vm2, %v194_v28, %v196_v55  ;;  %v200_v61 = vrot.slane %v25568_v8, 1  ;;  %v202_v34 = vrot.slane %v25585_v17, 1 }
  0xf2   :  { %v26219_v62 = vsel %vm154_vm2, %v196_v55, %v198_v9  ;;  %v204_v7 = vrot.slane %v25590_v21, 1  ;;  %v206_v28 = vrot.slane %v25607_v36, 1  ;;  %v208_v17 = vrot.slane %v25612_v40, 1  ;;  %v26253_v40 = vld [vmem:[%s32400_s0 + $0xf0] sm:$0xff] }
  0xf3   :  { %v26223_v49 = vsel %vm154_vm2, %v198_v9, %v200_v61  ;;  %v26231_v8 = vsel %vm154_vm2, %v200_v61, %v202_v34  ;;  %v210_v9 = vrot.slane %v25629_v54, 1  ;;  %v2231_v61 = vrot.slane %v26027_v2, 1 }
  0xf4   :  { %21080 = vmatmul.mubr.msk.f32.gmra.mrb[4].mxu0 %vm271_vm0, %v26135_v0  ;;  %v26235_v55 = vsel %vm154_vm2, %v202_v34, %v204_v7  ;;  %v26243_v21 = vsel %vm154_vm2, %v204_v7, %v206_v28  ;;  %v26248_v36 = vsel %vm154_vm2, %v206_v28, %v208_v17  ;;  %v32523_v7 = vrot.slane %v26253_v40, 1 }
  0xf5   :  { %21082 = vmatprep.mubr.msk.f32.mxu0 %vm271_vm0, %v26139_v24  ;;  %33039 = vst [vmem:[#allocation70_spill] sm:$0xff] %v26235_v55  ;;  %33040 = vst [vmem:[#allocation71_spill] sm:$0xff] %v26248_v36  ;;  %v26260_v34 = vsel %vm154_vm2, %v208_v17, %v210_v9  ;;  %v26264_v54 = vsel %vm154_vm2, %v210_v9, %v2231_v61  ;;  %v32524_v28 = vrot.slane %v25657_v29, 1 }
  0xf6   :  { %33041 = vst [vmem:[#allocation72_spill] sm:$0xff] %v26264_v54  ;;  %v26275_v17 = vsel %vm154_vm2, %v2231_v61, %v32523_v7  ;;  %v223_v61 = vrot.slane %v25698_v23, 1  ;;  %v225_v7 = vrot.slane %v25703_v33, 1  ;;  %v229_v23 = vrot.slane %v25724_v52, 1 }
  0xf7   :  { %33042 = vst [vmem:[#allocation73_spill] sm:$0xff] %v26275_v17 }
  0xf8   :  { %21083 = vmatmul.mubr.msk.f32.gmra.mrb[6].mxu0 %vm271_vm0, %v26147_v25 }
  0xf9   :  { %21085 = vmatprep.mubr.msk.f32.mxu0 %vm271_vm0, %v26151_v35 }
  0xfc   :  { %21086 = vmatmul.mubr.msk.f32.gmra.mrb[8].mxu0 %vm271_vm0, %v26159_v31 }
  0xfd   :  { %21088 = vmatprep.mubr.msk.f32.mxu0 %vm271_vm0, %v26163_v27 }
 0x100   :  { %21089 = vmatmul.mubr.msk.f32.gmra.mrb[10].mxu0 %vm271_vm0, %v26171_v38 }
 0x101   :  { %21091 = vmatprep.mubr.msk.f32.mxu0 %vm271_vm0, %v26175_v46 }
 0x104   :  { %21092 = vmatmul.mubr.msk.f32.gmra.mrb[12].mxu0 %vm271_vm0, %v26183_v44 }
 0x105   :  { %21094 = vmatprep.mubr.msk.f32.mxu0 %vm271_vm0, %v26187_v30 }
 0x108   :  { %21095 = vmatmul.mubr.msk.f32.gmra.mrb[14].mxu0 %vm271_vm0, %v26195_v50 }
 0x109   :  { %21097 = vmatprep.mubr.msk.f32.mxu0 %vm271_vm0, %v26199_v37 }
 0x10c   :  { %21098 = vmatmul.mubr.msk.f32.gmra.mrb[16].mxu0 %vm271_vm0, %v26207_v56 }
 0x10d   :  { %21100 = vmatprep.mubr.msk.f32.mxu0 %vm271_vm0, %v26211_v43 }
 0x110   :  { %21101 = vmatmul.mubr.msk.f32.gmra.mrb[18].mxu0 %vm271_vm0, %v26219_v62 }
 0x111   :  { %21103 = vmatprep.mubr.msk.f32.mxu0 %vm271_vm0, %v26223_v49 }
 0x114   :  { %21104 = vmatmul.mubr.msk.f32.gmra.mrb[20].mxu0 %vm271_vm0, %v26231_v8 }
 0x115   :  { %21106 = vmatprep.mubr.msk.f32.mxu0 %vm271_vm0, %v26235_v55  ;;  %v217_v55 = vrot.slane %v25662_v48, 1  ;;  %v221_v48 = vrot.slane %v25684_v11, 1 }
 0x117   :  { %v26281_v9 = vsel %vm154_vm2, %v32524_v28, %v217_v55  ;;  %v26301_v11 = vsel %vm154_vm2, %v221_v48, %v223_v61  ;;  %v227_v28 = vrot.slane %v25719_v10, 1  ;;  %v233_v10 = vrot.slane %v25746_v60, 1 }
 0x118   :  { %21107 = vmatmul.mubr.msk.f32.gmra.mrb[22].mxu0 %vm271_vm0, %v26243_v21 }
 0x119   :  { %21109 = vmatprep.mubr.msk.f32.mxu0 %vm271_vm0, %v26248_v36  ;;  %v219_v36 = vrot.slane %v25679_v42, 1  ;;  %v26313_v33 = vsel %vm154_vm2, %v225_v7, %v227_v28 }
 0x11b   :  { %v26293_v42 = vsel %vm154_vm2, %v219_v36, %v221_v48  ;;  %v26317_v48 = vsel %vm154_vm2, %v227_v28, %v229_v23  ;;  %v239_v28 = vrot.slane %v25785_v51, 1  ;;  %v245_v51 = vrot.slane %v25812_v14, 1 }
 0x11c   :  { %21110 = vmatmul.mubr.msk.f32.gmra.mrb[24].mxu0 %vm271_vm0, %v26260_v34 }
 0x11d   :  { %21112 = vmatprep.mubr.msk.f32.mxu0 %vm271_vm0, %v26264_v54  ;;  %v26289_v54 = vsel %vm154_vm2, %v217_v55, %v219_v36  ;;  %v26305_v55 = vsel %vm154_vm2, %v223_v61, %v225_v7  ;;  %v231_v36 = vrot.slane %v25741_v63, 1  ;;  %v235_v61 = vrot.slane %v25763_v57, 1 }
 0x11e   :  { %v237_v63 = vrot.slane %v25768_v58, 1  ;;  %v241_v57 = vrot.slane %v25790_v3, 1 }
 0x11f   :  { %v26325_v52 = vsel %vm154_vm2, %v229_v23, %v231_v36  ;;  %v26329_v7 = vsel %vm154_vm2, %v231_v36, %v233_v10  ;;  %v26337_v60 = vsel %vm154_vm2, %v233_v10, %v235_v61  ;;  %v243_v36 = vrot.slane %v25807_v45, 1 }
 0x120   :  { %21113 = vmatmul.mubr.msk.f32.gmra.mrb[26].mxu0 %vm271_vm0, %v26275_v17  ;;  %v26341_v23 = vsel %vm154_vm2, %v235_v61, %v237_v63  ;;  %v26349_v58 = vsel %vm154_vm2, %v237_v63, %v239_v28  ;;  %v26353_v10 = vsel %vm154_vm2, %v239_v28, %v241_v57  ;;  %v247_v61 = vrot.slane %v25829_v39, 1 }
 0x121   :  { %21115 = vmatprep.mubr.msk.f32.mxu0 %vm271_vm0, %v26281_v9  ;;  %v26361_v3 = vsel %vm154_vm2, %v241_v57, %v243_v36  ;;  %v26365_v63 = vsel %vm154_vm2, %v243_v36, %v245_v51  ;;  %v249_v45 = vrot.slane %v25834_v4, 1  ;;  %v251_v28 = vrot.slane %v25851_v32, 1 }
 0x122   :  { %v26373_v14 = vsel %vm154_vm2, %v245_v51, %v247_v61  ;;  %v253_v17 = vrot.slane %v25856_v59, 1  ;;  %v255_v36 = vrot.slane %v25873_v26, 1  ;;  %v257_v32 = vrot.slane %v25878_v53, 1 }
 0x123   :  { %v26377_v57 = vsel %vm154_vm2, %v247_v61, %v249_v45  ;;  %v26385_v4 = vsel %vm154_vm2, %v249_v45, %v251_v28  ;;  %v259_v59 = vrot.slane %v25895_v20, 1  ;;  %v261_v26 = vrot.slane %v25900_v47, 1 }
 0x124   :  { %21116 = vmatmul.mubr.msk.f32.gmra.mrb[28].mxu0 %vm271_vm0, %v26289_v54  ;;  %v26389_v51 = vsel %vm154_vm2, %v251_v28, %v253_v17  ;;  %v26397_v61 = vsel %vm154_vm2, %v253_v17, %v255_v36  ;;  %v26401_v45 = vsel %vm154_vm2, %v255_v36, %v257_v32  ;;  %v263_v53 = vrot.slane %v25917_v16, 1 }
 0x125   :  { %21118 = vmatprep.mubr.msk.f32.mxu0 %vm271_vm0, %v26293_v42  ;;  %v26409_v28 = vsel %vm154_vm2, %v257_v32, %v259_v59  ;;  %v26413_v17 = vsel %vm154_vm2, %v259_v59, %v261_v26  ;;  %v265_v20 = vrot.slane %v25922_v41, 1  ;;  %v267_v47 = vrot.slane %v25939_v1, 1  ;;  %v26431_v59 = vld [vmem:[%s32400_s0 + $0x1f8] sm:$0xff] }
 0x126   :  { %v26421_v36 = vsel %vm154_vm2, %v261_v26, %v263_v53  ;;  %v2235_v32 = vrot.slane %v26090_v5, 1  ;;  %v32552_v41 = vrot.slane %v26431_v59, 1 }
 0x127   :  { %33043 = vst [vmem:[#allocation74_spill] sm:$0xff] %v26421_v36  ;;  %v26426_v16 = vsel %vm154_vm2, %v263_v53, %v265_v20  ;;  %v26438_v26 = vsel %vm154_vm2, %v265_v20, %v267_v47  ;;  %v33047_v53 = vld [vmem:[#allocation3_spill] sm:$0xff]  ;;  %v33048_v20 = vld [vmem:[#allocation4_spill] sm:$0xff] }
 0x128   :  { %21119 = vmatmul.mubr.msk.f32.gmra.mrb[30].mxu0 %vm271_vm0, %v26301_v11  ;;  %33044 = vst [vmem:[#allocation75_spill] sm:$0xff] %v26426_v16  ;;  %33045 = vst [vmem:[#allocation76_spill] sm:$0xff] %v26438_v26  ;;  %v26442_v39 = vsel %vm154_vm2, %v267_v47, %v2235_v32  ;;  %v155_v1 = vrot.slane %v33047_v53, 1  ;;  %v17020_v47 = vld [vmem:[%s32399_s2 + $0x8] sm:$0xff] }
 0x129   :  { %21121 = vmatprep.mubr.msk.f32.mxu0 %vm271_vm0, %v26305_v55  ;;  %33046 = vst [vmem:[#allocation77_spill] sm:$0xff] %v26442_v39  ;;  %20727 = vmatprep.subr.mxu1 %v17020_v47 }
 0x12a   :  { %20728 = vmatpush3.msra.mxu1 %v17020_v47  ;;  %v33061_v47 = vld [vmem:[#allocation15_spill] sm:$0xff] }
 0x12c   :  { %21122 = vmatmul.mubr.msk.f32.gmra.mrb[32].mxu0 %vm271_vm0, %v26313_v33 }
 0x12d   :  { %21124 = vmatprep.mubr.msk.f32.mxu0 %vm271_vm0, %v26317_v48 }
 0x130   :  { %21125 = vmatmul.mubr.msk.f32.gmra.mrb[34].mxu0 %vm271_vm0, %v26325_v52 }
 0x131   :  { %21127 = vmatprep.mubr.msk.f32.mxu0 %vm271_vm0, %v26329_v7 }
 0x134   :  { %21128 = vmatmul.mubr.msk.f32.gmra.mrb[36].mxu0 %vm271_vm0, %v26337_v60 }
 0x135   :  { %21130 = vmatprep.mubr.msk.f32.mxu0 %vm271_vm0, %v26341_v23 }
 0x138   :  { %21131 = vmatmul.mubr.msk.f32.gmra.mrb[38].mxu0 %vm271_vm0, %v26349_v58 }
 0x139   :  { %21133 = vmatprep.mubr.msk.f32.mxu0 %vm271_vm0, %v26353_v10 }
 0x13c   :  { %21134 = vmatmul.mubr.msk.f32.gmra.mrb[40].mxu0 %vm271_vm0, %v26361_v3 }
 0x13d   :  { %21136 = vmatprep.mubr.msk.f32.mxu0 %vm271_vm0, %v26365_v63 }
 0x140   :  { %21137 = vmatmul.mubr.msk.f32.gmra.mrb[42].mxu0 %vm271_vm0, %v26373_v14 }
 0x141   :  { %21139 = vmatprep.mubr.msk.f32.mxu0 %vm271_vm0, %v26377_v57 }
 0x144   :  { %21140 = vmatmul.mubr.msk.f32.gmra.mrb[44].mxu0 %vm271_vm0, %v26385_v4 }
 0x145   :  { %21142 = vmatprep.mubr.msk.f32.mxu0 %vm271_vm0, %v26389_v51 }
 0x148   :  { %21143 = vmatmul.mubr.msk.f32.gmra.mrb[46].mxu0 %vm271_vm0, %v26397_v61 }
 0x149   :  { %21145 = vmatprep.mubr.msk.f32.mxu0 %vm271_vm0, %v26401_v45 }
 0x14c   :  { %21146 = vmatmul.mubr.msk.f32.gmra.mrb[48].mxu0 %vm271_vm0, %v26409_v28 }
 0x14d   :  { %21148 = vmatprep.mubr.msk.f32.mxu0 %vm271_vm0, %v26413_v17 }
 0x150   :  { %21149 = vmatmul.mubr.msk.f32.gmra.mrb[50].mxu0 %vm271_vm0, %v26421_v36  ;;  %v156_v36 = vrot.slane %v33048_v20, 1  ;;  %v26470_v20 = vld [vmem:[%s32399_s2 + $0x38] sm:$0xff] }
 0x151   :  { %21151 = vmatprep.mubr.msk.f32.mxu0 %vm271_vm0, %v26426_v16  ;;  %v26452_v16 = vsel %vm154_vm2, %v2235_v32, %v32552_v41  ;;  %v33051_v41 = vld [vmem:[#allocation2_spill] sm:$0xff] }
 0x152   :  { %v157_v53 = vsel %vm154_vm2, %v155_v1, %v156_v36  ;;  %23571 = vmatprep.subr.mxu1 %v33051_v41  ;;  %v33053_v1 = vld [vmem:[#allocation7_spill] sm:$0xff] }
 0x153   :  { %20729 = vmatprep.mubr.msk.f32.mxu1 %vm271_vm0, %v157_v53  ;;  %v33062_v53 = vld [vmem:[#allocation16_spill] sm:$0xff] }
 0x154   :  { %21152 = vmatmul.mubr.msk.f32.gmra.mrb[52].mxu0 %vm271_vm0, %v26438_v26  ;;  %v33049_v26 = vld [vmem:[#allocation5_spill] sm:$0xff] }
 0x155   :  { %21154 = vmatprep.mubr.msk.f32.mxu0 %vm271_vm0, %v26442_v39  ;;  %v33050_v39 = vrot.slane %v25342_v6, 1  ;;  %v33054_v6 = vld [vmem:[#allocation8_spill] sm:$0xff] }
 0x157   :  { %v159_v32 = vsel %vm154_vm2, %v156_v36, %v33050_v39  ;;  %v33055_v39 = vld [vmem:[#allocation9_spill] sm:$0xff]  ;;  %v33060_v36 = vld [vmem:[#allocation14_spill] sm:$0xff] }
 0x158   :  { %21155 = vmatmul.mubr.msk.f32.gmra.mrb[54].mxu0 %vm271_vm0, %v26452_v16  ;;  %20730 = vmatmul.mubr.msk.f32.vlgmr.msra.gmra.mrb[0].mxu1 %vm271_vm0, %v159_v32  ;;  %v33063_v32 = vld [vmem:[#allocation17_spill] sm:$0xff] }
 0x159   :  { %21159 = vmatprep.mubr.msk.f32.mxu0 %vm271_vm0, %v33049_v26  ;;  %v33052_v26 = vld [vmem:[#allocation6_spill] sm:$0xff]  ;;  %20732 = vmatprep.mubr.msk.f32.mxu1 %vm271_vm0, %v26096_v15 }
 0x15a   :  { %23572 = vmatpush3.msra.mxu1 %v33051_v41  ;;  %v33056_v15 = vld [vmem:[#allocation10_spill] sm:$0xff]  ;;  %v33057_v41 = vld [vmem:[#allocation11_spill] sm:$0xff] }
 0x15c   :  { %21160 = vmatmul.mubr.msk.f32.vlgmr.msra.gmra.mrb[0].mxu0 %vm271_vm0, %v33052_v26  ;;  %20733 = vmatmul.mubr.msk.f32.gmra.mrb[2].mxu1 %vm271_vm0, %v26104_v22  ;;  %v33058_v22 = vld [vmem:[#allocation12_spill] sm:$0xff]  ;;  %v33064_v26 = vld [vmem:[#allocation18_spill] sm:$0xff] }
 0x15d   :  { %21244 = vmatpush3.msra.mxu0 %v26114_v13  ;;  %21162 = vmatprep.mubr.msk.f32.mxu0 %vm271_vm0, %v33053_v1  ;;  %v33059_v13 = vld [vmem:[#allocation13_spill] sm:$0xff]  ;;  %v33085_v1 = vrot.slane %v25657_v29, 1  ;;  %v33089_v29 = vld [vmem:[#allocation38_spill] sm:$0xff] }
 0x15e   :  { %21329 = vmatprep.subr.mxu0 %v26470_v20  ;;  %20735 = vmatprep.mubr.msk.f32.mxu1 %vm271_vm0, %v26108_v12 }
 0x160   :  { %21163 = vmatmul.mubr.msk.f32.gmra.mrb[2].mxu0 %vm271_vm0, %v33054_v6  ;;  %20736 = vmatmul.mubr.msk.f32.gmra.mrb[4].mxu1 %vm271_vm0, %v26122_v18 }
 0x161   :  { %21165 = vmatprep.mubr.msk.f32.mxu0 %vm271_vm0, %v33055_v39  ;;  %20738 = vmatprep.mubr.msk.f32.mxu1 %vm271_vm0, %v26126_v19  ;;  %v33083_v39 = vld [vmem:[#allocation30_spill] sm:$0xff] }
 0x162   :  { %v213_v6 = vrot.slane %v33083_v39, 1  ;;  %v33087_v39 = vld [vmem:[#allocation36_spill] sm:$0xff] }
 0x164   :  { %21166 = vmatmul.mubr.msk.f32.gmra.mrb[4].mxu0 %vm271_vm0, %v33056_v15  ;;  %20739 = vmatmul.mubr.msk.f32.gmra.mrb[6].mxu1 %vm271_vm0, %v26135_v0  ;;  %v33080_v15 = vld [vmem:[#allocation33_spill] sm:$0xff] }
 0x165   :  { %21168 = vmatprep.mubr.msk.f32.mxu0 %vm271_vm0, %v33057_v41  ;;  %20741 = vmatprep.mubr.msk.f32.mxu1 %vm271_vm0, %v26139_v24 }
 0x168   :  { %21169 = vmatmul.mubr.msk.f32.gmra.mrb[6].mxu0 %vm271_vm0, %v33058_v22  ;;  %20742 = vmatmul.mubr.msk.f32.gmra.mrb[8].mxu1 %vm271_vm0, %v26147_v25  ;;  %v33077_v22 = vld [vmem:[#allocation28_spill] sm:$0xff] }
 0x169   :  { %21171 = vmatprep.mubr.msk.f32.mxu0 %vm271_vm0, %v33059_v13  ;;  %20744 = vmatprep.mubr.msk.f32.mxu1 %vm271_vm0, %v26151_v35  ;;  %v33076_v13 = vld [vmem:[#allocation32_spill] sm:$0xff]  ;;  %v33078_v41 = vrot.slane %v33077_v22, 2 }
 0x16c   :  { %21172 = vmatmul.mubr.msk.f32.gmra.mrb[8].mxu0 %vm271_vm0, %v33060_v36  ;;  %20745 = vmatmul.mubr.msk.f32.gmra.mrb[10].mxu1 %vm271_vm0, %v26159_v31  ;;  %v33074_v36 = vld [vmem:[#allocation31_spill] sm:$0xff] }
 0x16d   :  { %21174 = vmatprep.mubr.msk.f32.mxu0 %vm271_vm0, %v33061_v47  ;;  %20747 = vmatprep.mubr.msk.f32.mxu1 %vm271_vm0, %v26163_v27  ;;  %v33065_v47 = vld [vmem:[#allocation19_spill] sm:$0xff] }
 0x170   :  { %21175 = vmatmul.mubr.msk.f32.gmra.mrb[10].mxu0 %vm271_vm0, %v33062_v53  ;;  %20748 = vmatmul.mubr.msk.f32.gmra.mrb[12].mxu1 %vm271_vm0, %v26171_v38  ;;  %v33066_v53 = vld [vmem:[#allocation20_spill] sm:$0xff] }
 0x171   :  { %21177 = vmatprep.mubr.msk.f32.mxu0 %vm271_vm0, %v33063_v32  ;;  %20750 = vmatprep.mubr.msk.f32.mxu1 %vm271_vm0, %v26175_v46  ;;  %v33067_v32 = vld [vmem:[#allocation21_spill] sm:$0xff] }
 0x174   :  { %21178 = vmatmul.mubr.msk.f32.gmra.mrb[12].mxu0 %vm271_vm0, %v33064_v26  ;;  %20751 = vmatmul.mubr.msk.f32.gmra.mrb[14].mxu1 %vm271_vm0, %v26183_v44  ;;  %v33068_v26 = vld [vmem:[#allocation22_spill] sm:$0xff] }
 0x175   :  { %21180 = vmatprep.mubr.msk.f32.mxu0 %vm271_vm0, %v33065_v47  ;;  %20753 = vmatprep.mubr.msk.f32.mxu1 %vm271_vm0, %v26187_v30  ;;  %v33069_v47 = vld [vmem:[#allocation23_spill] sm:$0xff] }
 0x178   :  { %21181 = vmatmul.mubr.msk.f32.gmra.mrb[14].mxu0 %vm271_vm0, %v33066_v53  ;;  %20754 = vmatmul.mubr.msk.f32.gmra.mrb[16].mxu1 %vm271_vm0, %v26195_v50  ;;  %v33070_v53 = vld [vmem:[#allocation24_spill] sm:$0xff] }
 0x179   :  { %21183 = vmatprep.mubr.msk.f32.mxu0 %vm271_vm0, %v33067_v32  ;;  %20756 = vmatprep.mubr.msk.f32.mxu1 %vm271_vm0, %v26199_v37  ;;  %v33071_v32 = vld [vmem:[#allocation25_spill] sm:$0xff] }
 0x17c   :  { %21184 = vmatmul.mubr.msk.f32.gmra.mrb[16].mxu0 %vm271_vm0, %v33068_v26  ;;  %20757 = vmatmul.mubr.msk.f32.gmra.mrb[18].mxu1 %vm271_vm0, %v26207_v56  ;;  %v33072_v26 = vld [vmem:[#allocation26_spill] sm:$0xff] }
 0x17d   :  { %21186 = vmatprep.mubr.msk.f32.mxu0 %vm271_vm0, %v33069_v47  ;;  %20759 = vmatprep.mubr.msk.f32.mxu1 %vm271_vm0, %v26211_v43  ;;  %v33073_v47 = vld [vmem:[#allocation27_spill] sm:$0xff] }
 0x180   :  { %21187 = vmatmul.mubr.msk.f32.gmra.mrb[18].mxu0 %vm271_vm0, %v33070_v53  ;;  %20760 = vmatmul.mubr.msk.f32.gmra.mrb[20].mxu1 %vm271_vm0, %v26219_v62  ;;  %v2650_v53 = vrot.slane %v26027_v2, 2 }
 0x181   :  { %21189 = vmatprep.mubr.msk.f32.mxu0 %vm271_vm0, %v33071_v32  ;;  %20762 = vmatprep.mubr.msk.f32.mxu1 %vm271_vm0, %v26223_v49  ;;  %v33075_v32 = vld [vmem:[#allocation70_spill] sm:$0xff] }
 0x184   :  { %21190 = vmatmul.mubr.msk.f32.gmra.mrb[20].mxu0 %vm271_vm0, %v33072_v26  ;;  %20763 = vmatmul.mubr.msk.f32.gmra.mrb[22].mxu1 %vm271_vm0, %v26231_v8  ;;  %v32554_v26 = vrot.slane %v26253_v40, 2 }
 0x185   :  { %21192 = vmatprep.mubr.msk.f32.mxu0 %vm271_vm0, %v33073_v47  ;;  %20765 = vmatprep.mubr.msk.f32.mxu1 %vm271_vm0, %v33075_v32  ;;  %v26576_v47 = vsel %vm1186_vm1, %v33078_v41, %v2650_v53  ;;  %v33082_v41 = vld [vmem:[#allocation29_spill] sm:$0xff] }
 0x186   :  { %33079 = vst [vmem:[#allocation3_spill] sm:$0xff] %v26576_v47  ;;  %v212_v22 = vrot.slane %v33082_v41, 1  ;;  %v33096_v41 = vld [vmem:[#allocation45_spill] sm:$0xff] }
 0x188   :  { %21193 = vmatmul.mubr.msk.f32.gmra.mrb[22].mxu0 %vm271_vm0, %v33074_v36  ;;  %20766 = vmatmul.mubr.msk.f32.gmra.mrb[24].mxu1 %vm271_vm0, %v26243_v21  ;;  %v33081_v36 = vld [vmem:[#allocation71_spill] sm:$0xff] }
 0x189   :  { %21195 = vmatprep.mubr.msk.f32.mxu0 %vm271_vm0, %v33076_v13  ;;  %20768 = vmatprep.mubr.msk.f32.mxu1 %vm271_vm0, %v33081_v36  ;;  %v26589_v13 = vsel %vm1186_vm1, %v2650_v53, %v32554_v26  ;;  %v216_v53 = vsel %vm154_vm2, %v213_v6, %v33085_v1  ;;  %v33086_v26 = vld [vmem:[#allocation35_spill] sm:$0xff] }
 0x18a   :  { %v33090_v1 = vld [vmem:[#allocation39_spill] sm:$0xff] }
 0x18c   :  { %21196 = vmatmul.mubr.msk.f32.gmra.mrb[24].mxu0 %vm271_vm0, %v33080_v15  ;;  %20769 = vmatmul.mubr.msk.f32.gmra.mrb[26].mxu1 %vm271_vm0, %v26260_v34  ;;  %v33084_v15 = vld [vmem:[#allocation34_spill] sm:$0xff] }
 0x18d   :  { %21198 = vmatprep.mubr.msk.f32.mxu0 %vm271_vm0, %v26576_v47  ;;  %v214_v47 = vsel %vm154_vm2, %v212_v22, %v213_v6  ;;  %v33093_v6 = vld [vmem:[#allocation42_spill] sm:$0xff] }
 0x18e   :  { %20771 = vmatprep.mubr.msk.f32.mxu1 %vm271_vm0, %v214_v47  ;;  %v33094_v47 = vld [vmem:[#allocation43_spill] sm:$0xff]  ;;  %v33097_v22 = vld [vmem:[#allocation46_spill] sm:$0xff] }
 0x190   :  { %21199 = vmatmul.mubr.msk.f32.gmra.mrb[26].mxu0 %vm271_vm0, %v26589_v13  ;;  %20772 = vmatmul.mubr.msk.f32.gmra.mrb[28].mxu1 %vm271_vm0, %v216_v53  ;;  %v33098_v53 = vld [vmem:[#allocation48_spill] sm:$0xff] }
 0x191   :  { %21201 = vmatprep.mubr.msk.f32.mxu0 %vm271_vm0, %v33084_v15  ;;  %20774 = vmatprep.mubr.msk.f32.mxu1 %vm271_vm0, %v26281_v9  ;;  %v33088_v15 = vld [vmem:[#allocation37_spill] sm:$0xff]  ;;  %v33091_v9 = vld [vmem:[#allocation40_spill] sm:$0xff] }
 0x194   :  { %21202 = vmatmul.mubr.msk.f32.gmra.mrb[28].mxu0 %vm271_vm0, %v33086_v26  ;;  %20775 = vmatmul.mubr.msk.f32.gmra.mrb[30].mxu1 %vm271_vm0, %v26289_v54  ;;  %v33092_v54 = vld [vmem:[#allocation41_spill] sm:$0xff]  ;;  %v33095_v26 = vld [vmem:[#allocation44_spill] sm:$0xff] }
 0x195   :  { %21204 = vmatprep.mubr.msk.f32.mxu0 %vm271_vm0, %v33087_v39  ;;  %20777 = vmatprep.mubr.msk.f32.mxu1 %vm271_vm0, %v26293_v42 }
 0x198   :  { %21205 = vmatmul.mubr.msk.f32.gmra.mrb[30].mxu0 %vm271_vm0, %v33088_v15  ;;  %20778 = vmatmul.mubr.msk.f32.gmra.mrb[32].mxu1 %vm271_vm0, %v26301_v11 }
 0x199   :  { %21207 = vmatprep.mubr.msk.f32.mxu0 %vm271_vm0, %v33089_v29  ;;  %20780 = vmatprep.mubr.msk.f32.mxu1 %vm271_vm0, %v26305_v55  ;;  %v33117_v29 = vld [vmem:[#allocation76_spill] sm:$0xff] }
 0x19c   :  { %21208 = vmatmul.mubr.msk.f32.gmra.mrb[32].mxu0 %vm271_vm0, %v33090_v1  ;;  %20781 = vmatmul.mubr.msk.f32.gmra.mrb[34].mxu1 %vm271_vm0, %v26313_v33  ;;  %v33114_v1 = vld [vmem:[#allocation69_spill] sm:$0xff] }
 0x19d   :  { %21210 = vmatprep.mubr.msk.f32.mxu0 %vm271_vm0, %v33091_v9  ;;  %20783 = vmatprep.mubr.msk.f32.mxu1 %vm271_vm0, %v26317_v48  ;;  %v33113_v9 = vld [vmem:[#allocation74_spill] sm:$0xff] }
 0x1a0   :  { %21211 = vmatmul.mubr.msk.f32.gmra.mrb[34].mxu0 %vm271_vm0, %v33092_v54  ;;  %20784 = vmatmul.mubr.msk.f32.gmra.mrb[36].mxu1 %vm271_vm0, %v26325_v52 }
 0x1a1   :  { %21213 = vmatprep.mubr.msk.f32.mxu0 %vm271_vm0, %v33093_v6  ;;  %20786 = vmatprep.mubr.msk.f32.mxu1 %vm271_vm0, %v26329_v7  ;;  %v33110_v6 = vld [vmem:[#allocation66_spill] sm:$0xff] }
 0x1a2   :  { %v33111_v54 = vrot.slane %v33110_v6, 2 }
 0x1a4   :  { %21214 = vmatmul.mubr.msk.f32.gmra.mrb[36].mxu0 %vm271_vm0, %v33094_v47  ;;  %20787 = vmatmul.mubr.msk.f32.gmra.mrb[38].mxu1 %vm271_vm0, %v26337_v60  ;;  %v33108_v47 = vld [vmem:[#allocation67_spill] sm:$0xff] }
 0x1a5   :  { %21216 = vmatprep.mubr.msk.f32.mxu0 %vm271_vm0, %v33095_v26  ;;  %20789 = vmatprep.mubr.msk.f32.mxu1 %vm271_vm0, %v26341_v23  ;;  %v33099_v26 = vld [vmem:[#allocation49_spill] sm:$0xff] }
 0x1a8   :  { %21217 = vmatmul.mubr.msk.f32.gmra.mrb[38].mxu0 %vm271_vm0, %v33096_v41  ;;  %20790 = vmatmul.mubr.msk.f32.gmra.mrb[40].mxu1 %vm271_vm0, %v26349_v58  ;;  %v33100_v41 = vld [vmem:[#allocation52_spill] sm:$0xff] }
 0x1a9   :  { %21219 = vmatprep.mubr.msk.f32.mxu0 %vm271_vm0, %v33097_v22  ;;  %20792 = vmatprep.mubr.msk.f32.mxu1 %vm271_vm0, %v26353_v10  ;;  %v33101_v22 = vld [vmem:[#allocation53_spill] sm:$0xff] }
 0x1ac   :  { %21220 = vmatmul.mubr.msk.f32.gmra.mrb[40].mxu0 %vm271_vm0, %v33098_v53  ;;  %20793 = vmatmul.mubr.msk.f32.gmra.mrb[42].mxu1 %vm271_vm0, %v26361_v3  ;;  %v33102_v53 = vld [vmem:[#allocation56_spill] sm:$0xff] }
 0x1ad   :  { %21222 = vmatprep.mubr.msk.f32.mxu0 %vm271_vm0, %v33099_v26  ;;  %20795 = vmatprep.mubr.msk.f32.mxu1 %vm271_vm0, %v26365_v63  ;;  %v33103_v26 = vld [vmem:[#allocation57_spill] sm:$0xff] }
 0x1b0   :  { %21223 = vmatmul.mubr.msk.f32.gmra.mrb[42].mxu0 %vm271_vm0, %v33100_v41  ;;  %20796 = vmatmul.mubr.msk.f32.gmra.mrb[44].mxu1 %vm271_vm0, %v26373_v14  ;;  %v33104_v41 = vld [vmem:[#allocation60_spill] sm:$0xff] }
 0x1b1   :  { %21225 = vmatprep.mubr.msk.f32.mxu0 %vm271_vm0, %v33101_v22  ;;  %20798 = vmatprep.mubr.msk.f32.mxu1 %vm271_vm0, %v26377_v57  ;;  %v33105_v22 = vld [vmem:[#allocation61_spill] sm:$0xff] }
 0x1b4   :  { %21226 = vmatmul.mubr.msk.f32.gmra.mrb[44].mxu0 %vm271_vm0, %v33102_v53  ;;  %20799 = vmatmul.mubr.msk.f32.gmra.mrb[46].mxu1 %vm271_vm0, %v26385_v4  ;;  %v33106_v53 = vld [vmem:[#allocation64_spill] sm:$0xff] }
 0x1b5   :  { %21228 = vmatprep.mubr.msk.f32.mxu0 %vm271_vm0, %v33103_v26  ;;  %20801 = vmatprep.mubr.msk.f32.mxu1 %vm271_vm0, %v26389_v51  ;;  %v33107_v26 = vld [vmem:[#allocation65_spill] sm:$0xff] }
 0x1b8   :  { %21229 = vmatmul.mubr.msk.f32.gmra.mrb[46].mxu0 %vm271_vm0, %v33104_v41  ;;  %20802 = vmatmul.mubr.msk.f32.gmra.mrb[48].mxu1 %vm271_vm0, %v26397_v61  ;;  %v2654_v41 = vrot.slane %v26090_v5, 2 }
 0x1b9   :  { %21231 = vmatprep.mubr.msk.f32.mxu0 %vm271_vm0, %v33105_v22  ;;  %20804 = vmatprep.mubr.msk.f32.mxu1 %vm271_vm0, %v26401_v45  ;;  %v33109_v22 = vld [vmem:[#allocation68_spill] sm:$0xff] }
 0x1bc   :  { %21232 = vmatmul.mubr.msk.f32.gmra.mrb[48].mxu0 %vm271_vm0, %v33106_v53  ;;  %20805 = vmatmul.mubr.msk.f32.gmra.mrb[50].mxu1 %vm271_vm0, %v26409_v28  ;;  %v32556_v53 = vrot.slane %v26431_v59, 2 }
 0x1bd   :  { %21234 = vmatprep.mubr.msk.f32.mxu0 %vm271_vm0, %v33107_v26  ;;  %20807 = vmatprep.mubr.msk.f32.mxu1 %vm271_vm0, %v26413_v17  ;;  %v26704_v26 = vsel %vm1186_vm1, %v33111_v54, %v2654_v41  ;;  %v25222_v54 = vld [vmem:[%s32400_s0 + $0x20] sm:$0xff] }
 0x1be   :  { %33112 = vst [vmem:[#allocation4_spill] sm:$0xff] %v26704_v26 }
 0x1c0   :  { %21235 = vmatmul.mubr.msk.f32.gmra.mrb[50].mxu0 %vm271_vm0, %v33108_v47  ;;  %20808 = vmatmul.mubr.msk.f32.gmra.mrb[52].mxu1 %vm271_vm0, %v33113_v9  ;;  %v33115_v47 = vld [vmem:[#allocation75_spill] sm:$0xff] }
 0x1c1   :  { %21237 = vmatprep.mubr.msk.f32.mxu0 %vm271_vm0, %v33109_v22  ;;  %20810 = vmatprep.mubr.msk.f32.mxu1 %vm271_vm0, %v33115_v47  ;;  %v26717_v22 = vsel %vm1186_vm1, %v2654_v41, %v32556_v53  ;;  %v25223_v41 = vld [vmem:[%s32400_s0 + $0x28] sm:$0xff]  ;;  %v25224_v53 = vld [vmem:[%s32400_s0 + $0x30] sm:$0xff] }
 0x1c2   :  { %33116 = vst [vmem:[#allocation5_spill] sm:$0xff] %v26717_v22 }
 0x1c4   :  { %21238 = vmatmul.mubr.msk.f32.gmra.mrb[52].mxu0 %vm271_vm0, %v33114_v1  ;;  %20811 = vmatmul.mubr.msk.f32.gmra.mrb[54].mxu1 %vm271_vm0, %v33117_v29 }
 0x1c5   :  { %21240 = vmatprep.mubr.msk.f32.mxu0 %vm271_vm0, %v26704_v26  ;;  %20821 = vmatprep.mubr.msk.f32.mxu1 %vm271_vm0, %v25222_v54  ;;  %v26731_v26 = vld [vmem:[%s32399_s2 + $0x40] sm:$0xff] }
 0x1c8   :  { %21241 = vmatmul.mubr.msk.f32.gmra.mrb[54].mxu0 %vm271_vm0, %v26717_v22  ;;  %20822 = vmatmul.mubr.msk.f32.vlgmr.msra.gmra.mrb[4].mxu1 %vm271_vm0, %v25223_v41  ;;  %v33119_v22 = vld [vmem:[#allocation50_spill] sm:$0xff] }
 0x1c9   :  { %21245 = vmatprep.mubr.msk.f32.mxu0 %vm271_vm0, %v25222_v54  ;;  %20824 = vmatprep.mubr.msk.f32.mxu1 %vm271_vm0, %v25224_v53  ;;  %v25225_v54 = vld [vmem:[%s32400_s0 + $0x38] sm:$0xff] }
 0x1cc   :  { %21246 = vmatmul.mubr.msk.f32.vlgmr.msra.gmra.mrb[0].mxu0 %vm271_vm0, %v25223_v41  ;;  %20825 = vmatmul.mubr.msk.f32.gmra.mrb[6].mxu1 %vm271_vm0, %v25225_v54  ;;  %v25226_v41 = vld [vmem:[%s32400_s0 + $0x40] sm:$0xff] }
 0x1cd   :  { %21330 = vmatpush3.msra.mxu0 %v26470_v20  ;;  %21248 = vmatprep.mubr.msk.f32.mxu0 %vm271_vm0, %v25224_v53  ;;  %v25227_v20 = vld [vmem:[%s32400_s0 + $0x48] sm:$0xff]  ;;  %v25228_v53 = vld [vmem:[%s32400_s0 + $0x50] sm:$0xff] }
 0x1ce   :  { %21415 = vmatprep.subr.mxu0 %v26731_v26  ;;  %20827 = vmatprep.mubr.msk.f32.mxu1 %vm271_vm0, %v25226_v41 }
 0x1d0   :  { %21249 = vmatmul.mubr.msk.f32.gmra.mrb[2].mxu0 %vm271_vm0, %v25225_v54  ;;  %20828 = vmatmul.mubr.msk.f32.gmra.mrb[8].mxu1 %vm271_vm0, %v25227_v20  ;;  %v25229_v54 = vld [vmem:[%s32400_s0 + $0x58] sm:$0xff] }
 0x1d1   :  { %21251 = vmatprep.mubr.msk.f32.mxu0 %vm271_vm0, %v25226_v41  ;;  %20830 = vmatprep.mubr.msk.f32.mxu1 %vm271_vm0, %v25228_v53  ;;  %v25230_v41 = vld [vmem:[%s32400_s0 + $0x60] sm:$0xff] }
 0x1d4   :  { %21252 = vmatmul.mubr.msk.f32.gmra.mrb[4].mxu0 %vm271_vm0, %v25227_v20  ;;  %20831 = vmatmul.mubr.msk.f32.gmra.mrb[10].mxu1 %vm271_vm0, %v25229_v54  ;;  %v25231_v20 = vld [vmem:[%s32400_s0 + $0x68] sm:$0xff] }
 0x1d5   :  { %21254 = vmatprep.mubr.msk.f32.mxu0 %vm271_vm0, %v25228_v53  ;;  %20833 = vmatprep.mubr.msk.f32.mxu1 %vm271_vm0, %v25230_v41  ;;  %v25232_v53 = vld [vmem:[%s32400_s0 + $0x70] sm:$0xff] }
 0x1d8   :  { %21255 = vmatmul.mubr.msk.f32.gmra.mrb[6].mxu0 %vm271_vm0, %v25229_v54  ;;  %20834 = vmatmul.mubr.msk.f32.gmra.mrb[12].mxu1 %vm271_vm0, %v25231_v20  ;;  %v25233_v54 = vld [vmem:[%s32400_s0 + $0x78] sm:$0xff] }
 0x1d9   :  { %21257 = vmatprep.mubr.msk.f32.mxu0 %vm271_vm0, %v25230_v41  ;;  %20836 = vmatprep.mubr.msk.f32.mxu1 %vm271_vm0, %v25232_v53  ;;  %v25234_v41 = vld [vmem:[%s32400_s0 + $0x80] sm:$0xff] }
 0x1dc   :  { %21258 = vmatmul.mubr.msk.f32.gmra.mrb[8].mxu0 %vm271_vm0, %v25231_v20  ;;  %20837 = vmatmul.mubr.msk.f32.gmra.mrb[14].mxu1 %vm271_vm0, %v25233_v54  ;;  %v25235_v20 = vld [vmem:[%s32400_s0 + $0x88] sm:$0xff] }
 0x1dd   :  { %21260 = vmatprep.mubr.msk.f32.mxu0 %vm271_vm0, %v25232_v53  ;;  %20839 = vmatprep.mubr.msk.f32.mxu1 %vm271_vm0, %v25234_v41  ;;  %v25236_v53 = vld [vmem:[%s32400_s0 + $0x90] sm:$0xff] }
 0x1e0   :  { %21261 = vmatmul.mubr.msk.f32.gmra.mrb[10].mxu0 %vm271_vm0, %v25233_v54  ;;  %20840 = vmatmul.mubr.msk.f32.gmra.mrb[16].mxu1 %vm271_vm0, %v25235_v20  ;;  %v25237_v54 = vld [vmem:[%s32400_s0 + $0x98] sm:$0xff] }
 0x1e1   :  { %21263 = vmatprep.mubr.msk.f32.mxu0 %vm271_vm0, %v25234_v41  ;;  %20842 = vmatprep.mubr.msk.f32.mxu1 %vm271_vm0, %v25236_v53  ;;  %v25238_v41 = vld [vmem:[%s32400_s0 + $0xa0] sm:$0xff] }
 0x1e4   :  { %21264 = vmatmul.mubr.msk.f32.gmra.mrb[12].mxu0 %vm271_vm0, %v25235_v20  ;;  %20843 = vmatmul.mubr.msk.f32.gmra.mrb[18].mxu1 %vm271_vm0, %v25237_v54  ;;  %v25239_v20 = vld [vmem:[%s32400_s0 + $0xa8] sm:$0xff] }
 0x1e5   :  { %21266 = vmatprep.mubr.msk.f32.mxu0 %vm271_vm0, %v25236_v53  ;;  %20845 = vmatprep.mubr.msk.f32.mxu1 %vm271_vm0, %v25238_v41  ;;  %v25240_v53 = vld [vmem:[%s32400_s0 + $0xb0] sm:$0xff] }
 0x1e8   :  { %21267 = vmatmul.mubr.msk.f32.gmra.mrb[14].mxu0 %vm271_vm0, %v25237_v54  ;;  %20846 = vmatmul.mubr.msk.f32.gmra.mrb[20].mxu1 %vm271_vm0, %v25239_v20  ;;  %v25241_v54 = vld [vmem:[%s32400_s0 + $0xb8] sm:$0xff] }
 0x1e9   :  { %21269 = vmatprep.mubr.msk.f32.mxu0 %vm271_vm0, %v25238_v41  ;;  %20848 = vmatprep.mubr.msk.f32.mxu1 %vm271_vm0, %v25240_v53  ;;  %v25242_v41 = vld [vmem:[%s32400_s0 + $0xc0] sm:$0xff] }
 0x1ec   :  { %21270 = vmatmul.mubr.msk.f32.gmra.mrb[16].mxu0 %vm271_vm0, %v25239_v20  ;;  %20849 = vmatmul.mubr.msk.f32.gmra.mrb[22].mxu1 %vm271_vm0, %v25241_v54  ;;  %v25243_v20 = vld [vmem:[%s32400_s0 + $0xc8] sm:$0xff] }
 0x1ed   :  { %21272 = vmatprep.mubr.msk.f32.mxu0 %vm271_vm0, %v25240_v53  ;;  %20851 = vmatprep.mubr.msk.f32.mxu1 %vm271_vm0, %v25242_v41  ;;  %v25244_v53 = vld [vmem:[%s32400_s0 + $0xd0] sm:$0xff] }
 0x1f0   :  { %21273 = vmatmul.mubr.msk.f32.gmra.mrb[18].mxu0 %vm271_vm0, %v25241_v54  ;;  %20852 = vmatmul.mubr.msk.f32.gmra.mrb[24].mxu1 %vm271_vm0, %v25243_v20  ;;  %v25245_v54 = vld [vmem:[%s32400_s0 + $0xd8] sm:$0xff] }
 0x1f1   :  { %21275 = vmatprep.mubr.msk.f32.mxu0 %vm271_vm0, %v25242_v41  ;;  %20854 = vmatprep.mubr.msk.f32.mxu1 %vm271_vm0, %v25244_v53  ;;  %v25246_v41 = vld [vmem:[%s32400_s0 + $0x108] sm:$0xff] }
 0x1f4   :  { %21276 = vmatmul.mubr.msk.f32.gmra.mrb[20].mxu0 %vm271_vm0, %v25243_v20  ;;  %20855 = vmatmul.mubr.msk.f32.gmra.mrb[26].mxu1 %vm271_vm0, %v25245_v54  ;;  %v25247_v20 = vld [vmem:[%s32400_s0 + $0xe0] sm:$0xff] }
 0x1f5   :  { %21278 = vmatprep.mubr.msk.f32.mxu0 %vm271_vm0, %v25244_v53  ;;  %20857 = vmatprep.mubr.msk.f32.mxu1 %vm271_vm0, %v25246_v41  ;;  %v25248_v53 = vld [vmem:[%s32400_s0 + $0x110] sm:$0xff]  ;;  %v26873_v41 = vld [vmem:[%s32400_s0 + $0xf8] sm:$0xff] }
 0x1f8   :  { %21279 = vmatmul.mubr.msk.f32.gmra.mrb[22].mxu0 %vm271_vm0, %v25245_v54  ;;  %20858 = vmatmul.mubr.msk.f32.gmra.mrb[28].mxu1 %vm271_vm0, %v25248_v53  ;;  %v25249_v54 = vld [vmem:[%s32400_s0 + $0x118] sm:$0xff]  ;;  %v25252_v53 = vld [vmem:[%s32400_s0 + $0x130] sm:$0xff] }
 0x1f9   :  { %21281 = vmatprep.mubr.msk.f32.mxu0 %vm271_vm0, %v25247_v20  ;;  %20860 = vmatprep.mubr.msk.f32.mxu1 %vm271_vm0, %v25249_v54  ;;  %v25250_v20 = vld [vmem:[%s32400_s0 + $0x120] sm:$0xff]  ;;  %v25253_v54 = vld [vmem:[%s32400_s0 + $0x138] sm:$0xff] }
 0x1fc   :  { %21282 = vmatmul.mubr.msk.f32.gmra.mrb[24].mxu0 %vm271_vm0, %v26027_v2  ;;  %20861 = vmatmul.mubr.msk.f32.gmra.mrb[30].mxu1 %vm271_vm0, %v25250_v20  ;;  %v25251_v2 = vld [vmem:[%s32400_s0 + $0x128] sm:$0xff]  ;;  %v25254_v20 = vld [vmem:[%s32400_s0 + $0x140] sm:$0xff] }
 0x1fd   :  { %21284 = vmatprep.mubr.msk.f32.mxu0 %vm271_vm0, %v26253_v40  ;;  %20863 = vmatprep.mubr.msk.f32.mxu1 %vm271_vm0, %v25251_v2 }
 0x200   :  { %21285 = vmatmul.mubr.msk.f32.gmra.mrb[26].mxu0 %vm271_vm0, %v26873_v41  ;;  %20864 = vmatmul.mubr.msk.f32.gmra.mrb[32].mxu1 %vm271_vm0, %v25252_v53 }
 0x201   :  { %21287 = vmatprep.mubr.msk.f32.mxu0 %vm271_vm0, %v25251_v2  ;;  %20866 = vmatprep.mubr.msk.f32.mxu1 %vm271_vm0, %v25253_v54  ;;  %v25255_v2 = vld [vmem:[%s32400_s0 + $0x148] sm:$0xff] }
 0x204   :  { %21288 = vmatmul.mubr.msk.f32.gmra.mrb[28].mxu0 %vm271_vm0, %v25252_v53  ;;  %20867 = vmatmul.mubr.msk.f32.gmra.mrb[34].mxu1 %vm271_vm0, %v25254_v20  ;;  %v25256_v53 = vld [vmem:[%s32400_s0 + $0x150] sm:$0xff] }
 0x205   :  { %21290 = vmatprep.mubr.msk.f32.mxu0 %vm271_vm0, %v25253_v54  ;;  %20869 = vmatprep.mubr.msk.f32.mxu1 %vm271_vm0, %v25255_v2  ;;  %v25257_v54 = vld [vmem:[%s32400_s0 + $0x158] sm:$0xff] }
 0x208   :  { %21291 = vmatmul.mubr.msk.f32.gmra.mrb[30].mxu0 %vm271_vm0, %v25254_v20  ;;  %20870 = vmatmul.mubr.msk.f32.gmra.mrb[36].mxu1 %vm271_vm0, %v25256_v53  ;;  %v25258_v20 = vld [vmem:[%s32400_s0 + $0x160] sm:$0xff] }
 0x209   :  { %21293 = vmatprep.mubr.msk.f32.mxu0 %vm271_vm0, %v25255_v2  ;;  %20872 = vmatprep.mubr.msk.f32.mxu1 %vm271_vm0, %v25257_v54  ;;  %v25259_v2 = vld [vmem:[%s32400_s0 + $0x168] sm:$0xff] }
 0x20c   :  { %21294 = vmatmul.mubr.msk.f32.gmra.mrb[32].mxu0 %vm271_vm0, %v25256_v53  ;;  %20873 = vmatmul.mubr.msk.f32.gmra.mrb[38].mxu1 %vm271_vm0, %v25258_v20  ;;  %v25260_v53 = vld [vmem:[%s32400_s0 + $0x170] sm:$0xff] }
 0x20d   :  { %21296 = vmatprep.mubr.msk.f32.mxu0 %vm271_vm0, %v25257_v54  ;;  %20875 = vmatprep.mubr.msk.f32.mxu1 %vm271_vm0, %v25259_v2  ;;  %v25261_v54 = vld [vmem:[%s32400_s0 + $0x178] sm:$0xff] }
 0x210   :  { %21297 = vmatmul.mubr.msk.f32.gmra.mrb[34].mxu0 %vm271_vm0, %v25258_v20  ;;  %20876 = vmatmul.mubr.msk.f32.gmra.mrb[40].mxu1 %vm271_vm0, %v25260_v53  ;;  %v25262_v20 = vld [vmem:[%s32400_s0 + $0x180] sm:$0xff] }
 0x211   :  { %21299 = vmatprep.mubr.msk.f32.mxu0 %vm271_vm0, %v25259_v2  ;;  %20878 = vmatprep.mubr.msk.f32.mxu1 %vm271_vm0, %v25261_v54  ;;  %v25263_v2 = vld [vmem:[%s32400_s0 + $0x188] sm:$0xff] }
 0x214   :  { %21300 = vmatmul.mubr.msk.f32.gmra.mrb[36].mxu0 %vm271_vm0, %v25260_v53  ;;  %20879 = vmatmul.mubr.msk.f32.gmra.mrb[42].mxu1 %vm271_vm0, %v25262_v20  ;;  %v25264_v53 = vld [vmem:[%s32400_s0 + $0x190] sm:$0xff] }
 0x215   :  { %21302 = vmatprep.mubr.msk.f32.mxu0 %vm271_vm0, %v25261_v54  ;;  %20881 = vmatprep.mubr.msk.f32.mxu1 %vm271_vm0, %v25263_v2  ;;  %v33118_v54 = vld [vmem:[#allocation47_spill] sm:$0xff] }
 0x218   :  { %21303 = vmatmul.mubr.msk.f32.gmra.mrb[38].mxu0 %vm271_vm0, %v25262_v20  ;;  %20882 = vmatmul.mubr.msk.f32.gmra.mrb[44].mxu1 %vm271_vm0, %v25264_v53  ;;  %v25265_v20 = vld [vmem:[%s32400_s0 + $0x198] sm:$0xff] }
 0x219   :  { %21305 = vmatprep.mubr.msk.f32.mxu0 %vm271_vm0, %v25263_v2  ;;  %20884 = vmatprep.mubr.msk.f32.mxu1 %vm271_vm0, %v33118_v54  ;;  %v25266_v2 = vld [vmem:[%s32400_s0 + $0x1a0] sm:$0xff] }
 0x21a   :  { %v33121_v54 = vld [vmem:[#allocation54_spill] sm:$0xff] }
 0x21c   :  { %21306 = vmatmul.mubr.msk.f32.gmra.mrb[40].mxu0 %vm271_vm0, %v25264_v53  ;;  %20885 = vmatmul.mubr.msk.f32.gmra.mrb[46].mxu1 %vm271_vm0, %v25266_v2  ;;  %v33120_v53 = vld [vmem:[#allocation51_spill] sm:$0xff] }
 0x21d   :  { %21308 = vmatprep.mubr.msk.f32.mxu0 %vm271_vm0, %v25265_v20  ;;  %20887 = vmatprep.mubr.msk.f32.mxu1 %vm271_vm0, %v33119_v22  ;;  %v33122_v20 = vld [vmem:[#allocation55_spill] sm:$0xff] }
 0x220   :  { %21309 = vmatmul.mubr.msk.f32.gmra.mrb[42].mxu0 %vm271_vm0, %v25266_v2  ;;  %20888 = vmatmul.mubr.msk.f32.gmra.mrb[48].mxu1 %vm271_vm0, %v33120_v53  ;;  %v33123_v2 = vld [vmem:[#allocation58_spill] sm:$0xff] }
 0x221   :  { %21311 = vmatprep.mubr.msk.f32.mxu0 %vm271_vm0, %v33119_v22  ;;  %20890 = vmatprep.mubr.msk.f32.mxu1 %vm271_vm0, %v33121_v54  ;;  %v33124_v22 = vld [vmem:[#allocation59_spill] sm:$0xff] }
 0x224   :  { %21312 = vmatmul.mubr.msk.f32.gmra.mrb[44].mxu0 %vm271_vm0, %v33120_v53  ;;  %20891 = vmatmul.mubr.msk.f32.gmra.mrb[50].mxu1 %vm271_vm0, %v33122_v20  ;;  %v33125_v53 = vld [vmem:[#allocation62_spill] sm:$0xff] }
 0x225   :  { %21314 = vmatprep.mubr.msk.f32.mxu0 %vm271_vm0, %v33121_v54  ;;  %20893 = vmatprep.mubr.msk.f32.mxu1 %vm271_vm0, %v33123_v2  ;;  %v33126_v54 = vld [vmem:[#allocation63_spill] sm:$0xff] }
 0x228   :  { %21315 = vmatmul.mubr.msk.f32.gmra.mrb[46].mxu0 %vm271_vm0, %v33122_v20  ;;  %20894 = vmatmul.mubr.msk.f32.gmra.mrb[52].mxu1 %vm271_vm0, %v33124_v22  ;;  %v27003_v20 = vld [vmem:[%s32400_s0 + $0x200] sm:$0xff] }
 0x229   :  { %21317 = vmatprep.mubr.msk.f32.mxu0 %vm271_vm0, %v33123_v2  ;;  %20896 = vmatprep.mubr.msk.f32.mxu1 %vm271_vm0, %v33125_v53  ;;  %v33144_v2 = vld [vmem:[#allocation19_spill] sm:$0xff] }
 0x22c   :  { %21318 = vmatmul.mubr.msk.f32.gmra.mrb[48].mxu0 %vm271_vm0, %v33124_v22  ;;  %20897 = vmatmul.mubr.msk.f32.gmra.mrb[54].mxu1 %vm271_vm0, %v33126_v54 }
 0x22d   :  { %21320 = vmatprep.mubr.msk.f32.mxu0 %vm271_vm0, %v33125_v53 }
 0x230   :  { %21321 = vmatmul.mubr.msk.f32.gmra.mrb[50].mxu0 %vm271_vm0, %v33126_v54  ;;  %v33145_v54 = vld [vmem:[#allocation20_spill] sm:$0xff] }
 0x231   :  { %21323 = vmatprep.mubr.msk.f32.mxu0 %vm271_vm0, %v33110_v6 }
 0x234   :  { %21324 = vmatmul.mubr.msk.f32.gmra.mrb[52].mxu0 %vm271_vm0, %v26090_v5  ;;  %v3484_v5 = vrot.slane %v26873_v41, 1 }
 0x235   :  { %21326 = vmatprep.mubr.msk.f32.mxu0 %vm271_vm0, %v26431_v59 }
 0x238   :  { %21327 = vmatmul.mubr.msk.f32.gmra.mrb[54].mxu0 %vm271_vm0, %v27003_v20 }
 0x239   :  { %21331 = vmatprep.mubr.msk.f32.mxu0 %vm271_vm0, %v26108_v12  ;;  %v27058_v12 = vld [vmem:[%s32400_s0 + $0x100] sm:$0xff] }
 0x23c   :  { %21332 = vmatmul.mubr.msk.f32.vlgmr.msra.gmra.mrb[0].mxu0 %vm271_vm0, %v26122_v18  ;;  %v33127_v18 = vld [vmem:[#allocation72_spill] sm:$0xff] }
 0x23d   :  { %21416 = vmatpush3.msra.mxu0 %v26731_v26  ;;  %21334 = vmatprep.mubr.msk.f32.mxu0 %vm271_vm0, %v26126_v19  ;;  %v3486_v19 = vrot.slane %v27058_v12, 1  ;;  %v33143_v26 = vld [vmem:[#allocation18_spill] sm:$0xff] }
 0x240   :  { %21335 = vmatmul.mubr.msk.f32.gmra.mrb[2].mxu0 %vm271_vm0, %v26135_v0  ;;  %v33128_v0 = vrot.slane %v26253_v40, 1 }
 0x241   :  { %21337 = vmatprep.mubr.msk.f32.mxu0 %vm271_vm0, %v26139_v24 }
 0x242   :  { %v3485_v24 = vsel %vm154_vm2, %v33128_v0, %v3484_v5  ;;  %v33147_v0 = vld [vmem:[#allocation22_spill] sm:$0xff] }
 0x244   :  { %21338 = vmatmul.mubr.msk.f32.gmra.mrb[4].mxu0 %vm271_vm0, %v26147_v25  ;;  %v33129_v25 = vld [vmem:[#allocation73_spill] sm:$0xff] }
 0x245   :  { %21340 = vmatprep.mubr.msk.f32.mxu0 %vm271_vm0, %v26151_v35  ;;  %v3487_v35 = vsel %vm154_vm2, %v3484_v5, %v3486_v19  ;;  %v33146_v5 = vld [vmem:[#allocation21_spill] sm:$0xff] }
 0x248   :  { %21341 = vmatmul.mubr.msk.f32.gmra.mrb[6].mxu0 %vm271_vm0, %v26159_v31  ;;  %v27109_v31 = vpop.f32.mrb[0].mxu1 }
 0x249   :  { %21343 = vmatprep.mubr.msk.f32.mxu0 %vm271_vm0, %v26163_v27  ;;  %v27113_v27 = vpop.f32.mrb[1].mxu1 }
 0x24c   :  { %21344 = vmatmul.mubr.msk.f32.gmra.mrb[8].mxu0 %vm271_vm0, %v26171_v38  ;;  %v27117_v38 = vpop.f32.mrb[2].mxu1 }
 0x24d   :  { %21346 = vmatprep.mubr.msk.f32.mxu0 %vm271_vm0, %v26175_v46  ;;  %v27121_v46 = vpop.f32.mrb[3].mxu1 }
 0x250   :  { %21347 = vmatmul.mubr.msk.f32.gmra.mrb[10].mxu0 %vm271_vm0, %v26183_v44  ;;  %v17533_v44 = vld [vmem:[%s32401_s3 + $0x10] sm:$0xff] }
 0x251   :  { %21349 = vmatprep.mubr.msk.f32.mxu0 %vm271_vm0, %v26187_v30  ;;  %v17534_v30 = vld [vmem:[%s32401_s3 + $0x18] sm:$0xff] }
 0x254   :  { %21350 = vmatmul.mubr.msk.f32.gmra.mrb[12].mxu0 %vm271_vm0, %v26195_v50  ;;  %v23535_v50 = vpack.c.bf16 %v17534_v30, %v17533_v44  ;;  %v33149_v44 = vld [vmem:[#allocation24_spill] sm:$0xff]  ;;  %v33150_v30 = vld [vmem:[#allocation25_spill] sm:$0xff] }
 0x255   :  { %21352 = vmatprep.mubr.msk.f32.mxu0 %vm271_vm0, %v26199_v37  ;;  %v3488_v37 = vrot.slane %v27003_v20, 1 }
 0x256   :  { %23536 = vmatprep.subr.bf16.mxu1 %v23535_v50 }
 0x257   :  { %23538 = vmatpush3.bf16.msra.mxu1 %v23535_v50 }
 0x258   :  { %21353 = vmatmul.mubr.msk.f32.gmra.mrb[14].mxu0 %vm271_vm0, %v26207_v56  ;;  %v27137_v56 = vld [vmem:[%s32400_s0 + $0x208] sm:$0xff] }
 0x259   :  { %21355 = vmatprep.mubr.msk.f32.mxu0 %vm271_vm0, %v26211_v43 }
 0x25c   :  { %21356 = vmatmul.mubr.msk.f32.gmra.mrb[16].mxu0 %vm271_vm0, %v26219_v62 }
 0x25d   :  { %21358 = vmatprep.mubr.msk.f32.mxu0 %vm271_vm0, %v26223_v49  ;;  %v33130_v49 = vld [vmem:[#allocation77_spill] sm:$0xff] }
 0x260   :  { %21359 = vmatmul.mubr.msk.f32.gmra.mrb[18].mxu0 %vm271_vm0, %v26231_v8  ;;  %v3490_v8 = vrot.slane %v27137_v56, 1 }
 0x261   :  { %21361 = vmatprep.mubr.msk.f32.mxu0 %vm271_vm0, %v33075_v32 }
 0x264   :  { %21362 = vmatmul.mubr.msk.f32.gmra.mrb[20].mxu0 %vm271_vm0, %v26243_v21  ;;  %v33131_v21 = vrot.slane %v26431_v59, 1 }
 0x265   :  { %21364 = vmatprep.mubr.msk.f32.mxu0 %vm271_vm0, %v33081_v36 }
 0x268   :  { %21365 = vmatmul.mubr.msk.f32.gmra.mrb[22].mxu0 %vm271_vm0, %v26260_v34  ;;  %v3489_v34 = vsel %vm154_vm2, %v33131_v21, %v3488_v37 }
 0x269   :  { %21367 = vmatprep.mubr.msk.f32.mxu0 %vm271_vm0, %v33127_v18 }
 0x26c   :  { %21368 = vmatmul.mubr.msk.f32.gmra.mrb[24].mxu0 %vm271_vm0, %v33129_v25 }
 0x26d   :  { %21370 = vmatprep.mubr.msk.f32.mxu0 %vm271_vm0, %v3485_v24  ;;  %v33148_v24 = vld [vmem:[#allocation23_spill] sm:$0xff] }
 0x270   :  { %21371 = vmatmul.mubr.msk.f32.gmra.mrb[26].mxu0 %vm271_vm0, %v3487_v35 }
 0x271   :  { %21373 = vmatprep.mubr.msk.f32.mxu0 %vm271_vm0, %v26293_v42 }
 0x274   :  { %21374 = vmatmul.mubr.msk.f32.gmra.mrb[28].mxu0 %vm271_vm0, %v26301_v11 }
 0x275   :  { %21376 = vmatprep.mubr.msk.f32.mxu0 %vm271_vm0, %v26305_v55  ;;  %v3491_v55 = vsel %vm154_vm2, %v3488_v37, %v3490_v8  ;;  %v33152_v8 = vld [vmem:[#allocation27_spill] sm:$0xff] }
 0x278   :  { %21377 = vmatmul.mubr.msk.f32.gmra.mrb[30].mxu0 %vm271_vm0, %v26313_v33 }
 0x279   :  { %21379 = vmatprep.mubr.msk.f32.mxu0 %vm271_vm0, %v26317_v48 }
 0x27c   :  { %21380 = vmatmul.mubr.msk.f32.gmra.mrb[32].mxu0 %vm271_vm0, %v26325_v52  ;;  %v33132_v52 = vld [vmem:[#allocation7_spill] sm:$0xff] }
 0x27d   :  { %21382 = vmatprep.mubr.msk.f32.mxu0 %vm271_vm0, %v26329_v7 }
 0x280   :  { %21383 = vmatmul.mubr.msk.f32.gmra.mrb[34].mxu0 %vm271_vm0, %v26337_v60 }
 0x281   :  { %21385 = vmatprep.mubr.msk.f32.mxu0 %vm271_vm0, %v26341_v23  ;;  %v33133_v23 = vld [vmem:[#allocation8_spill] sm:$0xff] }
 0x284   :  { %21386 = vmatmul.mubr.msk.f32.gmra.mrb[36].mxu0 %vm271_vm0, %v26349_v58 }
 0x285   :  { %21388 = vmatprep.mubr.msk.f32.mxu0 %vm271_vm0, %v26353_v10 }
 0x288   :  { %21389 = vmatmul.mubr.msk.f32.gmra.mrb[38].mxu0 %vm271_vm0, %v26361_v3  ;;  %v33135_v3 = vld [vmem:[#allocation10_spill] sm:$0xff] }
 0x289   :  { %21391 = vmatprep.mubr.msk.f32.mxu0 %vm271_vm0, %v26365_v63  ;;  %v33136_v63 = vld [vmem:[#allocation11_spill] sm:$0xff] }
 0x28c   :  { %21392 = vmatmul.mubr.msk.f32.gmra.mrb[40].mxu0 %vm271_vm0, %v26373_v14 }
 0x28d   :  { %21394 = vmatprep.mubr.msk.f32.mxu0 %vm271_vm0, %v26377_v57 }
 0x290   :  { %21395 = vmatmul.mubr.msk.f32.gmra.mrb[42].mxu0 %vm271_vm0, %v26385_v4  ;;  %v33137_v4 = vld [vmem:[#allocation12_spill] sm:$0xff] }
 0x291   :  { %21397 = vmatprep.mubr.msk.f32.mxu0 %vm271_vm0, %v26389_v51  ;;  %v33138_v51 = vld [vmem:[#allocation13_spill] sm:$0xff] }
 0x294   :  { %21398 = vmatmul.mubr.msk.f32.gmra.mrb[44].mxu0 %vm271_vm0, %v26397_v61 }
 0x295   :  { %21400 = vmatprep.mubr.msk.f32.mxu0 %vm271_vm0, %v26401_v45 }
 0x298   :  { %21401 = vmatmul.mubr.msk.f32.gmra.mrb[46].mxu0 %vm271_vm0, %v26409_v28  ;;  %v33139_v28 = vld [vmem:[#allocation14_spill] sm:$0xff] }
 0x299   :  { %21403 = vmatprep.mubr.msk.f32.mxu0 %vm271_vm0, %v26413_v17  ;;  %v33140_v17 = vld [vmem:[#allocation15_spill] sm:$0xff] }
 0x29b   :  { %v27139_v43 = vpop.f32.mrb[4].mxu1 }
 0x29c   :  { %21404 = vmatmul.mubr.msk.f32.gmra.mrb[48].mxu0 %vm271_vm0, %v33113_v9  ;;  %v27141_v62 = vpop.f32.mrb[5].mxu1  ;;  %v33142_v9 = vld [vmem:[#allocation17_spill] sm:$0xff] }
 0x29d   :  { %21406 = vmatprep.mubr.msk.f32.mxu0 %vm271_vm0, %v33115_v47 }
 0x29f   :  { %v27151_v42 = vpop.f32.mrb[6].mxu1 }
 0x2a0   :  { %21407 = vmatmul.mubr.msk.f32.gmra.mrb[50].mxu0 %vm271_vm0, %v33117_v29  ;;  %v27153_v11 = vpop.f32.mrb[7].mxu1  ;;  %v33141_v29 = vld [vmem:[#allocation16_spill] sm:$0xff] }
 0x2a1   :  { %21409 = vmatprep.mubr.msk.f32.mxu0 %vm271_vm0, %v33130_v49  ;;  %v33151_v49 = vld [vmem:[#allocation26_spill] sm:$0xff] }
 0x2a3   :  { %v27159_v33 = vpop.f32.mrb[8].mxu1 }
 0x2a4   :  { %21410 = vmatmul.mubr.msk.f32.gmra.mrb[52].mxu0 %vm271_vm0, %v26452_v16  ;;  %v27161_v48 = vpop.f32.mrb[9].mxu1  ;;  %v33134_v16 = vld [vmem:[#allocation9_spill] sm:$0xff] }
 0x2a5   :  { %21412 = vmatprep.mubr.msk.f32.mxu0 %vm271_vm0, %v3489_v34 }
 0x2a7   :  { %v27166_v7 = vpop.f32.mrb[10].mxu1 }
 0x2a8   :  { %21413 = vmatmul.mubr.msk.f32.gmra.mrb[54].mxu0 %vm271_vm0, %v3491_v55  ;;  %v27168_v60 = vpop.f32.mrb[11].mxu1  ;;  %v33153_v55 = vld [vmem:[#allocation31_spill] sm:$0xff] }
 0x2a9   :  { %21417 = vmatprep.mubr.msk.f32.mxu0 %vm271_vm0, %v33132_v52  ;;  %v33154_v52 = vld [vmem:[#allocation32_spill] sm:$0xff] }
 0x2ab   :  { %v27174_v58 = vpop.f32.mrb[12].mxu1 }
 0x2ac   :  { %21418 = vmatmul.mubr.msk.f32.vlgmr.msra.gmra.mrb[0].mxu0 %vm271_vm0, %v33133_v23  ;;  %v27176_v10 = vpop.f32.mrb[13].mxu1  ;;  %v3903_v23 = vrot.slane %v26873_v41, 2 }
 0x2ad   :  { %21420 = vmatprep.mubr.msk.f32.mxu0 %vm271_vm0, %v33134_v16 }
 0x2af   :  { %v27182_v14 = vpop.f32.mrb[14].mxu1 }
 0x2b0   :  { %21421 = vmatmul.mubr.msk.f32.gmra.mrb[2].mxu0 %vm271_vm0, %v33135_v3  ;;  %v27184_v57 = vpop.f32.mrb[15].mxu1 }
 0x2b1   :  { %21423 = vmatprep.mubr.msk.f32.mxu0 %vm271_vm0, %v33136_v63  ;;  %v33155_v63 = vld [vmem:[#allocation33_spill] sm:$0xff] }
 0x2b3   :  { %v27190_v61 = vpop.f32.mrb[16].mxu1 }
 0x2b4   :  { %21424 = vmatmul.mubr.msk.f32.gmra.mrb[4].mxu0 %vm271_vm0, %v33137_v4  ;;  %v27192_v45 = vpop.f32.mrb[17].mxu1  ;;  %v33156_v4 = vld [vmem:[#allocation3_spill] sm:$0xff] }
 0x2b5   :  { %21426 = vmatprep.mubr.msk.f32.mxu0 %vm271_vm0, %v33138_v51  ;;  %v3905_v51 = vrot.slane %v27058_v12, 2 }
 0x2b7   :  { %v27198_v36 = vpop.f32.mrb[18].mxu1  ;;  %v3906_v41 = vsel %vm1186_vm1, %v3903_v23, %v3905_v51  ;;  %v33166_v51 = vld [vmem:[#allocation46_spill] sm:$0xff] }
 0x2b8   :  { %21427 = vmatmul.mubr.msk.f32.gmra.mrb[6].mxu0 %vm271_vm0, %v33139_v28  ;;  %v27200_v32 = vpop.f32.mrb[19].mxu1  ;;  %v33157_v28 = vrot.slane %v26253_v40, 2 }
 0x2b9   :  { %21429 = vmatprep.mubr.msk.f32.mxu0 %vm271_vm0, %v33140_v17 }
 0x2ba   :  { %v3904_v17 = vsel %vm1186_vm1, %v33157_v28, %v3903_v23 }
 0x2bb   :  { %v27206_v6 = vpop.f32.mrb[20].mxu1 }
 0x2bc   :  { %21430 = vmatmul.mubr.msk.f32.gmra.mrb[8].mxu0 %vm271_vm0, %v33141_v29  ;;  %v27208_v47 = vpop.f32.mrb[21].mxu1 }
 0x2bd   :  { %21432 = vmatprep.mubr.msk.f32.mxu0 %vm271_vm0, %v33142_v9 }
 0x2bf   :  { %v27214_v22 = vpop.f32.mrb[22].mxu1 }
 0x2c0   :  { %21433 = vmatmul.mubr.msk.f32.gmra.mrb[10].mxu0 %vm271_vm0, %v33143_v26  ;;  %v27216_v53 = vpop.f32.mrb[23].mxu1 }
 0x2c1   :  { %21435 = vmatprep.mubr.msk.f32.mxu0 %vm271_vm0, %v33144_v2 }
 0x2c3   :  { %v27222_v18 = vpop.f32.mrb[24].mxu1 }
 0x2c4   :  { %21436 = vmatmul.mubr.msk.f32.gmra.mrb[12].mxu0 %vm271_vm0, %v33145_v54  ;;  %v27224_v19 = vpop.f32.mrb[25].mxu1 }
 0x2c5   :  { %21438 = vmatprep.mubr.msk.f32.mxu0 %vm271_vm0, %v33146_v5 }
 0x2c7   :  { %v27230_v25 = vpop.f32.mrb[26].mxu1 }
 0x2c8   :  { %21439 = vmatmul.mubr.msk.f32.gmra.mrb[14].mxu0 %vm271_vm0, %v33147_v0  ;;  %v27232_v35 = vpop.f32.mrb[27].mxu1  ;;  %v33159_v0 = vld [vmem:[#allocation39_spill] sm:$0xff] }
 0x2c9   :  { %21441 = vmatprep.mubr.msk.f32.mxu0 %vm271_vm0, %v33148_v24  ;;  %v33160_v24 = vld [vmem:[#allocation40_spill] sm:$0xff] }
 0x2cb   :  { %v27238_v50 = vpop.f32.mrb[28].mxu1 }
 0x2cc   :  { %21442 = vmatmul.mubr.msk.f32.gmra.mrb[16].mxu0 %vm271_vm0, %v33149_v44  ;;  %v27240_v37 = vpop.f32.mrb[29].mxu1 }
 0x2cd   :  { %21444 = vmatprep.mubr.msk.f32.mxu0 %vm271_vm0, %v33150_v30  ;;  %v33161_v30 = vld [vmem:[#allocation41_spill] sm:$0xff] }
 0x2cf   :  { %v27246_v21 = vpop.f32.mrb[30].mxu1 }
 0x2d0   :  { %21445 = vmatmul.mubr.msk.f32.gmra.mrb[18].mxu0 %vm271_vm0, %v33151_v49  ;;  %v27248_v34 = vpop.f32.mrb[31].mxu1 }
 0x2d1   :  { %21447 = vmatprep.mubr.msk.f32.mxu0 %vm271_vm0, %v33152_v8 }
 0x2d3   :  { %v27255_v16 = vpop.f32.mrb[32].mxu1 }
 0x2d4   :  { %21448 = vmatmul.mubr.msk.f32.gmra.mrb[20].mxu0 %vm271_vm0, %v33153_v55  ;;  %v27257_v3 = vpop.f32.mrb[33].mxu1  ;;  %v33163_v55 = vld [vmem:[#allocation43_spill] sm:$0xff] }
 0x2d5   :  { %21450 = vmatprep.mubr.msk.f32.mxu0 %vm271_vm0, %v33154_v52  ;;  %v33164_v52 = vld [vmem:[#allocation44_spill] sm:$0xff] }
 0x2d7   :  { %v27267_v29 = vpop.f32.mrb[34].mxu1 }
 0x2d8   :  { %21451 = vmatmul.mubr.msk.f32.gmra.mrb[22].mxu0 %vm271_vm0, %v33155_v63  ;;  %v27269_v9 = vpop.f32.mrb[35].mxu1 }
 0x2d9   :  { %21453 = vmatprep.mubr.msk.f32.mxu0 %vm271_vm0, %v33156_v4  ;;  %v33165_v4 = vld [vmem:[#allocation45_spill] sm:$0xff] }
 0x2db   :  { %v27275_v26 = vpop.f32.mrb[36].mxu1 }
 0x2dc   :  { %21454 = vmatmul.mubr.msk.f32.gmra.mrb[24].mxu0 %vm271_vm0, %v26589_v13  ;;  %v27277_v2 = vpop.f32.mrb[37].mxu1  ;;  %v33158_v13 = vld [vmem:[#allocation38_spill] sm:$0xff] }
 0x2dd   :  { %21456 = vmatprep.mubr.msk.f32.mxu0 %vm271_vm0, %v3904_v17 }
 0x2df   :  { %v27282_v40 = vpop.f32.mrb[38].mxu1 }
 0x2e0   :  { %21457 = vmatmul.mubr.msk.f32.gmra.mrb[26].mxu0 %vm271_vm0, %v3906_v41  ;;  %v27284_v12 = vpop.f32.mrb[39].mxu1  ;;  %v33169_v41 = vld [vmem:[#allocation48_spill] sm:$0xff] }
 0x2e1   :  { %21459 = vmatprep.mubr.msk.f32.mxu0 %vm271_vm0, %v33087_v39 }
 0x2e3   :  { %v27290_v54 = vpop.f32.mrb[40].mxu1 }
 0x2e4   :  { %21460 = vmatmul.mubr.msk.f32.gmra.mrb[28].mxu0 %vm271_vm0, %v33088_v15  ;;  %v27292_v5 = vpop.f32.mrb[41].mxu1  ;;  %v33162_v15 = vld [vmem:[#allocation42_spill] sm:$0xff] }
 0x2e5   :  { %21462 = vmatprep.mubr.msk.f32.mxu0 %vm271_vm0, %v33158_v13  ;;  %v33170_v13 = vld [vmem:[#allocation49_spill] sm:$0xff] }
 0x2e7   :  { %v27298_v39 = vpop.f32.mrb[42].mxu1 }
 0x2e8   :  { %21463 = vmatmul.mubr.msk.f32.gmra.mrb[30].mxu0 %vm271_vm0, %v33159_v0  ;;  %v27300_v44 = vpop.f32.mrb[43].mxu1 }
 0x2e9   :  { %21465 = vmatprep.mubr.msk.f32.mxu0 %vm271_vm0, %v33160_v24 }
 0x2eb   :  { %v27306_v49 = vpop.f32.mrb[44].mxu1 }
 0x2ec   :  { %21466 = vmatmul.mubr.msk.f32.gmra.mrb[32].mxu0 %vm271_vm0, %v33161_v30  ;;  %v27308_v8 = vpop.f32.mrb[45].mxu1  ;;  %v33173_v30 = vld [vmem:[#allocation52_spill] sm:$0xff] }
 0x2ed   :  { %21468 = vmatprep.mubr.msk.f32.mxu0 %vm271_vm0, %v33162_v15  ;;  %v33174_v15 = vld [vmem:[#allocation53_spill] sm:$0xff] }
 0x2ef   :  { %v27314_v23 = vpop.f32.mrb[46].mxu1 }
 0x2f0   :  { %21469 = vmatmul.mubr.msk.f32.gmra.mrb[34].mxu0 %vm271_vm0, %v33163_v55  ;;  %v27316_v63 = vpop.f32.mrb[47].mxu1 }
 0x2f1   :  { %21471 = vmatprep.mubr.msk.f32.mxu0 %vm271_vm0, %v33164_v52 }
 0x2f3   :  { %v27322_v28 = vpop.f32.mrb[48].mxu1 }
 0x2f4   :  { %21472 = vmatmul.mubr.msk.f32.gmra.mrb[36].mxu0 %vm271_vm0, %v33165_v4  ;;  %33167 = vst [vmem:[#allocation2_spill] sm:$0xff] %v27322_v28  ;;  %v27324_v17 = vpop.f32.mrb[49].mxu1  ;;  %v33177_v4 = vld [vmem:[#allocation56_spill] sm:$0xff] }
 0x2f5   :  { %21474 = vmatprep.mubr.msk.f32.mxu0 %vm271_vm0, %v33166_v51  ;;  %33168 = vst [vmem:[#allocation6_spill] sm:$0xff] %v27324_v17  ;;  %v33178_v51 = vld [vmem:[#allocation57_spill] sm:$0xff] }
 0x2f7   :  { %v27330_v0 = vpop.f32.mrb[50].mxu1 }
 0x2f8   :  { %21475 = vmatmul.mubr.msk.f32.gmra.mrb[38].mxu0 %vm271_vm0, %v33169_v41  ;;  %33171 = vst [vmem:[#allocation70_spill] sm:$0xff] %v27330_v0  ;;  %v27332_v24 = vpop.f32.mrb[51].mxu1 }
 0x2f9   :  { %21477 = vmatprep.mubr.msk.f32.mxu0 %vm271_vm0, %v33170_v13  ;;  %33172 = vst [vmem:[#allocation28_spill] sm:$0xff] %v27332_v24  ;;  %v33181_v24 = vld [vmem:[#allocation60_spill] sm:$0xff] }
 0x2fb   :  { %v27338_v55 = vpop.f32.mrb[52].mxu1 }
 0x2fc   :  { %21478 = vmatmul.mubr.msk.f32.gmra.mrb[40].mxu0 %vm271_vm0, %v33173_v30  ;;  %33175 = vst [vmem:[#allocation71_spill] sm:$0xff] %v27338_v55  ;;  %v27340_v52 = vpop.f32.mrb[53].mxu1  ;;  %v33182_v30 = vld [vmem:[#allocation61_spill] sm:$0xff] }
 0x2fd   :  { %21480 = vmatprep.mubr.msk.f32.mxu0 %vm271_vm0, %v33174_v15  ;;  %33176 = vst [vmem:[#allocation29_spill] sm:$0xff] %v27340_v52  ;;  %v33183_v15 = vld [vmem:[#allocation64_spill] sm:$0xff]  ;;  %v33184_v52 = vld [vmem:[#allocation65_spill] sm:$0xff] }
 0x2ff   :  { %v27346_v41 = vpop.f32.mrb[54].mxu1 }
 0x300   :  { %21481 = vmatmul.mubr.msk.f32.gmra.mrb[42].mxu0 %vm271_vm0, %v33177_v4  ;;  %33179 = vst [vmem:[#allocation30_spill] sm:$0xff] %v27346_v41  ;;  %v27348_v13 = vpop.f32.mrb[55].mxu1  ;;  %v33185_v4 = vld [vmem:[#allocation67_spill] sm:$0xff]  ;;  %v33189_v41 = vld [vmem:[#allocation5_spill] sm:$0xff] }
 0x301   :  { %21483 = vmatprep.mubr.msk.f32.mxu0 %vm271_vm0, %v33178_v51  ;;  %33180 = vst [vmem:[#allocation34_spill] sm:$0xff] %v27348_v13  ;;  %v33186_v51 = vld [vmem:[#allocation68_spill] sm:$0xff]  ;;  %v3907_v13 = vrot.slane %v27003_v20, 2  ;;  %v4552_v20 = vld [vmem:[%s32401_s3 + $0x8] sm:$0xff] }
 0x304   :  { %21484 = vmatmul.mubr.msk.f32.gmra.mrb[44].mxu0 %vm271_vm0, %v33181_v24  ;;  %v33187_v24 = vld [vmem:[#allocation4_spill] sm:$0xff] }
 0x305   :  { %21486 = vmatprep.mubr.msk.f32.mxu0 %vm271_vm0, %v33182_v30  ;;  %v3909_v30 = vrot.slane %v27137_v56, 2 }
 0x308   :  { %21487 = vmatmul.mubr.msk.f32.gmra.mrb[46].mxu0 %vm271_vm0, %v33183_v15  ;;  %v33188_v15 = vrot.slane %v26431_v59, 2 }
 0x309   :  { %21489 = vmatprep.mubr.msk.f32.mxu0 %vm271_vm0, %v33184_v52 }
 0x30a   :  { %v3908_v52 = vsel %vm1186_vm1, %v33188_v15, %v3907_v13 }
 0x30c   :  { %21490 = vmatmul.mubr.msk.f32.gmra.mrb[48].mxu0 %vm271_vm0, %v33185_v4  ;;  %v3910_v4 = vsel %vm1186_vm1, %v3907_v13, %v3909_v30 }
 0x30d   :  { %21492 = vmatprep.mubr.msk.f32.mxu0 %vm271_vm0, %v33186_v51 }
 0x310   :  { %21493 = vmatmul.mubr.msk.f32.gmra.mrb[50].mxu0 %vm271_vm0, %v33114_v1  ;;  %v4551_v1 = vld [vmem:[%s32401_s3] sm:$0xff] }
 0x311   :  { %21495 = vmatprep.mubr.msk.f32.mxu0 %vm271_vm0, %v33187_v24  ;;  %v27382_v59 = vpack.c.bf16 %v4552_v20, %v4551_v1 }
 0x313   :  { %23540 = vmatprep.subr.bf16.mxu1 %v27382_v59 }
 0x314   :  { %21496 = vmatmul.mubr.msk.f32.gmra.mrb[52].mxu0 %vm271_vm0, %v33189_v41  ;;  %v27388_v41 = vld [vmem:[%s32402_s7] ss:$0 sm:$0xff] }
 0x315   :  { %21498 = vmatprep.mubr.msk.f32.mxu0 %vm271_vm0, %v3908_v52 }
 0x318   :  { %21499 = vmatmul.mubr.msk.f32.gmra.mrb[54].mxu0 %vm271_vm0, %v3910_v4 }
 0x37f   :  { %v21419_v56 = vpop.f32.mrb[0].mxu0 }
 0x380   :  { %v23573_v13 = vadd.f32 %v21419_v56, %v27109_v31  ;;  %v3987_v51 = vpop.f32.mrb[1].mxu0 }
 0x381   :  { %v23574_v24 = vadd.f32 %v3987_v51, %v27113_v27 }
 0x382   :  { %v4328_v30 = vadd.f32 %v23573_v13, %v27388_v41 }
 0x383   :  { %v4327_v15 = vadd.f32 %v23574_v24, %v27388_v41  ;;  %v21422_v52 = vpop.f32.mrb[2].mxu0 }
 0x384   :  { %vm4384_vm3 = vcmp.ge.f32.partialorder %v4328_v30, 0.0  ;;  %v4440_v4 = vmul.f32 0.2, %v4328_v30  ;;  %v23575_v1 = vadd.f32 %v21422_v52, %v27117_v38  ;;  %v3997_v20 = vpop.f32.mrb[3].mxu0 }
 0x385   :  { %vm4383_vm4 = vcmp.ge.f32.partialorder %v4327_v15, 0.0  ;;  %v4439_v55 = vmul.f32 0.2, %v4327_v15  ;;  %v23576_v0 = vadd.f32 %v3997_v20, %v27121_v46 }
 0x386   :  { %v27396_v17 = vsel %vm4384_vm3, %v4328_v30, %v4440_v4  ;;  %v4330_v31 = vadd.f32 %v23575_v1, %v27388_v41 }
 0x387   :  { %33190 = vst [vmem:[#allocation35_spill] sm:$0xff] %v27396_v17  ;;  %v27399_v56 = vsel %vm4383_vm4, %v4327_v15, %v4439_v55  ;;  %v4329_v27 = vadd.f32 %v23576_v0, %v27388_v41  ;;  %v21425_v13 = vpop.f32.mrb[4].mxu0  ;;  %v4604_v51 = vrot.slane %v27396_v17, 1  ;;  %v17631_v55 = vld [vmem:[%s32401_s3 + $0x20] sm:$0xff]  ;;  %v17632_v0 = vld [vmem:[%s32401_s3 + $0x28] sm:$0xff] }
 0x388   :  { %33191 = vst [vmem:[#allocation36_spill] sm:$0xff] %v27399_v56  ;;  %vm4386_vm6 = vcmp.ge.f32.partialorder %v4330_v31, 0.0  ;;  %v4442_v24 = vmul.f32 0.2, %v4330_v31  ;;  %v23577_v38 = vadd.f32 %v21425_v13, %v27139_v43  ;;  %v4007_v52 = vpop.f32.mrb[5].mxu0  ;;  %v4603_v28 = vrot.slane %v27399_v56, 1 }
 0x389   :  { %vm4385_vm7 = vcmp.ge.f32.partialorder %v4329_v27, 0.0  ;;  %v4441_v46 = vmul.f32 0.2, %v4329_v27  ;;  %v23578_v30 = vadd.f32 %v4007_v52, %v27141_v62 }
 0x38a   :  { %v27412_v15 = vsel %vm4386_vm6, %v4330_v31, %v4442_v24  ;;  %v4332_v4 = vadd.f32 %v23577_v38, %v27388_v41  ;;  %v4605_v43 = vsel %vm154_vm2, %v4603_v28, %v4604_v51  ;;  %v27422_v31 = vpack.c.bf16 %v17632_v0, %v17631_v55 }
 0x38b   :  { %33192 = vst [vmem:[#allocation37_spill] sm:$0xff] %v27412_v15  ;;  %v27416_v1 = vsel %vm4385_vm7, %v4329_v27, %v4441_v46  ;;  %v4331_v20 = vadd.f32 %v23578_v30, %v27388_v41  ;;  %v21428_v13 = vpop.f32.mrb[6].mxu0  ;;  %21505 = vmatprep.mubr.msk.f32.mxu1 %vm4704_vm5, %v4605_v43  ;;  %v4608_v62 = vrot.slane %v27412_v15, 1 }
 0x38c   :  { %v4606_v52 = vrot.slane %v27416_v1, 1  ;;  %vm4388_vm8 = vcmp.ge.f32.partialorder %v4332_v4, 0.0  ;;  %v4444_v17 = vmul.f32 0.2, %v4332_v4  ;;  %v4017_v56 = vpop.f32.mrb[7].mxu0  ;;  %v23579_v28 = vadd.f32 %v21428_v13, %v27151_v42 }
 0x38d   :  { %vm4387_vm9 = vcmp.ge.f32.partialorder %v4331_v20, 0.0  ;;  %v4443_v24 = vmul.f32 0.2, %v4331_v20  ;;  %v23580_v27 = vadd.f32 %v4017_v56, %v27153_v11 }
 0x38e   :  { %v27426_v38 = vsel %vm4388_vm8, %v4332_v4, %v4444_v17  ;;  %v4607_v46 = vsel %vm154_vm2, %v4604_v51, %v4606_v52  ;;  %v27430_v30 = vsel %vm154_vm2, %v4606_v52, %v4608_v62  ;;  %v4334_v15 = vadd.f32 %v23579_v28, %v27388_v41 }
 0x38f   :  { %33193 = vst [vmem:[#allocation66_spill] sm:$0xff] %v27430_v30  ;;  %v27432_v43 = vsel %vm4387_vm9, %v4331_v20, %v4443_v24  ;;  %v4333_v55 = vadd.f32 %v23580_v27, %v27388_v41  ;;  %v21431_v0 = vpop.f32.mrb[8].mxu0  ;;  %21506 = vmatmul.mubr.msk.f32.vlgmr.msra.gmra.mrb[56].mxu1 %vm4704_vm5, %v4607_v46  ;;  %v4612_v42 = vrot.slane %v27426_v38, 1 }
 0x390   :  { %v23581_v11 = vadd.f32 %v21431_v0, %v27159_v33  ;;  %v4027_v17 = vpop.f32.mrb[9].mxu0  ;;  %21508 = vmatprep.mubr.msk.f32.mxu1 %vm4704_vm5, %v27430_v30  ;;  %v4610_v56 = vrot.slane %v27432_v43, 1  ;;  %23542 = vmatpush3.bf16.msra.mxu1 %v27382_v59  ;;  %vm4390_vm10 = vcmp.ge.f32.partialorder %v4334_v15, 0.0  ;;  %v4446_v51 = vmul.f32 0.2, %v4334_v15 }
 0x391   :  { %vm4389_vm11 = vcmp.ge.f32.partialorder %v4333_v55, 0.0  ;;  %v4445_v4 = vmul.f32 0.2, %v4333_v55  ;;  %23544 = vmatprep.subr.bf16.mxu1 %v27422_v31  ;;  %v23582_v13 = vadd.f32 %v4027_v17, %v27161_v48 }
 0x392   :  { %v4336_v20 = vadd.f32 %v23581_v11, %v27388_v41  ;;  %v27447_v33 = vsel %vm154_vm2, %v4608_v62, %v4610_v56  ;;  %v27450_v52 = vsel %vm154_vm2, %v4610_v56, %v4612_v42  ;;  %v27452_v24 = vsel %vm4390_vm10, %v4334_v15, %v4446_v51 }
 0x393   :  { %33194 = vst [vmem:[#allocation74_spill] sm:$0xff] %v27447_v33  ;;  %33195 = vst [vmem:[#allocation69_spill] sm:$0xff] %v27450_v52  ;;  %v27454_v28 = vsel %vm4389_vm11, %v4333_v55, %v4445_v4  ;;  %v21434_v59 = vpop.f32.mrb[10].mxu0  ;;  %21509 = vmatmul.mubr.msk.f32.gmra.mrb[58].mxu1 %vm4704_vm5, %v27447_v33  ;;  %v4335_v46 = vadd.f32 %v23582_v13, %v27388_v41  ;;  %v4616_v55 = vrot.slane %v27452_v24, 1 }
 0x394   :  { %vm4392_vm12 = vcmp.ge.f32.partialorder %v4336_v20, 0.0  ;;  %v4448_v27 = vmul.f32 0.2, %v4336_v20  ;;  %v23583_v48 = vadd.f32 %v21434_v59, %v27166_v7  ;;  %v4037_v0 = vpop.f32.mrb[11].mxu0  ;;  %21511 = vmatprep.mubr.msk.f32.mxu1 %vm4704_vm5, %v27450_v52  ;;  %v4614_v15 = vrot.slane %v27454_v28, 1 }
 0x395   :  { %v23584_v62 = vadd.f32 %v4037_v0, %v27168_v60  ;;  %vm4391_vm13 = vcmp.ge.f32.partialorder %v4335_v46, 0.0  ;;  %v4447_v17 = vmul.f32 0.2, %v4335_v46 }
 0x396   :  { %v27465_v11 = vsel %vm4392_vm12, %v4336_v20, %v4448_v27  ;;  %v4338_v56 = vadd.f32 %v23583_v48, %v27388_v41  ;;  %v27470_v7 = vsel %vm154_vm2, %v4612_v42, %v4614_v15  ;;  %v27473_v13 = vsel %vm154_vm2, %v4614_v15, %v4616_v55 }
 0x397   :  { %v4337_v51 = vadd.f32 %v23584_v62, %v27388_v41  ;;  %v21437_v4 = vpop.f32.mrb[12].mxu0  ;;  %33196 = vst [vmem:[#allocation75_spill] sm:$0xff] %v27470_v7  ;;  %33197 = vst [vmem:[#allocation76_spill] sm:$0xff] %v27473_v13  ;;  %v4620_v60 = vrot.slane %v27465_v11, 1  ;;  %v27476_v59 = vsel %vm4391_vm13, %v4335_v46, %v4447_v17  ;;  %21512 = vmatmul.mubr.msk.f32.gmra.mrb[60].mxu1 %vm4704_vm5, %v27470_v7 }
 0x398   :  { %vm4394_vm14 = vcmp.ge.f32.partialorder %v4338_v56, 0.0  ;;  %v4450_v20 = vmul.f32 0.2, %v4338_v56  ;;  %v23585_v27 = vadd.f32 %v21437_v4, %v27174_v58  ;;  %v4047_v48 = vpop.f32.mrb[13].mxu0  ;;  %21514 = vmatprep.mubr.msk.f32.mxu1 %vm4704_vm5, %v27473_v13  ;;  %v4618_v62 = vrot.slane %v27476_v59, 1 }
 0x399   :  { %vm4393_vm15 = vcmp.ge.f32.partialorder %v4337_v51, 0.0  ;;  %v4449_v0 = vmul.f32 0.2, %v4337_v51  ;;  %v23586_v42 = vadd.f32 %v4047_v48, %v27176_v10 }
 0x39a   :  { %v27485_v15 = vsel %vm4394_vm14, %v4338_v56, %v4450_v20  ;;  %v4340_v46 = vadd.f32 %v23585_v27, %v27388_v41  ;;  %v27492_v7 = vsel %vm154_vm2, %v4616_v55, %v4618_v62  ;;  %v27495_v52 = vsel %vm154_vm2, %v4618_v62, %v4620_v60 }
 0x39b   :  { %v27488_v17 = vsel %vm4393_vm15, %v4337_v51, %v4449_v0  ;;  %v4339_v58 = vadd.f32 %v23586_v42, %v27388_v41  ;;  %v21440_v4 = vpop.f32.mrb[14].mxu0  ;;  %33198 = vst [vmem:[#allocation47_spill] sm:$0xff] %v27492_v7  ;;  %33199 = vst [vmem:[#allocation50_spill] sm:$0xff] %v27495_v52  ;;  %21515 = vmatmul.mubr.msk.f32.gmra.mrb[62].mxu1 %vm4704_vm5, %v27492_v7  ;;  %v4624_v55 = vrot.slane %v27485_v15, 1 }
 0x39c   :  { %vm4396_vm3 = vcmp.ge.f32.partialorder %v4340_v46, 0.0  ;;  %v4452_v10 = vmul.f32 0.2, %v4340_v46  ;;  %v23587_v48 = vadd.f32 %v21440_v4, %v27182_v14  ;;  %v4057_v56 = vpop.f32.mrb[15].mxu0  ;;  %v4622_v51 = vrot.slane %v27488_v17, 1  ;;  %21517 = vmatprep.mubr.msk.f32.mxu1 %vm4704_vm5, %v27495_v52 }
 0x39d   :  { %vm4395_vm4 = vcmp.ge.f32.partialorder %v4339_v58, 0.0  ;;  %v4451_v20 = vmul.f32 0.2, %v4339_v58  ;;  %v23588_v27 = vadd.f32 %v4057_v56, %v27184_v57 }
 0x39e   :  { %v27505_v0 = vsel %vm4396_vm3, %v4340_v46, %v4452_v10  ;;  %v4342_v42 = vadd.f32 %v23587_v48, %v27388_v41  ;;  %v27509_v14 = vsel %vm154_vm2, %v4620_v60, %v4622_v51  ;;  %v27515_v13 = vsel %vm154_vm2, %v4622_v51, %v4624_v55 }
 0x39f   :  { %33200 = vst [vmem:[#allocation51_spill] sm:$0xff] %v27509_v14  ;;  %v27511_v62 = vsel %vm4395_vm4, %v4339_v58, %v4451_v20  ;;  %v4341_v4 = vadd.f32 %v23588_v27, %v27388_v41  ;;  %v21443_v7 = vpop.f32.mrb[16].mxu0  ;;  %33201 = vst [vmem:[#allocation54_spill] sm:$0xff] %v27515_v13  ;;  %v4628_v57 = vrot.slane %v27505_v0, 1  ;;  %21518 = vmatmul.mubr.msk.f32.gmra.mrb[64].mxu1 %vm4704_vm5, %v27509_v14 }
 0x3a0   :  { %vm4398_vm6 = vcmp.ge.f32.partialorder %v4342_v42, 0.0  ;;  %v4454_v56 = vmul.f32 0.2, %v4342_v42  ;;  %v23589_v46 = vadd.f32 %v21443_v7, %v27190_v61  ;;  %v4067_v10 = vpop.f32.mrb[17].mxu0  ;;  %v4626_v60 = vrot.slane %v27511_v62, 1  ;;  %21520 = vmatprep.mubr.msk.f32.mxu1 %vm4704_vm5, %v27515_v13 }
 0x3a1   :  { %vm4397_vm7 = vcmp.ge.f32.partialorder %v4341_v4, 0.0  ;;  %v4453_v58 = vmul.f32 0.2, %v4341_v4  ;;  %v23590_v48 = vadd.f32 %v4067_v10, %v27192_v45 }
 0x3a2   :  { %v27525_v51 = vsel %vm4398_vm6, %v4342_v42, %v4454_v56  ;;  %v4344_v20 = vadd.f32 %v23589_v46, %v27388_v41  ;;  %v27529_v27 = vsel %vm154_vm2, %v4624_v55, %v4626_v60  ;;  %v27532_v61 = vsel %vm154_vm2, %v4626_v60, %v4628_v57 }
 0x3a3   :  { %33202 = vst [vmem:[#allocation55_spill] sm:$0xff] %v27529_v27  ;;  %33203 = vst [vmem:[#allocation58_spill] sm:$0xff] %v27532_v61  ;;  %v27534_v7 = vsel %vm4397_vm7, %v4341_v4, %v4453_v58  ;;  %v4343_v14 = vadd.f32 %v23590_v48, %v27388_v41  ;;  %v21446_v52 = vpop.f32.mrb[18].mxu0  ;;  %v4632_v45 = vrot.slane %v27525_v51, 1  ;;  %21521 = vmatmul.mubr.msk.f32.gmra.mrb[66].mxu1 %vm4704_vm5, %v27529_v27 }
 0x3a4   :  { %vm4400_vm8 = vcmp.ge.f32.partialorder %v4344_v20, 0.0  ;;  %v4456_v10 = vmul.f32 0.2, %v4344_v20  ;;  %v23591_v42 = vadd.f32 %v21446_v52, %v27198_v36  ;;  %v4077_v56 = vpop.f32.mrb[19].mxu0  ;;  %v4630_v55 = vrot.slane %v27534_v7, 1  ;;  %21523 = vmatprep.mubr.msk.f32.mxu1 %vm4704_vm5, %v27532_v61 }
 0x3a5   :  { %vm4399_vm9 = vcmp.ge.f32.partialorder %v4343_v14, 0.0  ;;  %v4455_v46 = vmul.f32 0.2, %v4343_v14  ;;  %v23592_v4 = vadd.f32 %v4077_v56, %v27200_v32 }
 0x3a6   :  { %v27545_v60 = vsel %vm4400_vm8, %v4344_v20, %v4456_v10  ;;  %v4346_v58 = vadd.f32 %v23591_v42, %v27388_v41  ;;  %v27549_v48 = vsel %vm154_vm2, %v4628_v57, %v4630_v55  ;;  %v27552_v36 = vsel %vm154_vm2, %v4630_v55, %v4632_v45 }
 0x3a7   :  { %33204 = vst [vmem:[#allocation59_spill] sm:$0xff] %v27549_v48  ;;  %33205 = vst [vmem:[#allocation62_spill] sm:$0xff] %v27552_v36  ;;  %v27554_v52 = vsel %vm4399_vm9, %v4343_v14, %v4455_v46  ;;  %v4345_v27 = vadd.f32 %v23592_v4, %v27388_v41  ;;  %v21449_v13 = vpop.f32.mrb[20].mxu0  ;;  %v4636_v32 = vrot.slane %v27545_v60, 1  ;;  %21524 = vmatmul.mubr.msk.f32.gmra.mrb[68].mxu1 %vm4704_vm5, %v27549_v48 }
 0x3a8   :  { %vm4402_vm10 = vcmp.ge.f32.partialorder %v4346_v58, 0.0  ;;  %v4458_v56 = vmul.f32 0.2, %v4346_v58  ;;  %v23593_v20 = vadd.f32 %v21449_v13, %v27206_v6  ;;  %v4087_v10 = vpop.f32.mrb[21].mxu0  ;;  %v4634_v57 = vrot.slane %v27554_v52, 1  ;;  %21526 = vmatprep.mubr.msk.f32.mxu1 %vm4704_vm5, %v27552_v36 }
 0x3a9   :  { %vm4401_vm11 = vcmp.ge.f32.partialorder %v4345_v27, 0.0  ;;  %v4457_v42 = vmul.f32 0.2, %v4345_v27  ;;  %v23594_v14 = vadd.f32 %v4087_v10, %v27208_v47 }
 0x3aa   :  { %v27565_v55 = vsel %vm4402_vm10, %v4346_v58, %v4458_v56  ;;  %v4348_v46 = vadd.f32 %v23593_v20, %v27388_v41  ;;  %v27569_v4 = vsel %vm154_vm2, %v4632_v45, %v4634_v57  ;;  %v27572_v6 = vsel %vm154_vm2, %v4634_v57, %v4636_v32 }
 0x3ab   :  { %33206 = vst [vmem:[#allocation63_spill] sm:$0xff] %v27569_v4  ;;  %33207 = vst [vmem:[#allocation72_spill] sm:$0xff] %v27572_v6  ;;  %v27574_v13 = vsel %vm4401_vm11, %v4345_v27, %v4457_v42  ;;  %v4347_v48 = vadd.f32 %v23594_v14, %v27388_v41  ;;  %v21452_v61 = vpop.f32.mrb[22].mxu0  ;;  %v4640_v47 = vrot.slane %v27565_v55, 1  ;;  %21527 = vmatmul.mubr.msk.f32.gmra.mrb[70].mxu1 %vm4704_vm5, %v27569_v4 }
 0x3ac   :  { %vm4404_vm12 = vcmp.ge.f32.partialorder %v4348_v46, 0.0  ;;  %v4460_v10 = vmul.f32 0.2, %v4348_v46  ;;  %v23595_v58 = vadd.f32 %v21452_v61, %v27214_v22  ;;  %v4097_v56 = vpop.f32.mrb[23].mxu0  ;;  %v4638_v45 = vrot.slane %v27574_v13, 1  ;;  %21529 = vmatprep.mubr.msk.f32.mxu1 %vm4704_vm5, %v27572_v6 }
 0x3ad   :  { %vm4403_vm13 = vcmp.ge.f32.partialorder %v4347_v48, 0.0  ;;  %v4459_v20 = vmul.f32 0.2, %v4347_v48  ;;  %v23596_v27 = vadd.f32 %v4097_v56, %v27216_v53 }
 0x3ae   :  { %v27585_v57 = vsel %vm4404_vm12, %v4348_v46, %v4460_v10  ;;  %v4350_v42 = vadd.f32 %v23595_v58, %v27388_v41  ;;  %v27589_v14 = vsel %vm154_vm2, %v4636_v32, %v4638_v45  ;;  %v27592_v22 = vsel %vm154_vm2, %v4638_v45, %v4640_v47 }
 0x3af   :  { %33208 = vst [vmem:[#allocation73_spill] sm:$0xff] %v27589_v14  ;;  %33209 = vst [vmem:[#allocation77_spill] sm:$0xff] %v27592_v22  ;;  %v27594_v61 = vsel %vm4403_vm13, %v4347_v48, %v4459_v20  ;;  %v4349_v4 = vadd.f32 %v23596_v27, %v27388_v41  ;;  %v21455_v36 = vpop.f32.mrb[24].mxu0  ;;  %v4644_v53 = vrot.slane %v27585_v57, 1  ;;  %21530 = vmatmul.mubr.msk.f32.gmra.mrb[72].mxu1 %vm4704_vm5, %v27589_v14 }
 0x3b0   :  { %vm4406_vm14 = vcmp.ge.f32.partialorder %v4350_v42, 0.0  ;;  %v4462_v56 = vmul.f32 0.2, %v4350_v42  ;;  %v27599_v46 = vadd.f32 %v21455_v36, %v27222_v18  ;;  %v4107_v32 = vpop.f32.mrb[25].mxu0  ;;  %v4642_v10 = vrot.slane %v27594_v61, 1  ;;  %21532 = vmatprep.mubr.msk.f32.mxu1 %vm4704_vm5, %v27592_v22 }
 0x3b1   :  { %vm4405_vm15 = vcmp.ge.f32.partialorder %v4349_v4, 0.0  ;;  %v4461_v58 = vmul.f32 0.2, %v4349_v4  ;;  %v23598_v48 = vadd.f32 %v4107_v32, %v27224_v19 }
 0x3b2   :  { %33210 = vst [vmem:[#allocation7_spill] sm:$0xff] %v27599_v46  ;;  %v27607_v45 = vsel %vm4406_vm14, %v4350_v42, %v4462_v56  ;;  %v27610_v20 = vsel %vm154_vm2, %v4640_v47, %v4642_v10  ;;  %v27613_v18 = vsel %vm154_vm2, %v4642_v10, %v4644_v53  ;;  %v33248_v46 = vld [vmem:[#allocation30_spill] sm:$0xff] }
 0x3b3   :  { %33211 = vst [vmem:[#allocation8_spill] sm:$0xff] %v27610_v20  ;;  %33212 = vst [vmem:[#allocation9_spill] sm:$0xff] %v27613_v18  ;;  %v27615_v36 = vsel %vm4405_vm15, %v4349_v4, %v4461_v58  ;;  %v4351_v27 = vadd.f32 %v23598_v48, %v27388_v41  ;;  %v21458_v14 = vpop.f32.mrb[26].mxu0  ;;  %v4648_v6 = vrot.slane %v27607_v45, 1  ;;  %21533 = vmatmul.mubr.msk.f32.gmra.mrb[74].mxu1 %vm4704_vm5, %v27610_v20 }
 0x3b4   :  { %v27620_v19 = vadd.f32 %v21458_v14, %v27230_v25  ;;  %v4117_v42 = vpop.f32.mrb[27].mxu0  ;;  %v4646_v47 = vrot.slane %v27615_v36, 1  ;;  %21535 = vmatprep.mubr.msk.f32.mxu1 %vm4704_vm5, %v27613_v18 }
 0x3b5   :  { %vm4407_vm3 = vcmp.ge.f32.partialorder %v4351_v27, 0.0  ;;  %v4463_v56 = vmul.f32 0.2, %v4351_v27  ;;  %v27626_v32 = vadd.f32 %v4117_v42, %v27232_v35 }
 0x3b6   :  { %33213 = vst [vmem:[#allocation10_spill] sm:$0xff] %v27620_v19  ;;  %v27631_v4 = vsel %vm154_vm2, %v4644_v53, %v4646_v47  ;;  %v27634_v25 = vsel %vm154_vm2, %v4646_v47, %v4648_v6 }
 0x3b7   :  { %33214 = vst [vmem:[#allocation11_spill] sm:$0xff] %v27626_v32  ;;  %33215 = vst [vmem:[#allocation12_spill] sm:$0xff] %v27631_v4  ;;  %v27636_v14 = vsel %vm4407_vm3, %v4351_v27, %v4463_v56  ;;  %v21461_v10 = vpop.f32.mrb[28].mxu0  ;;  %21536 = vmatmul.mubr.msk.f32.gmra.mrb[76].mxu1 %vm4704_vm5, %v27631_v4 }
 0x3b8   :  { %33216 = vst [vmem:[#allocation13_spill] sm:$0xff] %v27634_v25  ;;  %v23601_v58 = vadd.f32 %v21461_v10, %v27238_v50  ;;  %v4127_v48 = vpop.f32.mrb[29].mxu0  ;;  %v32592_v35 = vrot.slane %v27636_v14, 1  ;;  %21538 = vmatprep.mubr.msk.f32.mxu1 %vm4704_vm5, %v27634_v25 }
 0x3b9   :  { %v23602_v42 = vadd.f32 %v4127_v48, %v27240_v37 }
 0x3ba   :  { %v4356_v53 = vadd.f32 %v23601_v58, %v27388_v41  ;;  %v27649_v27 = vsel %vm154_vm2, %v4648_v6, %v32592_v35 }
 0x3bb   :  { %33217 = vst [vmem:[#allocation14_spill] sm:$0xff] %v27649_v27  ;;  %v4355_v50 = vadd.f32 %v23602_v42, %v27388_v41  ;;  %v21464_v47 = vpop.f32.mrb[30].mxu0  ;;  %21539 = vmatmul.mubr.msk.f32.gmra.mrb[78].mxu1 %vm4704_vm5, %v27649_v27 }
 0x3bc   :  { %vm4412_vm4 = vcmp.ge.f32.partialorder %v4356_v53, 0.0  ;;  %v4468_v56 = vmul.f32 0.2, %v4356_v53  ;;  %v23603_v10 = vadd.f32 %v21464_v47, %v27246_v21  ;;  %v4137_v37 = vpop.f32.mrb[31].mxu0 }
 0x3bd   :  { %vm4411_vm6 = vcmp.ge.f32.partialorder %v4355_v50, 0.0  ;;  %v4467_v48 = vmul.f32 0.2, %v4355_v50  ;;  %v23604_v58 = vadd.f32 %v4137_v37, %v27248_v34 }
 0x3be   :  { %v27656_v19 = vsel %vm4412_vm4, %v4356_v53, %v4468_v56  ;;  %v4358_v6 = vadd.f32 %v23603_v10, %v27388_v41 }
 0x3bf   :  { %v27659_v35 = vsel %vm4411_vm6, %v4355_v50, %v4467_v48  ;;  %v4357_v42 = vadd.f32 %v23604_v58, %v27388_v41  ;;  %v21467_v25 = vpop.f32.mrb[32].mxu0  ;;  %v4653_v4 = vrot.slane %v27656_v19, 1 }
 0x3c0   :  { %vm4414_vm7 = vcmp.ge.f32.partialorder %v4358_v6, 0.0  ;;  %v4470_v21 = vmul.f32 0.2, %v4358_v6  ;;  %v23605_v47 = vadd.f32 %v21467_v25, %v27255_v16  ;;  %v4147_v27 = vpop.f32.mrb[33].mxu0  ;;  %v4652_v18 = vrot.slane %v27659_v35, 1 }
 0x3c1   :  { %vm4413_vm8 = vcmp.ge.f32.partialorder %v4357_v42, 0.0  ;;  %v4469_v34 = vmul.f32 0.2, %v4357_v42  ;;  %v23606_v53 = vadd.f32 %v4147_v27, %v27257_v3 }
 0x3c2   :  { %v27666_v56 = vsel %vm4414_vm7, %v4358_v6, %v4470_v21  ;;  %v4360_v50 = vadd.f32 %v23605_v47, %v27388_v41  ;;  %v4654_v10 = vsel %vm154_vm2, %v4652_v18, %v4653_v4 }
 0x3c3   :  { %v27670_v37 = vsel %vm4413_vm8, %v4357_v42, %v4469_v34  ;;  %v4359_v48 = vadd.f32 %v23606_v53, %v27388_v41  ;;  %v21470_v58 = vpop.f32.mrb[34].mxu0  ;;  %21541 = vmatprep.mubr.msk.f32.mxu1 %vm4704_vm5, %v4654_v10  ;;  %v4657_v16 = vrot.slane %v27666_v56, 1 }
 0x3c4   :  { %vm4416_vm9 = vcmp.ge.f32.partialorder %v4360_v50, 0.0  ;;  %v4472_v25 = vmul.f32 0.2, %v4360_v50  ;;  %v23607_v20 = vadd.f32 %v21470_v58, %v27267_v29  ;;  %v4157_v3 = vpop.f32.mrb[35].mxu0  ;;  %v4655_v27 = vrot.slane %v27670_v37, 1 }
 0x3c5   :  { %vm4415_vm10 = vcmp.ge.f32.partialorder %v4359_v48, 0.0  ;;  %v4471_v6 = vmul.f32 0.2, %v4359_v48  ;;  %v23608_v18 = vadd.f32 %v4157_v3, %v27269_v9 }
 0x3c6   :  { %v27678_v42 = vsel %vm4416_vm9, %v4360_v50, %v4472_v25  ;;  %v4362_v21 = vadd.f32 %v23607_v20, %v27388_v41  ;;  %v4656_v47 = vsel %vm154_vm2, %v4653_v4, %v4655_v27  ;;  %v27683_v34 = vsel %vm154_vm2, %v4655_v27, %v4657_v16 }
 0x3c7   :  { %33218 = vst [vmem:[#allocation15_spill] sm:$0xff] %v27683_v34  ;;  %v27685_v53 = vsel %vm4415_vm10, %v4359_v48, %v4471_v6  ;;  %v4361_v29 = vadd.f32 %v23608_v18, %v27388_v41  ;;  %v21473_v10 = vpop.f32.mrb[36].mxu0  ;;  %21542 = vmatmul.mubr.msk.f32.gmra.mrb[80].mxu1 %vm4704_vm5, %v4656_v47  ;;  %v4661_v58 = vrot.slane %v27678_v42, 1 }
 0x3c8   :  { %vm4418_vm11 = vcmp.ge.f32.partialorder %v4362_v21, 0.0  ;;  %v4474_v9 = vmul.f32 0.2, %v4362_v21  ;;  %v23609_v50 = vadd.f32 %v21473_v10, %v27275_v26  ;;  %v4167_v25 = vpop.f32.mrb[37].mxu0  ;;  %21544 = vmatprep.mubr.msk.f32.mxu1 %vm4704_vm5, %v27683_v34  ;;  %v4659_v20 = vrot.slane %v27685_v53, 1 }
 0x3c9   :  { %vm4417_vm12 = vcmp.ge.f32.partialorder %v4361_v29, 0.0  ;;  %v4473_v4 = vmul.f32 0.2, %v4361_v29  ;;  %v23610_v48 = vadd.f32 %v4167_v25, %v27277_v2 }
 0x3ca   :  { %v27695_v3 = vsel %vm4418_vm11, %v4362_v21, %v4474_v9  ;;  %v4364_v27 = vadd.f32 %v23609_v50, %v27388_v41  ;;  %v27699_v6 = vsel %vm154_vm2, %v4657_v16, %v4659_v20  ;;  %v27702_v18 = vsel %vm154_vm2, %v4659_v20, %v4661_v58 }
 0x3cb   :  { %33219 = vst [vmem:[#allocation16_spill] sm:$0xff] %v27699_v6  ;;  %33220 = vst [vmem:[#allocation17_spill] sm:$0xff] %v27702_v18  ;;  %v27704_v26 = vsel %vm4417_vm12, %v4361_v29, %v4473_v4  ;;  %v4363_v47 = vadd.f32 %v23610_v48, %v27388_v41  ;;  %v21476_v10 = vpop.f32.mrb[38].mxu0  ;;  %21545 = vmatmul.mubr.msk.f32.gmra.mrb[82].mxu1 %vm4704_vm5, %v27699_v6  ;;  %v4665_v2 = vrot.slane %v27695_v3, 1 }
 0x3cc   :  { %vm4420_vm13 = vcmp.ge.f32.partialorder %v4364_v27, 0.0  ;;  %v4476_v21 = vmul.f32 0.2, %v4364_v27  ;;  %v23611_v9 = vadd.f32 %v21476_v10, %v27282_v40  ;;  %v4177_v50 = vpop.f32.mrb[39].mxu0  ;;  %21547 = vmatprep.mubr.msk.f32.mxu1 %vm4704_vm5, %v27702_v18  ;;  %v4663_v16 = vrot.slane %v27704_v26, 1 }
 0x3cd   :  { %vm4419_vm14 = vcmp.ge.f32.partialorder %v4363_v47, 0.0  ;;  %v4475_v29 = vmul.f32 0.2, %v4363_v47  ;;  %v23612_v25 = vadd.f32 %v4177_v50, %v27284_v12 }
 0x3ce   :  { %v27715_v20 = vsel %vm4420_vm13, %v4364_v27, %v4476_v21  ;;  %v4366_v4 = vadd.f32 %v23611_v9, %v27388_v41  ;;  %v27719_v48 = vsel %vm154_vm2, %v4661_v58, %v4663_v16  ;;  %v27722_v6 = vsel %vm154_vm2, %v4663_v16, %v4665_v2 }
 0x3cf   :  { %33221 = vst [vmem:[#allocation18_spill] sm:$0xff] %v27719_v48  ;;  %33222 = vst [vmem:[#allocation19_spill] sm:$0xff] %v27722_v6  ;;  %v27724_v40 = vsel %vm4419_vm14, %v4363_v47, %v4475_v29  ;;  %v4365_v10 = vadd.f32 %v23612_v25, %v27388_v41  ;;  %v21479_v18 = vpop.f32.mrb[40].mxu0  ;;  %21548 = vmatmul.mubr.msk.f32.gmra.mrb[84].mxu1 %vm4704_vm5, %v27719_v48  ;;  %v4669_v12 = vrot.slane %v27715_v20, 1 }
 0x3d0   :  { %vm4422_vm15 = vcmp.ge.f32.partialorder %v4366_v4, 0.0  ;;  %v4478_v27 = vmul.f32 0.2, %v4366_v4  ;;  %v23613_v21 = vadd.f32 %v21479_v18, %v27290_v54  ;;  %v4187_v9 = vpop.f32.mrb[41].mxu0  ;;  %21550 = vmatprep.mubr.msk.f32.mxu1 %vm4704_vm5, %v27722_v6  ;;  %v4667_v58 = vrot.slane %v27724_v40, 1 }
 0x3d1   :  { %vm4421_vm3 = vcmp.ge.f32.partialorder %v4365_v10, 0.0  ;;  %v4477_v47 = vmul.f32 0.2, %v4365_v10  ;;  %v23614_v50 = vadd.f32 %v4187_v9, %v27292_v5 }
 0x3d2   :  { %v27735_v16 = vsel %vm4422_vm15, %v4366_v4, %v4478_v27  ;;  %v4368_v29 = vadd.f32 %v23613_v21, %v27388_v41  ;;  %v27739_v25 = vsel %vm154_vm2, %v4665_v2, %v4667_v58  ;;  %v27742_v48 = vsel %vm154_vm2, %v4667_v58, %v4669_v12 }
 0x3d3   :  { %33223 = vst [vmem:[#allocation20_spill] sm:$0xff] %v27739_v25  ;;  %33224 = vst [vmem:[#allocation21_spill] sm:$0xff] %v27742_v48  ;;  %v27744_v54 = vsel %vm4421_vm3, %v4365_v10, %v4477_v47  ;;  %v4367_v18 = vadd.f32 %v23614_v50, %v27388_v41  ;;  %v21482_v6 = vpop.f32.mrb[42].mxu0  ;;  %21551 = vmatmul.mubr.msk.f32.gmra.mrb[86].mxu1 %vm4704_vm5, %v27739_v25  ;;  %v4673_v5 = vrot.slane %v27735_v16, 1 }
 0x3d4   :  { %vm4424_vm4 = vcmp.ge.f32.partialorder %v4368_v29, 0.0  ;;  %v4480_v4 = vmul.f32 0.2, %v4368_v29  ;;  %v23615_v27 = vadd.f32 %v21482_v6, %v27298_v39  ;;  %v4197_v21 = vpop.f32.mrb[43].mxu0  ;;  %21553 = vmatprep.mubr.msk.f32.mxu1 %vm4704_vm5, %v27742_v48  ;;  %v4671_v2 = vrot.slane %v27744_v54, 1 }
 0x3d5   :  { %vm4423_vm6 = vcmp.ge.f32.partialorder %v4367_v18, 0.0  ;;  %v4479_v10 = vmul.f32 0.2, %v4367_v18  ;;  %v23616_v9 = vadd.f32 %v4197_v21, %v27300_v44 }
 0x3d6   :  { %v27755_v58 = vsel %vm4424_vm4, %v4368_v29, %v4480_v4  ;;  %v4370_v47 = vadd.f32 %v23615_v27, %v27388_v41  ;;  %v27759_v50 = vsel %vm154_vm2, %v4669_v12, %v4671_v2  ;;  %v27762_v25 = vsel %vm154_vm2, %v4671_v2, %v4673_v5 }
 0x3d7   :  { %33225 = vst [vmem:[#allocation22_spill] sm:$0xff] %v27759_v50  ;;  %33226 = vst [vmem:[#allocation23_spill] sm:$0xff] %v27762_v25  ;;  %v27764_v39 = vsel %vm4423_vm6, %v4367_v18, %v4479_v10  ;;  %v4369_v6 = vadd.f32 %v23616_v9, %v27388_v41  ;;  %v21485_v48 = vpop.f32.mrb[44].mxu0  ;;  %21554 = vmatmul.mubr.msk.f32.gmra.mrb[88].mxu1 %vm4704_vm5, %v27759_v50  ;;  %v4677_v44 = vrot.slane %v27755_v58, 1 }
 0x3d8   :  { %vm4426_vm7 = vcmp.ge.f32.partialorder %v4370_v47, 0.0  ;;  %v4482_v29 = vmul.f32 0.2, %v4370_v47  ;;  %v23617_v4 = vadd.f32 %v21485_v48, %v27306_v49  ;;  %v4207_v27 = vpop.f32.mrb[45].mxu0  ;;  %21556 = vmatprep.mubr.msk.f32.mxu1 %vm4704_vm5, %v27762_v25  ;;  %v4675_v12 = vrot.slane %v27764_v39, 1 }
 0x3d9   :  { %vm4425_vm8 = vcmp.ge.f32.partialorder %v4369_v6, 0.0  ;;  %v4481_v18 = vmul.f32 0.2, %v4369_v6  ;;  %v23618_v21 = vadd.f32 %v4207_v27, %v27308_v8 }
 0x3da   :  { %v27775_v2 = vsel %vm4426_vm7, %v4370_v47, %v4482_v29  ;;  %v4372_v10 = vadd.f32 %v23617_v4, %v27388_v41  ;;  %v27779_v9 = vsel %vm154_vm2, %v4673_v5, %v4675_v12  ;;  %v27782_v50 = vsel %vm154_vm2, %v4675_v12, %v4677_v44 }
 0x3db   :  { %33227 = vst [vmem:[#allocation24_spill] sm:$0xff] %v27779_v9  ;;  %33228 = vst [vmem:[#allocation25_spill] sm:$0xff] %v27782_v50  ;;  %v27784_v49 = vsel %vm4425_vm8, %v4369_v6, %v4481_v18  ;;  %v4371_v48 = vadd.f32 %v23618_v21, %v27388_v41  ;;  %v21488_v25 = vpop.f32.mrb[46].mxu0  ;;  %21557 = vmatmul.mubr.msk.f32.gmra.mrb[90].mxu1 %vm4704_vm5, %v27779_v9  ;;  %v4681_v8 = vrot.slane %v27775_v2, 1 }
 0x3dc   :  { %vm4428_vm9 = vcmp.ge.f32.partialorder %v4372_v10, 0.0  ;;  %v4484_v47 = vmul.f32 0.2, %v4372_v10  ;;  %v23619_v29 = vadd.f32 %v21488_v25, %v27314_v23  ;;  %v4217_v4 = vpop.f32.mrb[47].mxu0  ;;  %21559 = vmatprep.mubr.msk.f32.mxu1 %vm4704_vm5, %v27782_v50  ;;  %v4679_v5 = vrot.slane %v27784_v49, 1 }
 0x3dd   :  { %vm4427_vm10 = vcmp.ge.f32.partialorder %v4371_v48, 0.0  ;;  %v4483_v6 = vmul.f32 0.2, %v4371_v48  ;;  %v23620_v27 = vadd.f32 %v4217_v4, %v27316_v63 }
 0x3de   :  { %v27795_v12 = vsel %vm4428_vm9, %v4372_v10, %v4484_v47  ;;  %v4374_v18 = vadd.f32 %v23619_v29, %v27388_v41  ;;  %v27799_v21 = vsel %vm154_vm2, %v4677_v44, %v4679_v5  ;;  %v27802_v9 = vsel %vm154_vm2, %v4679_v5, %v4681_v8  ;;  %v33231_v47 = vld [vmem:[#allocation2_spill] sm:$0xff] }
 0x3df   :  { %33229 = vst [vmem:[#allocation26_spill] sm:$0xff] %v27799_v21  ;;  %33230 = vst [vmem:[#allocation27_spill] sm:$0xff] %v27802_v9  ;;  %v27804_v23 = vsel %vm4427_vm10, %v4371_v48, %v4483_v6  ;;  %v4373_v25 = vadd.f32 %v23620_v27, %v27388_v41  ;;  %v21491_v50 = vpop.f32.mrb[48].mxu0  ;;  %21560 = vmatmul.mubr.msk.f32.gmra.mrb[92].mxu1 %vm4704_vm5, %v27799_v21  ;;  %v4685_v63 = vrot.slane %v27795_v12, 1  ;;  %v33232_v5 = vld [vmem:[#allocation6_spill] sm:$0xff] }
 0x3e0   :  { %vm4430_vm11 = vcmp.ge.f32.partialorder %v4374_v18, 0.0  ;;  %v4486_v10 = vmul.f32 0.2, %v4374_v18  ;;  %v23621_v29 = vadd.f32 %v21491_v50, %v33231_v47  ;;  %v4227_v4 = vpop.f32.mrb[49].mxu0  ;;  %21562 = vmatprep.mubr.msk.f32.mxu1 %vm4704_vm5, %v27802_v9  ;;  %v4683_v44 = vrot.slane %v27804_v23, 1 }
 0x3e1   :  { %vm4429_vm12 = vcmp.ge.f32.partialorder %v4373_v25, 0.0  ;;  %v4485_v48 = vmul.f32 0.2, %v4373_v25  ;;  %v23622_v6 = vadd.f32 %v4227_v4, %v33232_v5 }
 0x3e2   :  { %v27815_v27 = vsel %vm4430_vm11, %v4374_v18, %v4486_v10  ;;  %v4376_v21 = vadd.f32 %v23621_v29, %v27388_v41  ;;  %v27819_v34 = vsel %vm154_vm2, %v4681_v8, %v4683_v44  ;;  %v27822_v22 = vsel %vm154_vm2, %v4683_v44, %v4685_v63  ;;  %v33236_v10 = vld [vmem:[#allocation70_spill] sm:$0xff]  ;;  %v33237_v44 = vld [vmem:[#allocation28_spill] sm:$0xff] }
 0x3e3   :  { %33233 = vst [vmem:[#allocation31_spill] sm:$0xff] %v27815_v27  ;;  %33234 = vst [vmem:[#allocation32_spill] sm:$0xff] %v27819_v34  ;;  %v27824_v50 = vsel %vm4429_vm12, %v4373_v25, %v4485_v48  ;;  %v4375_v47 = vadd.f32 %v23622_v6, %v27388_v41  ;;  %v21494_v9 = vpop.f32.mrb[50].mxu0  ;;  %21563 = vmatmul.mubr.msk.f32.gmra.mrb[94].mxu1 %vm4704_vm5, %v27819_v34  ;;  %v4689_v4 = vrot.slane %v27815_v27, 1 }
 0x3e4   :  { %33235 = vst [vmem:[#allocation33_spill] sm:$0xff] %v27822_v22  ;;  %vm4432_vm13 = vcmp.ge.f32.partialorder %v4376_v21, 0.0  ;;  %v4488_v18 = vmul.f32 0.2, %v4376_v21  ;;  %v23623_v29 = vadd.f32 %v21494_v9, %v33236_v10  ;;  %v4237_v5 = vpop.f32.mrb[51].mxu0  ;;  %21565 = vmatprep.mubr.msk.f32.mxu1 %vm4704_vm5, %v27822_v22  ;;  %v4687_v8 = vrot.slane %v27824_v50, 1 }
 0x3e5   :  { %vm4431_vm14 = vcmp.ge.f32.partialorder %v4375_v47, 0.0  ;;  %v4487_v25 = vmul.f32 0.2, %v4375_v47  ;;  %v23624_v48 = vadd.f32 %v4237_v5, %v33237_v44 }
 0x3e6   :  { %v27835_v6 = vsel %vm4432_vm13, %v4376_v21, %v4488_v18  ;;  %v4378_v34 = vadd.f32 %v23623_v29, %v27388_v41  ;;  %v27839_v32 = vsel %vm154_vm2, %v4685_v63, %v4687_v8  ;;  %v27842_v33 = vsel %vm154_vm2, %v4687_v8, %v4689_v4  ;;  %v33242_v18 = vld [vmem:[#allocation71_spill] sm:$0xff] }
 0x3e7   :  { %33238 = vst [vmem:[#allocation3_spill] sm:$0xff] %v27835_v6  ;;  %33239 = vst [vmem:[#allocation38_spill] sm:$0xff] %v27839_v32  ;;  %v27844_v9 = vsel %vm4431_vm14, %v4375_v47, %v4487_v25  ;;  %v4377_v10 = vadd.f32 %v23624_v48, %v27388_v41  ;;  %v21497_v22 = vpop.f32.mrb[52].mxu0  ;;  %21566 = vmatmul.mubr.msk.f32.gmra.mrb[96].mxu1 %vm4704_vm5, %v27839_v32  ;;  %v4693_v5 = vrot.slane %v27835_v6, 1  ;;  %v33244_v25 = vld [vmem:[#allocation29_spill] sm:$0xff] }
 0x3e8   :  { %33240 = vst [vmem:[#allocation39_spill] sm:$0xff] %v27842_v33  ;;  %33241 = vst [vmem:[#allocation40_spill] sm:$0xff] %v27844_v9  ;;  %vm4434_vm15 = vcmp.ge.f32.partialorder %v4378_v34, 0.0  ;;  %v4490_v21 = vmul.f32 0.2, %v4378_v34  ;;  %v27851_v29 = vadd.f32 %v21497_v22, %v33242_v18  ;;  %v4247_v63 = vpop.f32.mrb[53].mxu0  ;;  %21568 = vmatprep.mubr.msk.f32.mxu1 %vm4704_vm5, %v27842_v33 }
 0x3e9   :  { %v4691_v47 = vrot.slane %v27844_v9, 1  ;;  %vm4433_vm3 = vcmp.ge.f32.partialorder %v4377_v10, 0.0  ;;  %v4489_v8 = vmul.f32 0.2, %v4377_v10  ;;  %v23626_v44 = vadd.f32 %v4247_v63, %v33244_v25 }
 0x3ea   :  { %33243 = vst [vmem:[#allocation41_spill] sm:$0xff] %v27851_v29  ;;  %v27857_v48 = vsel %vm4434_vm15, %v4378_v34, %v4490_v21  ;;  %v33250_v21 = vld [vmem:[#allocation34_spill] sm:$0xff] }
 0x3eb   :  { %33245 = vst [vmem:[#allocation42_spill] sm:$0xff] %v27857_v48  ;;  %v27860_v32 = vsel %vm154_vm2, %v4689_v4, %v4691_v47  ;;  %v27863_v30 = vsel %vm154_vm2, %v4691_v47, %v4693_v5  ;;  %v27865_v22 = vsel %vm4433_vm3, %v4377_v10, %v4489_v8  ;;  %v4379_v18 = vadd.f32 %v23626_v44, %v27388_v41  ;;  %v21500_v29 = vpop.f32.mrb[54].mxu0  ;;  %v17682_v44 = vld [vmem:[%s32401_s3 + $0x38] sm:$0xff] }
 0x3ec   :  { %33246 = vst [vmem:[#allocation43_spill] sm:$0xff] %v27860_v32  ;;  %33247 = vst [vmem:[#allocation44_spill] sm:$0xff] %v27865_v22  ;;  %21569 = vmatmul.mubr.msk.f32.gmra.mrb[98].mxu1 %vm4704_vm5, %v27860_v32  ;;  %v4697_v33 = vrot.slane %v27857_v48, 1  ;;  %v27872_v63 = vadd.f32 %v21500_v29, %v33248_v46  ;;  %v4257_v34 = vpop.f32.mrb[55].mxu0  ;;  %v4695_v4 = vrot.slane %v27865_v22, 1 }
 0x3ed   :  { %21571 = vmatprep.mubr.msk.f32.mxu1 %vm4704_vm5, %v27863_v30  ;;  %vm4435_vm4 = vcmp.ge.f32.partialorder %v4379_v18, 0.0  ;;  %v4491_v10 = vmul.f32 0.2, %v4379_v18  ;;  %v27878_v47 = vadd.f32 %v4257_v34, %v33250_v21  ;;  %v5510_v21 = vrot.slane %v27416_v1, 2 }
 0x3ee   :  { %33249 = vst [vmem:[#allocation45_spill] sm:$0xff] %v27872_v63  ;;  %v27881_v41 = vsel %vm154_vm2, %v4693_v5, %v4695_v4  ;;  %v27884_v8 = vsel %vm154_vm2, %v4695_v4, %v4697_v33  ;;  %v17681_v5 = vld [vmem:[%s32401_s3 + $0x30] sm:$0xff]  ;;  %v33255_v4 = vld [vmem:[#allocation35_spill] sm:$0xff] }
 0x3ef   :  { %33251 = vst [vmem:[#allocation46_spill] sm:$0xff] %v27881_v41  ;;  %33252 = vst [vmem:[#allocation48_spill] sm:$0xff] %v27884_v8  ;;  %v27886_v25 = vsel %vm4435_vm4, %v4379_v18, %v4491_v10  ;;  %v33254_v18 = vld [vmem:[#allocation36_spill] sm:$0xff]  ;;  %v27908_v34 = vpack.c.bf16 %v17682_v44, %v17681_v5  ;;  %v5508_v10 = vrot.slane %v33255_v4, 2  ;;  %v17731_v5 = vld [vmem:[%s32401_s3 + $0x40] sm:$0xff] }
 0x3f0   :  { %21572 = vmatmul.mubr.msk.f32.gmra.mrb[100].mxu1 %vm4704_vm5, %v27881_v41  ;;  %v32639_v46 = vrot.slane %v27886_v25, 1  ;;  %v17732_v44 = vld [vmem:[%s32401_s3 + $0x48] sm:$0xff]  ;;  %v5516_v41 = vrot.slane %v27426_v38, 2 }
 0x3f1   :  { %21574 = vmatprep.mubr.msk.f32.mxu1 %vm4704_vm5, %v27884_v8  ;;  %v5511_v63 = vsel %vm1186_vm1, %v5508_v10, %v5510_v21 }
 0x3f2   :  { %v27896_v29 = vsel %vm154_vm2, %v4697_v33, %v32639_v46  ;;  %v33256_v33 = vld [vmem:[#allocation37_spill] sm:$0xff]  ;;  %v28018_v46 = vpack.c.bf16 %v17732_v44, %v17731_v5  ;;  %v5522_v5 = vrot.slane %v27476_v59, 2 }
 0x3f3   :  { %33253 = vst [vmem:[#allocation49_spill] sm:$0xff] %v27896_v29 }
 0x3f4   :  { %21575 = vmatmul.mubr.msk.f32.gmra.mrb[102].mxu1 %vm4704_vm5, %v27896_v29  ;;  %v5514_v29 = vrot.slane %v27432_v43, 2 }
 0x3f5   :  { %21581 = vmatprep.mubr.msk.f32.mxu1 %vm4704_vm5, %v33254_v18 }
 0x3f8   :  { %21582 = vmatmul.mubr.msk.f32.vlgmr.msra.gmra.mrb[56].mxu1 %vm4704_vm5, %v33255_v4  ;;  %v5512_v4 = vrot.slane %v33256_v33, 2 }
 0x3f9   :  { %21584 = vmatprep.mubr.msk.f32.mxu1 %vm4704_vm5, %v27416_v1  ;;  %23546 = vmatpush3.bf16.msra.mxu1 %v27422_v31  ;;  %v5507_v31 = vrot.slane %v33254_v18, 2 }
 0x3fa   :  { %23548 = vmatprep.subr.bf16.mxu1 %v27908_v34  ;;  %v28024_v8 = vsel %vm1186_vm1, %v5510_v21, %v5512_v4  ;;  %v5520_v21 = vrot.slane %v27452_v24, 2 }
 0x3fb   :  { %v5509_v18 = vsel %vm1186_vm1, %v5507_v31, %v5508_v10  ;;  %v28032_v31 = vsel %vm1186_vm1, %v5512_v4, %v5514_v29  ;;  %v5518_v10 = vrot.slane %v27454_v28, 2  ;;  %v5526_v4 = vrot.slane %v27488_v17, 2 }
 0x3fc   :  { %21585 = vmatmul.mubr.msk.f32.gmra.mrb[58].mxu1 %vm4704_vm5, %v33256_v33 }
 0x3fd   :  { %21587 = vmatprep.mubr.msk.f32.mxu1 %vm4704_vm5, %v27432_v43  ;;  %v28050_v44 = vsel %vm1186_vm1, %v5518_v10, %v5520_v21 }
 0x3fe   :  { %33258 = vst [vmem:[#allocation53_spill] sm:$0xff] %v28050_v44 }
 0x400   :  { %21588 = vmatmul.mubr.msk.f32.gmra.mrb[60].mxu1 %vm4704_vm5, %v27426_v38 }
 0x401   :  { %21590 = vmatprep.mubr.msk.f32.mxu1 %vm4704_vm5, %v27454_v28 }
 0x404   :  { %21591 = vmatmul.mubr.msk.f32.gmra.mrb[62].mxu1 %vm4704_vm5, %v27452_v24 }
 0x405   :  { %21593 = vmatprep.mubr.msk.f32.mxu1 %vm4704_vm5, %v27476_v59 }
 0x408   :  { %21594 = vmatmul.mubr.msk.f32.gmra.mrb[64].mxu1 %vm4704_vm5, %v27465_v11 }
 0x409   :  { %21596 = vmatprep.mubr.msk.f32.mxu1 %vm4704_vm5, %v27488_v17 }
 0x40c   :  { %21597 = vmatmul.mubr.msk.f32.gmra.mrb[66].mxu1 %vm4704_vm5, %v27485_v15 }
 0x40d   :  { %21599 = vmatprep.mubr.msk.f32.mxu1 %vm4704_vm5, %v27511_v62 }
 0x410   :  { %21600 = vmatmul.mubr.msk.f32.gmra.mrb[68].mxu1 %vm4704_vm5, %v27505_v0 }
 0x411   :  { %21602 = vmatprep.mubr.msk.f32.mxu1 %vm4704_vm5, %v27534_v7 }
 0x414   :  { %21603 = vmatmul.mubr.msk.f32.gmra.mrb[70].mxu1 %vm4704_vm5, %v27525_v51 }
 0x415   :  { %21605 = vmatprep.mubr.msk.f32.mxu1 %vm4704_vm5, %v27554_v52 }
 0x418   :  { %21606 = vmatmul.mubr.msk.f32.gmra.mrb[72].mxu1 %vm4704_vm5, %v27545_v60 }
 0x419   :  { %21608 = vmatprep.mubr.msk.f32.mxu1 %vm4704_vm5, %v27574_v13 }
 0x41c   :  { %21609 = vmatmul.mubr.msk.f32.gmra.mrb[74].mxu1 %vm4704_vm5, %v27565_v55 }
 0x41d   :  { %21611 = vmatprep.mubr.msk.f32.mxu1 %vm4704_vm5, %v27594_v61 }
 0x420   :  { %21612 = vmatmul.mubr.msk.f32.gmra.mrb[76].mxu1 %vm4704_vm5, %v27585_v57 }
 0x421   :  { %21614 = vmatprep.mubr.msk.f32.mxu1 %vm4704_vm5, %v27615_v36 }
 0x424   :  { %21615 = vmatmul.mubr.msk.f32.gmra.mrb[78].mxu1 %vm4704_vm5, %v27607_v45 }
 0x425   :  { %21617 = vmatprep.mubr.msk.f32.mxu1 %vm4704_vm5, %v27659_v35 }
 0x428   :  { %21618 = vmatmul.mubr.msk.f32.gmra.mrb[80].mxu1 %vm4704_vm5, %v27656_v19 }
 0x429   :  { %21620 = vmatprep.mubr.msk.f32.mxu1 %vm4704_vm5, %v27670_v37 }
 0x42c   :  { %21621 = vmatmul.mubr.msk.f32.gmra.mrb[82].mxu1 %vm4704_vm5, %v27666_v56 }
 0x42d   :  { %21623 = vmatprep.mubr.msk.f32.mxu1 %vm4704_vm5, %v27685_v53 }
 0x430   :  { %21624 = vmatmul.mubr.msk.f32.gmra.mrb[84].mxu1 %vm4704_vm5, %v27678_v42 }
 0x431   :  { %21626 = vmatprep.mubr.msk.f32.mxu1 %vm4704_vm5, %v27704_v26 }
 0x434   :  { %21627 = vmatmul.mubr.msk.f32.gmra.mrb[86].mxu1 %vm4704_vm5, %v27695_v3 }
 0x435   :  { %21629 = vmatprep.mubr.msk.f32.mxu1 %vm4704_vm5, %v27724_v40 }
 0x438   :  { %21630 = vmatmul.mubr.msk.f32.gmra.mrb[88].mxu1 %vm4704_vm5, %v27715_v20 }
 0x439   :  { %21632 = vmatprep.mubr.msk.f32.mxu1 %vm4704_vm5, %v27744_v54 }
 0x43c   :  { %21633 = vmatmul.mubr.msk.f32.gmra.mrb[90].mxu1 %vm4704_vm5, %v27735_v16 }
 0x43d   :  { %21635 = vmatprep.mubr.msk.f32.mxu1 %vm4704_vm5, %v27764_v39 }
 0x440   :  { %21636 = vmatmul.mubr.msk.f32.gmra.mrb[92].mxu1 %vm4704_vm5, %v27755_v58 }
 0x441   :  { %21638 = vmatprep.mubr.msk.f32.mxu1 %vm4704_vm5, %v27784_v49 }
 0x444   :  { %21639 = vmatmul.mubr.msk.f32.gmra.mrb[94].mxu1 %vm4704_vm5, %v27775_v2 }
 0x445   :  { %21641 = vmatprep.mubr.msk.f32.mxu1 %vm4704_vm5, %v27804_v23 }
 0x448   :  { %21642 = vmatmul.mubr.msk.f32.gmra.mrb[96].mxu1 %vm4704_vm5, %v27795_v12 }
 0x449   :  { %21644 = vmatprep.mubr.msk.f32.mxu1 %vm4704_vm5, %v27824_v50 }
 0x44c   :  { %21645 = vmatmul.mubr.msk.f32.gmra.mrb[98].mxu1 %vm4704_vm5, %v27815_v27 }
 0x44d   :  { %21647 = vmatprep.mubr.msk.f32.mxu1 %vm4704_vm5, %v27844_v9 }
 0x450   :  { %21648 = vmatmul.mubr.msk.f32.gmra.mrb[100].mxu1 %vm4704_vm5, %v27835_v6 }
 0x451   :  { %21650 = vmatprep.mubr.msk.f32.mxu1 %vm4704_vm5, %v27865_v22 }
 0x454   :  { %21651 = vmatmul.mubr.msk.f32.gmra.mrb[102].mxu1 %vm4704_vm5, %v27857_v48 }
 0x455   :  { %21657 = vmatprep.mubr.msk.f32.mxu1 %vm4704_vm5, %v5509_v18  ;;  %v5524_v18 = vrot.slane %v27465_v11, 2 }
 0x458   :  { %21658 = vmatmul.mubr.msk.f32.vlgmr.msra.gmra.mrb[56].mxu1 %vm4704_vm5, %v5511_v63  ;;  %v28038_v63 = vsel %vm1186_vm1, %v5514_v29, %v5516_v41  ;;  %v28056_v29 = vsel %vm1186_vm1, %v5520_v21, %v5522_v5 }
 0x459   :  { %21660 = vmatprep.mubr.msk.f32.mxu1 %vm4704_vm5, %v28024_v8  ;;  %23550 = vmatpush3.bf16.msra.mxu1 %v27908_v34  ;;  %v28044_v34 = vsel %vm1186_vm1, %v5516_v41, %v5518_v10  ;;  %33259 = vst [vmem:[#allocation56_spill] sm:$0xff] %v28056_v29  ;;  %v28062_v41 = vsel %vm1186_vm1, %v5522_v5, %v5524_v18 }
 0x45a   :  { %23552 = vmatprep.subr.bf16.mxu1 %v28018_v46  ;;  %33257 = vst [vmem:[#allocation52_spill] sm:$0xff] %v28044_v34  ;;  %33260 = vst [vmem:[#allocation57_spill] sm:$0xff] %v28062_v41  ;;  %v28068_v10 = vsel %vm1186_vm1, %v5524_v18, %v5526_v4 }
 0x45b   :  { %33261 = vst [vmem:[#allocation60_spill] sm:$0xff] %v28068_v10 }
 0x45c   :  { %21661 = vmatmul.mubr.msk.f32.gmra.mrb[58].mxu1 %vm4704_vm5, %v28032_v31 }
 0x45d   :  { %21663 = vmatprep.mubr.msk.f32.mxu1 %vm4704_vm5, %v28038_v63 }
 0x460   :  { %21664 = vmatmul.mubr.msk.f32.gmra.mrb[60].mxu1 %vm4704_vm5, %v28044_v34  ;;  %v5528_v34 = vrot.slane %v27485_v15, 2 }
 0x461   :  { %21666 = vmatprep.mubr.msk.f32.mxu1 %vm4704_vm5, %v28050_v44  ;;  %v5530_v44 = vrot.slane %v27511_v62, 2 }
 0x462   :  { %v28074_v21 = vsel %vm1186_vm1, %v5526_v4, %v5528_v34 }
 0x463   :  { %33262 = vst [vmem:[#allocation61_spill] sm:$0xff] %v28074_v21  ;;  %v28080_v5 = vsel %vm1186_vm1, %v5528_v34, %v5530_v44 }
 0x464   :  { %21667 = vmatmul.mubr.msk.f32.gmra.mrb[62].mxu1 %vm4704_vm5, %v28056_v29  ;;  %v5532_v29 = vrot.slane %v27505_v0, 2  ;;  %33263 = vst [vmem:[#allocation64_spill] sm:$0xff] %v28080_v5 }
 0x465   :  { %21669 = vmatprep.mubr.msk.f32.mxu1 %vm4704_vm5, %v28062_v41  ;;  %v5534_v41 = vrot.slane %v27534_v7, 2 }
 0x466   :  { %v28086_v18 = vsel %vm1186_vm1, %v5530_v44, %v5532_v29 }
 0x467   :  { %33264 = vst [vmem:[#allocation65_spill] sm:$0xff] %v28086_v18  ;;  %v28092_v4 = vsel %vm1186_vm1, %v5532_v29, %v5534_v41 }
 0x468   :  { %21670 = vmatmul.mubr.msk.f32.gmra.mrb[64].mxu1 %vm4704_vm5, %v28068_v10  ;;  %v5536_v10 = vrot.slane %v27525_v51, 2  ;;  %33265 = vst [vmem:[#allocation67_spill] sm:$0xff] %v28092_v4 }
 0x469   :  { %21672 = vmatprep.mubr.msk.f32.mxu1 %vm4704_vm5, %v28074_v21  ;;  %v5538_v21 = vrot.slane %v27554_v52, 2 }
 0x46a   :  { %v28098_v34 = vsel %vm1186_vm1, %v5534_v41, %v5536_v10 }
 0x46b   :  { %33266 = vst [vmem:[#allocation68_spill] sm:$0xff] %v28098_v34  ;;  %v28104_v44 = vsel %vm1186_vm1, %v5536_v10, %v5538_v21 }
 0x46c   :  { %21673 = vmatmul.mubr.msk.f32.gmra.mrb[66].mxu1 %vm4704_vm5, %v28080_v5  ;;  %v5540_v5 = vrot.slane %v27545_v60, 2  ;;  %33267 = vst [vmem:[#allocation4_spill] sm:$0xff] %v28104_v44 }
 0x46d   :  { %21675 = vmatprep.mubr.msk.f32.mxu1 %vm4704_vm5, %v28086_v18  ;;  %v5542_v18 = vrot.slane %v27574_v13, 2 }
 0x46e   :  { %v28110_v29 = vsel %vm1186_vm1, %v5538_v21, %v5540_v5 }
 0x46f   :  { %33268 = vst [vmem:[#allocation5_spill] sm:$0xff] %v28110_v29  ;;  %v28116_v41 = vsel %vm1186_vm1, %v5540_v5, %v5542_v18 }
 0x470   :  { %21676 = vmatmul.mubr.msk.f32.gmra.mrb[68].mxu1 %vm4704_vm5, %v28092_v4  ;;  %v5544_v4 = vrot.slane %v27565_v55, 2  ;;  %33269 = vst [vmem:[#allocation2_spill] sm:$0xff] %v28116_v41 }
 0x471   :  { %21678 = vmatprep.mubr.msk.f32.mxu1 %vm4704_vm5, %v28098_v34  ;;  %v5546_v34 = vrot.slane %v27594_v61, 2 }
 0x472   :  { %v28122_v10 = vsel %vm1186_vm1, %v5542_v18, %v5544_v4 }
 0x473   :  { %33270 = vst [vmem:[#allocation6_spill] sm:$0xff] %v28122_v10  ;;  %v28128_v21 = vsel %vm1186_vm1, %v5544_v4, %v5546_v34 }
 0x474   :  { %21679 = vmatmul.mubr.msk.f32.gmra.mrb[70].mxu1 %vm4704_vm5, %v28104_v44  ;;  %v5548_v44 = vrot.slane %v27585_v57, 2  ;;  %33271 = vst [vmem:[#allocation70_spill] sm:$0xff] %v28128_v21 }
 0x475   :  { %21681 = vmatprep.mubr.msk.f32.mxu1 %vm4704_vm5, %v28110_v29  ;;  %v5550_v29 = vrot.slane %v27615_v36, 2 }
 0x476   :  { %v28134_v5 = vsel %vm1186_vm1, %v5546_v34, %v5548_v44  ;;  %v5557_v34 = vrot.slane %v27656_v19, 2 }
 0x477   :  { %33272 = vst [vmem:[#allocation28_spill] sm:$0xff] %v28134_v5  ;;  %v28140_v18 = vsel %vm1186_vm1, %v5548_v44, %v5550_v29 }
 0x478   :  { %21682 = vmatmul.mubr.msk.f32.gmra.mrb[72].mxu1 %vm4704_vm5, %v28116_v41  ;;  %v5552_v41 = vrot.slane %v27607_v45, 2  ;;  %33273 = vst [vmem:[#allocation71_spill] sm:$0xff] %v28140_v18 }
 0x479   :  { %21684 = vmatprep.mubr.msk.f32.mxu1 %vm4704_vm5, %v28122_v10  ;;  %v32680_v10 = vrot.slane %v27636_v14, 2 }
 0x47a   :  { %v28146_v4 = vsel %vm1186_vm1, %v5550_v29, %v5552_v41 }
 0x47b   :  { %33274 = vst [vmem:[#allocation29_spill] sm:$0xff] %v28146_v4  ;;  %v28155_v44 = vsel %vm1186_vm1, %v5552_v41, %v32680_v10  ;;  %v5565_v10 = vrot.slane %v27678_v42, 2 }
 0x47c   :  { %21685 = vmatmul.mubr.msk.f32.gmra.mrb[74].mxu1 %vm4704_vm5, %v28128_v21  ;;  %v5556_v21 = vrot.slane %v27659_v35, 2  ;;  %33275 = vst [vmem:[#allocation30_spill] sm:$0xff] %v28155_v44  ;;  %v5563_v35 = vrot.slane %v27685_v53, 2 }
 0x47d   :  { %21687 = vmatprep.mubr.msk.f32.mxu1 %vm4704_vm5, %v28134_v5  ;;  %v5559_v5 = vrot.slane %v27670_v37, 2 }
 0x47e   :  { %v5558_v29 = vsel %vm1186_vm1, %v5556_v21, %v5557_v34 }
 0x47f   :  { %v5560_v19 = vsel %vm1186_vm1, %v5557_v34, %v5559_v5  ;;  %v28179_v34 = vsel %vm1186_vm1, %v5563_v35, %v5565_v10 }
 0x480   :  { %21688 = vmatmul.mubr.msk.f32.gmra.mrb[76].mxu1 %vm4704_vm5, %v28140_v18  ;;  %v5561_v18 = vrot.slane %v27666_v56, 2  ;;  %33277 = vst [vmem:[#allocation36_spill] sm:$0xff] %v28179_v34 }
 0x481   :  { %21690 = vmatprep.mubr.msk.f32.mxu1 %vm4704_vm5, %v28146_v4 }
 0x482   :  { %v28167_v41 = vsel %vm1186_vm1, %v5559_v5, %v5561_v18  ;;  %v28173_v21 = vsel %vm1186_vm1, %v5561_v18, %v5563_v35 }
 0x483   :  { %33276 = vst [vmem:[#allocation34_spill] sm:$0xff] %v28173_v21 }
 0x484   :  { %21691 = vmatmul.mubr.msk.f32.gmra.mrb[78].mxu1 %vm4704_vm5, %v28155_v44  ;;  %v5567_v44 = vrot.slane %v27704_v26, 2 }
 0x485   :  { %21693 = vmatprep.mubr.msk.f32.mxu1 %vm4704_vm5, %v5558_v29  ;;  %v5569_v29 = vrot.slane %v27695_v3, 2 }
 0x486   :  { %v28185_v5 = vsel %vm1186_vm1, %v5565_v10, %v5567_v44 }
 0x487   :  { %33278 = vst [vmem:[#allocation35_spill] sm:$0xff] %v28185_v5  ;;  %v28191_v18 = vsel %vm1186_vm1, %v5567_v44, %v5569_v29 }
 0x488   :  { %21694 = vmatmul.mubr.msk.f32.gmra.mrb[80].mxu1 %vm4704_vm5, %v5560_v19  ;;  %v5571_v19 = vrot.slane %v27724_v40, 2  ;;  %33279 = vst [vmem:[#allocation37_spill] sm:$0xff] %v28191_v18 }
 0x489   :  { %21696 = vmatprep.mubr.msk.f32.mxu1 %vm4704_vm5, %v28167_v41 }
 0x48a   :  { %v28197_v35 = vsel %vm1186_vm1, %v5569_v29, %v5571_v19 }
 0x48b   :  { %33280 = vst [vmem:[#allocation78_spill] sm:$0xff] %v28197_v35 }
 0x48c   :  { %21697 = vmatmul.mubr.msk.f32.gmra.mrb[82].mxu1 %vm4704_vm5, %v28173_v21  ;;  %v5573_v21 = vrot.slane %v27715_v20, 2 }
 0x48d   :  { %21699 = vmatprep.mubr.msk.f32.mxu1 %vm4704_vm5, %v28179_v34  ;;  %v5575_v34 = vrot.slane %v27744_v54, 2 }
 0x48e   :  { %v28203_v10 = vsel %vm1186_vm1, %v5571_v19, %v5573_v21 }
 0x48f   :  { %33281 = vst [vmem:[#allocation79_spill] sm:$0xff] %v28203_v10  ;;  %v28209_v44 = vsel %vm1186_vm1, %v5573_v21, %v5575_v34 }
 0x490   :  { %21700 = vmatmul.mubr.msk.f32.gmra.mrb[84].mxu1 %vm4704_vm5, %v28185_v5  ;;  %v5577_v5 = vrot.slane %v27735_v16, 2  ;;  %33282 = vst [vmem:[#allocation80_spill] sm:$0xff] %v28209_v44 }
 0x491   :  { %21702 = vmatprep.mubr.msk.f32.mxu1 %vm4704_vm5, %v28191_v18  ;;  %v5579_v18 = vrot.slane %v27764_v39, 2 }
 0x492   :  { %v28215_v29 = vsel %vm1186_vm1, %v5575_v34, %v5577_v5 }
 0x493   :  { %33283 = vst [vmem:[#allocation81_spill] sm:$0xff] %v28215_v29  ;;  %v28221_v19 = vsel %vm1186_vm1, %v5577_v5, %v5579_v18 }
 0x494   :  { %21703 = vmatmul.mubr.msk.f32.gmra.mrb[86].mxu1 %vm4704_vm5, %v28197_v35  ;;  %v5581_v35 = vrot.slane %v27755_v58, 2  ;;  %33284 = vst [vmem:[#allocation82_spill] sm:$0xff] %v28221_v19 }
 0x495   :  { %21705 = vmatprep.mubr.msk.f32.mxu1 %vm4704_vm5, %v28203_v10  ;;  %v5583_v10 = vrot.slane %v27784_v49, 2 }
 0x496   :  { %v28227_v21 = vsel %vm1186_vm1, %v5579_v18, %v5581_v35 }
 0x497   :  { %33285 = vst [vmem:[#allocation83_spill] sm:$0xff] %v28227_v21  ;;  %v28233_v34 = vsel %vm1186_vm1, %v5581_v35, %v5583_v10 }
 0x498   :  { %21706 = vmatmul.mubr.msk.f32.gmra.mrb[88].mxu1 %vm4704_vm5, %v28209_v44  ;;  %v5585_v44 = vrot.slane %v27775_v2, 2  ;;  %33286 = vst [vmem:[#allocation84_spill] sm:$0xff] %v28233_v34 }
 0x499   :  { %21708 = vmatprep.mubr.msk.f32.mxu1 %vm4704_vm5, %v28215_v29  ;;  %v5587_v29 = vrot.slane %v27804_v23, 2 }
 0x49a   :  { %v28239_v5 = vsel %vm1186_vm1, %v5583_v10, %v5585_v44 }
 0x49b   :  { %33287 = vst [vmem:[#allocation85_spill] sm:$0xff] %v28239_v5  ;;  %v28245_v18 = vsel %vm1186_vm1, %v5585_v44, %v5587_v29 }
 0x49c   :  { %21709 = vmatmul.mubr.msk.f32.gmra.mrb[90].mxu1 %vm4704_vm5, %v28221_v19  ;;  %v5589_v19 = vrot.slane %v27795_v12, 2  ;;  %33288 = vst [vmem:[#allocation86_spill] sm:$0xff] %v28245_v18 }
 0x49d   :  { %21711 = vmatprep.mubr.msk.f32.mxu1 %vm4704_vm5, %v28227_v21  ;;  %v5591_v21 = vrot.slane %v27824_v50, 2 }
 0x49e   :  { %v28251_v35 = vsel %vm1186_vm1, %v5587_v29, %v5589_v19 }
 0x49f   :  { %33289 = vst [vmem:[#allocation87_spill] sm:$0xff] %v28251_v35  ;;  %v28257_v10 = vsel %vm1186_vm1, %v5589_v19, %v5591_v21 }
 0x4a0   :  { %21712 = vmatmul.mubr.msk.f32.gmra.mrb[92].mxu1 %vm4704_vm5, %v28233_v34  ;;  %v5593_v34 = vrot.slane %v27815_v27, 2  ;;  %33290 = vst [vmem:[#allocation88_spill] sm:$0xff] %v28257_v10 }
 0x4a1   :  { %21714 = vmatprep.mubr.msk.f32.mxu1 %vm4704_vm5, %v28239_v5  ;;  %v5595_v5 = vrot.slane %v27844_v9, 2 }
 0x4a2   :  { %v28263_v44 = vsel %vm1186_vm1, %v5591_v21, %v5593_v34 }
 0x4a3   :  { %33291 = vst [vmem:[#allocation89_spill] sm:$0xff] %v28263_v44  ;;  %v28269_v29 = vsel %vm1186_vm1, %v5593_v34, %v5595_v5 }
 0x4a4   :  { %21715 = vmatmul.mubr.msk.f32.gmra.mrb[94].mxu1 %vm4704_vm5, %v28245_v18  ;;  %v5597_v18 = vrot.slane %v27835_v6, 2  ;;  %33292 = vst [vmem:[#allocation90_spill] sm:$0xff] %v28269_v29 }
 0x4a5   :  { %21717 = vmatprep.mubr.msk.f32.mxu1 %vm4704_vm5, %v28251_v35  ;;  %v5599_v35 = vrot.slane %v27865_v22, 2 }
 0x4a6   :  { %v28275_v19 = vsel %vm1186_vm1, %v5595_v5, %v5597_v18 }
 0x4a7   :  { %33293 = vst [vmem:[#allocation91_spill] sm:$0xff] %v28275_v19  ;;  %v28281_v21 = vsel %vm1186_vm1, %v5597_v18, %v5599_v35  ;;  %v17781_v18 = vld [vmem:[%s32401_s3 + $0x50] sm:$0xff] }
 0x4a8   :  { %21718 = vmatmul.mubr.msk.f32.gmra.mrb[96].mxu1 %vm4704_vm5, %v28257_v10  ;;  %v5601_v10 = vrot.slane %v27857_v48, 2  ;;  %33294 = vst [vmem:[#allocation92_spill] sm:$0xff] %v28281_v21 }
 0x4a9   :  { %21720 = vmatprep.mubr.msk.f32.mxu1 %vm4704_vm5, %v28263_v44  ;;  %v32716_v44 = vrot.slane %v27886_v25, 2 }
 0x4aa   :  { %v28287_v34 = vsel %vm1186_vm1, %v5599_v35, %v5601_v10 }
 0x4ab   :  { %33295 = vst [vmem:[#allocation93_spill] sm:$0xff] %v28287_v34  ;;  %v28294_v5 = vsel %vm1186_vm1, %v5601_v10, %v32716_v44 }
 0x4ac   :  { %21721 = vmatmul.mubr.msk.f32.gmra.mrb[98].mxu1 %vm4704_vm5, %v28269_v29  ;;  %33296 = vst [vmem:[#allocation94_spill] sm:$0xff] %v28294_v5 }
 0x4ad   :  { %21723 = vmatprep.mubr.msk.f32.mxu1 %vm4704_vm5, %v28275_v19  ;;  %v17782_v19 = vld [vmem:[%s32401_s3 + $0x58] sm:$0xff] }
 0x4ae   :  { %v28306_v35 = vpack.c.bf16 %v17782_v19, %v17781_v18 }
 0x4b0   :  { %21724 = vmatmul.mubr.msk.f32.gmra.mrb[100].mxu1 %vm4704_vm5, %v28281_v21 }
 0x4b1   :  { %21726 = vmatprep.mubr.msk.f32.mxu1 %vm4704_vm5, %v28287_v34 }
 0x4b4   :  { %21727 = vmatmul.mubr.msk.f32.gmra.mrb[102].mxu1 %vm4704_vm5, %v28294_v5 }
 0x4b5   :  { %21733 = vmatprep.mubr.msk.f32.mxu1 %vm4704_vm5, %v27416_v1  ;;  %v28349_v1 = vld [vmem:[%s32402_s7] ss:$0 sm:$0xff] }
 0x4b8   :  { %21734 = vmatmul.mubr.msk.f32.vlgmr.msra.gmra.mrb[56].mxu1 %vm4704_vm5, %v33256_v33 }
 0x4b9   :  { %21736 = vmatprep.mubr.msk.f32.mxu1 %vm4704_vm5, %v27432_v43  ;;  %23554 = vmatpush3.bf16.msra.mxu1 %v28018_v46  ;;  %v33297_v46 = vld [vmem:[#allocation7_spill] sm:$0xff] }
 0x4ba   :  { %23556 = vmatprep.subr.bf16.mxu1 %v28306_v35  ;;  %v4352_v33 = vadd.f32 %v28349_v1, %v33297_v46 }
 0x4bc   :  { %21737 = vmatmul.mubr.msk.f32.gmra.mrb[58].mxu1 %vm4704_vm5, %v27426_v38  ;;  %v4464_v10 = vmul.f32 0.2, %v4352_v33  ;;  %vm4408_vm6 = vcmp.ge.f32.partialorder %v4352_v33, 0.0 }
 0x4bd   :  { %21739 = vmatprep.mubr.msk.f32.mxu1 %vm4704_vm5, %v27454_v28 }
 0x4be   :  { %v28361_v19 = vsel %vm4408_vm6, %v4352_v33, %v4464_v10  ;;  %v17831_v33 = vld [vmem:[%s32401_s3 + $0x60] sm:$0xff]  ;;  %v17832_v10 = vld [vmem:[%s32401_s3 + $0x68] sm:$0xff] }
 0x4bf   :  { %v28425_v44 = vpack.c.bf16 %v17832_v10, %v17831_v33  ;;  %v33305_v33 = vld [vmem:[#allocation50_spill] sm:$0xff] }
 0x4c0   :  { %21740 = vmatmul.mubr.msk.f32.gmra.mrb[60].mxu1 %vm4704_vm5, %v27452_v24  ;;  %v33307_v10 = vld [vmem:[#allocation54_spill] sm:$0xff] }
 0x4c1   :  { %21742 = vmatprep.mubr.msk.f32.mxu1 %vm4704_vm5, %v27476_v59 }
 0x4c4   :  { %21743 = vmatmul.mubr.msk.f32.gmra.mrb[62].mxu1 %vm4704_vm5, %v27465_v11 }
 0x4c5   :  { %21745 = vmatprep.mubr.msk.f32.mxu1 %vm4704_vm5, %v27488_v17 }
 0x4c8   :  { %21746 = vmatmul.mubr.msk.f32.gmra.mrb[64].mxu1 %vm4704_vm5, %v27485_v15 }
 0x4c9   :  { %21748 = vmatprep.mubr.msk.f32.mxu1 %vm4704_vm5, %v27511_v62 }
 0x4cc   :  { %21749 = vmatmul.mubr.msk.f32.gmra.mrb[66].mxu1 %vm4704_vm5, %v27505_v0 }
 0x4cd   :  { %21751 = vmatprep.mubr.msk.f32.mxu1 %vm4704_vm5, %v27534_v7 }
 0x4d0   :  { %21752 = vmatmul.mubr.msk.f32.gmra.mrb[68].mxu1 %vm4704_vm5, %v27525_v51 }
 0x4d1   :  { %21754 = vmatprep.mubr.msk.f32.mxu1 %vm4704_vm5, %v27554_v52 }
 0x4d4   :  { %21755 = vmatmul.mubr.msk.f32.gmra.mrb[70].mxu1 %vm4704_vm5, %v27545_v60 }
 0x4d5   :  { %21757 = vmatprep.mubr.msk.f32.mxu1 %vm4704_vm5, %v27574_v13 }
 0x4d8   :  { %21758 = vmatmul.mubr.msk.f32.gmra.mrb[72].mxu1 %vm4704_vm5, %v27565_v55 }
 0x4d9   :  { %21760 = vmatprep.mubr.msk.f32.mxu1 %vm4704_vm5, %v27594_v61 }
 0x4dc   :  { %21761 = vmatmul.mubr.msk.f32.gmra.mrb[74].mxu1 %vm4704_vm5, %v27585_v57 }
 0x4dd   :  { %21763 = vmatprep.mubr.msk.f32.mxu1 %vm4704_vm5, %v27615_v36 }
 0x4e0   :  { %21764 = vmatmul.mubr.msk.f32.gmra.mrb[76].mxu1 %vm4704_vm5, %v27607_v45 }
 0x4e1   :  { %21766 = vmatprep.mubr.msk.f32.mxu1 %vm4704_vm5, %v27636_v14 }
 0x4e4   :  { %21767 = vmatmul.mubr.msk.f32.gmra.mrb[78].mxu1 %vm4704_vm5, %v28361_v19 }
 0x4e5   :  { %21769 = vmatprep.mubr.msk.f32.mxu1 %vm4704_vm5, %v27670_v37 }
 0x4e8   :  { %21770 = vmatmul.mubr.msk.f32.gmra.mrb[80].mxu1 %vm4704_vm5, %v27666_v56  ;;  %v33298_v56 = vld [vmem:[#allocation41_spill] sm:$0xff] }
 0x4e9   :  { %21772 = vmatprep.mubr.msk.f32.mxu1 %vm4704_vm5, %v27685_v53  ;;  %v4380_v37 = vadd.f32 %v28349_v1, %v33298_v56  ;;  %v33299_v56 = vld [vmem:[#allocation66_spill] sm:$0xff] }
 0x4eb   :  { %v4492_v18 = vmul.f32 0.2, %v4380_v37  ;;  %vm4436_vm7 = vcmp.ge.f32.partialorder %v4380_v37, 0.0 }
 0x4ec   :  { %21773 = vmatmul.mubr.msk.f32.gmra.mrb[82].mxu1 %vm4704_vm5, %v27678_v42 }
 0x4ed   :  { %21775 = vmatprep.mubr.msk.f32.mxu1 %vm4704_vm5, %v27704_v26  ;;  %v28413_v46 = vsel %vm4436_vm7, %v4380_v37, %v4492_v18  ;;  %v33301_v37 = vld [vmem:[#allocation69_spill] sm:$0xff]  ;;  %v33302_v18 = vld [vmem:[#allocation75_spill] sm:$0xff] }
 0x4f0   :  { %21776 = vmatmul.mubr.msk.f32.gmra.mrb[84].mxu1 %vm4704_vm5, %v27695_v3 }
 0x4f1   :  { %21778 = vmatprep.mubr.msk.f32.mxu1 %vm4704_vm5, %v27724_v40 }
 0x4f4   :  { %21779 = vmatmul.mubr.msk.f32.gmra.mrb[86].mxu1 %vm4704_vm5, %v27715_v20 }
 0x4f5   :  { %21781 = vmatprep.mubr.msk.f32.mxu1 %vm4704_vm5, %v27744_v54 }
 0x4f8   :  { %21782 = vmatmul.mubr.msk.f32.gmra.mrb[88].mxu1 %vm4704_vm5, %v27735_v16 }
 0x4f9   :  { %21784 = vmatprep.mubr.msk.f32.mxu1 %vm4704_vm5, %v27764_v39 }
 0x4fc   :  { %21785 = vmatmul.mubr.msk.f32.gmra.mrb[90].mxu1 %vm4704_vm5, %v27755_v58 }
 0x4fd   :  { %21787 = vmatprep.mubr.msk.f32.mxu1 %vm4704_vm5, %v27784_v49 }
 0x500   :  { %21788 = vmatmul.mubr.msk.f32.gmra.mrb[92].mxu1 %vm4704_vm5, %v27775_v2 }
 0x501   :  { %21790 = vmatprep.mubr.msk.f32.mxu1 %vm4704_vm5, %v27804_v23 }
 0x504   :  { %21791 = vmatmul.mubr.msk.f32.gmra.mrb[94].mxu1 %vm4704_vm5, %v27795_v12 }
 0x505   :  { %21793 = vmatprep.mubr.msk.f32.mxu1 %vm4704_vm5, %v27824_v50 }
 0x508   :  { %21794 = vmatmul.mubr.msk.f32.gmra.mrb[96].mxu1 %vm4704_vm5, %v27815_v27 }
 0x509   :  { %21796 = vmatprep.mubr.msk.f32.mxu1 %vm4704_vm5, %v27844_v9  ;;  %v33319_v9 = vld [vmem:[#allocation12_spill] sm:$0xff] }
 0x50c   :  { %21797 = vmatmul.mubr.msk.f32.gmra.mrb[98].mxu1 %vm4704_vm5, %v27835_v6  ;;  %v33304_v6 = vld [vmem:[#allocation47_spill] sm:$0xff] }
 0x50d   :  { %21799 = vmatprep.mubr.msk.f32.mxu1 %vm4704_vm5, %v27865_v22  ;;  %v33303_v22 = vld [vmem:[#allocation76_spill] sm:$0xff] }
 0x510   :  { %21800 = vmatmul.mubr.msk.f32.gmra.mrb[100].mxu1 %vm4704_vm5, %v27857_v48  ;;  %v33300_v48 = vld [vmem:[#allocation74_spill] sm:$0xff] }
 0x511   :  { %21802 = vmatprep.mubr.msk.f32.mxu1 %vm4704_vm5, %v27886_v25 }
 0x514   :  { %21803 = vmatmul.mubr.msk.f32.gmra.mrb[102].mxu1 %vm4704_vm5, %v28413_v46 }
 0x515   :  { %21809 = vmatprep.mubr.msk.f32.mxu1 %vm4704_vm5, %v33299_v56  ;;  %v33309_v56 = vld [vmem:[#allocation58_spill] sm:$0xff] }
 0x518   :  { %21810 = vmatmul.mubr.msk.f32.vlgmr.msra.gmra.mrb[56].mxu1 %vm4704_vm5, %v33300_v48  ;;  %v33306_v48 = vld [vmem:[#allocation51_spill] sm:$0xff] }
 0x519   :  { %21812 = vmatprep.mubr.msk.f32.mxu1 %vm4704_vm5, %v33301_v37  ;;  %23558 = vmatpush3.bf16.msra.mxu1 %v28306_v35  ;;  %v33308_v35 = vld [vmem:[#allocation55_spill] sm:$0xff]  ;;  %v33315_v37 = vld [vmem:[#allocation73_spill] sm:$0xff] }
 0x51a   :  { %23560 = vmatprep.subr.bf16.mxu1 %v28425_v44 }
 0x51c   :  { %21813 = vmatmul.mubr.msk.f32.gmra.mrb[58].mxu1 %vm4704_vm5, %v33302_v18  ;;  %v33310_v18 = vld [vmem:[#allocation59_spill] sm:$0xff] }
 0x51d   :  { %21815 = vmatprep.mubr.msk.f32.mxu1 %vm4704_vm5, %v33303_v22  ;;  %v33311_v22 = vld [vmem:[#allocation62_spill] sm:$0xff] }
 0x520   :  { %21816 = vmatmul.mubr.msk.f32.gmra.mrb[60].mxu1 %vm4704_vm5, %v33304_v6  ;;  %v33312_v6 = vld [vmem:[#allocation63_spill] sm:$0xff] }
 0x521   :  { %21818 = vmatprep.mubr.msk.f32.mxu1 %vm4704_vm5, %v33305_v33  ;;  %v33313_v33 = vld [vmem:[#allocation72_spill] sm:$0xff] }
 0x524   :  { %21819 = vmatmul.mubr.msk.f32.gmra.mrb[62].mxu1 %vm4704_vm5, %v33306_v48  ;;  %v33314_v48 = vld [vmem:[#allocation11_spill] sm:$0xff] }
 0x525   :  { %21821 = vmatprep.mubr.msk.f32.mxu1 %vm4704_vm5, %v33307_v10  ;;  %v4353_v10 = vadd.f32 %v28349_v1, %v33314_v48  ;;  %v33320_v48 = vld [vmem:[#allocation13_spill] sm:$0xff] }
 0x527   :  { %vm4409_vm8 = vcmp.ge.f32.partialorder %v4353_v10, 0.0 }
 0x528   :  { %21822 = vmatmul.mubr.msk.f32.gmra.mrb[64].mxu1 %vm4704_vm5, %v33308_v35  ;;  %v33316_v35 = vld [vmem:[#allocation77_spill] sm:$0xff] }
 0x529   :  { %21824 = vmatprep.mubr.msk.f32.mxu1 %vm4704_vm5, %v33309_v56  ;;  %v4465_v56 = vmul.f32 0.2, %v4353_v10 }
 0x52c   :  { %21825 = vmatmul.mubr.msk.f32.gmra.mrb[66].mxu1 %vm4704_vm5, %v33310_v18  ;;  %v33317_v18 = vld [vmem:[#allocation8_spill] sm:$0xff] }
 0x52d   :  { %21827 = vmatprep.mubr.msk.f32.mxu1 %vm4704_vm5, %v33311_v22  ;;  %v33318_v22 = vld [vmem:[#allocation9_spill] sm:$0xff] }
 0x530   :  { %21828 = vmatmul.mubr.msk.f32.gmra.mrb[68].mxu1 %vm4704_vm5, %v33312_v6  ;;  %v28467_v6 = vsel %vm4409_vm8, %v4353_v10, %v4465_v56  ;;  %v33325_v56 = vld [vmem:[#allocation15_spill] sm:$0xff] }
 0x531   :  { %21830 = vmatprep.mubr.msk.f32.mxu1 %vm4704_vm5, %v33313_v33  ;;  %v6425_v33 = vrot.slane %v28361_v19, 1 }
 0x534   :  { %21831 = vmatmul.mubr.msk.f32.gmra.mrb[70].mxu1 %vm4704_vm5, %v33315_v37  ;;  %v33321_v37 = vld [vmem:[#allocation14_spill] sm:$0xff] }
 0x535   :  { %21833 = vmatprep.mubr.msk.f32.mxu1 %vm4704_vm5, %v33316_v35  ;;  %v32723_v35 = vrot.slane %v28467_v6, 1 }
 0x537   :  { %v28487_v10 = vsel %vm154_vm2, %v6425_v33, %v32723_v35  ;;  %v33331_v35 = vld [vmem:[#allocation21_spill] sm:$0xff] }
 0x538   :  { %21834 = vmatmul.mubr.msk.f32.gmra.mrb[72].mxu1 %vm4704_vm5, %v33317_v18  ;;  %v33322_v18 = vrot.slane %v27636_v14, 1  ;;  %33324 = vst [vmem:[#allocation41_spill] sm:$0xff] %v28487_v10 }
 0x539   :  { %21836 = vmatprep.mubr.msk.f32.mxu1 %vm4704_vm5, %v33318_v22 }
 0x53a   :  { %v28480_v27 = vsel %vm154_vm2, %v33322_v18, %v6425_v33  ;;  %v33328_v18 = vld [vmem:[#allocation18_spill] sm:$0xff]  ;;  %v33330_v33 = vld [vmem:[#allocation20_spill] sm:$0xff] }
 0x53b   :  { %33323 = vst [vmem:[#allocation7_spill] sm:$0xff] %v28480_v27 }
 0x53c   :  { %21837 = vmatmul.mubr.msk.f32.gmra.mrb[74].mxu1 %vm4704_vm5, %v33319_v9 }
 0x53d   :  { %21839 = vmatprep.mubr.msk.f32.mxu1 %vm4704_vm5, %v33320_v48  ;;  %v33327_v48 = vld [vmem:[#allocation17_spill] sm:$0xff] }
 0x540   :  { %21840 = vmatmul.mubr.msk.f32.gmra.mrb[76].mxu1 %vm4704_vm5, %v33321_v37  ;;  %v33326_v37 = vld [vmem:[#allocation16_spill] sm:$0xff] }
 0x541   :  { %21842 = vmatprep.mubr.msk.f32.mxu1 %vm4704_vm5, %v28480_v27  ;;  %v33329_v27 = vld [vmem:[#allocation19_spill] sm:$0xff] }
 0x544   :  { %21843 = vmatmul.mubr.msk.f32.gmra.mrb[78].mxu1 %vm4704_vm5, %v28487_v10  ;;  %v33332_v10 = vld [vmem:[#allocation22_spill] sm:$0xff] }
 0x545   :  { %21845 = vmatprep.mubr.msk.f32.mxu1 %vm4704_vm5, %v33325_v56  ;;  %v33333_v56 = vld [vmem:[#allocation23_spill] sm:$0xff] }
 0x548   :  { %21846 = vmatmul.mubr.msk.f32.gmra.mrb[80].mxu1 %vm4704_vm5, %v33326_v37  ;;  %v33334_v37 = vld [vmem:[#allocation24_spill] sm:$0xff] }
 0x549   :  { %21848 = vmatprep.mubr.msk.f32.mxu1 %vm4704_vm5, %v33327_v48  ;;  %v33335_v48 = vld [vmem:[#allocation25_spill] sm:$0xff] }
 0x54c   :  { %21849 = vmatmul.mubr.msk.f32.gmra.mrb[82].mxu1 %vm4704_vm5, %v33328_v18  ;;  %v33336_v18 = vld [vmem:[#allocation26_spill] sm:$0xff] }
 0x54d   :  { %21851 = vmatprep.mubr.msk.f32.mxu1 %vm4704_vm5, %v33329_v27  ;;  %v33337_v27 = vld [vmem:[#allocation27_spill] sm:$0xff] }
 0x550   :  { %21852 = vmatmul.mubr.msk.f32.gmra.mrb[84].mxu1 %vm4704_vm5, %v33330_v33  ;;  %v33338_v33 = vld [vmem:[#allocation32_spill] sm:$0xff] }
 0x551   :  { %21854 = vmatprep.mubr.msk.f32.mxu1 %vm4704_vm5, %v33331_v35  ;;  %v33339_v35 = vld [vmem:[#allocation33_spill] sm:$0xff] }
 0x554   :  { %21855 = vmatmul.mubr.msk.f32.gmra.mrb[86].mxu1 %vm4704_vm5, %v33332_v10  ;;  %v33340_v10 = vld [vmem:[#allocation38_spill] sm:$0xff] }
 0x555   :  { %21857 = vmatprep.mubr.msk.f32.mxu1 %vm4704_vm5, %v33333_v56  ;;  %v4381_v56 = vadd.f32 %v28349_v1, %v27878_v47  ;;  %v33343_v47 = vld [vmem:[#allocation48_spill] sm:$0xff] }
 0x557   :  { %vm4437_vm9 = vcmp.ge.f32.partialorder %v4381_v56, 0.0 }
 0x558   :  { %21858 = vmatmul.mubr.msk.f32.gmra.mrb[88].mxu1 %vm4704_vm5, %v33334_v37  ;;  %v33341_v37 = vld [vmem:[#allocation39_spill] sm:$0xff] }
 0x559   :  { %21860 = vmatprep.mubr.msk.f32.mxu1 %vm4704_vm5, %v33335_v48  ;;  %v4493_v48 = vmul.f32 0.2, %v4381_v56 }
 0x55c   :  { %21861 = vmatmul.mubr.msk.f32.gmra.mrb[90].mxu1 %vm4704_vm5, %v33336_v18 }
 0x55d   :  { %21863 = vmatprep.mubr.msk.f32.mxu1 %vm4704_vm5, %v33337_v27  ;;  %v33342_v27 = vld [vmem:[#allocation46_spill] sm:$0xff] }
 0x560   :  { %21864 = vmatmul.mubr.msk.f32.gmra.mrb[92].mxu1 %vm4704_vm5, %v33338_v33  ;;  %v28531_v33 = vsel %vm4437_vm9, %v4381_v56, %v4493_v48  ;;  %v17881_v56 = vld [vmem:[%s32401_s3 + $0x70] sm:$0xff] }
 0x561   :  { %21866 = vmatprep.mubr.msk.f32.mxu1 %vm4704_vm5, %v33339_v35  ;;  %v6429_v35 = vrot.slane %v28413_v46, 1 }
 0x564   :  { %21867 = vmatmul.mubr.msk.f32.gmra.mrb[94].mxu1 %vm4704_vm5, %v33340_v10  ;;  %v33344_v10 = vld [vmem:[#allocation49_spill] sm:$0xff] }
 0x565   :  { %21869 = vmatprep.mubr.msk.f32.mxu1 %vm4704_vm5, %v33341_v37  ;;  %v32726_v37 = vrot.slane %v28531_v33, 1 }
 0x567   :  { %v28551_v48 = vsel %vm154_vm2, %v6429_v35, %v32726_v37  ;;  %v33348_v37 = vld [vmem:[#allocation53_spill] sm:$0xff] }
 0x568   :  { %21870 = vmatmul.mubr.msk.f32.gmra.mrb[96].mxu1 %vm4704_vm5, %v27860_v32  ;;  %v33345_v32 = vrot.slane %v27886_v25, 1  ;;  %33346 = vst [vmem:[#allocation66_spill] sm:$0xff] %v28551_v48 }
 0x569   :  { %21872 = vmatprep.mubr.msk.f32.mxu1 %vm4704_vm5, %v27863_v30 }
 0x56a   :  { %v28544_v18 = vsel %vm154_vm2, %v33345_v32, %v6429_v35  ;;  %v33347_v35 = vld [vmem:[#allocation52_spill] sm:$0xff] }
 0x56c   :  { %21873 = vmatmul.mubr.msk.f32.gmra.mrb[98].mxu1 %vm4704_vm5, %v33342_v27 }
 0x56d   :  { %21875 = vmatprep.mubr.msk.f32.mxu1 %vm4704_vm5, %v33343_v47 }
 0x570   :  { %21876 = vmatmul.mubr.msk.f32.gmra.mrb[100].mxu1 %vm4704_vm5, %v33344_v10  ;;  %v17882_v10 = vld [vmem:[%s32401_s3 + $0x78] sm:$0xff] }
 0x571   :  { %21878 = vmatprep.mubr.msk.f32.mxu1 %vm4704_vm5, %v28544_v18  ;;  %v28563_v32 = vpack.c.bf16 %v17882_v10, %v17881_v56  ;;  %v33352_v10 = vld [vmem:[#allocation61_spill] sm:$0xff] }
 0x572   :  { %v33354_v56 = vld [vmem:[#allocation65_spill] sm:$0xff] }
 0x574   :  { %21879 = vmatmul.mubr.msk.f32.gmra.mrb[102].mxu1 %vm4704_vm5, %v28551_v48  ;;  %v33349_v48 = vld [vmem:[#allocation56_spill] sm:$0xff] }
 0x575   :  { %21885 = vmatprep.mubr.msk.f32.mxu1 %vm4704_vm5, %v28024_v8  ;;  %v33350_v8 = vld [vmem:[#allocation57_spill] sm:$0xff] }
 0x578   :  { %21886 = vmatmul.mubr.msk.f32.vlgmr.msra.gmra.mrb[56].mxu1 %vm4704_vm5, %v28032_v31  ;;  %v33351_v31 = vld [vmem:[#allocation60_spill] sm:$0xff] }
 0x579   :  { %21888 = vmatprep.mubr.msk.f32.mxu1 %vm4704_vm5, %v28038_v63  ;;  %23562 = vmatpush3.bf16.msra.mxu1 %v28425_v44  ;;  %v33353_v44 = vld [vmem:[#allocation64_spill] sm:$0xff] }
 0x57a   :  { %23564 = vmatprep.subr.bf16.mxu1 %v28563_v32 }
 0x57c   :  { %21889 = vmatmul.mubr.msk.f32.gmra.mrb[58].mxu1 %vm4704_vm5, %v33347_v35  ;;  %v33355_v35 = vld [vmem:[#allocation67_spill] sm:$0xff] }
 0x57d   :  { %21891 = vmatprep.mubr.msk.f32.mxu1 %vm4704_vm5, %v33348_v37  ;;  %v33356_v37 = vld [vmem:[#allocation68_spill] sm:$0xff] }
 0x580   :  { %21892 = vmatmul.mubr.msk.f32.gmra.mrb[60].mxu1 %vm4704_vm5, %v33349_v48  ;;  %v33357_v48 = vld [vmem:[#allocation4_spill] sm:$0xff] }
 0x581   :  { %21894 = vmatprep.mubr.msk.f32.mxu1 %vm4704_vm5, %v33350_v8  ;;  %v33358_v8 = vld [vmem:[#allocation5_spill] sm:$0xff] }
 0x584   :  { %21895 = vmatmul.mubr.msk.f32.gmra.mrb[62].mxu1 %vm4704_vm5, %v33351_v31  ;;  %v33359_v31 = vld [vmem:[#allocation2_spill] sm:$0xff] }
 0x585   :  { %21897 = vmatprep.mubr.msk.f32.mxu1 %vm4704_vm5, %v33352_v10  ;;  %v33360_v10 = vld [vmem:[#allocation6_spill] sm:$0xff] }
 0x588   :  { %21898 = vmatmul.mubr.msk.f32.gmra.mrb[64].mxu1 %vm4704_vm5, %v33353_v44  ;;  %v33361_v44 = vld [vmem:[#allocation70_spill] sm:$0xff] }
 0x589   :  { %21900 = vmatprep.mubr.msk.f32.mxu1 %vm4704_vm5, %v33354_v56  ;;  %v33362_v56 = vld [vmem:[#allocation28_spill] sm:$0xff] }
 0x58c   :  { %21901 = vmatmul.mubr.msk.f32.gmra.mrb[66].mxu1 %vm4704_vm5, %v33355_v35  ;;  %v33363_v35 = vld [vmem:[#allocation71_spill] sm:$0xff] }
 0x58d   :  { %21903 = vmatprep.mubr.msk.f32.mxu1 %vm4704_vm5, %v33356_v37  ;;  %v6797_v37 = vrot.slane %v28361_v19, 2 }
 0x590   :  { %21904 = vmatmul.mubr.msk.f32.gmra.mrb[68].mxu1 %vm4704_vm5, %v33357_v48 }
 0x591   :  { %21906 = vmatprep.mubr.msk.f32.mxu1 %vm4704_vm5, %v33358_v8  ;;  %v32730_v8 = vrot.slane %v28467_v6, 2 }
 0x594   :  { %21907 = vmatmul.mubr.msk.f32.gmra.mrb[70].mxu1 %vm4704_vm5, %v33359_v31  ;;  %v33364_v31 = vld [vmem:[#allocation30_spill] sm:$0xff] }
 0x595   :  { %21909 = vmatprep.mubr.msk.f32.mxu1 %vm4704_vm5, %v33360_v10  ;;  %v33365_v10 = vrot.slane %v27636_v14, 2 }
 0x598   :  { %21910 = vmatmul.mubr.msk.f32.gmra.mrb[72].mxu1 %vm4704_vm5, %v33361_v44  ;;  %v28614_v44 = vsel %vm1186_vm1, %v33365_v10, %v6797_v37  ;;  %v33370_v10 = vld [vmem:[#allocation35_spill] sm:$0xff] }
 0x599   :  { %21912 = vmatprep.mubr.msk.f32.mxu1 %vm4704_vm5, %v33362_v56  ;;  %33366 = vst [vmem:[#allocation74_spill] sm:$0xff] %v28614_v44 }
 0x59c   :  { %21913 = vmatmul.mubr.msk.f32.gmra.mrb[74].mxu1 %vm4704_vm5, %v33363_v35  ;;  %v28621_v35 = vsel %vm1186_vm1, %v6797_v37, %v32730_v8  ;;  %v33372_v37 = vld [vmem:[#allocation78_spill] sm:$0xff]  ;;  %v33373_v8 = vld [vmem:[#allocation79_spill] sm:$0xff] }
 0x59d   :  { %21915 = vmatprep.mubr.msk.f32.mxu1 %vm4704_vm5, %v28146_v4  ;;  %33367 = vst [vmem:[#allocation11_spill] sm:$0xff] %v28621_v35  ;;  %v33369_v4 = vld [vmem:[#allocation36_spill] sm:$0xff] }
 0x5a0   :  { %21916 = vmatmul.mubr.msk.f32.gmra.mrb[76].mxu1 %vm4704_vm5, %v33364_v31  ;;  %v33368_v31 = vld [vmem:[#allocation34_spill] sm:$0xff] }
 0x5a1   :  { %21918 = vmatprep.mubr.msk.f32.mxu1 %vm4704_vm5, %v28614_v44  ;;  %v33371_v44 = vld [vmem:[#allocation37_spill] sm:$0xff] }
 0x5a4   :  { %21919 = vmatmul.mubr.msk.f32.gmra.mrb[78].mxu1 %vm4704_vm5, %v28621_v35  ;;  %v33374_v35 = vld [vmem:[#allocation80_spill] sm:$0xff] }
 0x5a5   :  { %21921 = vmatprep.mubr.msk.f32.mxu1 %vm4704_vm5, %v28167_v41  ;;  %v33375_v41 = vld [vmem:[#allocation81_spill] sm:$0xff] }
 0x5a8   :  { %21922 = vmatmul.mubr.msk.f32.gmra.mrb[80].mxu1 %vm4704_vm5, %v33368_v31  ;;  %v33376_v31 = vld [vmem:[#allocation82_spill] sm:$0xff] }
 0x5a9   :  { %21924 = vmatprep.mubr.msk.f32.mxu1 %vm4704_vm5, %v33369_v4  ;;  %v33377_v4 = vld [vmem:[#allocation83_spill] sm:$0xff] }
 0x5ac   :  { %21925 = vmatmul.mubr.msk.f32.gmra.mrb[82].mxu1 %vm4704_vm5, %v33370_v10  ;;  %v33378_v10 = vld [vmem:[#allocation84_spill] sm:$0xff] }
 0x5ad   :  { %21927 = vmatprep.mubr.msk.f32.mxu1 %vm4704_vm5, %v33371_v44  ;;  %v33379_v44 = vld [vmem:[#allocation85_spill] sm:$0xff] }
 0x5b0   :  { %21928 = vmatmul.mubr.msk.f32.gmra.mrb[84].mxu1 %vm4704_vm5, %v33372_v37  ;;  %v33380_v37 = vld [vmem:[#allocation86_spill] sm:$0xff] }
 0x5b1   :  { %21930 = vmatprep.mubr.msk.f32.mxu1 %vm4704_vm5, %v33373_v8  ;;  %v33381_v8 = vld [vmem:[#allocation87_spill] sm:$0xff] }
 0x5b4   :  { %21931 = vmatmul.mubr.msk.f32.gmra.mrb[86].mxu1 %vm4704_vm5, %v33374_v35  ;;  %v33382_v35 = vld [vmem:[#allocation88_spill] sm:$0xff] }
 0x5b5   :  { %21933 = vmatprep.mubr.msk.f32.mxu1 %vm4704_vm5, %v33375_v41  ;;  %v33383_v41 = vld [vmem:[#allocation89_spill] sm:$0xff] }
 0x5b8   :  { %21934 = vmatmul.mubr.msk.f32.gmra.mrb[88].mxu1 %vm4704_vm5, %v33376_v31 }
 0x5b9   :  { %21936 = vmatprep.mubr.msk.f32.mxu1 %vm4704_vm5, %v33377_v4  ;;  %v33384_v4 = vld [vmem:[#allocation91_spill] sm:$0xff] }
 0x5bc   :  { %21937 = vmatmul.mubr.msk.f32.gmra.mrb[90].mxu1 %vm4704_vm5, %v33378_v10 }
 0x5bd   :  { %21939 = vmatprep.mubr.msk.f32.mxu1 %vm4704_vm5, %v33379_v44  ;;  %v6801_v44 = vrot.slane %v28413_v46, 2 }
 0x5c0   :  { %21940 = vmatmul.mubr.msk.f32.gmra.mrb[92].mxu1 %vm4704_vm5, %v33380_v37 }
 0x5c1   :  { %21942 = vmatprep.mubr.msk.f32.mxu1 %vm4704_vm5, %v33381_v8  ;;  %v6803_v8 = vrot.slane %v28531_v33, 2 }
 0x5c4   :  { %21943 = vmatmul.mubr.msk.f32.gmra.mrb[94].mxu1 %vm4704_vm5, %v33382_v35 }
 0x5c5   :  { %21945 = vmatprep.mubr.msk.f32.mxu1 %vm4704_vm5, %v33383_v41  ;;  %v33385_v41 = vrot.slane %v27886_v25, 2 }
 0x5c8   :  { %21946 = vmatmul.mubr.msk.f32.gmra.mrb[96].mxu1 %vm4704_vm5, %v28269_v29  ;;  %v28674_v29 = vsel %vm1186_vm1, %v33385_v41, %v6801_v44 }
 0x5c9   :  { %21948 = vmatprep.mubr.msk.f32.mxu1 %vm4704_vm5, %v33384_v4 }
 0x5cc   :  { %21949 = vmatmul.mubr.msk.f32.gmra.mrb[98].mxu1 %vm4704_vm5, %v28281_v21  ;;  %v28681_v21 = vsel %vm1186_vm1, %v6801_v44, %v6803_v8  ;;  %v33421_v44 = vld [vmem:[#allocation23_spill] sm:$0xff] }
 0x5cd   :  { %21951 = vmatprep.mubr.msk.f32.mxu1 %vm4704_vm5, %v28287_v34  ;;  %v17931_v34 = vld [vmem:[%s32401_s3 + $0x80] sm:$0xff] }
 0x5d0   :  { %21952 = vmatmul.mubr.msk.f32.gmra.mrb[100].mxu1 %vm4704_vm5, %v28294_v5  ;;  %v17932_v5 = vld [vmem:[%s32401_s3 + $0x88] sm:$0xff] }
 0x5d1   :  { %21954 = vmatprep.mubr.msk.f32.mxu1 %vm4704_vm5, %v28674_v29  ;;  %v23567_v41 = vpack.c.bf16 %v17932_v5, %v17931_v34  ;;  %v33415_v34 = vld [vmem:[#allocation17_spill] sm:$0xff]  ;;  %v33416_v5 = vld [vmem:[#allocation18_spill] sm:$0xff] }
 0x5d4   :  { %21955 = vmatmul.mubr.msk.f32.gmra.mrb[102].mxu1 %vm4704_vm5, %v28681_v21 }
 0x5d5   :  { %21961 = vmatprep.mubr.msk.f32.mxu1 %vm4704_vm5, %v27432_v43 }
 0x5d8   :  { %21962 = vmatmul.mubr.msk.f32.vlgmr.msra.gmra.mrb[56].mxu1 %vm4704_vm5, %v27426_v38  ;;  %v33386_v38 = vld [vmem:[#allocation10_spill] sm:$0xff] }
 0x5d9   :  { %21964 = vmatprep.mubr.msk.f32.mxu1 %vm4704_vm5, %v27454_v28  ;;  %23566 = vmatpush3.bf16.msra.mxu1 %v28563_v32  ;;  %v4354_v43 = vadd.f32 %v28349_v1, %v33386_v38  ;;  %v33420_v32 = vld [vmem:[#allocation22_spill] sm:$0xff]  ;;  %v33423_v38 = vld [vmem:[#allocation25_spill] sm:$0xff] }
 0x5da   :  { %23568 = vmatprep.subr.bf16.mxu1 %v23567_v41 }
 0x5db   :  { %vm4410_vm10 = vcmp.ge.f32.partialorder %v4354_v43, 0.0 }
 0x5dc   :  { %21965 = vmatmul.mubr.msk.f32.gmra.mrb[58].mxu1 %vm4704_vm5, %v27452_v24  ;;  %v4466_v24 = vmul.f32 0.2, %v4354_v43 }
 0x5dd   :  { %21967 = vmatprep.mubr.msk.f32.mxu1 %vm4704_vm5, %v27476_v59  ;;  %v33388_v59 = vld [vmem:[#allocation40_spill] sm:$0xff] }
 0x5de   :  { %v28740_v28 = vsel %vm4410_vm10, %v4354_v43, %v4466_v24  ;;  %v17982_v43 = vld [vmem:[%s32403_s4 + $0x8] sm:$0xff]  ;;  %v33424_v24 = vld [vmem:[#allocation26_spill] sm:$0xff] }
 0x5e0   :  { %21968 = vmatmul.mubr.msk.f32.gmra.mrb[60].mxu1 %vm4704_vm5, %v27465_v11  ;;  %v33387_v11 = vld [vmem:[#allocation31_spill] sm:$0xff] }
 0x5e1   :  { %21970 = vmatprep.mubr.msk.f32.mxu1 %vm4704_vm5, %v27488_v17  ;;  %v33390_v17 = vld [vmem:[#allocation44_spill] sm:$0xff] }
 0x5e4   :  { %21971 = vmatmul.mubr.msk.f32.gmra.mrb[62].mxu1 %vm4704_vm5, %v27485_v15  ;;  %v33389_v15 = vld [vmem:[#allocation3_spill] sm:$0xff] }
 0x5e5   :  { %21973 = vmatprep.mubr.msk.f32.mxu1 %vm4704_vm5, %v27511_v62 }
 0x5e8   :  { %21974 = vmatmul.mubr.msk.f32.gmra.mrb[64].mxu1 %vm4704_vm5, %v27505_v0  ;;  %v33391_v0 = vld [vmem:[#allocation45_spill] sm:$0xff] }
 0x5e9   :  { %21976 = vmatprep.mubr.msk.f32.mxu1 %vm4704_vm5, %v27534_v7  ;;  %v4382_v62 = vadd.f32 %v28349_v1, %v33391_v0  ;;  %v33417_v1 = vld [vmem:[#allocation19_spill] sm:$0xff] }
 0x5ea   :  { %v33429_v0 = vld [vmem:[#allocation39_spill] sm:$0xff] }
 0x5eb   :  { %v4494_v7 = vmul.f32 0.2, %v4382_v62  ;;  %vm4438_vm11 = vcmp.ge.f32.partialorder %v4382_v62, 0.0 }
 0x5ec   :  { %21977 = vmatmul.mubr.msk.f32.gmra.mrb[66].mxu1 %vm4704_vm5, %v27525_v51  ;;  %v33392_v51 = vld [vmem:[#allocation42_spill] sm:$0xff] }
 0x5ed   :  { %21979 = vmatprep.mubr.msk.f32.mxu1 %vm4704_vm5, %v27554_v52  ;;  %v33393_v52 = vld [vmem:[#allocation69_spill] sm:$0xff] }
 0x5f0   :  { %21980 = vmatmul.mubr.msk.f32.gmra.mrb[68].mxu1 %vm4704_vm5, %v27545_v60  ;;  %v28792_v60 = vsel %vm4438_vm11, %v4382_v62, %v4494_v7  ;;  %v33430_v62 = vld [vmem:[#allocation43_spill] sm:$0xff]  ;;  %v33431_v7 = vld [vmem:[#allocation49_spill] sm:$0xff] }
 0x5f1   :  { %21982 = vmatprep.mubr.msk.f32.mxu1 %vm4704_vm5, %v27574_v13  ;;  %v33395_v13 = vld [vmem:[#allocation76_spill] sm:$0xff] }
 0x5f4   :  { %21983 = vmatmul.mubr.msk.f32.gmra.mrb[70].mxu1 %vm4704_vm5, %v27565_v55  ;;  %v33394_v55 = vld [vmem:[#allocation75_spill] sm:$0xff] }
 0x5f5   :  { %21985 = vmatprep.mubr.msk.f32.mxu1 %vm4704_vm5, %v27594_v61  ;;  %v33397_v61 = vld [vmem:[#allocation50_spill] sm:$0xff] }
 0x5f8   :  { %21986 = vmatmul.mubr.msk.f32.gmra.mrb[72].mxu1 %vm4704_vm5, %v27585_v57  ;;  %v33396_v57 = vld [vmem:[#allocation47_spill] sm:$0xff] }
 0x5f9   :  { %21988 = vmatprep.mubr.msk.f32.mxu1 %vm4704_vm5, %v27615_v36  ;;  %v33399_v36 = vld [vmem:[#allocation54_spill] sm:$0xff] }
 0x5fc   :  { %21989 = vmatmul.mubr.msk.f32.gmra.mrb[74].mxu1 %vm4704_vm5, %v27607_v45  ;;  %v33398_v45 = vld [vmem:[#allocation51_spill] sm:$0xff] }
 0x5fd   :  { %21991 = vmatprep.mubr.msk.f32.mxu1 %vm4704_vm5, %v27636_v14  ;;  %v33400_v14 = vld [vmem:[#allocation55_spill] sm:$0xff] }
 0x600   :  { %21992 = vmatmul.mubr.msk.f32.gmra.mrb[76].mxu1 %vm4704_vm5, %v28361_v19  ;;  %v33418_v19 = vld [vmem:[#allocation20_spill] sm:$0xff] }
 0x601   :  { %21994 = vmatprep.mubr.msk.f32.mxu1 %vm4704_vm5, %v28467_v6 }
 0x604   :  { %21995 = vmatmul.mubr.msk.f32.gmra.mrb[78].mxu1 %vm4704_vm5, %v28740_v28 }
 0x605   :  { %21997 = vmatprep.mubr.msk.f32.mxu1 %vm4704_vm5, %v27685_v53  ;;  %v33402_v53 = vld [vmem:[#allocation59_spill] sm:$0xff] }
 0x608   :  { %21998 = vmatmul.mubr.msk.f32.gmra.mrb[80].mxu1 %vm4704_vm5, %v27678_v42  ;;  %v33401_v42 = vld [vmem:[#allocation58_spill] sm:$0xff] }
 0x609   :  { %22000 = vmatprep.mubr.msk.f32.mxu1 %vm4704_vm5, %v27704_v26  ;;  %v33404_v26 = vld [vmem:[#allocation63_spill] sm:$0xff] }
 0x60c   :  { %22001 = vmatmul.mubr.msk.f32.gmra.mrb[82].mxu1 %vm4704_vm5, %v27695_v3  ;;  %v33403_v3 = vld [vmem:[#allocation62_spill] sm:$0xff] }
 0x60d   :  { %22003 = vmatprep.mubr.msk.f32.mxu1 %vm4704_vm5, %v27724_v40  ;;  %v33406_v40 = vld [vmem:[#allocation73_spill] sm:$0xff] }
 0x610   :  { %22004 = vmatmul.mubr.msk.f32.gmra.mrb[84].mxu1 %vm4704_vm5, %v27715_v20  ;;  %v33405_v20 = vld [vmem:[#allocation72_spill] sm:$0xff] }
 0x611   :  { %22006 = vmatprep.mubr.msk.f32.mxu1 %vm4704_vm5, %v27744_v54  ;;  %v33408_v54 = vld [vmem:[#allocation8_spill] sm:$0xff] }
 0x614   :  { %22007 = vmatmul.mubr.msk.f32.gmra.mrb[86].mxu1 %vm4704_vm5, %v27735_v16  ;;  %v33407_v16 = vld [vmem:[#allocation77_spill] sm:$0xff] }
 0x615   :  { %22009 = vmatprep.mubr.msk.f32.mxu1 %vm4704_vm5, %v27764_v39  ;;  %v7536_v39 = vrot.slane %v28740_v28, 1 }
 0x618   :  { %22010 = vmatmul.mubr.msk.f32.gmra.mrb[88].mxu1 %vm4704_vm5, %v27755_v58  ;;  %v33409_v58 = vld [vmem:[#allocation13_spill] sm:$0xff] }
 0x619   :  { %22012 = vmatprep.mubr.msk.f32.mxu1 %vm4704_vm5, %v27784_v49  ;;  %v33411_v49 = vld [vmem:[#allocation7_spill] sm:$0xff] }
 0x61c   :  { %22013 = vmatmul.mubr.msk.f32.gmra.mrb[90].mxu1 %vm4704_vm5, %v27775_v2  ;;  %v33410_v2 = vld [vmem:[#allocation14_spill] sm:$0xff] }
 0x61d   :  { %22015 = vmatprep.mubr.msk.f32.mxu1 %vm4704_vm5, %v27804_v23 }
 0x620   :  { %22016 = vmatmul.mubr.msk.f32.gmra.mrb[92].mxu1 %vm4704_vm5, %v27795_v12  ;;  %v25270_v12 = vmov 0.0  }
 0x621   :  { %22018 = vmatprep.mubr.msk.f32.mxu1 %vm4704_vm5, %v27824_v50  ;;  %v28839_v23 = vrot.slane %v25270_v12, 1  ;;  %v33413_v50 = vld [vmem:[#allocation41_spill] sm:$0xff] }
 0x623   :  { %33412 = vst [vmem:[#allocation9_spill] sm:$0xff] %v28839_v23 }
 0x624   :  { %22019 = vmatmul.mubr.msk.f32.gmra.mrb[94].mxu1 %vm4704_vm5, %v33387_v11  ;;  %v33425_v11 = vld [vmem:[#allocation27_spill] sm:$0xff] }
 0x625   :  { %22021 = vmatprep.mubr.msk.f32.mxu1 %vm4704_vm5, %v33388_v59  ;;  %v33426_v59 = vld [vmem:[#allocation32_spill] sm:$0xff] }
 0x628   :  { %22022 = vmatmul.mubr.msk.f32.gmra.mrb[96].mxu1 %vm4704_vm5, %v33389_v15  ;;  %v33427_v15 = vld [vmem:[#allocation33_spill] sm:$0xff] }
 0x629   :  { %22024 = vmatprep.mubr.msk.f32.mxu1 %vm4704_vm5, %v33390_v17  ;;  %v33428_v17 = vld [vmem:[#allocation38_spill] sm:$0xff] }
 0x62c   :  { %22025 = vmatmul.mubr.msk.f32.gmra.mrb[98].mxu1 %vm4704_vm5, %v33392_v51  ;;  %v7540_v51 = vrot.slane %v28792_v60, 1 }
 0x62d   :  { %22027 = vmatprep.mubr.msk.f32.mxu1 %vm4704_vm5, %v27886_v25  ;;  %v7539_v25 = vsel %vm154_vm2, %v7536_v39, %v28839_v23 }
 0x630   :  { %22028 = vmatmul.mubr.msk.f32.gmra.mrb[100].mxu1 %vm4704_vm5, %v28413_v46  ;;  %v33419_v46 = vld [vmem:[#allocation21_spill] sm:$0xff] }
 0x631   :  { %22030 = vmatprep.mubr.msk.f32.mxu1 %vm4704_vm5, %v28531_v33 }
 0x634   :  { %22031 = vmatmul.mubr.msk.f32.gmra.mrb[102].mxu1 %vm4704_vm5, %v28792_v60 }
 0x635   :  { %22037 = vmatprep.mubr.msk.f32.mxu1 %vm4704_vm5, %v33393_v52  ;;  %v33432_v52 = vld [vmem:[#allocation66_spill] sm:$0xff] }
 0x638   :  { %22038 = vmatmul.mubr.msk.f32.vlgmr.msra.gmra.mrb[56].mxu1 %vm4704_vm5, %v33394_v55  ;;  %v33433_v55 = vrot.slane %v28531_v33, 1 }
 0x639   :  { %22040 = vmatprep.mubr.msk.f32.mxu1 %vm4704_vm5, %v33395_v13  ;;  %23570 = vmatpush3.bf16.msra.mxu1 %v23567_v41  ;;  %v33422_v41 = vld [vmem:[#allocation24_spill] sm:$0xff] }
 0x63a   :  { %22185 = vmatprep.subr.mxu1 %v17982_v43  ;;  %v33436_v13 = vld [vmem:[#allocation56_spill] sm:$0xff] }
 0x63c   :  { %22041 = vmatmul.mubr.msk.f32.gmra.mrb[58].mxu1 %vm4704_vm5, %v33396_v57  ;;  %v33437_v57 = vld [vmem:[#allocation57_spill] sm:$0xff] }
 0x63d   :  { %22043 = vmatprep.mubr.msk.f32.mxu1 %vm4704_vm5, %v33397_v61  ;;  %v33438_v61 = vld [vmem:[#allocation60_spill] sm:$0xff] }
 0x640   :  { %22044 = vmatmul.mubr.msk.f32.gmra.mrb[60].mxu1 %vm4704_vm5, %v33398_v45  ;;  %v33439_v45 = vld [vmem:[#allocation61_spill] sm:$0xff] }
 0x641   :  { %22046 = vmatprep.mubr.msk.f32.mxu1 %vm4704_vm5, %v33399_v36  ;;  %v33441_v36 = vld [vmem:[#allocation65_spill] sm:$0xff] }
 0x644   :  { %22047 = vmatmul.mubr.msk.f32.gmra.mrb[62].mxu1 %vm4704_vm5, %v33400_v14  ;;  %v33442_v14 = vld [vmem:[#allocation67_spill] sm:$0xff] }
 0x645   :  { %22049 = vmatprep.mubr.msk.f32.mxu1 %vm4704_vm5, %v33401_v42  ;;  %v33443_v42 = vld [vmem:[#allocation68_spill] sm:$0xff] }
 0x648   :  { %22050 = vmatmul.mubr.msk.f32.gmra.mrb[64].mxu1 %vm4704_vm5, %v33402_v53  ;;  %v33444_v53 = vld [vmem:[#allocation5_spill] sm:$0xff] }
 0x649   :  { %22052 = vmatprep.mubr.msk.f32.mxu1 %vm4704_vm5, %v33403_v3  ;;  %v33445_v3 = vld [vmem:[#allocation2_spill] sm:$0xff] }
 0x64c   :  { %22053 = vmatmul.mubr.msk.f32.gmra.mrb[66].mxu1 %vm4704_vm5, %v33404_v26  ;;  %v33446_v26 = vld [vmem:[#allocation6_spill] sm:$0xff] }
 0x64d   :  { %22055 = vmatprep.mubr.msk.f32.mxu1 %vm4704_vm5, %v33405_v20  ;;  %v33447_v20 = vld [vmem:[#allocation70_spill] sm:$0xff] }
 0x650   :  { %22056 = vmatmul.mubr.msk.f32.gmra.mrb[68].mxu1 %vm4704_vm5, %v33406_v40  ;;  %v33448_v40 = vld [vmem:[#allocation71_spill] sm:$0xff] }
 0x651   :  { %22058 = vmatprep.mubr.msk.f32.mxu1 %vm4704_vm5, %v33407_v16  ;;  %v33449_v16 = vld [vmem:[#allocation29_spill] sm:$0xff] }
 0x654   :  { %22059 = vmatmul.mubr.msk.f32.gmra.mrb[70].mxu1 %vm4704_vm5, %v33408_v54  ;;  %v33450_v54 = vld [vmem:[#allocation30_spill] sm:$0xff] }
 0x655   :  { %22061 = vmatprep.mubr.msk.f32.mxu1 %vm4704_vm5, %v33318_v22  ;;  %v33414_v22 = vrot.slane %v28467_v6, 1 }
 0x658   :  { %22062 = vmatmul.mubr.msk.f32.gmra.mrb[72].mxu1 %vm4704_vm5, %v33319_v9  ;;  %v7537_v9 = vsel %vm154_vm2, %v33414_v22, %v7536_v39  ;;  %v28948_v39 = vrot.slane %v25270_v12, 2  ;;  %v33456_v22 = vld [vmem:[#allocation35_spill] sm:$0xff]  ;;  %v33457_v12 = vld [vmem:[#allocation37_spill] sm:$0xff] }
 0x659   :  { %22064 = vmatprep.mubr.msk.f32.mxu1 %vm4704_vm5, %v33409_v58  ;;  %v33451_v58 = vld [vmem:[#allocation74_spill] sm:$0xff] }
 0x65a   :  { %33452 = vst [vmem:[#allocation12_spill] sm:$0xff] %v28948_v39 }
 0x65c   :  { %22065 = vmatmul.mubr.msk.f32.gmra.mrb[74].mxu1 %vm4704_vm5, %v33410_v2  ;;  %v33453_v2 = vld [vmem:[#allocation11_spill] sm:$0xff] }
 0x65d   :  { %22067 = vmatprep.mubr.msk.f32.mxu1 %vm4704_vm5, %v33411_v49 }
 0x660   :  { %22068 = vmatmul.mubr.msk.f32.gmra.mrb[76].mxu1 %vm4704_vm5, %v33413_v50  ;;  %v33455_v50 = vld [vmem:[#allocation36_spill] sm:$0xff] }
 0x661   :  { %22070 = vmatprep.mubr.msk.f32.mxu1 %vm4704_vm5, %v7537_v9  ;;  %v33458_v9 = vld [vmem:[#allocation78_spill] sm:$0xff] }
 0x664   :  { %22071 = vmatmul.mubr.msk.f32.gmra.mrb[78].mxu1 %vm4704_vm5, %v7539_v25  ;;  %v33460_v25 = vld [vmem:[#allocation80_spill] sm:$0xff] }
 0x665   :  { %22073 = vmatprep.mubr.msk.f32.mxu1 %vm4704_vm5, %v33415_v34  ;;  %v33461_v34 = vld [vmem:[#allocation81_spill] sm:$0xff] }
 0x668   :  { %22074 = vmatmul.mubr.msk.f32.gmra.mrb[80].mxu1 %vm4704_vm5, %v33416_v5  ;;  %v33462_v5 = vld [vmem:[#allocation83_spill] sm:$0xff] }
 0x669   :  { %22076 = vmatprep.mubr.msk.f32.mxu1 %vm4704_vm5, %v33417_v1  ;;  %v33463_v1 = vld [vmem:[#allocation85_spill] sm:$0xff] }
 0x66c   :  { %22077 = vmatmul.mubr.msk.f32.gmra.mrb[82].mxu1 %vm4704_vm5, %v33418_v19  ;;  %v33464_v19 = vld [vmem:[#allocation87_spill] sm:$0xff] }
 0x66d   :  { %22079 = vmatprep.mubr.msk.f32.mxu1 %vm4704_vm5, %v33419_v46  ;;  %v33465_v46 = vld [vmem:[#allocation89_spill] sm:$0xff] }
 0x670   :  { %22080 = vmatmul.mubr.msk.f32.gmra.mrb[84].mxu1 %vm4704_vm5, %v33420_v32  ;;  %v33468_v32 = vld [vmem:[#allocation93_spill] sm:$0xff] }
 0x671   :  { %22082 = vmatprep.mubr.msk.f32.mxu1 %vm4704_vm5, %v33421_v44  ;;  %v33469_v44 = vld [vmem:[#allocation94_spill] sm:$0xff] }
 0x674   :  { %22083 = vmatmul.mubr.msk.f32.gmra.mrb[86].mxu1 %vm4704_vm5, %v33422_v41 }
 0x675   :  { %22085 = vmatprep.mubr.msk.f32.mxu1 %vm4704_vm5, %v33423_v38 }
 0x678   :  { %22086 = vmatmul.mubr.msk.f32.gmra.mrb[88].mxu1 %vm4704_vm5, %v33424_v24 }
 0x679   :  { %22088 = vmatprep.mubr.msk.f32.mxu1 %vm4704_vm5, %v33425_v11 }
 0x67c   :  { %22089 = vmatmul.mubr.msk.f32.gmra.mrb[90].mxu1 %vm4704_vm5, %v33426_v59 }
 0x67d   :  { %22091 = vmatprep.mubr.msk.f32.mxu1 %vm4704_vm5, %v33427_v15 }
 0x680   :  { %22092 = vmatmul.mubr.msk.f32.gmra.mrb[92].mxu1 %vm4704_vm5, %v33428_v17 }
 0x681   :  { %22094 = vmatprep.mubr.msk.f32.mxu1 %vm4704_vm5, %v33429_v0 }
 0x684   :  { %22095 = vmatmul.mubr.msk.f32.gmra.mrb[94].mxu1 %vm4704_vm5, %v33430_v62 }
 0x685   :  { %22097 = vmatprep.mubr.msk.f32.mxu1 %vm4704_vm5, %v27863_v30  ;;  %v7541_v30 = vsel %vm154_vm2, %v33433_v55, %v7540_v51 }
 0x688   :  { %22098 = vmatmul.mubr.msk.f32.gmra.mrb[96].mxu1 %vm4704_vm5, %v33342_v27  ;;  %v7542_v27 = vsel %vm154_vm2, %v7540_v51, %v28839_v23 }
 0x689   :  { %22100 = vmatprep.mubr.msk.f32.mxu1 %vm4704_vm5, %v33343_v47  ;;  %v33434_v47 = vld [vmem:[#allocation52_spill] sm:$0xff] }
 0x68c   :  { %22101 = vmatmul.mubr.msk.f32.gmra.mrb[98].mxu1 %vm4704_vm5, %v33431_v7 }
 0x68d   :  { %22103 = vmatprep.mubr.msk.f32.mxu1 %vm4704_vm5, %v28544_v18  ;;  %v33435_v18 = vld [vmem:[#allocation53_spill] sm:$0xff] }
 0x690   :  { %22104 = vmatmul.mubr.msk.f32.gmra.mrb[100].mxu1 %vm4704_vm5, %v33432_v52 }
 0x691   :  { %22106 = vmatprep.mubr.msk.f32.mxu1 %vm4704_vm5, %v7541_v30 }
 0x694   :  { %22107 = vmatmul.mubr.msk.f32.gmra.mrb[102].mxu1 %vm4704_vm5, %v7542_v27 }
 0x695   :  { %22113 = vmatprep.mubr.msk.f32.mxu1 %vm4704_vm5, %v28038_v63  ;;  %v33440_v63 = vld [vmem:[#allocation64_spill] sm:$0xff] }
 0x698   :  { %22114 = vmatmul.mubr.msk.f32.vlgmr.msra.gmra.mrb[56].mxu1 %vm4704_vm5, %v33434_v47 }
 0x699   :  { %22116 = vmatprep.mubr.msk.f32.mxu1 %vm4704_vm5, %v33435_v18  ;;  %22186 = vmatpush3.msra.mxu1 %v17982_v43 }
 0x69c   :  { %22117 = vmatmul.mubr.msk.f32.gmra.mrb[58].mxu1 %vm4704_vm5, %v33436_v13 }
 0x69d   :  { %22119 = vmatprep.mubr.msk.f32.mxu1 %vm4704_vm5, %v33437_v57 }
 0x6a0   :  { %22120 = vmatmul.mubr.msk.f32.gmra.mrb[60].mxu1 %vm4704_vm5, %v33438_v61 }
 0x6a1   :  { %22122 = vmatprep.mubr.msk.f32.mxu1 %vm4704_vm5, %v33439_v45 }
 0x6a4   :  { %22123 = vmatmul.mubr.msk.f32.gmra.mrb[62].mxu1 %vm4704_vm5, %v33440_v63 }
 0x6a5   :  { %22125 = vmatprep.mubr.msk.f32.mxu1 %vm4704_vm5, %v33441_v36 }
 0x6a8   :  { %22126 = vmatmul.mubr.msk.f32.gmra.mrb[64].mxu1 %vm4704_vm5, %v33442_v14 }
 0x6a9   :  { %22128 = vmatprep.mubr.msk.f32.mxu1 %vm4704_vm5, %v33443_v42 }
 0x6ac   :  { %22129 = vmatmul.mubr.msk.f32.gmra.mrb[66].mxu1 %vm4704_vm5, %v33357_v48  ;;  %v7907_v48 = vrot.slane %v28740_v28, 2 }
 0x6ad   :  { %22131 = vmatprep.mubr.msk.f32.mxu1 %vm4704_vm5, %v33444_v53 }
 0x6ae   :  { %v7910_v28 = vsel %vm1186_vm1, %v7907_v48, %v28948_v39 }
 0x6b0   :  { %22132 = vmatmul.mubr.msk.f32.gmra.mrb[68].mxu1 %vm4704_vm5, %v33445_v3 }
 0x6b1   :  { %22134 = vmatprep.mubr.msk.f32.mxu1 %vm4704_vm5, %v33446_v26 }
 0x6b4   :  { %22135 = vmatmul.mubr.msk.f32.gmra.mrb[70].mxu1 %vm4704_vm5, %v33447_v20 }
 0x6b5   :  { %22137 = vmatprep.mubr.msk.f32.mxu1 %vm4704_vm5, %v33362_v56  ;;  %v33454_v56 = vrot.slane %v28467_v6, 2  ;;  %v33459_v6 = vld [vmem:[#allocation79_spill] sm:$0xff] }
 0x6b7   :  { %v7908_v49 = vsel %vm1186_vm1, %v33454_v56, %v7907_v48 }
 0x6b8   :  { %22138 = vmatmul.mubr.msk.f32.gmra.mrb[72].mxu1 %vm4704_vm5, %v33448_v40  ;;  %v29049_v40 = vld [vmem:[%s32403_s4 + $0x10] sm:$0xff] }
 0x6b9   :  { %22140 = vmatprep.mubr.msk.f32.mxu1 %vm4704_vm5, %v33449_v16 }
 0x6bc   :  { %22141 = vmatmul.mubr.msk.f32.gmra.mrb[74].mxu1 %vm4704_vm5, %v33450_v54 }
 0x6bd   :  { %22143 = vmatprep.mubr.msk.f32.mxu1 %vm4704_vm5, %v33451_v58 }
 0x6c0   :  { %22144 = vmatmul.mubr.msk.f32.gmra.mrb[76].mxu1 %vm4704_vm5, %v33453_v2 }
 0x6c1   :  { %22146 = vmatprep.mubr.msk.f32.mxu1 %vm4704_vm5, %v7908_v49 }
 0x6c4   :  { %22147 = vmatmul.mubr.msk.f32.gmra.mrb[78].mxu1 %vm4704_vm5, %v7910_v28 }
 0x6c5   :  { %22149 = vmatprep.mubr.msk.f32.mxu1 %vm4704_vm5, %v33455_v50 }
 0x6c8   :  { %22150 = vmatmul.mubr.msk.f32.gmra.mrb[80].mxu1 %vm4704_vm5, %v33456_v22 }
 0x6c9   :  { %22152 = vmatprep.mubr.msk.f32.mxu1 %vm4704_vm5, %v33457_v12 }
 0x6cc   :  { %22153 = vmatmul.mubr.msk.f32.gmra.mrb[82].mxu1 %vm4704_vm5, %v33458_v9 }
 0x6cd   :  { %22155 = vmatprep.mubr.msk.f32.mxu1 %vm4704_vm5, %v33459_v6 }
 0x6d0   :  { %22156 = vmatmul.mubr.msk.f32.gmra.mrb[84].mxu1 %vm4704_vm5, %v33460_v25 }
 0x6d1   :  { %22158 = vmatprep.mubr.msk.f32.mxu1 %vm4704_vm5, %v33461_v34 }
 0x6d4   :  { %22159 = vmatmul.mubr.msk.f32.gmra.mrb[86].mxu1 %vm4704_vm5, %v33376_v31  ;;  %v33466_v31 = vld [vmem:[#allocation90_spill] sm:$0xff] }
 0x6d5   :  { %22161 = vmatprep.mubr.msk.f32.mxu1 %vm4704_vm5, %v33462_v5 }
 0x6d8   :  { %22162 = vmatmul.mubr.msk.f32.gmra.mrb[88].mxu1 %vm4704_vm5, %v33378_v10  ;;  %v33467_v10 = vld [vmem:[#allocation92_spill] sm:$0xff] }
 0x6d9   :  { %22164 = vmatprep.mubr.msk.f32.mxu1 %vm4704_vm5, %v33463_v1 }
 0x6dc   :  { %22165 = vmatmul.mubr.msk.f32.gmra.mrb[90].mxu1 %vm4704_vm5, %v33380_v37  ;;  %v7911_v37 = vrot.slane %v28792_v60, 2  ;;  %v8475_v60 = vld [vmem:[%s32403_s4] sm:$0xff] }
 0x6dd   :  { %22167 = vmatprep.mubr.msk.f32.mxu1 %vm4704_vm5, %v33464_v19  ;;  %22247 = vmatprep.subr.mxu1 %v8475_v60 }
 0x6e0   :  { %22168 = vmatmul.mubr.msk.f32.gmra.mrb[92].mxu1 %vm4704_vm5, %v33382_v35  ;;  %v7913_v35 = vsel %vm1186_vm1, %v7911_v37, %v28948_v39 }
 0x6e1   :  { %22170 = vmatprep.mubr.msk.f32.mxu1 %vm4704_vm5, %v33465_v46 }
 0x6e4   :  { %22171 = vmatmul.mubr.msk.f32.gmra.mrb[94].mxu1 %vm4704_vm5, %v33466_v31 }
 0x6e5   :  { %22173 = vmatprep.mubr.msk.f32.mxu1 %vm4704_vm5, %v33384_v4  ;;  %v7912_v4 = vsel %vm1186_vm1, %v6803_v8, %v7911_v37 }
 0x6e8   :  { %22174 = vmatmul.mubr.msk.f32.gmra.mrb[96].mxu1 %vm4704_vm5, %v33467_v10 }
 0x6e9   :  { %22176 = vmatprep.mubr.msk.f32.mxu1 %vm4704_vm5, %v33468_v32 }
 0x6ec   :  { %22177 = vmatmul.mubr.msk.f32.gmra.mrb[98].mxu1 %vm4704_vm5, %v33469_v44 }
 0x6ed   :  { %22179 = vmatprep.mubr.msk.f32.mxu1 %vm4704_vm5, %v28674_v29  ;;  %v29017_v29 = vld [vmem:[%s32402_s7 + $0x1] ss:$0 sm:$0xff] }
 0x6f0   :  { %22180 = vmatmul.mubr.msk.f32.gmra.mrb[100].mxu1 %vm4704_vm5, %v28681_v21 }
 0x6f1   :  { %22182 = vmatprep.mubr.msk.f32.mxu1 %vm4704_vm5, %v7912_v4 }
 0x6f4   :  { %22183 = vmatmul.mubr.msk.f32.gmra.mrb[102].mxu1 %vm4704_vm5, %v7913_v35 }
 0x76b   :  { %v22115_v21 = vpop.f32.mrb[56].mxu1 }
 0x76c   :  { %v8284_v33 = vadd.f32 %v22115_v21, %v29017_v29  ;;  %v7991_v8 = vpop.f32.mrb[57].mxu1 }
 0x76d   :  { %v8283_v41 = vadd.f32 %v29017_v29, %v7991_v8 }
 0x76e   :  { %vm8332_vm12 = vcmp.ge.f32.partialorder %v8284_v33, 0.0  ;;  %v8380_v38 = vmul.f32 0.2, %v8284_v33 }
 0x76f   :  { %vm8331_vm13 = vcmp.ge.f32.partialorder %v8283_v41, 0.0  ;;  %v8379_v43 = vmul.f32 0.2, %v8283_v41  ;;  %v22118_v24 = vpop.f32.mrb[58].mxu1 }
 0x770   :  { %v29021_v11 = vsel %vm8332_vm12, %v8284_v33, %v8380_v38  ;;  %v8286_v59 = vadd.f32 %v22118_v24, %v29017_v29  ;;  %v8001_v15 = vpop.f32.mrb[59].mxu1 }
 0x771   :  { %v8519_v17 = vrot.slane %v29021_v11, 1  ;;  %v29025_v0 = vsel %vm8331_vm13, %v8283_v41, %v8379_v43  ;;  %v8285_v62 = vadd.f32 %v29017_v29, %v8001_v15 }
 0x772   :  { %v8518_v51 = vrot.slane %v29025_v0, 1  ;;  %vm8334_vm5 = vcmp.ge.f32.partialorder %v8286_v59, 0.0  ;;  %v8382_v7 = vmul.f32 0.2, %v8286_v59 }
 0x773   :  { %vm8333_vm14 = vcmp.ge.f32.partialorder %v8285_v62, 0.0  ;;  %v8381_v52 = vmul.f32 0.2, %v8285_v62  ;;  %v22121_v55 = vpop.f32.mrb[60].mxu1 }
 0x774   :  { %v29029_v30 = vsel %vm8334_vm5, %v8286_v59, %v8382_v7  ;;  %v8288_v27 = vadd.f32 %v22121_v55, %v29017_v29  ;;  %v8011_v47 = vpop.f32.mrb[61].mxu1  ;;  %v8520_v18 = vsel %vm154_vm2, %v8518_v51, %v8519_v17 }
 0x775   :  { %v29033_v13 = vsel %vm8333_vm14, %v8285_v62, %v8381_v52  ;;  %v8287_v57 = vadd.f32 %v29017_v29, %v8011_v47  ;;  %22187 = vmatprep.mubr.msk.f32.mxu1 %vm271_vm0, %v8520_v18  ;;  %v8523_v61 = vrot.slane %v29029_v30, 1 }
 0x776   :  { %v8521_v45 = vrot.slane %v29033_v13, 1  ;;  %vm8336_vm15 = vcmp.ge.f32.partialorder %v8288_v27, 0.0  ;;  %v8384_v63 = vmul.f32 0.2, %v8288_v27 }
 0x777   :  { %vm8335_vm3 = vcmp.ge.f32.partialorder %v8287_v57, 0.0  ;;  %v8383_v36 = vmul.f32 0.2, %v8287_v57  ;;  %v22124_v14 = vpop.f32.mrb[62].mxu1 }
 0x778   :  { %v29039_v42 = vsel %vm8336_vm15, %v8288_v27, %v8384_v63  ;;  %v8290_v53 = vadd.f32 %v22124_v14, %v29017_v29  ;;  %v8021_v3 = vpop.f32.mrb[63].mxu1  ;;  %v8522_v26 = vsel %vm154_vm2, %v8519_v17, %v8521_v45  ;;  %v29044_v20 = vsel %vm154_vm2, %v8521_v45, %v8523_v61 }
 0x779   :  { %v29051_v16 = vsel %vm8335_vm3, %v8287_v57, %v8383_v36  ;;  %v8289_v48 = vadd.f32 %v29017_v29, %v8021_v3  ;;  %22188 = vmatmul.mubr.msk.f32.vlgmr.msra.gmra.mrb[104].mxu1 %vm271_vm0, %v8522_v26  ;;  %v8527_v54 = vrot.slane %v29039_v42, 1 }
 0x77a   :  { %vm8338_vm4 = vcmp.ge.f32.partialorder %v8290_v53, 0.0  ;;  %v8386_v58 = vmul.f32 0.2, %v8290_v53  ;;  %22190 = vmatprep.mubr.msk.f32.mxu1 %vm271_vm0, %v29044_v20  ;;  %v8525_v2 = vrot.slane %v29051_v16, 1  ;;  %22248 = vmatpush3.msra.mxu1 %v8475_v60 }
 0x77b   :  { %vm8337_vm6 = vcmp.ge.f32.partialorder %v8289_v48, 0.0  ;;  %v8385_v56 = vmul.f32 0.2, %v8289_v48  ;;  %v22127_v49 = vpop.f32.mrb[64].mxu1  ;;  %22309 = vmatprep.subr.mxu1 %v29049_v40 }
 0x77c   :  { %v29060_v28 = vsel %vm8338_vm4, %v8290_v53, %v8386_v58  ;;  %v8292_v50 = vadd.f32 %v22127_v49, %v29017_v29  ;;  %v8031_v22 = vpop.f32.mrb[65].mxu1  ;;  %v29064_v12 = vsel %vm154_vm2, %v8523_v61, %v8525_v2  ;;  %v29067_v9 = vsel %vm154_vm2, %v8525_v2, %v8527_v54 }
 0x77d   :  { %v29069_v6 = vsel %vm8337_vm6, %v8289_v48, %v8385_v56  ;;  %v8291_v25 = vadd.f32 %v29017_v29, %v8031_v22  ;;  %22191 = vmatmul.mubr.msk.f32.gmra.mrb[106].mxu1 %vm271_vm0, %v29064_v12  ;;  %v8531_v34 = vrot.slane %v29060_v28, 1 }
 0x77e   :  { %vm8340_vm7 = vcmp.ge.f32.partialorder %v8292_v50, 0.0  ;;  %v8388_v5 = vmul.f32 0.2, %v8292_v50  ;;  %22193 = vmatprep.mubr.msk.f32.mxu1 %vm271_vm0, %v29067_v9  ;;  %v8529_v1 = vrot.slane %v29069_v6, 1 }
 0x77f   :  { %vm8339_vm8 = vcmp.ge.f32.partialorder %v8291_v25, 0.0  ;;  %v8387_v19 = vmul.f32 0.2, %v8291_v25  ;;  %v22130_v46 = vpop.f32.mrb[66].mxu1 }
 0x780   :  { %v29078_v31 = vsel %vm8340_vm7, %v8292_v50, %v8388_v5  ;;  %v8294_v10 = vadd.f32 %v22130_v46, %v29017_v29  ;;  %v8041_v32 = vpop.f32.mrb[67].mxu1  ;;  %v29082_v37 = vsel %vm154_vm2, %v8527_v54, %v8529_v1  ;;  %v29085_v44 = vsel %vm154_vm2, %v8529_v1, %v8531_v34 }
 0x781   :  { %v29087_v4 = vsel %vm8339_vm8, %v8291_v25, %v8387_v19  ;;  %v8293_v35 = vadd.f32 %v29017_v29, %v8041_v32  ;;  %22194 = vmatmul.mubr.msk.f32.gmra.mrb[108].mxu1 %vm271_vm0, %v29082_v37  ;;  %v8535_v60 = vrot.slane %v29078_v31, 1 }
 0x782   :  { %vm8342_vm9 = vcmp.ge.f32.partialorder %v8294_v10, 0.0  ;;  %v8390_v21 = vmul.f32 0.2, %v8294_v10  ;;  %22196 = vmatprep.mubr.msk.f32.mxu1 %vm271_vm0, %v29085_v44  ;;  %v8533_v33 = vrot.slane %v29087_v4, 1 }
 0x783   :  { %vm8341_vm10 = vcmp.ge.f32.partialorder %v8293_v35, 0.0  ;;  %v8389_v8 = vmul.f32 0.2, %v8293_v35  ;;  %v22133_v41 = vpop.f32.mrb[68].mxu1 }
 0x784   :  { %v29096_v38 = vsel %vm8342_vm9, %v8294_v10, %v8390_v21  ;;  %v8296_v43 = vadd.f32 %v22133_v41, %v29017_v29  ;;  %v8051_v24 = vpop.f32.mrb[69].mxu1  ;;  %v29100_v59 = vsel %vm154_vm2, %v8531_v34, %v8533_v33  ;;  %v29103_v15 = vsel %vm154_vm2, %v8533_v33, %v8535_v60 }
 0x785   :  { %33470 = vst [vmem:[#allocation15_spill] sm:$0xff] %v29100_v59  ;;  %33471 = vst [vmem:[#allocation16_spill] sm:$0xff] %v29103_v15  ;;  %v29105_v17 = vsel %vm8341_vm10, %v8293_v35, %v8389_v8  ;;  %v8295_v62 = vadd.f32 %v29017_v29, %v8051_v24  ;;  %22197 = vmatmul.mubr.msk.f32.gmra.mrb[110].mxu1 %vm271_vm0, %v29100_v59  ;;  %v8539_v51 = vrot.slane %v29096_v38, 1 }
 0x786   :  { %vm8344_vm11 = vcmp.ge.f32.partialorder %v8296_v43, 0.0  ;;  %v8392_v7 = vmul.f32 0.2, %v8296_v43  ;;  %22199 = vmatprep.mubr.msk.f32.mxu1 %vm271_vm0, %v29103_v15  ;;  %v8537_v52 = vrot.slane %v29105_v17, 1 }
 0x787   :  { %vm8343_vm12 = vcmp.ge.f32.partialorder %v8295_v62, 0.0  ;;  %v8391_v55 = vmul.f32 0.2, %v8295_v62  ;;  %v22136_v27 = vpop.f32.mrb[70].mxu1 }
 0x788   :  { %v29114_v47 = vsel %vm8344_vm11, %v8296_v43, %v8392_v7  ;;  %v8298_v18 = vadd.f32 %v22136_v27, %v29017_v29  ;;  %v8061_v57 = vpop.f32.mrb[71].mxu1  ;;  %v29118_v61 = vsel %vm154_vm2, %v8535_v60, %v8537_v52  ;;  %v29121_v45 = vsel %vm154_vm2, %v8537_v52, %v8539_v51 }
 0x789   :  { %33472 = vst [vmem:[#allocation46_spill] sm:$0xff] %v29118_v61  ;;  %33473 = vst [vmem:[#allocation48_spill] sm:$0xff] %v29121_v45  ;;  %v29123_v63 = vsel %vm8343_vm12, %v8295_v62, %v8391_v55  ;;  %v8297_v36 = vadd.f32 %v29017_v29, %v8061_v57  ;;  %22200 = vmatmul.mubr.msk.f32.gmra.mrb[112].mxu1 %vm271_vm0, %v29118_v61  ;;  %v8543_v14 = vrot.slane %v29114_v47, 1 }
 0x78a   :  { %vm8346_vm13 = vcmp.ge.f32.partialorder %v8298_v18, 0.0  ;;  %v8394_v53 = vmul.f32 0.2, %v8298_v18  ;;  %22202 = vmatprep.mubr.msk.f32.mxu1 %vm271_vm0, %v29121_v45  ;;  %v8541_v3 = vrot.slane %v29123_v63, 1 }
 0x78b   :  { %vm8345_vm5 = vcmp.ge.f32.partialorder %v8297_v36, 0.0  ;;  %v8393_v26 = vmul.f32 0.2, %v8297_v36  ;;  %v22139_v48 = vpop.f32.mrb[72].mxu1 }
 0x78c   :  { %v29132_v54 = vsel %vm8346_vm13, %v8298_v18, %v8394_v53  ;;  %v8300_v58 = vadd.f32 %v22139_v48, %v29017_v29  ;;  %v8071_v2 = vpop.f32.mrb[73].mxu1  ;;  %v29136_v56 = vsel %vm154_vm2, %v8539_v51, %v8541_v3  ;;  %v29139_v49 = vsel %vm154_vm2, %v8541_v3, %v8543_v14 }
 0x78d   :  { %33474 = vst [vmem:[#allocation4_spill] sm:$0xff] %v29136_v56  ;;  %33475 = vst [vmem:[#allocation28_spill] sm:$0xff] %v29139_v49  ;;  %v29141_v50 = vsel %vm8345_vm5, %v8297_v36, %v8393_v26  ;;  %v8299_v22 = vadd.f32 %v29017_v29, %v8071_v2  ;;  %22203 = vmatmul.mubr.msk.f32.gmra.mrb[114].mxu1 %vm271_vm0, %v29136_v56  ;;  %v8547_v25 = vrot.slane %v29132_v54, 1 }
 0x78e   :  { %vm8348_vm14 = vcmp.ge.f32.partialorder %v8300_v58, 0.0  ;;  %v8396_v34 = vmul.f32 0.2, %v8300_v58  ;;  %22205 = vmatprep.mubr.msk.f32.mxu1 %vm271_vm0, %v29139_v49  ;;  %v8545_v5 = vrot.slane %v29141_v50, 1 }
 0x78f   :  { %vm8347_vm15 = vcmp.ge.f32.partialorder %v8299_v22, 0.0  ;;  %v8395_v1 = vmul.f32 0.2, %v8299_v22  ;;  %v22142_v19 = vpop.f32.mrb[74].mxu1 }
 0x790   :  { %v29150_v46 = vsel %vm8348_vm14, %v8300_v58, %v8396_v34  ;;  %v8302_v10 = vadd.f32 %v22142_v19, %v29017_v29  ;;  %v8081_v32 = vpop.f32.mrb[75].mxu1  ;;  %v29154_v35 = vsel %vm154_vm2, %v8543_v14, %v8545_v5  ;;  %v29157_v60 = vsel %vm154_vm2, %v8545_v5, %v8547_v25 }
 0x791   :  { %33476 = vst [vmem:[#allocation34_spill] sm:$0xff] %v29154_v35  ;;  %33477 = vst [vmem:[#allocation82_spill] sm:$0xff] %v29157_v60  ;;  %v29159_v21 = vsel %vm8347_vm15, %v8299_v22, %v8395_v1  ;;  %v8301_v33 = vadd.f32 %v29017_v29, %v8081_v32  ;;  %22206 = vmatmul.mubr.msk.f32.gmra.mrb[116].mxu1 %vm271_vm0, %v29154_v35  ;;  %v8551_v8 = vrot.slane %v29150_v46, 1 }
 0x792   :  { %vm8350_vm3 = vcmp.ge.f32.partialorder %v8302_v10, 0.0  ;;  %v8398_v41 = vmul.f32 0.2, %v8302_v10  ;;  %22208 = vmatprep.mubr.msk.f32.mxu1 %vm271_vm0, %v29157_v60  ;;  %v8549_v43 = vrot.slane %v29159_v21, 1 }
 0x793   :  { %vm8349_vm4 = vcmp.ge.f32.partialorder %v8301_v33, 0.0  ;;  %v8397_v24 = vmul.f32 0.2, %v8301_v33  ;;  %v29168_v62 = vpop.f32.mrb[76].mxu1 }
 0x794   :  { %v29170_v51 = vsel %vm8350_vm3, %v8302_v10, %v8398_v41  ;;  %v8091_v7 = vpop.f32.mrb[77].mxu1  ;;  %v29173_v52 = vsel %vm154_vm2, %v8547_v25, %v8549_v43  ;;  %v29176_v55 = vsel %vm154_vm2, %v8549_v43, %v8551_v8 }
 0x795   :  { %33478 = vst [vmem:[#allocation84_spill] sm:$0xff] %v29173_v52  ;;  %33479 = vst [vmem:[#allocation86_spill] sm:$0xff] %v29176_v55  ;;  %v29178_v27 = vsel %vm8349_vm4, %v8301_v33, %v8397_v24  ;;  %v8303_v18 = vadd.f32 %v29017_v29, %v8091_v7  ;;  %22209 = vmatmul.mubr.msk.f32.gmra.mrb[118].mxu1 %vm271_vm0, %v29173_v52  ;;  %v8555_v57 = vrot.slane %v29170_v51, 1 }
 0x796   :  { %22211 = vmatprep.mubr.msk.f32.mxu1 %vm271_vm0, %v29176_v55  ;;  %v8553_v36 = vrot.slane %v29178_v27, 1 }
 0x797   :  { %vm8351_vm6 = vcmp.ge.f32.partialorder %v8303_v18, 0.0  ;;  %v8399_v14 = vmul.f32 0.2, %v8303_v18  ;;  %v29187_v53 = vpop.f32.mrb[78].mxu1 }
 0x798   :  { %33480 = vst [vmem:[#allocation88_spill] sm:$0xff] %v29187_v53  ;;  %v29189_v3 = vpop.f32.mrb[79].mxu1  ;;  %v29192_v26 = vsel %vm154_vm2, %v8551_v8, %v8553_v36  ;;  %v29195_v48 = vsel %vm154_vm2, %v8553_v36, %v8555_v57 }
 0x799   :  { %33481 = vst [vmem:[#allocation91_spill] sm:$0xff] %v29189_v3  ;;  %33482 = vst [vmem:[#allocation10_spill] sm:$0xff] %v29192_v26  ;;  %v29197_v58 = vsel %vm8351_vm6, %v8303_v18, %v8399_v14  ;;  %22212 = vmatmul.mubr.msk.f32.gmra.mrb[120].mxu1 %vm271_vm0, %v29192_v26 }
 0x79a   :  { %33483 = vst [vmem:[#allocation31_spill] sm:$0xff] %v29195_v48  ;;  %22214 = vmatprep.mubr.msk.f32.mxu1 %vm271_vm0, %v29195_v48  ;;  %v32736_v2 = vrot.slane %v29197_v58, 1 }
 0x79b   :  { %v22151_v22 = vpop.f32.mrb[80].mxu1 }
 0x79c   :  { %v8308_v25 = vadd.f32 %v22151_v22, %v29017_v29  ;;  %v8111_v34 = vpop.f32.mrb[81].mxu1  ;;  %v29208_v5 = vsel %vm154_vm2, %v8555_v57, %v32736_v2 }
 0x79d   :  { %33484 = vst [vmem:[#allocation40_spill] sm:$0xff] %v29208_v5  ;;  %v8307_v1 = vadd.f32 %v29017_v29, %v8111_v34  ;;  %22215 = vmatmul.mubr.msk.f32.gmra.mrb[122].mxu1 %vm271_vm0, %v29208_v5 }
 0x79e   :  { %vm8356_vm7 = vcmp.ge.f32.partialorder %v8308_v25, 0.0  ;;  %v8404_v19 = vmul.f32 0.2, %v8308_v25 }
 0x79f   :  { %vm8355_vm8 = vcmp.ge.f32.partialorder %v8307_v1, 0.0  ;;  %v8403_v10 = vmul.f32 0.2, %v8307_v1  ;;  %v22154_v32 = vpop.f32.mrb[82].mxu1 }
 0x7a0   :  { %v29213_v33 = vsel %vm8356_vm7, %v8308_v25, %v8404_v19  ;;  %v8310_v8 = vadd.f32 %v22154_v32, %v29017_v29  ;;  %v8121_v41 = vpop.f32.mrb[83].mxu1 }
 0x7a1   :  { %v8560_v43 = vrot.slane %v29213_v33, 1  ;;  %v29217_v24 = vsel %vm8355_vm8, %v8307_v1, %v8403_v10  ;;  %v8309_v7 = vadd.f32 %v29017_v29, %v8121_v41 }
 0x7a2   :  { %v8559_v18 = vrot.slane %v29217_v24, 1  ;;  %vm8358_vm9 = vcmp.ge.f32.partialorder %v8310_v8, 0.0  ;;  %v8406_v57 = vmul.f32 0.2, %v8310_v8 }
 0x7a3   :  { %vm8357_vm10 = vcmp.ge.f32.partialorder %v8309_v7, 0.0  ;;  %v8405_v36 = vmul.f32 0.2, %v8309_v7  ;;  %v22157_v14 = vpop.f32.mrb[84].mxu1 }
 0x7a4   :  { %v29221_v22 = vsel %vm8358_vm9, %v8310_v8, %v8406_v57  ;;  %v8312_v25 = vadd.f32 %v22157_v14, %v29017_v29  ;;  %v8131_v34 = vpop.f32.mrb[85].mxu1  ;;  %v8561_v19 = vsel %vm154_vm2, %v8559_v18, %v8560_v43 }
 0x7a5   :  { %v29225_v32 = vsel %vm8357_vm10, %v8309_v7, %v8405_v36  ;;  %v8311_v1 = vadd.f32 %v29017_v29, %v8131_v34  ;;  %22217 = vmatprep.mubr.msk.f32.mxu1 %vm271_vm0, %v8561_v19  ;;  %v8564_v10 = vrot.slane %v29221_v22, 1 }
 0x7a6   :  { %vm8360_vm11 = vcmp.ge.f32.partialorder %v8312_v25, 0.0  ;;  %v8408_v41 = vmul.f32 0.2, %v8312_v25  ;;  %v8562_v2 = vrot.slane %v29225_v32, 1 }
 0x7a7   :  { %vm8359_vm12 = vcmp.ge.f32.partialorder %v8311_v1, 0.0  ;;  %v8407_v8 = vmul.f32 0.2, %v8311_v1  ;;  %v22160_v57 = vpop.f32.mrb[86].mxu1 }
 0x7a8   :  { %v29231_v39 = vsel %vm8360_vm11, %v8312_v25, %v8408_v41  ;;  %v8314_v14 = vadd.f32 %v22160_v57, %v29017_v29  ;;  %v8141_v18 = vpop.f32.mrb[87].mxu1  ;;  %v8563_v7 = vsel %vm154_vm2, %v8560_v43, %v8562_v2  ;;  %v29236_v36 = vsel %vm154_vm2, %v8562_v2, %v8564_v10 }
 0x7a9   :  { %33485 = vst [vmem:[#allocation3_spill] sm:$0xff] %v29236_v36  ;;  %v29238_v34 = vsel %vm8359_vm12, %v8311_v1, %v8407_v8  ;;  %v8313_v19 = vadd.f32 %v29017_v29, %v8141_v18  ;;  %22218 = vmatmul.mubr.msk.f32.gmra.mrb[124].mxu1 %vm271_vm0, %v8563_v7  ;;  %v8568_v23 = vrot.slane %v29231_v39, 1 }
 0x7aa   :  { %vm8362_vm13 = vcmp.ge.f32.partialorder %v8314_v14, 0.0  ;;  %v8410_v53 = vmul.f32 0.2, %v8314_v14  ;;  %22220 = vmatprep.mubr.msk.f32.mxu1 %vm271_vm0, %v29236_v36  ;;  %v8566_v25 = vrot.slane %v29238_v34, 1 }
 0x7ab   :  { %vm8361_vm5 = vcmp.ge.f32.partialorder %v8313_v19, 0.0  ;;  %v8409_v43 = vmul.f32 0.2, %v8313_v19  ;;  %v22163_v41 = vpop.f32.mrb[88].mxu1 }
 0x7ac   :  { %v29246_v2 = vsel %vm8362_vm13, %v8314_v14, %v8410_v53  ;;  %v8316_v1 = vadd.f32 %v22163_v41, %v29017_v29  ;;  %v8151_v8 = vpop.f32.mrb[89].mxu1  ;;  %v29250_v57 = vsel %vm154_vm2, %v8564_v10, %v8566_v25  ;;  %v29253_v18 = vsel %vm154_vm2, %v8566_v25, %v8568_v23 }
 0x7ad   :  { %33486 = vst [vmem:[#allocation44_spill] sm:$0xff] %v29250_v57  ;;  %33487 = vst [vmem:[#allocation45_spill] sm:$0xff] %v29253_v18  ;;  %v29255_v7 = vsel %vm8361_vm5, %v8313_v19, %v8409_v43  ;;  %v8315_v36 = vadd.f32 %v29017_v29, %v8151_v8  ;;  %22221 = vmatmul.mubr.msk.f32.gmra.mrb[126].mxu1 %vm271_vm0, %v29250_v57  ;;  %v8572_v5 = vrot.slane %v29246_v2, 1 }
 0x7ae   :  { %vm8364_vm14 = vcmp.ge.f32.partialorder %v8316_v1, 0.0  ;;  %v8412_v53 = vmul.f32 0.2, %v8316_v1  ;;  %22223 = vmatprep.mubr.msk.f32.mxu1 %vm271_vm0, %v29253_v18  ;;  %v8570_v10 = vrot.slane %v29255_v7, 1 }
 0x7af   :  { %vm8363_vm15 = vcmp.ge.f32.partialorder %v8315_v36, 0.0  ;;  %v8411_v14 = vmul.f32 0.2, %v8315_v36  ;;  %v22166_v25 = vpop.f32.mrb[90].mxu1 }
 0x7b0   :  { %v29264_v41 = vsel %vm8364_vm14, %v8316_v1, %v8412_v53  ;;  %v8318_v19 = vadd.f32 %v22166_v25, %v29017_v29  ;;  %v8161_v43 = vpop.f32.mrb[91].mxu1  ;;  %v29268_v8 = vsel %vm154_vm2, %v8568_v23, %v8570_v10  ;;  %v29271_v57 = vsel %vm154_vm2, %v8570_v10, %v8572_v5 }
 0x7b1   :  { %33488 = vst [vmem:[#allocation42_spill] sm:$0xff] %v29268_v8  ;;  %33489 = vst [vmem:[#allocation69_spill] sm:$0xff] %v29271_v57  ;;  %v29273_v48 = vsel %vm8363_vm15, %v8315_v36, %v8411_v14  ;;  %v8317_v18 = vadd.f32 %v29017_v29, %v8161_v43  ;;  %22224 = vmatmul.mubr.msk.f32.gmra.mrb[128].mxu1 %vm271_vm0, %v29268_v8  ;;  %v8576_v26 = vrot.slane %v29264_v41, 1 }
 0x7b2   :  { %vm8366_vm3 = vcmp.ge.f32.partialorder %v8318_v19, 0.0  ;;  %v8414_v1 = vmul.f32 0.2, %v8318_v19  ;;  %22226 = vmatprep.mubr.msk.f32.mxu1 %vm271_vm0, %v29271_v57  ;;  %v8574_v23 = vrot.slane %v29273_v48, 1 }
 0x7b3   :  { %vm8365_vm4 = vcmp.ge.f32.partialorder %v8317_v18, 0.0  ;;  %v8413_v53 = vmul.f32 0.2, %v8317_v18  ;;  %v22169_v10 = vpop.f32.mrb[92].mxu1 }
 0x7b4   :  { %v29282_v25 = vsel %vm8366_vm3, %v8318_v19, %v8414_v1  ;;  %v8320_v36 = vadd.f32 %v22169_v10, %v29017_v29  ;;  %v8171_v14 = vpop.f32.mrb[93].mxu1  ;;  %v29286_v43 = vsel %vm154_vm2, %v8572_v5, %v8574_v23  ;;  %v29289_v8 = vsel %vm154_vm2, %v8574_v23, %v8576_v26 }
 0x7b5   :  { %33490 = vst [vmem:[#allocation75_spill] sm:$0xff] %v29286_v43  ;;  %33491 = vst [vmem:[#allocation76_spill] sm:$0xff] %v29289_v8  ;;  %v29291_v55 = vsel %vm8365_vm4, %v8317_v18, %v8413_v53  ;;  %v8319_v57 = vadd.f32 %v29017_v29, %v8171_v14  ;;  %22227 = vmatmul.mubr.msk.f32.gmra.mrb[130].mxu1 %vm271_vm0, %v29286_v43  ;;  %v8580_v52 = vrot.slane %v29282_v25, 1 }
 0x7b6   :  { %vm8368_vm6 = vcmp.ge.f32.partialorder %v8320_v36, 0.0  ;;  %v8416_v19 = vmul.f32 0.2, %v8320_v36  ;;  %22229 = vmatprep.mubr.msk.f32.mxu1 %vm271_vm0, %v29289_v8  ;;  %v8578_v5 = vrot.slane %v29291_v55, 1 }
 0x7b7   :  { %vm8367_vm7 = vcmp.ge.f32.partialorder %v8319_v57, 0.0  ;;  %v8415_v1 = vmul.f32 0.2, %v8319_v57  ;;  %v22172_v23 = vpop.f32.mrb[94].mxu1 }
 0x7b8   :  { %v29300_v10 = vsel %vm8368_vm6, %v8320_v36, %v8416_v19  ;;  %v8322_v18 = vadd.f32 %v22172_v23, %v29017_v29  ;;  %v8181_v53 = vpop.f32.mrb[95].mxu1  ;;  %v29304_v14 = vsel %vm154_vm2, %v8576_v26, %v8578_v5  ;;  %v29307_v43 = vsel %vm154_vm2, %v8578_v5, %v8580_v52 }
 0x7b9   :  { %33492 = vst [vmem:[#allocation47_spill] sm:$0xff] %v29304_v14  ;;  %33493 = vst [vmem:[#allocation50_spill] sm:$0xff] %v29307_v43  ;;  %v29309_v60 = vsel %vm8367_vm7, %v8319_v57, %v8415_v1  ;;  %v8321_v8 = vadd.f32 %v29017_v29, %v8181_v53  ;;  %22230 = vmatmul.mubr.msk.f32.gmra.mrb[132].mxu1 %vm271_vm0, %v29304_v14  ;;  %v8584_v35 = vrot.slane %v29300_v10, 1 }
 0x7ba   :  { %vm8370_vm8 = vcmp.ge.f32.partialorder %v8322_v18, 0.0  ;;  %v8418_v36 = vmul.f32 0.2, %v8322_v18  ;;  %22232 = vmatprep.mubr.msk.f32.mxu1 %vm271_vm0, %v29307_v43  ;;  %v8582_v26 = vrot.slane %v29309_v60, 1 }
 0x7bb   :  { %vm8369_vm9 = vcmp.ge.f32.partialorder %v8321_v8, 0.0  ;;  %v8417_v19 = vmul.f32 0.2, %v8321_v8  ;;  %v22175_v5 = vpop.f32.mrb[96].mxu1 }
 0x7bc   :  { %v29318_v23 = vsel %vm8370_vm8, %v8322_v18, %v8418_v36  ;;  %v8324_v57 = vadd.f32 %v22175_v5, %v29017_v29  ;;  %v8191_v1 = vpop.f32.mrb[97].mxu1  ;;  %v29322_v53 = vsel %vm154_vm2, %v8580_v52, %v8582_v26  ;;  %v29325_v14 = vsel %vm154_vm2, %v8582_v26, %v8584_v35 }
 0x7bd   :  { %33494 = vst [vmem:[#allocation51_spill] sm:$0xff] %v29322_v53  ;;  %33495 = vst [vmem:[#allocation54_spill] sm:$0xff] %v29325_v14  ;;  %v29327_v3 = vsel %vm8369_vm9, %v8321_v8, %v8417_v19  ;;  %v8323_v43 = vadd.f32 %v29017_v29, %v8191_v1  ;;  %22233 = vmatmul.mubr.msk.f32.gmra.mrb[134].mxu1 %vm271_vm0, %v29322_v53  ;;  %v8588_v49 = vrot.slane %v29318_v23, 1 }
 0x7be   :  { %vm8372_vm10 = vcmp.ge.f32.partialorder %v8324_v57, 0.0  ;;  %v8420_v18 = vmul.f32 0.2, %v8324_v57  ;;  %22235 = vmatprep.mubr.msk.f32.mxu1 %vm271_vm0, %v29325_v14  ;;  %v8586_v52 = vrot.slane %v29327_v3, 1 }
 0x7bf   :  { %vm8371_vm11 = vcmp.ge.f32.partialorder %v8323_v43, 0.0  ;;  %v8419_v36 = vmul.f32 0.2, %v8323_v43  ;;  %v22178_v26 = vpop.f32.mrb[98].mxu1 }
 0x7c0   :  { %v29336_v5 = vsel %vm8372_vm10, %v8324_v57, %v8420_v18  ;;  %v8326_v8 = vadd.f32 %v22178_v26, %v29017_v29  ;;  %v8201_v19 = vpop.f32.mrb[99].mxu1  ;;  %v29340_v1 = vsel %vm154_vm2, %v8584_v35, %v8586_v52  ;;  %v29343_v53 = vsel %vm154_vm2, %v8586_v52, %v8588_v49 }
 0x7c1   :  { %33496 = vst [vmem:[#allocation55_spill] sm:$0xff] %v29340_v1  ;;  %33497 = vst [vmem:[#allocation58_spill] sm:$0xff] %v29343_v53  ;;  %v29345_v56 = vsel %vm8371_vm11, %v8323_v43, %v8419_v36  ;;  %v8325_v14 = vadd.f32 %v29017_v29, %v8201_v19  ;;  %22236 = vmatmul.mubr.msk.f32.gmra.mrb[136].mxu1 %vm271_vm0, %v29340_v1  ;;  %v8592_v45 = vrot.slane %v29336_v5, 1 }
 0x7c2   :  { %vm8374_vm12 = vcmp.ge.f32.partialorder %v8326_v8, 0.0  ;;  %v8422_v57 = vmul.f32 0.2, %v8326_v8  ;;  %22238 = vmatprep.mubr.msk.f32.mxu1 %vm271_vm0, %v29343_v53  ;;  %v8590_v35 = vrot.slane %v29345_v56, 1 }
 0x7c3   :  { %vm8373_vm13 = vcmp.ge.f32.partialorder %v8325_v14, 0.0  ;;  %v8421_v18 = vmul.f32 0.2, %v8325_v14  ;;  %v29354_v52 = vpop.f32.mrb[100].mxu1 }
 0x7c4   :  { %v29356_v43 = vsel %vm8374_vm12, %v8326_v8, %v8422_v57  ;;  %v8211_v36 = vpop.f32.mrb[101].mxu1  ;;  %v29359_v26 = vsel %vm154_vm2, %v8588_v49, %v8590_v35  ;;  %v29362_v19 = vsel %vm154_vm2, %v8590_v35, %v8592_v45 }
 0x7c5   :  { %33498 = vst [vmem:[#allocation59_spill] sm:$0xff] %v29359_v26  ;;  %v29364_v1 = vsel %vm8373_vm13, %v8325_v14, %v8421_v18  ;;  %v8327_v61 = vadd.f32 %v29017_v29, %v8211_v36  ;;  %22239 = vmatmul.mubr.msk.f32.gmra.mrb[138].mxu1 %vm271_vm0, %v29359_v26  ;;  %v8596_v53 = vrot.slane %v29356_v43, 1 }
 0x7c6   :  { %22241 = vmatprep.mubr.msk.f32.mxu1 %vm271_vm0, %v29362_v19  ;;  %v8594_v8 = vrot.slane %v29364_v1, 1 }
 0x7c7   :  { %vm8375_vm5 = vcmp.ge.f32.partialorder %v8327_v61, 0.0  ;;  %v8423_v49 = vmul.f32 0.2, %v8327_v61  ;;  %v29373_v57 = vpop.f32.mrb[102].mxu1 }
 0x7c8   :  { %33499 = vst [vmem:[#allocation62_spill] sm:$0xff] %v29373_v57  ;;  %v29375_v35 = vpop.f32.mrb[103].mxu1  ;;  %v29378_v14 = vsel %vm154_vm2, %v8592_v45, %v8594_v8  ;;  %v29381_v29 = vsel %vm154_vm2, %v8594_v8, %v8596_v53  ;;  %v9292_v45 = vrot.slane %v29025_v0, 2 }
 0x7c9   :  { %33500 = vst [vmem:[#allocation63_spill] sm:$0xff] %v29381_v29  ;;  %v29383_v18 = vsel %vm8375_vm5, %v8327_v61, %v8423_v49  ;;  %22242 = vmatmul.mubr.msk.f32.gmra.mrb[140].mxu1 %vm271_vm0, %v29378_v14  ;;  %v18104_v61 = vld [vmem:[%s32403_s4 + $0x18] sm:$0xff]  ;;  %v9297_v49 = vrot.slane %v29029_v30, 2 }
 0x7ca   :  { %22244 = vmatprep.mubr.msk.f32.mxu1 %vm271_vm0, %v29381_v29  ;;  %v32787_v36 = vrot.slane %v29383_v18, 1  ;;  %v9333_v29 = vrot.slane %v29217_v24, 2 }
 0x7cc   :  { %v29393_v57 = vsel %vm154_vm2, %v8596_v53, %v32787_v36  ;;  %v9295_v53 = vrot.slane %v29033_v13, 2  ;;  %v29492_v36 = vld [vmem:[%s32403_s4 + $0x20] sm:$0xff] }
 0x7cd   :  { %33501 = vst [vmem:[#allocation72_spill] sm:$0xff] %v29393_v57  ;;  %22245 = vmatmul.mubr.msk.f32.gmra.mrb[142].mxu1 %vm271_vm0, %v29393_v57 }
 0x7ce   :  { %22249 = vmatprep.mubr.msk.f32.mxu1 %vm271_vm0, %v29025_v0  ;;  %v9299_v0 = vrot.slane %v29051_v16, 2  ;;  %v29496_v57 = vsel %vm1186_vm1, %v9295_v53, %v9297_v49 }
 0x7cf   :  { %33502 = vst [vmem:[#allocation73_spill] sm:$0xff] %v29496_v57 }
 0x7d1   :  { %22250 = vmatmul.mubr.msk.f32.vlgmr.msra.gmra.mrb[104].mxu1 %vm271_vm0, %v29021_v11 }
 0x7d2   :  { %22252 = vmatprep.mubr.msk.f32.mxu1 %vm271_vm0, %v29033_v13  ;;  %22310 = vmatpush3.msra.mxu1 %v29049_v40  ;;  %v9293_v40 = vrot.slane %v29021_v11, 2 }
 0x7d3   :  { %22371 = vmatprep.subr.mxu1 %v18104_v61 }
 0x7d4   :  { %v9294_v8 = vsel %vm1186_vm1, %v9292_v45, %v9293_v40  ;;  %v9296_v11 = vsel %vm1186_vm1, %v9293_v40, %v9295_v53  ;;  %v9301_v45 = vrot.slane %v29039_v42, 2  ;;  %v29503_v40 = vsel %vm1186_vm1, %v9297_v49, %v9299_v0 }
 0x7d5   :  { %22253 = vmatmul.mubr.msk.f32.gmra.mrb[106].mxu1 %vm271_vm0, %v29029_v30  ;;  %33503 = vst [vmem:[#allocation77_spill] sm:$0xff] %v29503_v40  ;;  %v9305_v53 = vrot.slane %v29060_v28, 2 }
 0x7d6   :  { %22255 = vmatprep.mubr.msk.f32.mxu1 %vm271_vm0, %v29051_v16 }
 0x7d9   :  { %22256 = vmatmul.mubr.msk.f32.gmra.mrb[108].mxu1 %vm271_vm0, %v29039_v42 }
 0x7da   :  { %22258 = vmatprep.mubr.msk.f32.mxu1 %vm271_vm0, %v29069_v6 }
 0x7dd   :  { %22259 = vmatmul.mubr.msk.f32.gmra.mrb[110].mxu1 %vm271_vm0, %v29060_v28 }
 0x7de   :  { %22261 = vmatprep.mubr.msk.f32.mxu1 %vm271_vm0, %v29087_v4 }
 0x7e1   :  { %22262 = vmatmul.mubr.msk.f32.gmra.mrb[112].mxu1 %vm271_vm0, %v29078_v31 }
 0x7e2   :  { %22264 = vmatprep.mubr.msk.f32.mxu1 %vm271_vm0, %v29105_v17 }
 0x7e5   :  { %22265 = vmatmul.mubr.msk.f32.gmra.mrb[114].mxu1 %vm271_vm0, %v29096_v38 }
 0x7e6   :  { %22267 = vmatprep.mubr.msk.f32.mxu1 %vm271_vm0, %v29123_v63 }
 0x7e9   :  { %22268 = vmatmul.mubr.msk.f32.gmra.mrb[116].mxu1 %vm271_vm0, %v29114_v47 }
 0x7ea   :  { %22270 = vmatprep.mubr.msk.f32.mxu1 %vm271_vm0, %v29141_v50 }
 0x7ed   :  { %22271 = vmatmul.mubr.msk.f32.gmra.mrb[118].mxu1 %vm271_vm0, %v29132_v54 }
 0x7ee   :  { %22273 = vmatprep.mubr.msk.f32.mxu1 %vm271_vm0, %v29159_v21 }
 0x7f1   :  { %22274 = vmatmul.mubr.msk.f32.gmra.mrb[120].mxu1 %vm271_vm0, %v29150_v46 }
 0x7f2   :  { %22276 = vmatprep.mubr.msk.f32.mxu1 %vm271_vm0, %v29178_v27 }
 0x7f5   :  { %22277 = vmatmul.mubr.msk.f32.gmra.mrb[122].mxu1 %vm271_vm0, %v29170_v51 }
 0x7f6   :  { %22279 = vmatprep.mubr.msk.f32.mxu1 %vm271_vm0, %v29217_v24  ;;  %v9338_v24 = vrot.slane %v29221_v22, 2 }
 0x7f9   :  { %22280 = vmatmul.mubr.msk.f32.gmra.mrb[124].mxu1 %vm271_vm0, %v29213_v33 }
 0x7fa   :  { %22282 = vmatprep.mubr.msk.f32.mxu1 %vm271_vm0, %v29225_v32 }
 0x7fd   :  { %22283 = vmatmul.mubr.msk.f32.gmra.mrb[126].mxu1 %vm271_vm0, %v29221_v22 }
 0x7fe   :  { %22285 = vmatprep.mubr.msk.f32.mxu1 %vm271_vm0, %v29238_v34 }
 0x801   :  { %22286 = vmatmul.mubr.msk.f32.gmra.mrb[128].mxu1 %vm271_vm0, %v29231_v39 }
 0x802   :  { %22288 = vmatprep.mubr.msk.f32.mxu1 %vm271_vm0, %v29255_v7 }
 0x805   :  { %22289 = vmatmul.mubr.msk.f32.gmra.mrb[130].mxu1 %vm271_vm0, %v29246_v2 }
 0x806   :  { %22291 = vmatprep.mubr.msk.f32.mxu1 %vm271_vm0, %v29273_v48 }
 0x809   :  { %22292 = vmatmul.mubr.msk.f32.gmra.mrb[132].mxu1 %vm271_vm0, %v29264_v41 }
 0x80a   :  { %22294 = vmatprep.mubr.msk.f32.mxu1 %vm271_vm0, %v29291_v55 }
 0x80d   :  { %22295 = vmatmul.mubr.msk.f32.gmra.mrb[134].mxu1 %vm271_vm0, %v29282_v25 }
 0x80e   :  { %22297 = vmatprep.mubr.msk.f32.mxu1 %vm271_vm0, %v29309_v60 }
 0x811   :  { %22298 = vmatmul.mubr.msk.f32.gmra.mrb[136].mxu1 %vm271_vm0, %v29300_v10 }
 0x812   :  { %22300 = vmatprep.mubr.msk.f32.mxu1 %vm271_vm0, %v29327_v3 }
 0x815   :  { %22301 = vmatmul.mubr.msk.f32.gmra.mrb[138].mxu1 %vm271_vm0, %v29318_v23 }
 0x816   :  { %22303 = vmatprep.mubr.msk.f32.mxu1 %vm271_vm0, %v29345_v56 }
 0x819   :  { %22304 = vmatmul.mubr.msk.f32.gmra.mrb[140].mxu1 %vm271_vm0, %v29336_v5 }
 0x81a   :  { %22306 = vmatprep.mubr.msk.f32.mxu1 %vm271_vm0, %v29364_v1 }
 0x81d   :  { %22307 = vmatmul.mubr.msk.f32.gmra.mrb[142].mxu1 %vm271_vm0, %v29356_v43 }
 0x81e   :  { %22311 = vmatprep.mubr.msk.f32.mxu1 %vm271_vm0, %v9294_v8  ;;  %v9303_v8 = vrot.slane %v29069_v6, 2 }
 0x820   :  { %v29521_v49 = vsel %vm1186_vm1, %v9303_v8, %v9305_v53 }
 0x821   :  { %22312 = vmatmul.mubr.msk.f32.vlgmr.msra.gmra.mrb[104].mxu1 %vm271_vm0, %v9296_v11  ;;  %v29509_v11 = vsel %vm1186_vm1, %v9299_v0, %v9301_v45  ;;  %33506 = vst [vmem:[#allocation14_spill] sm:$0xff] %v29521_v49 }
 0x822   :  { %22314 = vmatprep.mubr.msk.f32.mxu1 %vm271_vm0, %v29496_v57  ;;  %22372 = vmatpush3.msra.mxu1 %v18104_v61  ;;  %33504 = vst [vmem:[#allocation8_spill] sm:$0xff] %v29509_v11  ;;  %v29515_v61 = vsel %vm1186_vm1, %v9301_v45, %v9303_v8  ;;  %v9307_v57 = vrot.slane %v29087_v4, 2 }
 0x823   :  { %22433 = vmatprep.subr.mxu1 %v29492_v36  ;;  %33505 = vst [vmem:[#allocation13_spill] sm:$0xff] %v29515_v61 }
 0x824   :  { %v29527_v0 = vsel %vm1186_vm1, %v9305_v53, %v9307_v57 }
 0x825   :  { %22315 = vmatmul.mubr.msk.f32.gmra.mrb[106].mxu1 %vm271_vm0, %v29503_v40  ;;  %v9309_v40 = vrot.slane %v29078_v31, 2  ;;  %33507 = vst [vmem:[#allocation7_spill] sm:$0xff] %v29527_v0 }
 0x826   :  { %22317 = vmatprep.mubr.msk.f32.mxu1 %vm271_vm0, %v29509_v11  ;;  %v9311_v11 = vrot.slane %v29105_v17, 2 }
 0x827   :  { %v29533_v45 = vsel %vm1186_vm1, %v9307_v57, %v9309_v40 }
 0x828   :  { %33508 = vst [vmem:[#allocation41_spill] sm:$0xff] %v29533_v45  ;;  %v29539_v8 = vsel %vm1186_vm1, %v9309_v40, %v9311_v11 }
 0x829   :  { %22318 = vmatmul.mubr.msk.f32.gmra.mrb[108].mxu1 %vm271_vm0, %v29515_v61  ;;  %v9313_v61 = vrot.slane %v29096_v38, 2  ;;  %33509 = vst [vmem:[#allocation17_spill] sm:$0xff] %v29539_v8 }
 0x82a   :  { %22320 = vmatprep.mubr.msk.f32.mxu1 %vm271_vm0, %v29521_v49  ;;  %v9315_v49 = vrot.slane %v29123_v63, 2 }
 0x82b   :  { %v29545_v53 = vsel %vm1186_vm1, %v9311_v11, %v9313_v61 }
 0x82c   :  { %33510 = vst [vmem:[#allocation18_spill] sm:$0xff] %v29545_v53  ;;  %v29551_v57 = vsel %vm1186_vm1, %v9313_v61, %v9315_v49 }
 0x82d   :  { %22321 = vmatmul.mubr.msk.f32.gmra.mrb[110].mxu1 %vm271_vm0, %v29527_v0  ;;  %v9317_v0 = vrot.slane %v29114_v47, 2  ;;  %33511 = vst [vmem:[#allocation19_spill] sm:$0xff] %v29551_v57 }
 0x82e   :  { %22323 = vmatprep.mubr.msk.f32.mxu1 %vm271_vm0, %v29533_v45  ;;  %v9319_v45 = vrot.slane %v29141_v50, 2 }
 0x82f   :  { %v29557_v40 = vsel %vm1186_vm1, %v9315_v49, %v9317_v0 }
 0x830   :  { %33512 = vst [vmem:[#allocation20_spill] sm:$0xff] %v29557_v40  ;;  %v29563_v11 = vsel %vm1186_vm1, %v9317_v0, %v9319_v45 }
 0x831   :  { %22324 = vmatmul.mubr.msk.f32.gmra.mrb[112].mxu1 %vm271_vm0, %v29539_v8  ;;  %v9321_v8 = vrot.slane %v29132_v54, 2  ;;  %33513 = vst [vmem:[#allocation21_spill] sm:$0xff] %v29563_v11 }
 0x832   :  { %22326 = vmatprep.mubr.msk.f32.mxu1 %vm271_vm0, %v29545_v53  ;;  %v9323_v53 = vrot.slane %v29159_v21, 2 }
 0x833   :  { %v29569_v61 = vsel %vm1186_vm1, %v9319_v45, %v9321_v8 }
 0x834   :  { %33514 = vst [vmem:[#allocation22_spill] sm:$0xff] %v29569_v61  ;;  %v29575_v49 = vsel %vm1186_vm1, %v9321_v8, %v9323_v53  ;;  %v9334_v8 = vrot.slane %v29213_v33, 2 }
 0x835   :  { %22327 = vmatmul.mubr.msk.f32.gmra.mrb[114].mxu1 %vm271_vm0, %v29551_v57  ;;  %v9325_v57 = vrot.slane %v29150_v46, 2  ;;  %33515 = vst [vmem:[#allocation23_spill] sm:$0xff] %v29575_v49 }
 0x836   :  { %22329 = vmatprep.mubr.msk.f32.mxu1 %vm271_vm0, %v29557_v40  ;;  %v9327_v40 = vrot.slane %v29178_v27, 2  ;;  %v9335_v33 = vsel %vm1186_vm1, %v9333_v29, %v9334_v8 }
 0x837   :  { %v29581_v0 = vsel %vm1186_vm1, %v9323_v53, %v9325_v57 }
 0x838   :  { %33516 = vst [vmem:[#allocation24_spill] sm:$0xff] %v29581_v0  ;;  %v29587_v45 = vsel %vm1186_vm1, %v9325_v57, %v9327_v40 }
 0x839   :  { %22330 = vmatmul.mubr.msk.f32.gmra.mrb[116].mxu1 %vm271_vm0, %v29563_v11  ;;  %v9329_v11 = vrot.slane %v29170_v51, 2  ;;  %33517 = vst [vmem:[#allocation25_spill] sm:$0xff] %v29587_v45 }
 0x83a   :  { %22332 = vmatprep.mubr.msk.f32.mxu1 %vm271_vm0, %v29569_v61  ;;  %v32820_v61 = vrot.slane %v29197_v58, 2 }
 0x83b   :  { %v29595_v53 = vsel %vm1186_vm1, %v9327_v40, %v9329_v11 }
 0x83c   :  { %33518 = vst [vmem:[#allocation26_spill] sm:$0xff] %v29595_v53  ;;  %v29602_v57 = vsel %vm1186_vm1, %v9329_v11, %v32820_v61  ;;  %v9342_v61 = vrot.slane %v29231_v39, 2 }
 0x83d   :  { %22333 = vmatmul.mubr.msk.f32.gmra.mrb[118].mxu1 %vm271_vm0, %v29575_v49  ;;  %33519 = vst [vmem:[#allocation27_spill] sm:$0xff] %v29602_v57 }
 0x83e   :  { %22335 = vmatprep.mubr.msk.f32.mxu1 %vm271_vm0, %v29581_v0  ;;  %v9336_v0 = vrot.slane %v29225_v32, 2 }
 0x840   :  { %v9337_v40 = vsel %vm1186_vm1, %v9334_v8, %v9336_v0  ;;  %v29614_v11 = vsel %vm1186_vm1, %v9336_v0, %v9338_v24 }
 0x841   :  { %22336 = vmatmul.mubr.msk.f32.gmra.mrb[120].mxu1 %vm271_vm0, %v29587_v45 }
 0x842   :  { %22338 = vmatprep.mubr.msk.f32.mxu1 %vm271_vm0, %v29595_v53  ;;  %v9340_v53 = vrot.slane %v29238_v34, 2 }
 0x844   :  { %v29620_v29 = vsel %vm1186_vm1, %v9338_v24, %v9340_v53  ;;  %v29626_v8 = vsel %vm1186_vm1, %v9340_v53, %v9342_v61 }
 0x845   :  { %22339 = vmatmul.mubr.msk.f32.gmra.mrb[122].mxu1 %vm271_vm0, %v29602_v57  ;;  %33520 = vst [vmem:[#allocation32_spill] sm:$0xff] %v29620_v29  ;;  %v9344_v57 = vrot.slane %v29255_v7, 2  ;;  %33521 = vst [vmem:[#allocation33_spill] sm:$0xff] %v29626_v8 }
 0x846   :  { %22341 = vmatprep.mubr.msk.f32.mxu1 %vm271_vm0, %v9335_v33  ;;  %v9346_v33 = vrot.slane %v29246_v2, 2 }
 0x847   :  { %v29632_v0 = vsel %vm1186_vm1, %v9342_v61, %v9344_v57 }
 0x848   :  { %33522 = vst [vmem:[#allocation38_spill] sm:$0xff] %v29632_v0  ;;  %v29638_v24 = vsel %vm1186_vm1, %v9344_v57, %v9346_v33 }
 0x849   :  { %22342 = vmatmul.mubr.msk.f32.gmra.mrb[124].mxu1 %vm271_vm0, %v9337_v40  ;;  %v9348_v40 = vrot.slane %v29273_v48, 2  ;;  %33523 = vst [vmem:[#allocation39_spill] sm:$0xff] %v29638_v24 }
 0x84a   :  { %22344 = vmatprep.mubr.msk.f32.mxu1 %vm271_vm0, %v29614_v11 }
 0x84b   :  { %v29644_v53 = vsel %vm1186_vm1, %v9346_v33, %v9348_v40 }
 0x84c   :  { %33524 = vst [vmem:[#allocation43_spill] sm:$0xff] %v29644_v53 }
 0x84d   :  { %22345 = vmatmul.mubr.msk.f32.gmra.mrb[126].mxu1 %vm271_vm0, %v29620_v29  ;;  %v9350_v29 = vrot.slane %v29264_v41, 2 }
 0x84e   :  { %22347 = vmatprep.mubr.msk.f32.mxu1 %vm271_vm0, %v29626_v8  ;;  %v9352_v8 = vrot.slane %v29291_v55, 2 }
 0x84f   :  { %v29650_v61 = vsel %vm1186_vm1, %v9348_v40, %v9350_v29 }
 0x850   :  { %33525 = vst [vmem:[#allocation49_spill] sm:$0xff] %v29650_v61  ;;  %v29656_v57 = vsel %vm1186_vm1, %v9350_v29, %v9352_v8 }
 0x851   :  { %22348 = vmatmul.mubr.msk.f32.gmra.mrb[128].mxu1 %vm271_vm0, %v29632_v0  ;;  %v9354_v0 = vrot.slane %v29282_v25, 2  ;;  %33526 = vst [vmem:[#allocation66_spill] sm:$0xff] %v29656_v57 }
 0x852   :  { %22350 = vmatprep.mubr.msk.f32.mxu1 %vm271_vm0, %v29638_v24  ;;  %v9356_v24 = vrot.slane %v29309_v60, 2 }
 0x853   :  { %v29662_v33 = vsel %vm1186_vm1, %v9352_v8, %v9354_v0 }
 0x854   :  { %33527 = vst [vmem:[#allocation52_spill] sm:$0xff] %v29662_v33  ;;  %v29668_v40 = vsel %vm1186_vm1, %v9354_v0, %v9356_v24 }
 0x855   :  { %22351 = vmatmul.mubr.msk.f32.gmra.mrb[130].mxu1 %vm271_vm0, %v29644_v53  ;;  %v9358_v53 = vrot.slane %v29300_v10, 2  ;;  %33528 = vst [vmem:[#allocation53_spill] sm:$0xff] %v29668_v40 }
 0x856   :  { %22353 = vmatprep.mubr.msk.f32.mxu1 %vm271_vm0, %v29650_v61  ;;  %v9360_v61 = vrot.slane %v29327_v3, 2 }
 0x857   :  { %v29674_v29 = vsel %vm1186_vm1, %v9356_v24, %v9358_v53 }
 0x858   :  { %33529 = vst [vmem:[#allocation56_spill] sm:$0xff] %v29674_v29  ;;  %v29680_v8 = vsel %vm1186_vm1, %v9358_v53, %v9360_v61 }
 0x859   :  { %22354 = vmatmul.mubr.msk.f32.gmra.mrb[132].mxu1 %vm271_vm0, %v29656_v57  ;;  %v9362_v57 = vrot.slane %v29318_v23, 2  ;;  %33530 = vst [vmem:[#allocation57_spill] sm:$0xff] %v29680_v8 }
 0x85a   :  { %22356 = vmatprep.mubr.msk.f32.mxu1 %vm271_vm0, %v29662_v33  ;;  %v9364_v33 = vrot.slane %v29345_v56, 2 }
 0x85b   :  { %v29686_v0 = vsel %vm1186_vm1, %v9360_v61, %v9362_v57 }
 0x85c   :  { %33531 = vst [vmem:[#allocation60_spill] sm:$0xff] %v29686_v0  ;;  %v29692_v24 = vsel %vm1186_vm1, %v9362_v57, %v9364_v33 }
 0x85d   :  { %22357 = vmatmul.mubr.msk.f32.gmra.mrb[134].mxu1 %vm271_vm0, %v29668_v40  ;;  %v9366_v40 = vrot.slane %v29336_v5, 2  ;;  %33532 = vst [vmem:[#allocation61_spill] sm:$0xff] %v29692_v24 }
 0x85e   :  { %22359 = vmatprep.mubr.msk.f32.mxu1 %vm271_vm0, %v29674_v29  ;;  %v9368_v29 = vrot.slane %v29364_v1, 2 }
 0x85f   :  { %v29698_v53 = vsel %vm1186_vm1, %v9364_v33, %v9366_v40 }
 0x860   :  { %v29704_v61 = vsel %vm1186_vm1, %v9366_v40, %v9368_v29  ;;  %v18186_v40 = vld [vmem:[%s32403_s4 + $0x28] sm:$0xff] }
 0x861   :  { %22360 = vmatmul.mubr.msk.f32.gmra.mrb[136].mxu1 %vm271_vm0, %v29680_v8  ;;  %v9370_v8 = vrot.slane %v29356_v43, 2  ;;  %33533 = vst [vmem:[#allocation64_spill] sm:$0xff] %v29704_v61 }
 0x862   :  { %22362 = vmatprep.mubr.msk.f32.mxu1 %vm271_vm0, %v29686_v0  ;;  %v32846_v0 = vrot.slane %v29383_v18, 2 }
 0x863   :  { %v29710_v57 = vsel %vm1186_vm1, %v9368_v29, %v9370_v8 }
 0x864   :  { %v29717_v33 = vsel %vm1186_vm1, %v9370_v8, %v32846_v0  ;;  %v33537_v8 = vld [vmem:[#allocation4_spill] sm:$0xff] }
 0x865   :  { %22363 = vmatmul.mubr.msk.f32.gmra.mrb[138].mxu1 %vm271_vm0, %v29692_v24  ;;  %33534 = vst [vmem:[#allocation65_spill] sm:$0xff] %v29717_v33 }
 0x866   :  { %22365 = vmatprep.mubr.msk.f32.mxu1 %vm271_vm0, %v29698_v53 }
 0x869   :  { %22366 = vmatmul.mubr.msk.f32.gmra.mrb[140].mxu1 %vm271_vm0, %v29704_v61 }
 0x86a   :  { %22368 = vmatprep.mubr.msk.f32.mxu1 %vm271_vm0, %v29710_v57 }
 0x86d   :  { %22369 = vmatmul.mubr.msk.f32.gmra.mrb[142].mxu1 %vm271_vm0, %v29717_v33 }
 0x86e   :  { %22373 = vmatprep.mubr.msk.f32.mxu1 %vm271_vm0, %v29033_v13 }
 0x871   :  { %22374 = vmatmul.mubr.msk.f32.vlgmr.msra.gmra.mrb[104].mxu1 %vm271_vm0, %v29029_v30  ;;  %v29758_v30 = vld [vmem:[%s32402_s7 + $0x1] ss:$0 sm:$0xff] }
 0x872   :  { %22376 = vmatprep.mubr.msk.f32.mxu1 %vm271_vm0, %v29051_v16  ;;  %22434 = vmatpush3.msra.mxu1 %v29492_v36  ;;  %v8304_v13 = vadd.f32 %v29758_v30, %v29168_v62  ;;  %v8328_v62 = vadd.f32 %v29758_v30, %v29354_v52  ;;  %v18227_v52 = vld [vmem:[%s32403_s4 + $0x30] sm:$0xff] }
 0x873   :  { %22495 = vmatprep.subr.mxu1 %v18186_v40 }
 0x874   :  { %v8400_v36 = vmul.f32 0.2, %v8304_v13  ;;  %vm8352_vm14 = vcmp.ge.f32.partialorder %v8304_v13, 0.0  ;;  %vm8376_vm15 = vcmp.ge.f32.partialorder %v8328_v62, 0.0 }
 0x875   :  { %22377 = vmatmul.mubr.msk.f32.gmra.mrb[106].mxu1 %vm271_vm0, %v29039_v42 }
 0x876   :  { %22379 = vmatprep.mubr.msk.f32.mxu1 %vm271_vm0, %v29069_v6  ;;  %v29770_v29 = vsel %vm8352_vm14, %v8304_v13, %v8400_v36  ;;  %v33539_v13 = vld [vmem:[#allocation91_spill] sm:$0xff] }
 0x877   :  { %v8305_v36 = vadd.f32 %v29758_v30, %v33539_v13  ;;  %v33545_v13 = vld [vmem:[#allocation31_spill] sm:$0xff] }
 0x879   :  { %22380 = vmatmul.mubr.msk.f32.gmra.mrb[108].mxu1 %vm271_vm0, %v29060_v28  ;;  %v8401_v0 = vmul.f32 0.2, %v8305_v36  ;;  %vm8353_vm3 = vcmp.ge.f32.partialorder %v8305_v36, 0.0 }
 0x87a   :  { %22382 = vmatprep.mubr.msk.f32.mxu1 %vm271_vm0, %v29087_v4 }
 0x87d   :  { %22383 = vmatmul.mubr.msk.f32.gmra.mrb[110].mxu1 %vm271_vm0, %v29078_v31 }
 0x87e   :  { %22385 = vmatprep.mubr.msk.f32.mxu1 %vm271_vm0, %v29105_v17 }
 0x881   :  { %22386 = vmatmul.mubr.msk.f32.gmra.mrb[112].mxu1 %vm271_vm0, %v29096_v38 }
 0x882   :  { %22388 = vmatprep.mubr.msk.f32.mxu1 %vm271_vm0, %v29123_v63 }
 0x885   :  { %22389 = vmatmul.mubr.msk.f32.gmra.mrb[114].mxu1 %vm271_vm0, %v29114_v47 }
 0x886   :  { %22391 = vmatprep.mubr.msk.f32.mxu1 %vm271_vm0, %v29141_v50 }
 0x889   :  { %22392 = vmatmul.mubr.msk.f32.gmra.mrb[116].mxu1 %vm271_vm0, %v29132_v54 }
 0x88a   :  { %22394 = vmatprep.mubr.msk.f32.mxu1 %vm271_vm0, %v29159_v21 }
 0x88d   :  { %22395 = vmatmul.mubr.msk.f32.gmra.mrb[118].mxu1 %vm271_vm0, %v29150_v46 }
 0x88e   :  { %22397 = vmatprep.mubr.msk.f32.mxu1 %vm271_vm0, %v29178_v27 }
 0x891   :  { %22398 = vmatmul.mubr.msk.f32.gmra.mrb[120].mxu1 %vm271_vm0, %v29170_v51 }
 0x892   :  { %22400 = vmatprep.mubr.msk.f32.mxu1 %vm271_vm0, %v29197_v58 }
 0x895   :  { %22401 = vmatmul.mubr.msk.f32.gmra.mrb[122].mxu1 %vm271_vm0, %v29770_v29 }
 0x896   :  { %22403 = vmatprep.mubr.msk.f32.mxu1 %vm271_vm0, %v29225_v32 }
 0x899   :  { %22404 = vmatmul.mubr.msk.f32.gmra.mrb[124].mxu1 %vm271_vm0, %v29221_v22  ;;  %v8424_v22 = vmul.f32 0.2, %v8328_v62 }
 0x89a   :  { %22406 = vmatprep.mubr.msk.f32.mxu1 %vm271_vm0, %v29238_v34 }
 0x89b   :  { %v29814_v32 = vsel %vm8376_vm15, %v8328_v62, %v8424_v22  ;;  %v33540_v62 = vld [vmem:[#allocation34_spill] sm:$0xff] }
 0x89c   :  { %v33541_v22 = vld [vmem:[#allocation82_spill] sm:$0xff] }
 0x89d   :  { %22407 = vmatmul.mubr.msk.f32.gmra.mrb[126].mxu1 %vm271_vm0, %v29231_v39 }
 0x89e   :  { %22409 = vmatprep.mubr.msk.f32.mxu1 %vm271_vm0, %v29255_v7 }
 0x8a1   :  { %22410 = vmatmul.mubr.msk.f32.gmra.mrb[128].mxu1 %vm271_vm0, %v29246_v2 }
 0x8a2   :  { %22412 = vmatprep.mubr.msk.f32.mxu1 %vm271_vm0, %v29273_v48 }
 0x8a5   :  { %22413 = vmatmul.mubr.msk.f32.gmra.mrb[130].mxu1 %vm271_vm0, %v29264_v41 }
 0x8a6   :  { %22415 = vmatprep.mubr.msk.f32.mxu1 %vm271_vm0, %v29291_v55 }
 0x8a9   :  { %22416 = vmatmul.mubr.msk.f32.gmra.mrb[132].mxu1 %vm271_vm0, %v29282_v25 }
 0x8aa   :  { %22418 = vmatprep.mubr.msk.f32.mxu1 %vm271_vm0, %v29309_v60 }
 0x8ad   :  { %22419 = vmatmul.mubr.msk.f32.gmra.mrb[134].mxu1 %vm271_vm0, %v29300_v10 }
 0x8ae   :  { %22421 = vmatprep.mubr.msk.f32.mxu1 %vm271_vm0, %v29327_v3 }
 0x8b1   :  { %22422 = vmatmul.mubr.msk.f32.gmra.mrb[136].mxu1 %vm271_vm0, %v29318_v23 }
 0x8b2   :  { %22424 = vmatprep.mubr.msk.f32.mxu1 %vm271_vm0, %v29345_v56 }
 0x8b5   :  { %22425 = vmatmul.mubr.msk.f32.gmra.mrb[138].mxu1 %vm271_vm0, %v29336_v5 }
 0x8b6   :  { %22427 = vmatprep.mubr.msk.f32.mxu1 %vm271_vm0, %v29364_v1 }
 0x8b9   :  { %22428 = vmatmul.mubr.msk.f32.gmra.mrb[140].mxu1 %vm271_vm0, %v29356_v43 }
 0x8ba   :  { %22430 = vmatprep.mubr.msk.f32.mxu1 %vm271_vm0, %v29383_v18 }
 0x8bd   :  { %22431 = vmatmul.mubr.msk.f32.gmra.mrb[142].mxu1 %vm271_vm0, %v29814_v32 }
 0x8be   :  { %22435 = vmatprep.mubr.msk.f32.mxu1 %vm271_vm0, %v29044_v20  ;;  %v33535_v20 = vld [vmem:[#allocation46_spill] sm:$0xff] }
 0x8c1   :  { %22436 = vmatmul.mubr.msk.f32.vlgmr.msra.gmra.mrb[104].mxu1 %vm271_vm0, %v29064_v12  ;;  %v33536_v12 = vld [vmem:[#allocation48_spill] sm:$0xff] }
 0x8c2   :  { %22438 = vmatprep.mubr.msk.f32.mxu1 %vm271_vm0, %v29067_v9  ;;  %22496 = vmatpush3.msra.mxu1 %v18186_v40  ;;  %v33538_v40 = vld [vmem:[#allocation28_spill] sm:$0xff] }
 0x8c3   :  { %22557 = vmatprep.subr.mxu1 %v18227_v52 }
 0x8c5   :  { %22439 = vmatmul.mubr.msk.f32.gmra.mrb[106].mxu1 %vm271_vm0, %v29082_v37 }
 0x8c6   :  { %22441 = vmatprep.mubr.msk.f32.mxu1 %vm271_vm0, %v29085_v44 }
 0x8c9   :  { %22442 = vmatmul.mubr.msk.f32.gmra.mrb[108].mxu1 %vm271_vm0, %v29100_v59 }
 0x8ca   :  { %22444 = vmatprep.mubr.msk.f32.mxu1 %vm271_vm0, %v29103_v15  ;;  %v33544_v15 = vld [vmem:[#allocation10_spill] sm:$0xff] }
 0x8cd   :  { %22445 = vmatmul.mubr.msk.f32.gmra.mrb[110].mxu1 %vm271_vm0, %v33535_v20  ;;  %v33542_v20 = vld [vmem:[#allocation84_spill] sm:$0xff] }
 0x8ce   :  { %22447 = vmatprep.mubr.msk.f32.mxu1 %vm271_vm0, %v33536_v12  ;;  %v33543_v12 = vld [vmem:[#allocation86_spill] sm:$0xff] }
 0x8d1   :  { %22448 = vmatmul.mubr.msk.f32.gmra.mrb[112].mxu1 %vm271_vm0, %v33537_v8  ;;  %v29853_v8 = vsel %vm8353_vm3, %v8305_v36, %v8401_v0  ;;  %v33550_v36 = vld [vmem:[#allocation3_spill] sm:$0xff] }
 0x8d2   :  { %22450 = vmatprep.mubr.msk.f32.mxu1 %vm271_vm0, %v33538_v40  ;;  %v10080_v40 = vrot.slane %v29770_v29, 1 }
 0x8d5   :  { %22451 = vmatmul.mubr.msk.f32.gmra.mrb[114].mxu1 %vm271_vm0, %v33540_v62  ;;  %v33546_v62 = vld [vmem:[#allocation40_spill] sm:$0xff] }
 0x8d6   :  { %22453 = vmatprep.mubr.msk.f32.mxu1 %vm271_vm0, %v33541_v22  ;;  %v32850_v22 = vrot.slane %v29853_v8, 1 }
 0x8d8   :  { %v29873_v0 = vsel %vm154_vm2, %v10080_v40, %v32850_v22  ;;  %v33556_v22 = vld [vmem:[#allocation76_spill] sm:$0xff] }
 0x8d9   :  { %22454 = vmatmul.mubr.msk.f32.gmra.mrb[116].mxu1 %vm271_vm0, %v33542_v20  ;;  %v33547_v20 = vrot.slane %v29197_v58, 1  ;;  %33549 = vst [vmem:[#allocation68_spill] sm:$0xff] %v29873_v0 }
 0x8da   :  { %22456 = vmatprep.mubr.msk.f32.mxu1 %vm271_vm0, %v33543_v12 }
 0x8db   :  { %v29866_v59 = vsel %vm154_vm2, %v33547_v20, %v10080_v40  ;;  %v33553_v20 = vld [vmem:[#allocation42_spill] sm:$0xff]  ;;  %v33555_v40 = vld [vmem:[#allocation75_spill] sm:$0xff] }
 0x8dc   :  { %33548 = vst [vmem:[#allocation67_spill] sm:$0xff] %v29866_v59 }
 0x8dd   :  { %22457 = vmatmul.mubr.msk.f32.gmra.mrb[118].mxu1 %vm271_vm0, %v33544_v15 }
 0x8de   :  { %22459 = vmatprep.mubr.msk.f32.mxu1 %vm271_vm0, %v33545_v13  ;;  %v33552_v13 = vld [vmem:[#allocation45_spill] sm:$0xff] }
 0x8e1   :  { %22460 = vmatmul.mubr.msk.f32.gmra.mrb[120].mxu1 %vm271_vm0, %v33546_v62  ;;  %v33551_v62 = vld [vmem:[#allocation44_spill] sm:$0xff] }
 0x8e2   :  { %22462 = vmatprep.mubr.msk.f32.mxu1 %vm271_vm0, %v29866_v59  ;;  %v33554_v59 = vld [vmem:[#allocation69_spill] sm:$0xff] }
 0x8e5   :  { %22463 = vmatmul.mubr.msk.f32.gmra.mrb[122].mxu1 %vm271_vm0, %v29873_v0  ;;  %v33557_v0 = vld [vmem:[#allocation47_spill] sm:$0xff] }
 0x8e6   :  { %22465 = vmatprep.mubr.msk.f32.mxu1 %vm271_vm0, %v33550_v36  ;;  %v33558_v36 = vld [vmem:[#allocation50_spill] sm:$0xff] }
 0x8e9   :  { %22466 = vmatmul.mubr.msk.f32.gmra.mrb[124].mxu1 %vm271_vm0, %v33551_v62  ;;  %v33559_v62 = vld [vmem:[#allocation51_spill] sm:$0xff] }
 0x8ea   :  { %22468 = vmatprep.mubr.msk.f32.mxu1 %vm271_vm0, %v33552_v13  ;;  %v33560_v13 = vld [vmem:[#allocation54_spill] sm:$0xff] }
 0x8ed   :  { %22469 = vmatmul.mubr.msk.f32.gmra.mrb[126].mxu1 %vm271_vm0, %v33553_v20  ;;  %v33561_v20 = vld [vmem:[#allocation55_spill] sm:$0xff] }
 0x8ee   :  { %22471 = vmatprep.mubr.msk.f32.mxu1 %vm271_vm0, %v33554_v59  ;;  %v8329_v59 = vadd.f32 %v29758_v30, %v29375_v35  ;;  %v33563_v35 = vld [vmem:[#allocation63_spill] sm:$0xff] }
 0x8f0   :  { %vm8377_vm4 = vcmp.ge.f32.partialorder %v8329_v59, 0.0 }
 0x8f1   :  { %22472 = vmatmul.mubr.msk.f32.gmra.mrb[128].mxu1 %vm271_vm0, %v33555_v40  ;;  %v33562_v40 = vld [vmem:[#allocation58_spill] sm:$0xff] }
 0x8f2   :  { %22474 = vmatprep.mubr.msk.f32.mxu1 %vm271_vm0, %v33556_v22  ;;  %v8425_v22 = vmul.f32 0.2, %v8329_v59 }
 0x8f5   :  { %22475 = vmatmul.mubr.msk.f32.gmra.mrb[130].mxu1 %vm271_vm0, %v33557_v0 }
 0x8f6   :  { %22477 = vmatprep.mubr.msk.f32.mxu1 %vm271_vm0, %v33558_v36 }
 0x8f9   :  { %22478 = vmatmul.mubr.msk.f32.gmra.mrb[132].mxu1 %vm271_vm0, %v33559_v62  ;;  %v29909_v62 = vsel %vm8377_vm4, %v8329_v59, %v8425_v22  ;;  %v33568_v22 = vld [vmem:[#allocation73_spill] sm:$0xff] }
 0x8fa   :  { %22480 = vmatprep.mubr.msk.f32.mxu1 %vm271_vm0, %v33560_v13  ;;  %v10084_v13 = vrot.slane %v29814_v32, 1 }
 0x8fd   :  { %22481 = vmatmul.mubr.msk.f32.gmra.mrb[134].mxu1 %vm271_vm0, %v33561_v20  ;;  %v33564_v20 = vld [vmem:[#allocation72_spill] sm:$0xff] }
 0x8fe   :  { %22483 = vmatprep.mubr.msk.f32.mxu1 %vm271_vm0, %v33562_v40  ;;  %v32853_v40 = vrot.slane %v29909_v62, 1 }
 0x900   :  { %v29929_v59 = vsel %vm154_vm2, %v10084_v13, %v32853_v40  ;;  %v33572_v40 = vld [vmem:[#allocation14_spill] sm:$0xff] }
 0x901   :  { %22484 = vmatmul.mubr.msk.f32.gmra.mrb[136].mxu1 %vm271_vm0, %v29359_v26  ;;  %v33565_v26 = vrot.slane %v29383_v18, 1  ;;  %33567 = vst [vmem:[#allocation2_spill] sm:$0xff] %v29929_v59 }
 0x902   :  { %22486 = vmatprep.mubr.msk.f32.mxu1 %vm271_vm0, %v29362_v19 }
 0x903   :  { %v29922_v36 = vsel %vm154_vm2, %v33565_v26, %v10084_v13  ;;  %v33569_v26 = vld [vmem:[#allocation77_spill] sm:$0xff] }
 0x904   :  { %33566 = vst [vmem:[#allocation5_spill] sm:$0xff] %v29922_v36  ;;  %v33571_v13 = vld [vmem:[#allocation13_spill] sm:$0xff] }
 0x905   :  { %22487 = vmatmul.mubr.msk.f32.gmra.mrb[138].mxu1 %vm271_vm0, %v29378_v14 }
 0x906   :  { %22489 = vmatprep.mubr.msk.f32.mxu1 %vm271_vm0, %v33563_v35  ;;  %v33570_v35 = vld [vmem:[#allocation8_spill] sm:$0xff] }
 0x909   :  { %22490 = vmatmul.mubr.msk.f32.gmra.mrb[140].mxu1 %vm271_vm0, %v33564_v20  ;;  %v18268_v20 = vld [vmem:[%s32403_s4 + $0x38] sm:$0xff] }
 0x90a   :  { %22492 = vmatprep.mubr.msk.f32.mxu1 %vm271_vm0, %v29922_v36  ;;  %v33575_v36 = vld [vmem:[#allocation17_spill] sm:$0xff] }
 0x90d   :  { %22493 = vmatmul.mubr.msk.f32.gmra.mrb[142].mxu1 %vm271_vm0, %v29929_v59  ;;  %v33573_v59 = vld [vmem:[#allocation7_spill] sm:$0xff] }
 0x90e   :  { %22497 = vmatprep.mubr.msk.f32.mxu1 %vm271_vm0, %v33568_v22  ;;  %v33574_v22 = vld [vmem:[#allocation41_spill] sm:$0xff] }
 0x911   :  { %22498 = vmatmul.mubr.msk.f32.vlgmr.msra.gmra.mrb[104].mxu1 %vm271_vm0, %v33569_v26  ;;  %v33576_v26 = vld [vmem:[#allocation18_spill] sm:$0xff] }
 0x912   :  { %22500 = vmatprep.mubr.msk.f32.mxu1 %vm271_vm0, %v33570_v35  ;;  %22558 = vmatpush3.msra.mxu1 %v18227_v52  ;;  %v33577_v52 = vld [vmem:[#allocation19_spill] sm:$0xff]  ;;  %v33578_v35 = vld [vmem:[#allocation20_spill] sm:$0xff] }
 0x913   :  { %22619 = vmatprep.subr.mxu1 %v18268_v20 }
 0x915   :  { %22501 = vmatmul.mubr.msk.f32.gmra.mrb[106].mxu1 %vm271_vm0, %v33571_v13  ;;  %v33579_v13 = vld [vmem:[#allocation21_spill] sm:$0xff] }
 0x916   :  { %22503 = vmatprep.mubr.msk.f32.mxu1 %vm271_vm0, %v33572_v40  ;;  %v33580_v40 = vld [vmem:[#allocation22_spill] sm:$0xff] }
 0x919   :  { %22504 = vmatmul.mubr.msk.f32.gmra.mrb[108].mxu1 %vm271_vm0, %v33573_v59 }
 0x91a   :  { %22506 = vmatprep.mubr.msk.f32.mxu1 %vm271_vm0, %v33574_v22  ;;  %v33581_v22 = vld [vmem:[#allocation24_spill] sm:$0xff] }
 0x91d   :  { %22507 = vmatmul.mubr.msk.f32.gmra.mrb[110].mxu1 %vm271_vm0, %v33575_v36 }
 0x91e   :  { %22509 = vmatprep.mubr.msk.f32.mxu1 %vm271_vm0, %v33576_v26  ;;  %v10403_v26 = vrot.slane %v29770_v29, 2 }
 0x921   :  { %22510 = vmatmul.mubr.msk.f32.gmra.mrb[112].mxu1 %vm271_vm0, %v33577_v52  ;;  %v33582_v52 = vld [vmem:[#allocation26_spill] sm:$0xff] }
 0x922   :  { %22512 = vmatprep.mubr.msk.f32.mxu1 %vm271_vm0, %v33578_v35  ;;  %v32859_v35 = vrot.slane %v29853_v8, 2 }
 0x925   :  { %22513 = vmatmul.mubr.msk.f32.gmra.mrb[114].mxu1 %vm271_vm0, %v33579_v13  ;;  %v33583_v13 = vld [vmem:[#allocation27_spill] sm:$0xff] }
 0x926   :  { %22515 = vmatprep.mubr.msk.f32.mxu1 %vm271_vm0, %v33580_v40  ;;  %v33584_v40 = vrot.slane %v29197_v58, 2 }
 0x929   :  { %22516 = vmatmul.mubr.msk.f32.gmra.mrb[116].mxu1 %vm271_vm0, %v29575_v49  ;;  %v29977_v49 = vsel %vm1186_vm1, %v33584_v40, %v10403_v26  ;;  %v33589_v40 = vld [vmem:[#allocation38_spill] sm:$0xff] }
 0x92a   :  { %22518 = vmatprep.mubr.msk.f32.mxu1 %vm271_vm0, %v33581_v22  ;;  %33585 = vst [vmem:[#allocation6_spill] sm:$0xff] %v29977_v49 }
 0x92d   :  { %22519 = vmatmul.mubr.msk.f32.gmra.mrb[118].mxu1 %vm271_vm0, %v29587_v45  ;;  %v29984_v45 = vsel %vm1186_vm1, %v10403_v26, %v32859_v35  ;;  %v33591_v26 = vld [vmem:[#allocation43_spill] sm:$0xff]  ;;  %v33592_v35 = vld [vmem:[#allocation49_spill] sm:$0xff] }
 0x92e   :  { %22521 = vmatprep.mubr.msk.f32.mxu1 %vm271_vm0, %v33582_v52  ;;  %33586 = vst [vmem:[#allocation70_spill] sm:$0xff] %v29984_v45  ;;  %v33588_v52 = vld [vmem:[#allocation33_spill] sm:$0xff] }
 0x931   :  { %22522 = vmatmul.mubr.msk.f32.gmra.mrb[120].mxu1 %vm271_vm0, %v33583_v13  ;;  %v33587_v13 = vld [vmem:[#allocation32_spill] sm:$0xff] }
 0x932   :  { %22524 = vmatprep.mubr.msk.f32.mxu1 %vm271_vm0, %v29977_v49  ;;  %v33590_v49 = vld [vmem:[#allocation39_spill] sm:$0xff] }
 0x935   :  { %22525 = vmatmul.mubr.msk.f32.gmra.mrb[122].mxu1 %vm271_vm0, %v29984_v45  ;;  %v33593_v45 = vld [vmem:[#allocation66_spill] sm:$0xff] }
 0x936   :  { %22527 = vmatprep.mubr.msk.f32.mxu1 %vm271_vm0, %v29614_v11  ;;  %v33594_v11 = vld [vmem:[#allocation52_spill] sm:$0xff] }
 0x939   :  { %22528 = vmatmul.mubr.msk.f32.gmra.mrb[124].mxu1 %vm271_vm0, %v33587_v13  ;;  %v33595_v13 = vld [vmem:[#allocation53_spill] sm:$0xff] }
 0x93a   :  { %22530 = vmatprep.mubr.msk.f32.mxu1 %vm271_vm0, %v33588_v52  ;;  %v33596_v52 = vld [vmem:[#allocation56_spill] sm:$0xff] }
 0x93d   :  { %22531 = vmatmul.mubr.msk.f32.gmra.mrb[126].mxu1 %vm271_vm0, %v33589_v40  ;;  %v33597_v40 = vld [vmem:[#allocation57_spill] sm:$0xff] }
 0x93e   :  { %22533 = vmatprep.mubr.msk.f32.mxu1 %vm271_vm0, %v33590_v49  ;;  %v33598_v49 = vld [vmem:[#allocation60_spill] sm:$0xff] }
 0x941   :  { %22534 = vmatmul.mubr.msk.f32.gmra.mrb[128].mxu1 %vm271_vm0, %v33591_v26 }
 0x942   :  { %22536 = vmatprep.mubr.msk.f32.mxu1 %vm271_vm0, %v33592_v35 }
 0x945   :  { %22537 = vmatmul.mubr.msk.f32.gmra.mrb[130].mxu1 %vm271_vm0, %v33593_v45 }
 0x946   :  { %22539 = vmatprep.mubr.msk.f32.mxu1 %vm271_vm0, %v33594_v11  ;;  %v10407_v11 = vrot.slane %v29814_v32, 2 }
 0x949   :  { %22540 = vmatmul.mubr.msk.f32.gmra.mrb[132].mxu1 %vm271_vm0, %v33595_v13 }
 0x94a   :  { %22542 = vmatprep.mubr.msk.f32.mxu1 %vm271_vm0, %v33596_v52  ;;  %v10409_v52 = vrot.slane %v29909_v62, 2 }
 0x94d   :  { %22543 = vmatmul.mubr.msk.f32.gmra.mrb[134].mxu1 %vm271_vm0, %v33597_v40 }
 0x94e   :  { %22545 = vmatprep.mubr.msk.f32.mxu1 %vm271_vm0, %v33598_v49  ;;  %v33599_v49 = vrot.slane %v29383_v18, 2 }
 0x951   :  { %22546 = vmatmul.mubr.msk.f32.gmra.mrb[136].mxu1 %vm271_vm0, %v29692_v24  ;;  %v30029_v24 = vsel %vm1186_vm1, %v33599_v49, %v10407_v11  ;;  %v33628_v49 = vld [vmem:[#allocation63_spill] sm:$0xff] }
 0x952   :  { %22548 = vmatprep.mubr.msk.f32.mxu1 %vm271_vm0, %v29698_v53 }
 0x955   :  { %22549 = vmatmul.mubr.msk.f32.gmra.mrb[138].mxu1 %vm271_vm0, %v29704_v61  ;;  %v30036_v61 = vsel %vm1186_vm1, %v10407_v11, %v10409_v52  ;;  %v33635_v11 = vld [vmem:[#allocation14_spill] sm:$0xff] }
 0x956   :  { %22551 = vmatprep.mubr.msk.f32.mxu1 %vm271_vm0, %v29710_v57 }
 0x959   :  { %22552 = vmatmul.mubr.msk.f32.gmra.mrb[140].mxu1 %vm271_vm0, %v29717_v33  ;;  %v18309_v33 = vld [vmem:[%s32403_s4 + $0x40] sm:$0xff] }
 0x95a   :  { %22554 = vmatprep.mubr.msk.f32.mxu1 %vm271_vm0, %v30029_v24 }
 0x95d   :  { %22555 = vmatmul.mubr.msk.f32.gmra.mrb[142].mxu1 %vm271_vm0, %v30036_v61 }
 0x95e   :  { %22559 = vmatprep.mubr.msk.f32.mxu1 %vm271_vm0, %v29051_v16 }
 0x961   :  { %22560 = vmatmul.mubr.msk.f32.vlgmr.msra.gmra.mrb[104].mxu1 %vm271_vm0, %v29039_v42  ;;  %v33600_v42 = vld [vmem:[#allocation88_spill] sm:$0xff] }
 0x962   :  { %22562 = vmatprep.mubr.msk.f32.mxu1 %vm271_vm0, %v29069_v6  ;;  %22620 = vmatpush3.msra.mxu1 %v18268_v20  ;;  %v8306_v16 = vadd.f32 %v29758_v30, %v33600_v42  ;;  %v33634_v20 = vld [vmem:[#allocation13_spill] sm:$0xff] }
 0x963   :  { %22681 = vmatprep.subr.mxu1 %v18309_v33  ;;  %v33636_v42 = vld [vmem:[#allocation41_spill] sm:$0xff] }
 0x964   :  { %vm8354_vm6 = vcmp.ge.f32.partialorder %v8306_v16, 0.0 }
 0x965   :  { %22563 = vmatmul.mubr.msk.f32.gmra.mrb[106].mxu1 %vm271_vm0, %v29060_v28  ;;  %v8402_v28 = vmul.f32 0.2, %v8306_v16 }
 0x966   :  { %22565 = vmatprep.mubr.msk.f32.mxu1 %vm271_vm0, %v29087_v4 }
 0x967   :  { %v30083_v6 = vsel %vm8354_vm6, %v8306_v16, %v8402_v28  ;;  %v33637_v16 = vld [vmem:[#allocation18_spill] sm:$0xff]  ;;  %v33638_v28 = vld [vmem:[#allocation19_spill] sm:$0xff] }
 0x969   :  { %22566 = vmatmul.mubr.msk.f32.gmra.mrb[108].mxu1 %vm271_vm0, %v29078_v31 }
 0x96a   :  { %22568 = vmatprep.mubr.msk.f32.mxu1 %vm271_vm0, %v29105_v17  ;;  %v33602_v17 = vld [vmem:[#allocation15_spill] sm:$0xff] }
 0x96d   :  { %22569 = vmatmul.mubr.msk.f32.gmra.mrb[110].mxu1 %vm271_vm0, %v29096_v38 }
 0x96e   :  { %22571 = vmatprep.mubr.msk.f32.mxu1 %vm271_vm0, %v29123_v63  ;;  %v33604_v63 = vld [vmem:[#allocation46_spill] sm:$0xff] }
 0x971   :  { %22572 = vmatmul.mubr.msk.f32.gmra.mrb[112].mxu1 %vm271_vm0, %v29114_v47  ;;  %v33603_v47 = vld [vmem:[#allocation16_spill] sm:$0xff] }
 0x972   :  { %22574 = vmatprep.mubr.msk.f32.mxu1 %vm271_vm0, %v29141_v50  ;;  %v33610_v50 = vld [vmem:[#allocation84_spill] sm:$0xff] }
 0x975   :  { %22575 = vmatmul.mubr.msk.f32.gmra.mrb[114].mxu1 %vm271_vm0, %v29132_v54  ;;  %v33605_v54 = vld [vmem:[#allocation48_spill] sm:$0xff] }
 0x976   :  { %22577 = vmatprep.mubr.msk.f32.mxu1 %vm271_vm0, %v29159_v21  ;;  %v33612_v21 = vld [vmem:[#allocation40_spill] sm:$0xff] }
 0x979   :  { %22578 = vmatmul.mubr.msk.f32.gmra.mrb[116].mxu1 %vm271_vm0, %v29150_v46  ;;  %v33611_v46 = vld [vmem:[#allocation31_spill] sm:$0xff] }
 0x97a   :  { %22580 = vmatprep.mubr.msk.f32.mxu1 %vm271_vm0, %v29178_v27  ;;  %v33614_v27 = vld [vmem:[#allocation68_spill] sm:$0xff] }
 0x97d   :  { %22581 = vmatmul.mubr.msk.f32.gmra.mrb[118].mxu1 %vm271_vm0, %v29170_v51  ;;  %v33613_v51 = vld [vmem:[#allocation67_spill] sm:$0xff] }
 0x97e   :  { %22583 = vmatprep.mubr.msk.f32.mxu1 %vm271_vm0, %v29197_v58 }
 0x981   :  { %22584 = vmatmul.mubr.msk.f32.gmra.mrb[120].mxu1 %vm271_vm0, %v29770_v29  ;;  %v33630_v29 = vld [vmem:[#allocation5_spill] sm:$0xff] }
 0x982   :  { %22586 = vmatprep.mubr.msk.f32.mxu1 %vm271_vm0, %v29853_v8 }
 0x985   :  { %22587 = vmatmul.mubr.msk.f32.gmra.mrb[122].mxu1 %vm271_vm0, %v30083_v6 }
 0x986   :  { %22589 = vmatprep.mubr.msk.f32.mxu1 %vm271_vm0, %v29238_v34  ;;  %v33617_v34 = vld [vmem:[#allocation45_spill] sm:$0xff] }
 0x989   :  { %22590 = vmatmul.mubr.msk.f32.gmra.mrb[124].mxu1 %vm271_vm0, %v29231_v39  ;;  %v33601_v39 = vld [vmem:[#allocation62_spill] sm:$0xff] }
 0x98a   :  { %22592 = vmatprep.mubr.msk.f32.mxu1 %vm271_vm0, %v29255_v7  ;;  %v8330_v31 = vadd.f32 %v29758_v30, %v33601_v39  ;;  %v33619_v7 = vld [vmem:[#allocation69_spill] sm:$0xff]  ;;  %v33629_v30 = vld [vmem:[#allocation72_spill] sm:$0xff] }
 0x98b   :  { %v33639_v39 = vld [vmem:[#allocation20_spill] sm:$0xff] }
 0x98c   :  { %v8426_v4 = vmul.f32 0.2, %v8330_v31  ;;  %vm8378_vm7 = vcmp.ge.f32.partialorder %v8330_v31, 0.0 }
 0x98d   :  { %22593 = vmatmul.mubr.msk.f32.gmra.mrb[126].mxu1 %vm271_vm0, %v29246_v2  ;;  %v33618_v2 = vld [vmem:[#allocation42_spill] sm:$0xff] }
 0x98e   :  { %22595 = vmatprep.mubr.msk.f32.mxu1 %vm271_vm0, %v29273_v48  ;;  %v30127_v38 = vsel %vm8378_vm7, %v8330_v31, %v8426_v4  ;;  %v33616_v48 = vld [vmem:[#allocation9_spill] sm:$0xff]  ;;  %v33641_v4 = vld [vmem:[#allocation22_spill] sm:$0xff] }
 0x98f   :  { %v33640_v31 = vld [vmem:[#allocation21_spill] sm:$0xff] }
 0x991   :  { %22596 = vmatmul.mubr.msk.f32.gmra.mrb[128].mxu1 %vm271_vm0, %v29264_v41  ;;  %v33620_v41 = vld [vmem:[#allocation75_spill] sm:$0xff] }
 0x992   :  { %22598 = vmatprep.mubr.msk.f32.mxu1 %vm271_vm0, %v29291_v55  ;;  %v18351_v55 = vld [vmem:[%s32404_s5 + $0x8] sm:$0xff] }
 0x993   :  { %22743 = vmatprep.subr.mxu0 %v18351_v55 }
 0x994   :  { %22744 = vmatpush3.msra.mxu0 %v18351_v55 }
 0x995   :  { %22599 = vmatmul.mubr.msk.f32.gmra.mrb[130].mxu1 %vm271_vm0, %v29282_v25  ;;  %v33621_v25 = vld [vmem:[#allocation76_spill] sm:$0xff] }
 0x996   :  { %22601 = vmatprep.mubr.msk.f32.mxu1 %vm271_vm0, %v29309_v60  ;;  %v11043_v60 = vrot.slane %v30083_v6, 1 }
 0x998   :  { %v11045_v58 = vsel %vm154_vm2, %v11043_v60, %v33616_v48 }
 0x999   :  { %22602 = vmatmul.mubr.msk.f32.gmra.mrb[132].mxu1 %vm271_vm0, %v29300_v10  ;;  %v33622_v10 = vld [vmem:[#allocation50_spill] sm:$0xff] }
 0x99a   :  { %22604 = vmatprep.mubr.msk.f32.mxu1 %vm271_vm0, %v29327_v3 }
 0x99d   :  { %22605 = vmatmul.mubr.msk.f32.gmra.mrb[134].mxu1 %vm271_vm0, %v29318_v23  ;;  %v33623_v23 = vld [vmem:[#allocation51_spill] sm:$0xff] }
 0x99e   :  { %22607 = vmatprep.mubr.msk.f32.mxu1 %vm271_vm0, %v29345_v56  ;;  %v33609_v56 = vld [vmem:[#allocation82_spill] sm:$0xff] }
 0x9a1   :  { %22608 = vmatmul.mubr.msk.f32.gmra.mrb[136].mxu1 %vm271_vm0, %v29336_v5  ;;  %v33624_v5 = vld [vmem:[#allocation54_spill] sm:$0xff] }
 0x9a2   :  { %22610 = vmatprep.mubr.msk.f32.mxu1 %vm271_vm0, %v29364_v1  ;;  %v33625_v1 = vld [vmem:[#allocation55_spill] sm:$0xff] }
 0x9a5   :  { %22611 = vmatmul.mubr.msk.f32.gmra.mrb[138].mxu1 %vm271_vm0, %v29356_v43  ;;  %v33626_v43 = vld [vmem:[#allocation58_spill] sm:$0xff] }
 0x9a6   :  { %22613 = vmatprep.mubr.msk.f32.mxu1 %vm271_vm0, %v29383_v18  ;;  %v33627_v18 = vld [vmem:[#allocation59_spill] sm:$0xff] }
 0x9a9   :  { %22614 = vmatmul.mubr.msk.f32.gmra.mrb[140].mxu1 %vm271_vm0, %v29814_v32  ;;  %v33631_v32 = vld [vmem:[#allocation2_spill] sm:$0xff] }
 0x9aa   :  { %22616 = vmatprep.mubr.msk.f32.mxu1 %vm271_vm0, %v29909_v62 }
 0x9ad   :  { %22617 = vmatmul.mubr.msk.f32.gmra.mrb[142].mxu1 %vm271_vm0, %v30127_v38 }
 0x9ae   :  { %22621 = vmatprep.mubr.msk.f32.mxu1 %vm271_vm0, %v29067_v9  ;;  %v33606_v9 = vld [vmem:[#allocation4_spill] sm:$0xff] }
 0x9b1   :  { %22622 = vmatmul.mubr.msk.f32.vlgmr.msra.gmra.mrb[104].mxu1 %vm271_vm0, %v29082_v37  ;;  %v33607_v37 = vld [vmem:[#allocation28_spill] sm:$0xff] }
 0x9b2   :  { %22624 = vmatprep.mubr.msk.f32.mxu1 %vm271_vm0, %v29085_v44  ;;  %22682 = vmatpush3.msra.mxu1 %v18309_v33  ;;  %v33608_v44 = vld [vmem:[#allocation34_spill] sm:$0xff]  ;;  %v11046_v33 = vrot.slane %v30127_v38, 1 }
 0x9b5   :  { %22625 = vmatmul.mubr.msk.f32.gmra.mrb[106].mxu1 %vm271_vm0, %v33602_v17  ;;  %v33644_v17 = vld [vmem:[#allocation26_spill] sm:$0xff] }
 0x9b6   :  { %22627 = vmatprep.mubr.msk.f32.mxu1 %vm271_vm0, %v33603_v47  ;;  %v11364_v47 = vrot.slane %v30083_v6, 2  ;;  %v33650_v6 = vld [vmem:[#allocation33_spill] sm:$0xff] }
 0x9b9   :  { %22628 = vmatmul.mubr.msk.f32.gmra.mrb[108].mxu1 %vm271_vm0, %v33604_v63  ;;  %v33645_v63 = vld [vmem:[#allocation27_spill] sm:$0xff] }
 0x9ba   :  { %22630 = vmatprep.mubr.msk.f32.mxu1 %vm271_vm0, %v33605_v54  ;;  %v33646_v54 = vld [vmem:[#allocation6_spill] sm:$0xff] }
 0x9bd   :  { %22631 = vmatmul.mubr.msk.f32.gmra.mrb[110].mxu1 %vm271_vm0, %v33606_v9  ;;  %v33647_v9 = vld [vmem:[#allocation70_spill] sm:$0xff] }
 0x9be   :  { %22633 = vmatprep.mubr.msk.f32.mxu1 %vm271_vm0, %v33607_v37  ;;  %v33648_v37 = vrot.slane %v29853_v8, 2 }
 0x9c1   :  { %22634 = vmatmul.mubr.msk.f32.gmra.mrb[112].mxu1 %vm271_vm0, %v33608_v44  ;;  %v33649_v44 = vld [vmem:[#allocation12_spill] sm:$0xff] }
 0x9c2   :  { %22636 = vmatprep.mubr.msk.f32.mxu1 %vm271_vm0, %v33609_v56  ;;  %v11366_v56 = vsel %vm1186_vm1, %v11364_v47, %v33649_v44 }
 0x9c5   :  { %22637 = vmatmul.mubr.msk.f32.gmra.mrb[114].mxu1 %vm271_vm0, %v33610_v50  ;;  %v33651_v50 = vld [vmem:[#allocation38_spill] sm:$0xff] }
 0x9c6   :  { %22639 = vmatprep.mubr.msk.f32.mxu1 %vm271_vm0, %v33543_v12  ;;  %v33632_v12 = vrot.slane %v29909_v62, 1 }
 0x9c9   :  { %22640 = vmatmul.mubr.msk.f32.gmra.mrb[116].mxu1 %vm271_vm0, %v33544_v15  ;;  %v33615_v15 = vrot.slane %v29853_v8, 1  ;;  %v33653_v8 = vld [vmem:[#allocation52_spill] sm:$0xff] }
 0x9ca   :  { %22642 = vmatprep.mubr.msk.f32.mxu1 %vm271_vm0, %v33611_v46  ;;  %v33652_v46 = vld [vmem:[#allocation39_spill] sm:$0xff] }
 0x9cb   :  { %v11044_v3 = vsel %vm154_vm2, %v33615_v15, %v11043_v60  ;;  %v33654_v60 = vld [vmem:[#allocation56_spill] sm:$0xff] }
 0x9cd   :  { %22643 = vmatmul.mubr.msk.f32.gmra.mrb[118].mxu1 %vm271_vm0, %v33612_v21  ;;  %v33655_v21 = vld [vmem:[#allocation60_spill] sm:$0xff] }
 0x9ce   :  { %22645 = vmatprep.mubr.msk.f32.mxu1 %vm271_vm0, %v33613_v51 }
 0x9d1   :  { %22646 = vmatmul.mubr.msk.f32.gmra.mrb[120].mxu1 %vm271_vm0, %v33614_v27 }
 0x9d2   :  { %22648 = vmatprep.mubr.msk.f32.mxu1 %vm271_vm0, %v11044_v3 }
 0x9d5   :  { %22649 = vmatmul.mubr.msk.f32.gmra.mrb[122].mxu1 %vm271_vm0, %v11045_v58 }
 0x9d6   :  { %22651 = vmatprep.mubr.msk.f32.mxu1 %vm271_vm0, %v33617_v34 }
 0x9d9   :  { %22652 = vmatmul.mubr.msk.f32.gmra.mrb[124].mxu1 %vm271_vm0, %v33618_v2 }
 0x9da   :  { %22654 = vmatprep.mubr.msk.f32.mxu1 %vm271_vm0, %v33619_v7 }
 0x9dd   :  { %22655 = vmatmul.mubr.msk.f32.gmra.mrb[126].mxu1 %vm271_vm0, %v33620_v41 }
 0x9de   :  { %22657 = vmatprep.mubr.msk.f32.mxu1 %vm271_vm0, %v33621_v25 }
 0x9e1   :  { %22658 = vmatmul.mubr.msk.f32.gmra.mrb[128].mxu1 %vm271_vm0, %v33557_v0  ;;  %v33633_v0 = vld [vmem:[#allocation8_spill] sm:$0xff] }
 0x9e2   :  { %22660 = vmatprep.mubr.msk.f32.mxu1 %vm271_vm0, %v33622_v10 }
 0x9e5   :  { %22661 = vmatmul.mubr.msk.f32.gmra.mrb[130].mxu1 %vm271_vm0, %v33623_v23 }
 0x9e6   :  { %22663 = vmatprep.mubr.msk.f32.mxu1 %vm271_vm0, %v33624_v5 }
 0x9e9   :  { %22664 = vmatmul.mubr.msk.f32.gmra.mrb[132].mxu1 %vm271_vm0, %v33625_v1 }
 0x9ea   :  { %22666 = vmatprep.mubr.msk.f32.mxu1 %vm271_vm0, %v33626_v43 }
 0x9ed   :  { %22667 = vmatmul.mubr.msk.f32.gmra.mrb[134].mxu1 %vm271_vm0, %v33627_v18 }
 0x9ee   :  { %22669 = vmatprep.mubr.msk.f32.mxu1 %vm271_vm0, %v29362_v19  ;;  %v11047_v19 = vsel %vm154_vm2, %v33632_v12, %v11046_v33 }
 0x9f1   :  { %22670 = vmatmul.mubr.msk.f32.gmra.mrb[136].mxu1 %vm271_vm0, %v29378_v14  ;;  %v11048_v14 = vsel %vm154_vm2, %v11046_v33, %v33616_v48 }
 0x9f2   :  { %22672 = vmatprep.mubr.msk.f32.mxu1 %vm271_vm0, %v33628_v49 }
 0x9f5   :  { %22673 = vmatmul.mubr.msk.f32.gmra.mrb[138].mxu1 %vm271_vm0, %v33629_v30 }
 0x9f6   :  { %22675 = vmatprep.mubr.msk.f32.mxu1 %vm271_vm0, %v33630_v29 }
 0x9f9   :  { %22676 = vmatmul.mubr.msk.f32.gmra.mrb[140].mxu1 %vm271_vm0, %v33631_v32 }
 0x9fa   :  { %22678 = vmatprep.mubr.msk.f32.mxu1 %vm271_vm0, %v11047_v19 }
 0x9fd   :  { %22679 = vmatmul.mubr.msk.f32.gmra.mrb[142].mxu1 %vm271_vm0, %v11048_v14 }
 0x9fe   :  { %22683 = vmatprep.mubr.msk.f32.mxu1 %vm271_vm0, %v33633_v0 }
 0xa01   :  { %22684 = vmatmul.mubr.msk.f32.vlgmr.msra.gmra.mrb[104].mxu1 %vm271_vm0, %v33634_v20 }
 0xa02   :  { %22686 = vmatprep.mubr.msk.f32.mxu1 %vm271_vm0, %v33635_v11 }
 0xa05   :  { %22687 = vmatmul.mubr.msk.f32.gmra.mrb[106].mxu1 %vm271_vm0, %v33573_v59  ;;  %v33642_v59 = vld [vmem:[#allocation23_spill] sm:$0xff] }
 0xa06   :  { %22689 = vmatprep.mubr.msk.f32.mxu1 %vm271_vm0, %v33636_v42 }
 0xa09   :  { %22690 = vmatmul.mubr.msk.f32.gmra.mrb[108].mxu1 %vm271_vm0, %v33575_v36  ;;  %v33643_v36 = vld [vmem:[#allocation25_spill] sm:$0xff] }
 0xa0a   :  { %22692 = vmatprep.mubr.msk.f32.mxu1 %vm271_vm0, %v33637_v16  ;;  %v30348_v16 = vld [vmem:[%s32404_s5 + $0x10] sm:$0xff] }
 0xa0d   :  { %22693 = vmatmul.mubr.msk.f32.gmra.mrb[110].mxu1 %vm271_vm0, %v33638_v28 }
 0xa0e   :  { %22695 = vmatprep.mubr.msk.f32.mxu1 %vm271_vm0, %v33639_v39 }
 0xa11   :  { %22696 = vmatmul.mubr.msk.f32.gmra.mrb[112].mxu1 %vm271_vm0, %v33640_v31 }
 0xa12   :  { %22698 = vmatprep.mubr.msk.f32.mxu1 %vm271_vm0, %v33641_v4 }
 0xa15   :  { %22699 = vmatmul.mubr.msk.f32.gmra.mrb[114].mxu1 %vm271_vm0, %v33642_v59 }
 0xa16   :  { %22701 = vmatprep.mubr.msk.f32.mxu1 %vm271_vm0, %v33581_v22  ;;  %v11365_v22 = vsel %vm1186_vm1, %v33648_v37, %v11364_v47 }
 0xa19   :  { %22702 = vmatmul.mubr.msk.f32.gmra.mrb[116].mxu1 %vm271_vm0, %v33643_v36 }
 0xa1a   :  { %22704 = vmatprep.mubr.msk.f32.mxu1 %vm271_vm0, %v33644_v17 }
 0xa1d   :  { %22705 = vmatmul.mubr.msk.f32.gmra.mrb[118].mxu1 %vm271_vm0, %v33645_v63 }
 0xa1e   :  { %22707 = vmatprep.mubr.msk.f32.mxu1 %vm271_vm0, %v33646_v54 }
 0xa21   :  { %22708 = vmatmul.mubr.msk.f32.gmra.mrb[120].mxu1 %vm271_vm0, %v33647_v9 }
 0xa22   :  { %22710 = vmatprep.mubr.msk.f32.mxu1 %vm271_vm0, %v11365_v22 }
 0xa25   :  { %22711 = vmatmul.mubr.msk.f32.gmra.mrb[122].mxu1 %vm271_vm0, %v11366_v56 }
 0xa26   :  { %22713 = vmatprep.mubr.msk.f32.mxu1 %vm271_vm0, %v33650_v6 }
 0xa29   :  { %22714 = vmatmul.mubr.msk.f32.gmra.mrb[124].mxu1 %vm271_vm0, %v33651_v50 }
 0xa2a   :  { %22716 = vmatprep.mubr.msk.f32.mxu1 %vm271_vm0, %v33652_v46 }
 0xa2d   :  { %22717 = vmatmul.mubr.msk.f32.gmra.mrb[126].mxu1 %vm271_vm0, %v33591_v26  ;;  %v33656_v26 = vld [vmem:[#allocation61_spill] sm:$0xff] }
 0xa2e   :  { %22719 = vmatprep.mubr.msk.f32.mxu1 %vm271_vm0, %v33592_v35  ;;  %v11367_v35 = vrot.slane %v30127_v38, 2 }
 0xa31   :  { %22720 = vmatmul.mubr.msk.f32.gmra.mrb[128].mxu1 %vm271_vm0, %v33593_v45  ;;  %v33657_v45 = vld [vmem:[#allocation64_spill] sm:$0xff] }
 0xa32   :  { %22722 = vmatprep.mubr.msk.f32.mxu1 %vm271_vm0, %v33653_v8 }
 0xa35   :  { %22723 = vmatmul.mubr.msk.f32.gmra.mrb[130].mxu1 %vm271_vm0, %v33595_v13  ;;  %v33658_v13 = vld [vmem:[#allocation65_spill] sm:$0xff] }
 0xa36   :  { %22725 = vmatprep.mubr.msk.f32.mxu1 %vm271_vm0, %v33654_v60 }
 0xa39   :  { %22726 = vmatmul.mubr.msk.f32.gmra.mrb[132].mxu1 %vm271_vm0, %v33597_v40  ;;  %v11850_v40 = vld [vmem:[%s32404_s5] sm:$0xff] }
 0xa3a   :  { %22728 = vmatprep.mubr.msk.f32.mxu1 %vm271_vm0, %v33655_v21  ;;  %22793 = vmatprep.subr.mxu0 %v11850_v40 }
 0xa3d   :  { %22729 = vmatmul.mubr.msk.f32.gmra.mrb[134].mxu1 %vm271_vm0, %v33656_v26 }
 0xa3e   :  { %22731 = vmatprep.mubr.msk.f32.mxu1 %vm271_vm0, %v29698_v53  ;;  %v11368_v53 = vsel %vm1186_vm1, %v10409_v52, %v11367_v35 }
 0xa41   :  { %22732 = vmatmul.mubr.msk.f32.gmra.mrb[136].mxu1 %vm271_vm0, %v33657_v45 }
 0xa42   :  { %22734 = vmatprep.mubr.msk.f32.mxu1 %vm271_vm0, %v29710_v57  ;;  %v11369_v57 = vsel %vm1186_vm1, %v11367_v35, %v33649_v44 }
 0xa45   :  { %22735 = vmatmul.mubr.msk.f32.gmra.mrb[138].mxu1 %vm271_vm0, %v33658_v13 }
 0xa46   :  { %22737 = vmatprep.mubr.msk.f32.mxu1 %vm271_vm0, %v30029_v24  ;;  %v30316_v24 = vld [vmem:[%s32402_s7 + $0x2] ss:$0 sm:$0xff] }
 0xa49   :  { %22738 = vmatmul.mubr.msk.f32.gmra.mrb[140].mxu1 %vm271_vm0, %v30036_v61 }
 0xa4a   :  { %22740 = vmatprep.mubr.msk.f32.mxu1 %vm271_vm0, %v11368_v53 }
 0xa4d   :  { %22741 = vmatmul.mubr.msk.f32.gmra.mrb[142].mxu1 %vm271_vm0, %v11369_v57 }
 0xad4   :  { %v22685_v61 = vpop.f32.mrb[104].mxu1 }
 0xad5   :  { %v11691_v62 = vadd.f32 %v22685_v61, %v30316_v24  ;;  %v11446_v52 = vpop.f32.mrb[105].mxu1 }
 0xad6   :  { %v11690_v38 = vadd.f32 %v30316_v24, %v11446_v52 }
 0xad7   :  { %vm11731_vm8 = vcmp.ge.f32.partialorder %v11691_v62, 0.0  ;;  %v11771_v51 = vmul.f32 0.2, %v11691_v62 }
 0xad8   :  { %vm11730_vm9 = vcmp.ge.f32.partialorder %v11690_v38, 0.0  ;;  %v11770_v55 = vmul.f32 0.2, %v11690_v38  ;;  %v22688_v27 = vpop.f32.mrb[106].mxu1 }
 0xad9   :  { %v30320_v15 = vsel %vm11731_vm8, %v11691_v62, %v11771_v51  ;;  %v11693_v3 = vadd.f32 %v22688_v27, %v30316_v24  ;;  %v11456_v58 = vpop.f32.mrb[107].mxu1 }
 0xada   :  { %v11886_v34 = vrot.slane %v30320_v15, 1  ;;  %v30324_v2 = vsel %vm11730_vm9, %v11690_v38, %v11770_v55  ;;  %v11692_v7 = vadd.f32 %v30316_v24, %v11456_v58 }
 0xadb   :  { %v11885_v41 = vrot.slane %v30324_v2, 1  ;;  %vm11733_vm10 = vcmp.ge.f32.partialorder %v11693_v3, 0.0  ;;  %v11773_v25 = vmul.f32 0.2, %v11693_v3 }
 0xadc   :  { %vm11732_vm11 = vcmp.ge.f32.partialorder %v11692_v7, 0.0  ;;  %v11772_v10 = vmul.f32 0.2, %v11692_v7  ;;  %v22691_v23 = vpop.f32.mrb[108].mxu1 }
 0xadd   :  { %v30328_v5 = vsel %vm11733_vm10, %v11693_v3, %v11773_v25  ;;  %v11695_v1 = vadd.f32 %v22691_v23, %v30316_v24  ;;  %v11466_v43 = vpop.f32.mrb[109].mxu1  ;;  %v11887_v18 = vsel %vm154_vm2, %v11885_v41, %v11886_v34 }
 0xade   :  { %v30332_v49 = vsel %vm11732_vm11, %v11692_v7, %v11772_v10  ;;  %v11694_v33 = vadd.f32 %v30316_v24, %v11466_v43  ;;  %22745 = vmatprep.mubr.msk.f32.mxu0 %vm271_vm0, %v11887_v18  ;;  %v11890_v30 = vrot.slane %v30328_v5, 1 }
 0xadf   :  { %v11888_v29 = vrot.slane %v30332_v49, 1  ;;  %vm11735_vm12 = vcmp.ge.f32.partialorder %v11695_v1, 0.0  ;;  %v11775_v32 = vmul.f32 0.2, %v11695_v1 }
 0xae0   :  { %vm11734_vm13 = vcmp.ge.f32.partialorder %v11694_v33, 0.0  ;;  %v11774_v12 = vmul.f32 0.2, %v11694_v33  ;;  %v22694_v19 = vpop.f32.mrb[110].mxu1 }
 0xae1   :  { %v30338_v14 = vsel %vm11735_vm12, %v11695_v1, %v11775_v32  ;;  %v11697_v0 = vadd.f32 %v22694_v19, %v30316_v24  ;;  %v11476_v20 = vpop.f32.mrb[111].mxu1  ;;  %v11889_v11 = vsel %vm154_vm2, %v11886_v34, %v11888_v29  ;;  %v30343_v42 = vsel %vm154_vm2, %v11888_v29, %v11890_v30 }
 0xae2   :  { %v30350_v28 = vsel %vm11734_vm13, %v11694_v33, %v11774_v12  ;;  %v11696_v39 = vadd.f32 %v30316_v24, %v11476_v20  ;;  %22746 = vmatmul.mubr.msk.f32.vlgmr.msra.gmra.mrb[56].mxu0 %vm271_vm0, %v11889_v11  ;;  %v11894_v31 = vrot.slane %v30338_v14, 1 }
 0xae3   :  { %vm11737_vm5 = vcmp.ge.f32.partialorder %v11697_v0, 0.0  ;;  %v11777_v4 = vmul.f32 0.2, %v11697_v0  ;;  %22748 = vmatprep.mubr.msk.f32.mxu0 %vm271_vm0, %v30343_v42  ;;  %v11892_v59 = vrot.slane %v30350_v28, 1  ;;  %22794 = vmatpush3.msra.mxu0 %v11850_v40 }
 0xae4   :  { %vm11736_vm14 = vcmp.ge.f32.partialorder %v11696_v39, 0.0  ;;  %v11776_v36 = vmul.f32 0.2, %v11696_v39  ;;  %v22697_v17 = vpop.f32.mrb[112].mxu1  ;;  %22843 = vmatprep.subr.mxu0 %v30348_v16 }
 0xae5   :  { %v30359_v47 = vsel %vm11737_vm5, %v11697_v0, %v11777_v4  ;;  %v11699_v63 = vadd.f32 %v22697_v17, %v30316_v24  ;;  %v11486_v54 = vpop.f32.mrb[113].mxu1  ;;  %v30363_v9 = vsel %vm154_vm2, %v11890_v30, %v11892_v59  ;;  %v30366_v37 = vsel %vm154_vm2, %v11892_v59, %v11894_v31 }
 0xae6   :  { %v30368_v22 = vsel %vm11736_vm14, %v11696_v39, %v11776_v36  ;;  %v11698_v56 = vadd.f32 %v30316_v24, %v11486_v54  ;;  %22749 = vmatmul.mubr.msk.f32.gmra.mrb[58].mxu0 %vm271_vm0, %v30363_v9  ;;  %v11898_v6 = vrot.slane %v30359_v47, 1 }
 0xae7   :  { %vm11739_vm15 = vcmp.ge.f32.partialorder %v11699_v63, 0.0  ;;  %v11779_v50 = vmul.f32 0.2, %v11699_v63  ;;  %22751 = vmatprep.mubr.msk.f32.mxu0 %vm271_vm0, %v30366_v37  ;;  %v11896_v46 = vrot.slane %v30368_v22, 1 }
 0xae8   :  { %vm11738_vm3 = vcmp.ge.f32.partialorder %v11698_v56, 0.0  ;;  %v11778_v8 = vmul.f32 0.2, %v11698_v56  ;;  %v22700_v60 = vpop.f32.mrb[114].mxu1 }
 0xae9   :  { %v30377_v21 = vsel %vm11739_vm15, %v11699_v63, %v11779_v50  ;;  %v11701_v26 = vadd.f32 %v22700_v60, %v30316_v24  ;;  %v11496_v45 = vpop.f32.mrb[115].mxu1  ;;  %v30381_v35 = vsel %vm154_vm2, %v11894_v31, %v11896_v46  ;;  %v30384_v13 = vsel %vm154_vm2, %v11896_v46, %v11898_v6 }
 0xaea   :  { %v30386_v53 = vsel %vm11738_vm3, %v11698_v56, %v11778_v8  ;;  %v11700_v57 = vadd.f32 %v30316_v24, %v11496_v45  ;;  %22752 = vmatmul.mubr.msk.f32.gmra.mrb[60].mxu0 %vm271_vm0, %v30381_v35  ;;  %v11902_v40 = vrot.slane %v30377_v21, 1 }
 0xaeb   :  { %vm11741_vm4 = vcmp.ge.f32.partialorder %v11701_v26, 0.0  ;;  %v11781_v61 = vmul.f32 0.2, %v11701_v26  ;;  %22754 = vmatprep.mubr.msk.f32.mxu0 %vm271_vm0, %v30384_v13  ;;  %v11900_v62 = vrot.slane %v30386_v53, 1 }
 0xaec   :  { %vm11740_vm6 = vcmp.ge.f32.partialorder %v11700_v57, 0.0  ;;  %v11780_v52 = vmul.f32 0.2, %v11700_v57  ;;  %v22703_v38 = vpop.f32.mrb[116].mxu1 }
 0xaed   :  { %v30395_v51 = vsel %vm11741_vm4, %v11701_v26, %v11781_v61  ;;  %v11703_v55 = vadd.f32 %v22703_v38, %v30316_v24  ;;  %v11506_v27 = vpop.f32.mrb[117].mxu1  ;;  %v30399_v3 = vsel %vm154_vm2, %v11898_v6, %v11900_v62  ;;  %v30402_v58 = vsel %vm154_vm2, %v11900_v62, %v11902_v40 }
 0xaee   :  { %v30404_v34 = vsel %vm11740_vm6, %v11700_v57, %v11780_v52  ;;  %v11702_v7 = vadd.f32 %v30316_v24, %v11506_v27  ;;  %22755 = vmatmul.mubr.msk.f32.gmra.mrb[62].mxu0 %vm271_vm0, %v30399_v3  ;;  %v11906_v41 = vrot.slane %v30395_v51, 1 }
 0xaef   :  { %vm11743_vm7 = vcmp.ge.f32.partialorder %v11703_v55, 0.0  ;;  %v11783_v25 = vmul.f32 0.2, %v11703_v55  ;;  %22757 = vmatprep.mubr.msk.f32.mxu0 %vm271_vm0, %v30402_v58  ;;  %v11904_v10 = vrot.slane %v30404_v34, 1 }
 0xaf0   :  { %vm11742_vm8 = vcmp.ge.f32.partialorder %v11702_v7, 0.0  ;;  %v11782_v23 = vmul.f32 0.2, %v11702_v7  ;;  %v22706_v1 = vpop.f32.mrb[118].mxu1 }
 0xaf1   :  { %v30413_v43 = vsel %vm11743_vm7, %v11703_v55, %v11783_v25  ;;  %v11705_v18 = vadd.f32 %v22706_v1, %v30316_v24  ;;  %v11516_v33 = vpop.f32.mrb[119].mxu1  ;;  %v30417_v30 = vsel %vm154_vm2, %v11902_v40, %v11904_v10  ;;  %v30420_v29 = vsel %vm154_vm2, %v11904_v10, %v11906_v41 }
 0xaf2   :  { %v30422_v32 = vsel %vm11742_vm8, %v11702_v7, %v11782_v23  ;;  %v11704_v12 = vadd.f32 %v30316_v24, %v11516_v33  ;;  %22758 = vmatmul.mubr.msk.f32.gmra.mrb[64].mxu0 %vm271_vm0, %v30417_v30  ;;  %v11910_v19 = vrot.slane %v30413_v43, 1 }
 0xaf3   :  { %vm11745_vm9 = vcmp.ge.f32.partialorder %v11705_v18, 0.0  ;;  %v11785_v0 = vmul.f32 0.2, %v11705_v18  ;;  %22760 = vmatprep.mubr.msk.f32.mxu0 %vm271_vm0, %v30420_v29  ;;  %v11908_v20 = vrot.slane %v30422_v32, 1 }
 0xaf4   :  { %vm11744_vm10 = vcmp.ge.f32.partialorder %v11704_v12, 0.0  ;;  %v11784_v11 = vmul.f32 0.2, %v11704_v12  ;;  %v30431_v39 = vpop.f32.mrb[120].mxu1 }
 0xaf5   :  { %v30433_v31 = vsel %vm11745_vm9, %v11705_v18, %v11785_v0  ;;  %v11526_v4 = vpop.f32.mrb[121].mxu1  ;;  %v30436_v59 = vsel %vm154_vm2, %v11906_v41, %v11908_v20  ;;  %v30439_v36 = vsel %vm154_vm2, %v11908_v20, %v11910_v19 }
 0xaf6   :  { %v30441_v17 = vsel %vm11744_vm10, %v11704_v12, %v11784_v11  ;;  %v11706_v63 = vadd.f32 %v30316_v24, %v11526_v4  ;;  %22761 = vmatmul.mubr.msk.f32.gmra.mrb[66].mxu0 %vm271_vm0, %v30436_v59  ;;  %v11914_v54 = vrot.slane %v30433_v31, 1 }
 0xaf7   :  { %22763 = vmatprep.mubr.msk.f32.mxu0 %vm271_vm0, %v30439_v36  ;;  %v11912_v56 = vrot.slane %v30441_v17, 1 }
 0xaf8   :  { %vm11746_vm11 = vcmp.ge.f32.partialorder %v11706_v63, 0.0  ;;  %v11786_v6 = vmul.f32 0.2, %v11706_v63  ;;  %v30450_v50 = vpop.f32.mrb[122].mxu1 }
 0xaf9   :  { %33659 = vst [vmem:[#allocation71_spill] sm:$0xff] %v30450_v50  ;;  %v30452_v46 = vpop.f32.mrb[123].mxu1  ;;  %v30455_v8 = vsel %vm154_vm2, %v11910_v19, %v11912_v56  ;;  %v30458_v60 = vsel %vm154_vm2, %v11912_v56, %v11914_v54 }
 0xafa   :  { %v30460_v26 = vsel %vm11746_vm11, %v11706_v63, %v11786_v6  ;;  %22764 = vmatmul.mubr.msk.f32.gmra.mrb[68].mxu0 %vm271_vm0, %v30455_v8 }
 0xafb   :  { %22766 = vmatprep.mubr.msk.f32.mxu0 %vm271_vm0, %v30458_v60  ;;  %v32864_v45 = vrot.slane %v30460_v26, 1 }
 0xafc   :  { %v22715_v57 = vpop.f32.mrb[124].mxu1 }
 0xafd   :  { %v11711_v40 = vadd.f32 %v22715_v57, %v30316_v24  ;;  %v11546_v61 = vpop.f32.mrb[125].mxu1  ;;  %v30471_v62 = vsel %vm154_vm2, %v11914_v54, %v32864_v45 }
 0xafe   :  { %v11710_v52 = vadd.f32 %v30316_v24, %v11546_v61  ;;  %22767 = vmatmul.mubr.msk.f32.gmra.mrb[70].mxu0 %vm271_vm0, %v30471_v62 }
 0xaff   :  { %vm11751_vm12 = vcmp.ge.f32.partialorder %v11711_v40, 0.0  ;;  %v11791_v38 = vmul.f32 0.2, %v11711_v40 }
 0xb00   :  { %vm11750_vm13 = vcmp.ge.f32.partialorder %v11710_v52, 0.0  ;;  %v11790_v55 = vmul.f32 0.2, %v11710_v52  ;;  %v22718_v27 = vpop.f32.mrb[126].mxu1 }
 0xb01   :  { %v30476_v7 = vsel %vm11751_vm12, %v11711_v40, %v11791_v38  ;;  %v11713_v41 = vadd.f32 %v22718_v27, %v30316_v24  ;;  %v11556_v25 = vpop.f32.mrb[127].mxu1 }
 0xb02   :  { %v11919_v10 = vrot.slane %v30476_v7, 1  ;;  %v30480_v23 = vsel %vm11750_vm13, %v11710_v52, %v11790_v55  ;;  %v11712_v1 = vadd.f32 %v30316_v24, %v11556_v25 }
 0xb03   :  { %v11918_v18 = vrot.slane %v30480_v23, 1  ;;  %vm11753_vm5 = vcmp.ge.f32.partialorder %v11713_v41, 0.0  ;;  %v11793_v33 = vmul.f32 0.2, %v11713_v41 }
 0xb04   :  { %vm11752_vm14 = vcmp.ge.f32.partialorder %v11712_v1, 0.0  ;;  %v11792_v12 = vmul.f32 0.2, %v11712_v1  ;;  %v22721_v19 = vpop.f32.mrb[128].mxu1 }
 0xb05   :  { %v30484_v0 = vsel %vm11753_vm5, %v11713_v41, %v11793_v33  ;;  %v11715_v20 = vadd.f32 %v22721_v19, %v30316_v24  ;;  %v11566_v11 = vpop.f32.mrb[129].mxu1  ;;  %v11920_v4 = vsel %vm154_vm2, %v11918_v18, %v11919_v10 }
 0xb06   :  { %v30488_v63 = vsel %vm11752_vm14, %v11712_v1, %v11792_v12  ;;  %v11714_v54 = vadd.f32 %v30316_v24, %v11566_v11  ;;  %22769 = vmatprep.mubr.msk.f32.mxu0 %vm271_vm0, %v11920_v4  ;;  %v11923_v56 = vrot.slane %v30484_v0, 1 }
 0xb07   :  { %vm11755_vm15 = vcmp.ge.f32.partialorder %v11715_v20, 0.0  ;;  %v11795_v6 = vmul.f32 0.2, %v11715_v20  ;;  %v11921_v57 = vrot.slane %v30488_v63, 1 }
 0xb08   :  { %vm11754_vm3 = vcmp.ge.f32.partialorder %v11714_v54, 0.0  ;;  %v11794_v40 = vmul.f32 0.2, %v11714_v54  ;;  %v22724_v61 = vpop.f32.mrb[130].mxu1 }
 0xb09   :  { %v30494_v52 = vsel %vm11755_vm15, %v11715_v20, %v11795_v6  ;;  %v11717_v38 = vadd.f32 %v22724_v61, %v30316_v24  ;;  %v11576_v55 = vpop.f32.mrb[131].mxu1  ;;  %v11922_v27 = vsel %vm154_vm2, %v11919_v10, %v11921_v57  ;;  %v30499_v41 = vsel %vm154_vm2, %v11921_v57, %v11923_v56 }
 0xb0a   :  { %33660 = vst [vmem:[#allocation29_spill] sm:$0xff] %v30499_v41  ;;  %v30501_v25 = vsel %vm11754_vm3, %v11714_v54, %v11794_v40  ;;  %v11716_v1 = vadd.f32 %v30316_v24, %v11576_v55  ;;  %22770 = vmatmul.mubr.msk.f32.gmra.mrb[72].mxu0 %vm271_vm0, %v11922_v27  ;;  %v11927_v18 = vrot.slane %v30494_v52, 1 }
 0xb0b   :  { %vm11757_vm4 = vcmp.ge.f32.partialorder %v11717_v38, 0.0  ;;  %v11797_v33 = vmul.f32 0.2, %v11717_v38  ;;  %22772 = vmatprep.mubr.msk.f32.mxu0 %vm271_vm0, %v30499_v41  ;;  %v11925_v12 = vrot.slane %v30501_v25, 1 }
 0xb0c   :  { %vm11756_vm6 = vcmp.ge.f32.partialorder %v11716_v1, 0.0  ;;  %v11796_v10 = vmul.f32 0.2, %v11716_v1  ;;  %v22727_v19 = vpop.f32.mrb[132].mxu1 }
 0xb0d   :  { %v30509_v20 = vsel %vm11757_vm4, %v11717_v38, %v11797_v33  ;;  %v11719_v11 = vadd.f32 %v22727_v19, %v30316_v24  ;;  %v11586_v4 = vpop.f32.mrb[133].mxu1  ;;  %v30513_v54 = vsel %vm154_vm2, %v11923_v56, %v11925_v12  ;;  %v30516_v6 = vsel %vm154_vm2, %v11925_v12, %v11927_v18 }
 0xb0e   :  { %33661 = vst [vmem:[#allocation30_spill] sm:$0xff] %v30513_v54  ;;  %33662 = vst [vmem:[#allocation74_spill] sm:$0xff] %v30516_v6  ;;  %v30518_v57 = vsel %vm11756_vm6, %v11716_v1, %v11796_v10  ;;  %v11718_v40 = vadd.f32 %v30316_v24, %v11586_v4  ;;  %22773 = vmatmul.mubr.msk.f32.gmra.mrb[74].mxu0 %vm271_vm0, %v30513_v54  ;;  %v11931_v61 = vrot.slane %v30509_v20, 1 }
 0xb0f   :  { %vm11759_vm7 = vcmp.ge.f32.partialorder %v11719_v11, 0.0  ;;  %v11799_v38 = vmul.f32 0.2, %v11719_v11  ;;  %22775 = vmatprep.mubr.msk.f32.mxu0 %vm271_vm0, %v30516_v6  ;;  %v11929_v56 = vrot.slane %v30518_v57, 1 }
 0xb10   :  { %vm11758_vm8 = vcmp.ge.f32.partialorder %v11718_v40, 0.0  ;;  %v11798_v55 = vmul.f32 0.2, %v11718_v40  ;;  %v22730_v27 = vpop.f32.mrb[134].mxu1 }
 0xb11   :  { %v30527_v33 = vsel %vm11759_vm7, %v11719_v11, %v11799_v38  ;;  %v11721_v1 = vadd.f32 %v22730_v27, %v30316_v24  ;;  %v11596_v12 = vpop.f32.mrb[135].mxu1  ;;  %v30531_v10 = vsel %vm154_vm2, %v11927_v18, %v11929_v56  ;;  %v30534_v19 = vsel %vm154_vm2, %v11929_v56, %v11931_v61 }
 0xb12   :  { %33663 = vst [vmem:[#allocation11_spill] sm:$0xff] %v30531_v10  ;;  %33664 = vst [vmem:[#allocation36_spill] sm:$0xff] %v30534_v19  ;;  %v30536_v4 = vsel %vm11758_vm8, %v11718_v40, %v11798_v55  ;;  %v11720_v45 = vadd.f32 %v30316_v24, %v11596_v12  ;;  %22776 = vmatmul.mubr.msk.f32.gmra.mrb[76].mxu0 %vm271_vm0, %v30531_v10  ;;  %v11935_v44 = vrot.slane %v30527_v33, 1 }
 0xb13   :  { %vm11761_vm9 = vcmp.ge.f32.partialorder %v11721_v1, 0.0  ;;  %v11801_v11 = vmul.f32 0.2, %v11721_v1  ;;  %22778 = vmatprep.mubr.msk.f32.mxu0 %vm271_vm0, %v30534_v19  ;;  %v11933_v18 = vrot.slane %v30536_v4, 1 }
 0xb14   :  { %vm11760_vm10 = vcmp.ge.f32.partialorder %v11720_v45, 0.0  ;;  %v11800_v38 = vmul.f32 0.2, %v11720_v45  ;;  %v22733_v56 = vpop.f32.mrb[136].mxu1 }
 0xb15   :  { %v30545_v27 = vsel %vm11761_vm9, %v11721_v1, %v11801_v11  ;;  %v11723_v40 = vadd.f32 %v22733_v56, %v30316_v24  ;;  %v11606_v55 = vpop.f32.mrb[137].mxu1  ;;  %v30549_v12 = vsel %vm154_vm2, %v11931_v61, %v11933_v18  ;;  %v30552_v48 = vsel %vm154_vm2, %v11933_v18, %v11935_v44 }
 0xb16   :  { %33665 = vst [vmem:[#allocation35_spill] sm:$0xff] %v30549_v12  ;;  %33666 = vst [vmem:[#allocation37_spill] sm:$0xff] %v30552_v48  ;;  %v30554_v50 = vsel %vm11760_vm10, %v11720_v45, %v11800_v38  ;;  %v11722_v19 = vadd.f32 %v30316_v24, %v11606_v55  ;;  %22779 = vmatmul.mubr.msk.f32.gmra.mrb[78].mxu0 %vm271_vm0, %v30549_v12  ;;  %v11939_v10 = vrot.slane %v30545_v27, 1 }
 0xb17   :  { %vm11763_vm11 = vcmp.ge.f32.partialorder %v11723_v40, 0.0  ;;  %v11803_v1 = vmul.f32 0.2, %v11723_v40  ;;  %22781 = vmatprep.mubr.msk.f32.mxu0 %vm271_vm0, %v30552_v48  ;;  %v11937_v61 = vrot.slane %v30554_v50, 1 }
 0xb18   :  { %vm11762_vm12 = vcmp.ge.f32.partialorder %v11722_v19, 0.0  ;;  %v11802_v11 = vmul.f32 0.2, %v11722_v19  ;;  %v22736_v18 = vpop.f32.mrb[138].mxu1 }
 0xb19   :  { %v30563_v56 = vsel %vm11763_vm11, %v11723_v40, %v11803_v1  ;;  %v11725_v45 = vadd.f32 %v22736_v18, %v30316_v24  ;;  %v11616_v38 = vpop.f32.mrb[139].mxu1  ;;  %v30567_v55 = vsel %vm154_vm2, %v11935_v44, %v11937_v61  ;;  %v30570_v12 = vsel %vm154_vm2, %v11937_v61, %v11939_v10 }
 0xb1a   :  { %33667 = vst [vmem:[#allocation78_spill] sm:$0xff] %v30567_v55  ;;  %33668 = vst [vmem:[#allocation79_spill] sm:$0xff] %v30570_v12  ;;  %v30572_v6 = vsel %vm11762_vm12, %v11722_v19, %v11802_v11  ;;  %v11724_v48 = vadd.f32 %v30316_v24, %v11616_v38  ;;  %22782 = vmatmul.mubr.msk.f32.gmra.mrb[80].mxu0 %vm271_vm0, %v30567_v55  ;;  %v11943_v54 = vrot.slane %v30563_v56, 1 }
 0xb1b   :  { %vm11765_vm13 = vcmp.ge.f32.partialorder %v11725_v45, 0.0  ;;  %v11805_v40 = vmul.f32 0.2, %v11725_v45  ;;  %22784 = vmatprep.mubr.msk.f32.mxu0 %vm271_vm0, %v30570_v12  ;;  %v11941_v44 = vrot.slane %v30572_v6, 1 }
 0xb1c   :  { %vm11764_vm5 = vcmp.ge.f32.partialorder %v11724_v48, 0.0  ;;  %v11804_v1 = vmul.f32 0.2, %v11724_v48  ;;  %v30581_v61 = vpop.f32.mrb[140].mxu1 }
 0xb1d   :  { %v30583_v19 = vsel %vm11765_vm13, %v11725_v45, %v11805_v40  ;;  %v11626_v11 = vpop.f32.mrb[141].mxu1  ;;  %v30586_v18 = vsel %vm154_vm2, %v11939_v10, %v11941_v44  ;;  %v30589_v38 = vsel %vm154_vm2, %v11941_v44, %v11943_v54 }
 0xb1e   :  { %33669 = vst [vmem:[#allocation80_spill] sm:$0xff] %v30586_v18  ;;  %33670 = vst [vmem:[#allocation81_spill] sm:$0xff] %v30589_v38  ;;  %v30591_v55 = vsel %vm11764_vm5, %v11724_v48, %v11804_v1  ;;  %v11726_v41 = vadd.f32 %v30316_v24, %v11626_v11  ;;  %22785 = vmatmul.mubr.msk.f32.gmra.mrb[82].mxu0 %vm271_vm0, %v30586_v18  ;;  %v11947_v12 = vrot.slane %v30583_v19, 1 }
 0xb1f   :  { %22787 = vmatprep.mubr.msk.f32.mxu0 %vm271_vm0, %v30589_v38  ;;  %v11945_v45 = vrot.slane %v30591_v55, 1 }
 0xb20   :  { %vm11766_vm14 = vcmp.ge.f32.partialorder %v11726_v41, 0.0  ;;  %v11806_v10 = vmul.f32 0.2, %v11726_v41  ;;  %v30600_v40 = vpop.f32.mrb[142].mxu1 }
 0xb21   :  { %33671 = vst [vmem:[#allocation83_spill] sm:$0xff] %v30600_v40  ;;  %v30602_v44 = vpop.f32.mrb[143].mxu1  ;;  %v30605_v48 = vsel %vm154_vm2, %v11943_v54, %v11945_v45  ;;  %v30608_v1 = vsel %vm154_vm2, %v11945_v45, %v11947_v12  ;;  %v12531_v54 = vrot.slane %v30324_v2, 2 }
 0xb22   :  { %33672 = vst [vmem:[#allocation85_spill] sm:$0xff] %v30608_v1  ;;  %v30610_v11 = vsel %vm11766_vm14, %v11726_v41, %v11806_v10  ;;  %22788 = vmatmul.mubr.msk.f32.gmra.mrb[84].mxu0 %vm271_vm0, %v30605_v48  ;;  %v18449_v41 = vld [vmem:[%s32404_s5 + $0x18] sm:$0xff]  ;;  %v12536_v10 = vrot.slane %v30328_v5, 2 }
 0xb23   :  { %22790 = vmatprep.mubr.msk.f32.mxu0 %vm271_vm0, %v30608_v1  ;;  %v32885_v38 = vrot.slane %v30610_v11, 1  ;;  %v12564_v1 = vrot.slane %v30480_v23, 2 }
 0xb25   :  { %v30620_v40 = vsel %vm154_vm2, %v11947_v12, %v32885_v38  ;;  %v12534_v12 = vrot.slane %v30332_v49, 2  ;;  %v30703_v38 = vld [vmem:[%s32404_s5 + $0x20] sm:$0xff] }
 0xb26   :  { %33673 = vst [vmem:[#allocation87_spill] sm:$0xff] %v30620_v40  ;;  %22791 = vmatmul.mubr.msk.f32.gmra.mrb[86].mxu0 %vm271_vm0, %v30620_v40 }
 0xb27   :  { %22795 = vmatprep.mubr.msk.f32.mxu0 %vm271_vm0, %v30324_v2  ;;  %v12538_v2 = vrot.slane %v30350_v28, 2  ;;  %v30707_v40 = vsel %vm1186_vm1, %v12534_v12, %v12536_v10 }
 0xb28   :  { %33674 = vst [vmem:[#allocation89_spill] sm:$0xff] %v30707_v40 }
 0xb2a   :  { %22796 = vmatmul.mubr.msk.f32.vlgmr.msra.gmra.mrb[56].mxu0 %vm271_vm0, %v30320_v15 }
 0xb2b   :  { %22798 = vmatprep.mubr.msk.f32.mxu0 %vm271_vm0, %v30332_v49  ;;  %22844 = vmatpush3.msra.mxu0 %v30348_v16  ;;  %v12532_v16 = vrot.slane %v30320_v15, 2 }
 0xb2c   :  { %22893 = vmatprep.subr.mxu0 %v18449_v41 }
 0xb2d   :  { %v12533_v45 = vsel %vm1186_vm1, %v12531_v54, %v12532_v16  ;;  %v12535_v15 = vsel %vm1186_vm1, %v12532_v16, %v12534_v12  ;;  %v12540_v54 = vrot.slane %v30338_v14, 2  ;;  %v30714_v16 = vsel %vm1186_vm1, %v12536_v10, %v12538_v2 }
 0xb2e   :  { %22799 = vmatmul.mubr.msk.f32.gmra.mrb[58].mxu0 %vm271_vm0, %v30328_v5  ;;  %33675 = vst [vmem:[#allocation90_spill] sm:$0xff] %v30714_v16  ;;  %v12544_v12 = vrot.slane %v30359_v47, 2 }
 0xb2f   :  { %22801 = vmatprep.mubr.msk.f32.mxu0 %vm271_vm0, %v30350_v28 }
 0xb32   :  { %22802 = vmatmul.mubr.msk.f32.gmra.mrb[60].mxu0 %vm271_vm0, %v30338_v14 }
 0xb33   :  { %22804 = vmatprep.mubr.msk.f32.mxu0 %vm271_vm0, %v30368_v22 }
 0xb36   :  { %22805 = vmatmul.mubr.msk.f32.gmra.mrb[62].mxu0 %vm271_vm0, %v30359_v47 }
 0xb37   :  { %22807 = vmatprep.mubr.msk.f32.mxu0 %vm271_vm0, %v30386_v53 }
 0xb3a   :  { %22808 = vmatmul.mubr.msk.f32.gmra.mrb[64].mxu0 %vm271_vm0, %v30377_v21 }
 0xb3b   :  { %22810 = vmatprep.mubr.msk.f32.mxu0 %vm271_vm0, %v30404_v34 }
 0xb3e   :  { %22811 = vmatmul.mubr.msk.f32.gmra.mrb[66].mxu0 %vm271_vm0, %v30395_v51 }
 0xb3f   :  { %22813 = vmatprep.mubr.msk.f32.mxu0 %vm271_vm0, %v30422_v32 }
 0xb42   :  { %22814 = vmatmul.mubr.msk.f32.gmra.mrb[68].mxu0 %vm271_vm0, %v30413_v43 }
 0xb43   :  { %22816 = vmatprep.mubr.msk.f32.mxu0 %vm271_vm0, %v30441_v17 }
 0xb46   :  { %22817 = vmatmul.mubr.msk.f32.gmra.mrb[70].mxu0 %vm271_vm0, %v30433_v31 }
 0xb47   :  { %22819 = vmatprep.mubr.msk.f32.mxu0 %vm271_vm0, %v30480_v23  ;;  %v12569_v23 = vrot.slane %v30484_v0, 2 }
 0xb4a   :  { %22820 = vmatmul.mubr.msk.f32.gmra.mrb[72].mxu0 %vm271_vm0, %v30476_v7 }
 0xb4b   :  { %22822 = vmatprep.mubr.msk.f32.mxu0 %vm271_vm0, %v30488_v63 }
 0xb4e   :  { %22823 = vmatmul.mubr.msk.f32.gmra.mrb[74].mxu0 %vm271_vm0, %v30484_v0 }
 0xb4f   :  { %22825 = vmatprep.mubr.msk.f32.mxu0 %vm271_vm0, %v30501_v25 }
 0xb52   :  { %22826 = vmatmul.mubr.msk.f32.gmra.mrb[76].mxu0 %vm271_vm0, %v30494_v52 }
 0xb53   :  { %22828 = vmatprep.mubr.msk.f32.mxu0 %vm271_vm0, %v30518_v57 }
 0xb56   :  { %22829 = vmatmul.mubr.msk.f32.gmra.mrb[78].mxu0 %vm271_vm0, %v30509_v20 }
 0xb57   :  { %22831 = vmatprep.mubr.msk.f32.mxu0 %vm271_vm0, %v30536_v4 }
 0xb5a   :  { %22832 = vmatmul.mubr.msk.f32.gmra.mrb[80].mxu0 %vm271_vm0, %v30527_v33 }
 0xb5b   :  { %22834 = vmatprep.mubr.msk.f32.mxu0 %vm271_vm0, %v30554_v50 }
 0xb5e   :  { %22835 = vmatmul.mubr.msk.f32.gmra.mrb[82].mxu0 %vm271_vm0, %v30545_v27 }
 0xb5f   :  { %22837 = vmatprep.mubr.msk.f32.mxu0 %vm271_vm0, %v30572_v6 }
 0xb62   :  { %22838 = vmatmul.mubr.msk.f32.gmra.mrb[84].mxu0 %vm271_vm0, %v30563_v56 }
 0xb63   :  { %22840 = vmatprep.mubr.msk.f32.mxu0 %vm271_vm0, %v30591_v55 }
 0xb66   :  { %22841 = vmatmul.mubr.msk.f32.gmra.mrb[86].mxu0 %vm271_vm0, %v30583_v19 }
 0xb67   :  { %22845 = vmatprep.mubr.msk.f32.mxu0 %vm271_vm0, %v12533_v45  ;;  %v12542_v45 = vrot.slane %v30368_v22, 2 }
 0xb69   :  { %v30732_v10 = vsel %vm1186_vm1, %v12542_v45, %v12544_v12 }
 0xb6a   :  { %22846 = vmatmul.mubr.msk.f32.vlgmr.msra.gmra.mrb[56].mxu0 %vm271_vm0, %v12535_v15  ;;  %v30720_v15 = vsel %vm1186_vm1, %v12538_v2, %v12540_v54  ;;  %33678 = vst [vmem:[#allocation94_spill] sm:$0xff] %v30732_v10 }
 0xb6b   :  { %22848 = vmatprep.mubr.msk.f32.mxu0 %vm271_vm0, %v30707_v40  ;;  %22894 = vmatpush3.msra.mxu0 %v18449_v41  ;;  %33676 = vst [vmem:[#allocation92_spill] sm:$0xff] %v30720_v15  ;;  %v30726_v41 = vsel %vm1186_vm1, %v12540_v54, %v12542_v45  ;;  %v12546_v40 = vrot.slane %v30386_v53, 2 }
 0xb6c   :  { %22943 = vmatprep.subr.mxu0 %v30703_v38  ;;  %33677 = vst [vmem:[#allocation93_spill] sm:$0xff] %v30726_v41 }
 0xb6d   :  { %v30738_v2 = vsel %vm1186_vm1, %v12544_v12, %v12546_v40 }
 0xb6e   :  { %22849 = vmatmul.mubr.msk.f32.gmra.mrb[58].mxu0 %vm271_vm0, %v30714_v16  ;;  %v12548_v16 = vrot.slane %v30377_v21, 2  ;;  %33679 = vst [vmem:[#allocation91_spill] sm:$0xff] %v30738_v2 }
 0xb6f   :  { %22851 = vmatprep.mubr.msk.f32.mxu0 %vm271_vm0, %v30720_v15  ;;  %v12550_v15 = vrot.slane %v30404_v34, 2 }
 0xb70   :  { %v30744_v54 = vsel %vm1186_vm1, %v12546_v40, %v12548_v16 }
 0xb71   :  { %33680 = vst [vmem:[#allocation86_spill] sm:$0xff] %v30744_v54  ;;  %v30750_v45 = vsel %vm1186_vm1, %v12548_v16, %v12550_v15 }
 0xb72   :  { %22852 = vmatmul.mubr.msk.f32.gmra.mrb[60].mxu0 %vm271_vm0, %v30726_v41  ;;  %v12552_v41 = vrot.slane %v30395_v51, 2  ;;  %33681 = vst [vmem:[#allocation10_spill] sm:$0xff] %v30750_v45 }
 0xb73   :  { %22854 = vmatprep.mubr.msk.f32.mxu0 %vm271_vm0, %v30732_v10  ;;  %v12554_v10 = vrot.slane %v30422_v32, 2 }
 0xb74   :  { %v30756_v12 = vsel %vm1186_vm1, %v12550_v15, %v12552_v41 }
 0xb75   :  { %33682 = vst [vmem:[#allocation3_spill] sm:$0xff] %v30756_v12  ;;  %v30762_v40 = vsel %vm1186_vm1, %v12552_v41, %v12554_v10  ;;  %v12565_v41 = vrot.slane %v30476_v7, 2 }
 0xb76   :  { %22855 = vmatmul.mubr.msk.f32.gmra.mrb[62].mxu0 %vm271_vm0, %v30738_v2  ;;  %v12556_v2 = vrot.slane %v30413_v43, 2  ;;  %33683 = vst [vmem:[#allocation44_spill] sm:$0xff] %v30762_v40 }
 0xb77   :  { %22857 = vmatprep.mubr.msk.f32.mxu0 %vm271_vm0, %v30744_v54  ;;  %v12558_v54 = vrot.slane %v30441_v17, 2  ;;  %v12566_v7 = vsel %vm1186_vm1, %v12564_v1, %v12565_v41 }
 0xb78   :  { %v30768_v16 = vsel %vm1186_vm1, %v12554_v10, %v12556_v2 }
 0xb79   :  { %33684 = vst [vmem:[#allocation47_spill] sm:$0xff] %v30768_v16  ;;  %v30774_v15 = vsel %vm1186_vm1, %v12556_v2, %v12558_v54 }
 0xb7a   :  { %22858 = vmatmul.mubr.msk.f32.gmra.mrb[64].mxu0 %vm271_vm0, %v30750_v45  ;;  %v12560_v45 = vrot.slane %v30433_v31, 2  ;;  %33685 = vst [vmem:[#allocation73_spill] sm:$0xff] %v30774_v15 }
 0xb7b   :  { %22860 = vmatprep.mubr.msk.f32.mxu0 %vm271_vm0, %v30756_v12  ;;  %v32910_v12 = vrot.slane %v30460_v26, 2 }
 0xb7c   :  { %v30782_v10 = vsel %vm1186_vm1, %v12558_v54, %v12560_v45 }
 0xb7d   :  { %33686 = vst [vmem:[#allocation77_spill] sm:$0xff] %v30782_v10  ;;  %v30789_v2 = vsel %vm1186_vm1, %v12560_v45, %v32910_v12  ;;  %v12573_v12 = vrot.slane %v30494_v52, 2 }
 0xb7e   :  { %22861 = vmatmul.mubr.msk.f32.gmra.mrb[66].mxu0 %vm271_vm0, %v30762_v40  ;;  %33687 = vst [vmem:[#allocation7_spill] sm:$0xff] %v30789_v2 }
 0xb7f   :  { %22863 = vmatprep.mubr.msk.f32.mxu0 %vm271_vm0, %v30768_v16  ;;  %v12567_v16 = vrot.slane %v30488_v63, 2 }
 0xb81   :  { %v12568_v54 = vsel %vm1186_vm1, %v12565_v41, %v12567_v16  ;;  %v30801_v45 = vsel %vm1186_vm1, %v12567_v16, %v12569_v23 }
 0xb82   :  { %22864 = vmatmul.mubr.msk.f32.gmra.mrb[68].mxu0 %vm271_vm0, %v30774_v15 }
 0xb83   :  { %22866 = vmatprep.mubr.msk.f32.mxu0 %vm271_vm0, %v30782_v10  ;;  %v12571_v10 = vrot.slane %v30501_v25, 2 }
 0xb85   :  { %v30807_v1 = vsel %vm1186_vm1, %v12569_v23, %v12571_v10  ;;  %v30813_v41 = vsel %vm1186_vm1, %v12571_v10, %v12573_v12 }
 0xb86   :  { %22867 = vmatmul.mubr.msk.f32.gmra.mrb[70].mxu0 %vm271_vm0, %v30789_v2  ;;  %33688 = vst [vmem:[#allocation17_spill] sm:$0xff] %v30807_v1  ;;  %v12575_v2 = vrot.slane %v30518_v57, 2  ;;  %33689 = vst [vmem:[#allocation24_spill] sm:$0xff] %v30813_v41 }
 0xb87   :  { %22869 = vmatprep.mubr.msk.f32.mxu0 %vm271_vm0, %v12566_v7  ;;  %v12577_v7 = vrot.slane %v30509_v20, 2 }
 0xb88   :  { %v30819_v16 = vsel %vm1186_vm1, %v12573_v12, %v12575_v2 }
 0xb89   :  { %33690 = vst [vmem:[#allocation32_spill] sm:$0xff] %v30819_v16  ;;  %v30825_v23 = vsel %vm1186_vm1, %v12575_v2, %v12577_v7 }
 0xb8a   :  { %22870 = vmatmul.mubr.msk.f32.gmra.mrb[72].mxu0 %vm271_vm0, %v12568_v54  ;;  %v12579_v54 = vrot.slane %v30536_v4, 2  ;;  %33691 = vst [vmem:[#allocation43_spill] sm:$0xff] %v30825_v23 }
 0xb8b   :  { %22872 = vmatprep.mubr.msk.f32.mxu0 %vm271_vm0, %v30801_v45 }
 0xb8c   :  { %v30831_v10 = vsel %vm1186_vm1, %v12577_v7, %v12579_v54 }
 0xb8d   :  { %33692 = vst [vmem:[#allocation49_spill] sm:$0xff] %v30831_v10 }
 0xb8e   :  { %22873 = vmatmul.mubr.msk.f32.gmra.mrb[74].mxu0 %vm271_vm0, %v30807_v1  ;;  %v12581_v1 = vrot.slane %v30527_v33, 2 }
 0xb8f   :  { %22875 = vmatprep.mubr.msk.f32.mxu0 %vm271_vm0, %v30813_v41  ;;  %v12583_v41 = vrot.slane %v30554_v50, 2 }
 0xb90   :  { %v30837_v12 = vsel %vm1186_vm1, %v12579_v54, %v12581_v1 }
 0xb91   :  { %33693 = vst [vmem:[#allocation66_spill] sm:$0xff] %v30837_v12  ;;  %v30843_v2 = vsel %vm1186_vm1, %v12581_v1, %v12583_v41 }
 0xb92   :  { %22876 = vmatmul.mubr.msk.f32.gmra.mrb[76].mxu0 %vm271_vm0, %v30819_v16  ;;  %v12585_v16 = vrot.slane %v30545_v27, 2  ;;  %33694 = vst [vmem:[#allocation53_spill] sm:$0xff] %v30843_v2 }
 0xb93   :  { %22878 = vmatprep.mubr.msk.f32.mxu0 %vm271_vm0, %v30825_v23  ;;  %v12587_v23 = vrot.slane %v30572_v6, 2 }
 0xb94   :  { %v30849_v7 = vsel %vm1186_vm1, %v12583_v41, %v12585_v16 }
 0xb95   :  { %33695 = vst [vmem:[#allocation57_spill] sm:$0xff] %v30849_v7  ;;  %v30855_v54 = vsel %vm1186_vm1, %v12585_v16, %v12587_v23 }
 0xb96   :  { %22879 = vmatmul.mubr.msk.f32.gmra.mrb[78].mxu0 %vm271_vm0, %v30831_v10  ;;  %v12589_v10 = vrot.slane %v30563_v56, 2  ;;  %33696 = vst [vmem:[#allocation88_spill] sm:$0xff] %v30855_v54 }
 0xb97   :  { %22881 = vmatprep.mubr.msk.f32.mxu0 %vm271_vm0, %v30837_v12  ;;  %v12591_v12 = vrot.slane %v30591_v55, 2 }
 0xb98   :  { %v30861_v1 = vsel %vm1186_vm1, %v12587_v23, %v12589_v10 }
 0xb99   :  { %v30867_v41 = vsel %vm1186_vm1, %v12589_v10, %v12591_v12  ;;  %v18515_v10 = vld [vmem:[%s32404_s5 + $0x28] sm:$0xff] }
 0xb9a   :  { %22882 = vmatmul.mubr.msk.f32.gmra.mrb[80].mxu0 %vm271_vm0, %v30843_v2  ;;  %v12593_v2 = vrot.slane %v30583_v19, 2  ;;  %33697 = vst [vmem:[#allocation62_spill] sm:$0xff] %v30867_v41 }
 0xb9b   :  { %22884 = vmatprep.mubr.msk.f32.mxu0 %vm271_vm0, %v30849_v7  ;;  %v32929_v7 = vrot.slane %v30610_v11, 2 }
 0xb9c   :  { %v30873_v16 = vsel %vm1186_vm1, %v12591_v12, %v12593_v2 }
 0xb9d   :  { %v30880_v23 = vsel %vm1186_vm1, %v12593_v2, %v32929_v7  ;;  %v33707_v7 = vld [vmem:[#allocation78_spill] sm:$0xff] }
 0xb9e   :  { %22885 = vmatmul.mubr.msk.f32.gmra.mrb[82].mxu0 %vm271_vm0, %v30855_v54  ;;  %33698 = vst [vmem:[#allocation15_spill] sm:$0xff] %v30880_v23 }
 0xb9f   :  { %22887 = vmatprep.mubr.msk.f32.mxu0 %vm271_vm0, %v30861_v1 }
 0xba2   :  { %22888 = vmatmul.mubr.msk.f32.gmra.mrb[84].mxu0 %vm271_vm0, %v30867_v41 }
 0xba3   :  { %22890 = vmatprep.mubr.msk.f32.mxu0 %vm271_vm0, %v30873_v16 }
 0xba6   :  { %22891 = vmatmul.mubr.msk.f32.gmra.mrb[86].mxu0 %vm271_vm0, %v30880_v23 }
 0xba7   :  { %22895 = vmatprep.mubr.msk.f32.mxu0 %vm271_vm0, %v30332_v49 }
 0xbaa   :  { %22896 = vmatmul.mubr.msk.f32.vlgmr.msra.gmra.mrb[56].mxu0 %vm271_vm0, %v30328_v5  ;;  %v11707_v5 = vadd.f32 %v30431_v39, %v30316_v24  ;;  %v11727_v39 = vadd.f32 %v30581_v61, %v30316_v24  ;;  %v18548_v61 = vld [vmem:[%s32404_s5 + $0x30] sm:$0xff] }
 0xbab   :  { %22898 = vmatprep.mubr.msk.f32.mxu0 %vm271_vm0, %v30350_v28  ;;  %22944 = vmatpush3.msra.mxu0 %v30703_v38 }
 0xbac   :  { %22993 = vmatprep.subr.mxu0 %v18515_v10  ;;  %v11787_v49 = vmul.f32 0.2, %v11707_v5  ;;  %vm11747_vm15 = vcmp.ge.f32.partialorder %v11707_v5, 0.0  ;;  %vm11767_vm3 = vcmp.ge.f32.partialorder %v11727_v39, 0.0 }
 0xbae   :  { %22899 = vmatmul.mubr.msk.f32.gmra.mrb[58].mxu0 %vm271_vm0, %v30338_v14  ;;  %v30920_v38 = vsel %vm11747_vm15, %v11707_v5, %v11787_v49 }
 0xbaf   :  { %22901 = vmatprep.mubr.msk.f32.mxu0 %vm271_vm0, %v30368_v22  ;;  %v13191_v2 = vrot.slane %v30920_v38, 1 }
 0xbb2   :  { %22902 = vmatmul.mubr.msk.f32.gmra.mrb[60].mxu0 %vm271_vm0, %v30359_v47 }
 0xbb3   :  { %22904 = vmatprep.mubr.msk.f32.mxu0 %vm271_vm0, %v30386_v53 }
 0xbb6   :  { %22905 = vmatmul.mubr.msk.f32.gmra.mrb[62].mxu0 %vm271_vm0, %v30377_v21 }
 0xbb7   :  { %22907 = vmatprep.mubr.msk.f32.mxu0 %vm271_vm0, %v30404_v34 }
 0xbba   :  { %22908 = vmatmul.mubr.msk.f32.gmra.mrb[64].mxu0 %vm271_vm0, %v30395_v51 }
 0xbbb   :  { %22910 = vmatprep.mubr.msk.f32.mxu0 %vm271_vm0, %v30422_v32 }
 0xbbe   :  { %22911 = vmatmul.mubr.msk.f32.gmra.mrb[66].mxu0 %vm271_vm0, %v30413_v43 }
 0xbbf   :  { %22913 = vmatprep.mubr.msk.f32.mxu0 %vm271_vm0, %v30441_v17 }
 0xbc2   :  { %22914 = vmatmul.mubr.msk.f32.gmra.mrb[68].mxu0 %vm271_vm0, %v30433_v31 }
 0xbc3   :  { %22916 = vmatprep.mubr.msk.f32.mxu0 %vm271_vm0, %v30460_v26 }
 0xbc6   :  { %22917 = vmatmul.mubr.msk.f32.gmra.mrb[70].mxu0 %vm271_vm0, %v30920_v38 }
 0xbc7   :  { %22919 = vmatprep.mubr.msk.f32.mxu0 %vm271_vm0, %v30488_v63 }
 0xbca   :  { %22920 = vmatmul.mubr.msk.f32.gmra.mrb[72].mxu0 %vm271_vm0, %v30484_v0  ;;  %v11807_v0 = vmul.f32 0.2, %v11727_v39 }
 0xbcb   :  { %22922 = vmatprep.mubr.msk.f32.mxu0 %vm271_vm0, %v30501_v25 }
 0xbcc   :  { %v30956_v63 = vsel %vm11767_vm3, %v11727_v39, %v11807_v0  ;;  %v33700_v39 = vld [vmem:[#allocation29_spill] sm:$0xff]  ;;  %v33701_v0 = vld [vmem:[#allocation30_spill] sm:$0xff] }
 0xbce   :  { %22923 = vmatmul.mubr.msk.f32.gmra.mrb[74].mxu0 %vm271_vm0, %v30494_v52 }
 0xbcf   :  { %22925 = vmatprep.mubr.msk.f32.mxu0 %vm271_vm0, %v30518_v57 }
 0xbd2   :  { %22926 = vmatmul.mubr.msk.f32.gmra.mrb[76].mxu0 %vm271_vm0, %v30509_v20 }
 0xbd3   :  { %22928 = vmatprep.mubr.msk.f32.mxu0 %vm271_vm0, %v30536_v4 }
 0xbd6   :  { %22929 = vmatmul.mubr.msk.f32.gmra.mrb[78].mxu0 %vm271_vm0, %v30527_v33 }
 0xbd7   :  { %22931 = vmatprep.mubr.msk.f32.mxu0 %vm271_vm0, %v30554_v50 }
 0xbda   :  { %22932 = vmatmul.mubr.msk.f32.gmra.mrb[80].mxu0 %vm271_vm0, %v30545_v27 }
 0xbdb   :  { %22934 = vmatprep.mubr.msk.f32.mxu0 %vm271_vm0, %v30572_v6 }
 0xbde   :  { %22935 = vmatmul.mubr.msk.f32.gmra.mrb[82].mxu0 %vm271_vm0, %v30563_v56 }
 0xbdf   :  { %22937 = vmatprep.mubr.msk.f32.mxu0 %vm271_vm0, %v30591_v55 }
 0xbe2   :  { %22938 = vmatmul.mubr.msk.f32.gmra.mrb[84].mxu0 %vm271_vm0, %v30583_v19 }
 0xbe3   :  { %22940 = vmatprep.mubr.msk.f32.mxu0 %vm271_vm0, %v30610_v11 }
 0xbe6   :  { %22941 = vmatmul.mubr.msk.f32.gmra.mrb[86].mxu0 %vm271_vm0, %v30956_v63 }
 0xbe7   :  { %22945 = vmatprep.mubr.msk.f32.mxu0 %vm271_vm0, %v30343_v42  ;;  %v11708_v42 = vadd.f32 %v30316_v24, %v30452_v46 }
 0xbe9   :  { %vm11748_vm4 = vcmp.ge.f32.partialorder %v11708_v42, 0.0 }
 0xbea   :  { %22946 = vmatmul.mubr.msk.f32.vlgmr.msra.gmra.mrb[56].mxu0 %vm271_vm0, %v30363_v9  ;;  %v11788_v9 = vmul.f32 0.2, %v11708_v42 }
 0xbeb   :  { %22948 = vmatprep.mubr.msk.f32.mxu0 %vm271_vm0, %v30366_v37  ;;  %22994 = vmatpush3.msra.mxu0 %v18515_v10  ;;  %v33699_v10 = vrot.slane %v30460_v26, 1 }
 0xbec   :  { %23043 = vmatprep.subr.mxu0 %v18548_v61  ;;  %v30987_v12 = vsel %vm11748_vm4, %v11708_v42, %v11788_v9  ;;  %v33702_v42 = vld [vmem:[#allocation74_spill] sm:$0xff]  ;;  %v33703_v9 = vld [vmem:[#allocation11_spill] sm:$0xff] }
 0xbed   :  { %v32928_v46 = vrot.slane %v30987_v12, 1  ;;  %v31000_v5 = vsel %vm154_vm2, %v33699_v10, %v13191_v2  ;;  %v33704_v10 = vld [vmem:[#allocation36_spill] sm:$0xff] }
 0xbee   :  { %22949 = vmatmul.mubr.msk.f32.gmra.mrb[58].mxu0 %vm271_vm0, %v30381_v35 }
 0xbef   :  { %22951 = vmatprep.mubr.msk.f32.mxu0 %vm271_vm0, %v30384_v13  ;;  %v31007_v49 = vsel %vm154_vm2, %v13191_v2, %v32928_v46  ;;  %v33705_v2 = vld [vmem:[#allocation35_spill] sm:$0xff]  ;;  %v33706_v46 = vld [vmem:[#allocation37_spill] sm:$0xff] }
 0xbf2   :  { %22952 = vmatmul.mubr.msk.f32.gmra.mrb[60].mxu0 %vm271_vm0, %v30399_v3 }
 0xbf3   :  { %22954 = vmatprep.mubr.msk.f32.mxu0 %vm271_vm0, %v30402_v58 }
 0xbf6   :  { %22955 = vmatmul.mubr.msk.f32.gmra.mrb[62].mxu0 %vm271_vm0, %v30417_v30 }
 0xbf7   :  { %22957 = vmatprep.mubr.msk.f32.mxu0 %vm271_vm0, %v30420_v29 }
 0xbfa   :  { %22958 = vmatmul.mubr.msk.f32.gmra.mrb[64].mxu0 %vm271_vm0, %v30436_v59 }
 0xbfb   :  { %22960 = vmatprep.mubr.msk.f32.mxu0 %vm271_vm0, %v30439_v36 }
 0xbfe   :  { %22961 = vmatmul.mubr.msk.f32.gmra.mrb[66].mxu0 %vm271_vm0, %v30455_v8 }
 0xbff   :  { %22963 = vmatprep.mubr.msk.f32.mxu0 %vm271_vm0, %v30458_v60 }
 0xc02   :  { %22964 = vmatmul.mubr.msk.f32.gmra.mrb[68].mxu0 %vm271_vm0, %v30471_v62 }
 0xc03   :  { %22966 = vmatprep.mubr.msk.f32.mxu0 %vm271_vm0, %v31000_v5 }
 0xc06   :  { %22967 = vmatmul.mubr.msk.f32.gmra.mrb[70].mxu0 %vm271_vm0, %v31007_v49 }
 0xc07   :  { %22969 = vmatprep.mubr.msk.f32.mxu0 %vm271_vm0, %v33700_v39  ;;  %v11728_v39 = vadd.f32 %v30316_v24, %v30602_v44  ;;  %v33710_v24 = vld [vmem:[#allocation85_spill] sm:$0xff] }
 0xc09   :  { %vm11768_vm6 = vcmp.ge.f32.partialorder %v11728_v39, 0.0 }
 0xc0a   :  { %22970 = vmatmul.mubr.msk.f32.gmra.mrb[72].mxu0 %vm271_vm0, %v33701_v0  ;;  %v33708_v0 = vld [vmem:[#allocation79_spill] sm:$0xff] }
 0xc0b   :  { %22972 = vmatprep.mubr.msk.f32.mxu0 %vm271_vm0, %v33702_v42  ;;  %v11808_v42 = vmul.f32 0.2, %v11728_v39 }
 0xc0e   :  { %22973 = vmatmul.mubr.msk.f32.gmra.mrb[74].mxu0 %vm271_vm0, %v33703_v9 }
 0xc0f   :  { %22975 = vmatprep.mubr.msk.f32.mxu0 %vm271_vm0, %v33704_v10  ;;  %v33709_v10 = vld [vmem:[#allocation81_spill] sm:$0xff] }
 0xc12   :  { %22976 = vmatmul.mubr.msk.f32.gmra.mrb[76].mxu0 %vm271_vm0, %v33705_v2  ;;  %v31035_v2 = vsel %vm11768_vm6, %v11728_v39, %v11808_v42  ;;  %v33715_v39 = vld [vmem:[#allocation89_spill] sm:$0xff] }
 0xc13   :  { %22978 = vmatprep.mubr.msk.f32.mxu0 %vm271_vm0, %v33706_v46  ;;  %v13195_v46 = vrot.slane %v30956_v63, 1  ;;  %v32931_v44 = vrot.slane %v31035_v2, 1 }
 0xc15   :  { %v31055_v42 = vsel %vm154_vm2, %v13195_v46, %v32931_v44  ;;  %v33719_v44 = vld [vmem:[#allocation94_spill] sm:$0xff] }
 0xc16   :  { %22979 = vmatmul.mubr.msk.f32.gmra.mrb[78].mxu0 %vm271_vm0, %v33707_v7  ;;  %33714 = vst [vmem:[#allocation46_spill] sm:$0xff] %v31055_v42 }
 0xc17   :  { %22981 = vmatprep.mubr.msk.f32.mxu0 %vm271_vm0, %v33708_v0  ;;  %v33711_v0 = vld [vmem:[#allocation87_spill] sm:$0xff] }
 0xc1a   :  { %22982 = vmatmul.mubr.msk.f32.gmra.mrb[80].mxu0 %vm271_vm0, %v30586_v18  ;;  %v33712_v18 = vrot.slane %v30610_v11, 1 }
 0xc1b   :  { %22984 = vmatprep.mubr.msk.f32.mxu0 %vm271_vm0, %v33709_v10 }
 0xc1c   :  { %v31048_v7 = vsel %vm154_vm2, %v33712_v18, %v13195_v46  ;;  %v33716_v18 = vld [vmem:[#allocation90_spill] sm:$0xff]  ;;  %v33718_v46 = vld [vmem:[#allocation93_spill] sm:$0xff] }
 0xc1d   :  { %33713 = vst [vmem:[#allocation16_spill] sm:$0xff] %v31048_v7 }
 0xc1e   :  { %22985 = vmatmul.mubr.msk.f32.gmra.mrb[82].mxu0 %vm271_vm0, %v30605_v48 }
 0xc1f   :  { %22987 = vmatprep.mubr.msk.f32.mxu0 %vm271_vm0, %v33710_v24  ;;  %v33717_v24 = vld [vmem:[#allocation92_spill] sm:$0xff] }
 0xc22   :  { %22988 = vmatmul.mubr.msk.f32.gmra.mrb[84].mxu0 %vm271_vm0, %v33711_v0  ;;  %v18581_v0 = vld [vmem:[%s32404_s5 + $0x38] sm:$0xff] }
 0xc23   :  { %22990 = vmatprep.mubr.msk.f32.mxu0 %vm271_vm0, %v31048_v7  ;;  %v33722_v7 = vld [vmem:[#allocation10_spill] sm:$0xff] }
 0xc26   :  { %22991 = vmatmul.mubr.msk.f32.gmra.mrb[86].mxu0 %vm271_vm0, %v31055_v42  ;;  %v33720_v42 = vld [vmem:[#allocation91_spill] sm:$0xff] }
 0xc27   :  { %22995 = vmatprep.mubr.msk.f32.mxu0 %vm271_vm0, %v33715_v39  ;;  %v33721_v39 = vld [vmem:[#allocation86_spill] sm:$0xff] }
 0xc2a   :  { %22996 = vmatmul.mubr.msk.f32.vlgmr.msra.gmra.mrb[56].mxu0 %vm271_vm0, %v33716_v18  ;;  %v33723_v18 = vld [vmem:[#allocation3_spill] sm:$0xff] }
 0xc2b   :  { %22998 = vmatprep.mubr.msk.f32.mxu0 %vm271_vm0, %v33717_v24  ;;  %23044 = vmatpush3.msra.mxu0 %v18548_v61  ;;  %v33724_v61 = vld [vmem:[#allocation47_spill] sm:$0xff] }
 0xc2c   :  { %23093 = vmatprep.subr.mxu0 %v18581_v0 }
 0xc2e   :  { %22999 = vmatmul.mubr.msk.f32.gmra.mrb[58].mxu0 %vm271_vm0, %v33718_v46 }
 0xc2f   :  { %23001 = vmatprep.mubr.msk.f32.mxu0 %vm271_vm0, %v33719_v44  ;;  %v13466_v44 = vrot.slane %v30920_v38, 2 }
 0xc32   :  { %23002 = vmatmul.mubr.msk.f32.gmra.mrb[60].mxu0 %vm271_vm0, %v33720_v42  ;;  %v33725_v42 = vld [vmem:[#allocation77_spill] sm:$0xff] }
 0xc33   :  { %23004 = vmatprep.mubr.msk.f32.mxu0 %vm271_vm0, %v33721_v39  ;;  %v32937_v39 = vrot.slane %v30987_v12, 2 }
 0xc36   :  { %23005 = vmatmul.mubr.msk.f32.gmra.mrb[62].mxu0 %vm271_vm0, %v33722_v7  ;;  %v33726_v7 = vld [vmem:[#allocation7_spill] sm:$0xff] }
 0xc37   :  { %23007 = vmatprep.mubr.msk.f32.mxu0 %vm271_vm0, %v33723_v18  ;;  %v33727_v18 = vrot.slane %v30460_v26, 2 }
 0xc3a   :  { %23008 = vmatmul.mubr.msk.f32.gmra.mrb[64].mxu0 %vm271_vm0, %v30762_v40  ;;  %v31095_v40 = vsel %vm1186_vm1, %v33727_v18, %v13466_v44  ;;  %v33732_v18 = vld [vmem:[#allocation32_spill] sm:$0xff] }
 0xc3b   :  { %23010 = vmatprep.mubr.msk.f32.mxu0 %vm271_vm0, %v33724_v61  ;;  %33728 = vst [vmem:[#allocation48_spill] sm:$0xff] %v31095_v40 }
 0xc3e   :  { %23011 = vmatmul.mubr.msk.f32.gmra.mrb[66].mxu0 %vm271_vm0, %v30774_v15  ;;  %v31102_v15 = vsel %vm1186_vm1, %v13466_v44, %v32937_v39  ;;  %v33734_v44 = vld [vmem:[#allocation49_spill] sm:$0xff]  ;;  %v33735_v39 = vld [vmem:[#allocation66_spill] sm:$0xff] }
 0xc3f   :  { %23013 = vmatprep.mubr.msk.f32.mxu0 %vm271_vm0, %v33725_v42  ;;  %33729 = vst [vmem:[#allocation4_spill] sm:$0xff] %v31102_v15  ;;  %v33731_v42 = vld [vmem:[#allocation24_spill] sm:$0xff] }
 0xc42   :  { %23014 = vmatmul.mubr.msk.f32.gmra.mrb[68].mxu0 %vm271_vm0, %v33726_v7  ;;  %v33730_v7 = vld [vmem:[#allocation17_spill] sm:$0xff] }
 0xc43   :  { %23016 = vmatprep.mubr.msk.f32.mxu0 %vm271_vm0, %v31095_v40  ;;  %v33733_v40 = vld [vmem:[#allocation43_spill] sm:$0xff] }
 0xc46   :  { %23017 = vmatmul.mubr.msk.f32.gmra.mrb[70].mxu0 %vm271_vm0, %v31102_v15  ;;  %v33736_v15 = vld [vmem:[#allocation53_spill] sm:$0xff] }
 0xc47   :  { %23019 = vmatprep.mubr.msk.f32.mxu0 %vm271_vm0, %v30801_v45  ;;  %v33737_v45 = vld [vmem:[#allocation57_spill] sm:$0xff] }
 0xc4a   :  { %23020 = vmatmul.mubr.msk.f32.gmra.mrb[72].mxu0 %vm271_vm0, %v33730_v7  ;;  %v13470_v7 = vrot.slane %v30956_v63, 2 }
 0xc4b   :  { %23022 = vmatprep.mubr.msk.f32.mxu0 %vm271_vm0, %v33731_v42 }
 0xc4e   :  { %23023 = vmatmul.mubr.msk.f32.gmra.mrb[74].mxu0 %vm271_vm0, %v33732_v18 }
 0xc4f   :  { %23025 = vmatprep.mubr.msk.f32.mxu0 %vm271_vm0, %v33733_v40 }
 0xc52   :  { %23026 = vmatmul.mubr.msk.f32.gmra.mrb[76].mxu0 %vm271_vm0, %v33734_v44 }
 0xc53   :  { %23028 = vmatprep.mubr.msk.f32.mxu0 %vm271_vm0, %v33735_v39  ;;  %v13472_v39 = vrot.slane %v31035_v2, 2 }
 0xc56   :  { %23029 = vmatmul.mubr.msk.f32.gmra.mrb[78].mxu0 %vm271_vm0, %v33736_v15 }
 0xc57   :  { %23031 = vmatprep.mubr.msk.f32.mxu0 %vm271_vm0, %v33737_v45  ;;  %v33738_v45 = vrot.slane %v30610_v11, 2 }
 0xc5a   :  { %23032 = vmatmul.mubr.msk.f32.gmra.mrb[80].mxu0 %vm271_vm0, %v30855_v54  ;;  %v31139_v54 = vsel %vm1186_vm1, %v33738_v45, %v13470_v7 }
 0xc5b   :  { %23034 = vmatprep.mubr.msk.f32.mxu0 %vm271_vm0, %v30861_v1 }
 0xc5e   :  { %23035 = vmatmul.mubr.msk.f32.gmra.mrb[82].mxu0 %vm271_vm0, %v30867_v41  ;;  %v31146_v41 = vsel %vm1186_vm1, %v13470_v7, %v13472_v39 }
 0xc5f   :  { %23037 = vmatprep.mubr.msk.f32.mxu0 %vm271_vm0, %v30873_v16 }
 0xc62   :  { %23038 = vmatmul.mubr.msk.f32.gmra.mrb[84].mxu0 %vm271_vm0, %v30880_v23  ;;  %v18614_v23 = vld [vmem:[%s32404_s5 + $0x40] sm:$0xff] }
 0xc63   :  { %23040 = vmatprep.mubr.msk.f32.mxu0 %vm271_vm0, %v31139_v54 }
 0xc66   :  { %23041 = vmatmul.mubr.msk.f32.gmra.mrb[86].mxu0 %vm271_vm0, %v31146_v41 }
 0xc67   :  { %23045 = vmatprep.mubr.msk.f32.mxu0 %vm271_vm0, %v30350_v28  ;;  %v33739_v28 = vld [vmem:[#allocation71_spill] sm:$0xff] }
 0xc6a   :  { %23046 = vmatmul.mubr.msk.f32.vlgmr.msra.gmra.mrb[56].mxu0 %vm271_vm0, %v30338_v14  ;;  %v25269_v14 = vld [vmem:[%s32402_s7 + $0x2] ss:$0 sm:$0xff] }
 0xc6b   :  { %23048 = vmatprep.mubr.msk.f32.mxu0 %vm271_vm0, %v30368_v22  ;;  %23094 = vmatpush3.msra.mxu0 %v18581_v0  ;;  %v33769_v0 = vld [vmem:[#allocation57_spill] sm:$0xff] }
 0xc6c   :  { %23143 = vmatprep.subr.mxu0 %v18614_v23 }
 0xc6e   :  { %23049 = vmatmul.mubr.msk.f32.gmra.mrb[58].mxu0 %vm271_vm0, %v30359_v47  ;;  %v11709_v47 = vadd.f32 %v25269_v14, %v33739_v28 }
 0xc6f   :  { %23051 = vmatprep.mubr.msk.f32.mxu0 %vm271_vm0, %v30386_v53  ;;  %v33740_v53 = vld [vmem:[#allocation83_spill] sm:$0xff] }
 0xc70   :  { %v11789_v22 = vmul.f32 0.2, %v11709_v47  ;;  %vm11749_vm7 = vcmp.ge.f32.partialorder %v11709_v47, 0.0 }
 0xc72   :  { %23052 = vmatmul.mubr.msk.f32.gmra.mrb[60].mxu0 %vm271_vm0, %v30377_v21  ;;  %v31187_v21 = vsel %vm11749_vm7, %v11709_v47, %v11789_v22 }
 0xc73   :  { %23054 = vmatprep.mubr.msk.f32.mxu0 %vm271_vm0, %v30404_v34 }
 0xc76   :  { %23055 = vmatmul.mubr.msk.f32.gmra.mrb[62].mxu0 %vm271_vm0, %v30395_v51  ;;  %v11729_v51 = vadd.f32 %v25269_v14, %v33740_v53 }
 0xc77   :  { %23057 = vmatprep.mubr.msk.f32.mxu0 %vm271_vm0, %v30422_v32  ;;  %v18648_v32 = vld [vmem:[%s32405_s6 + $0x8] sm:$0xff] }
 0xc78   :  { %v11809_v34 = vmul.f32 0.2, %v11729_v51  ;;  %vm11769_vm8 = vcmp.ge.f32.partialorder %v11729_v51, 0.0 }
 0xc7a   :  { %23058 = vmatmul.mubr.msk.f32.gmra.mrb[64].mxu0 %vm271_vm0, %v30413_v43  ;;  %v31222_v43 = vsel %vm11769_vm8, %v11729_v51, %v11809_v34 }
 0xc7b   :  { %23060 = vmatprep.mubr.msk.f32.mxu0 %vm271_vm0, %v30441_v17  ;;  %v33748_v17 = vld [vmem:[#allocation79_spill] sm:$0xff] }
 0xc7e   :  { %23061 = vmatmul.mubr.msk.f32.gmra.mrb[66].mxu0 %vm271_vm0, %v30433_v31  ;;  %v33745_v31 = vld [vmem:[#allocation35_spill] sm:$0xff] }
 0xc7f   :  { %23063 = vmatprep.mubr.msk.f32.mxu0 %vm271_vm0, %v30460_v26  ;;  %v33751_v26 = vld [vmem:[#allocation87_spill] sm:$0xff] }
 0xc82   :  { %23064 = vmatmul.mubr.msk.f32.gmra.mrb[68].mxu0 %vm271_vm0, %v30920_v38  ;;  %v33764_v38 = vld [vmem:[#allocation48_spill] sm:$0xff] }
 0xc83   :  { %23066 = vmatprep.mubr.msk.f32.mxu0 %vm271_vm0, %v30987_v12 }
 0xc86   :  { %23067 = vmatmul.mubr.msk.f32.gmra.mrb[70].mxu0 %vm271_vm0, %v31187_v21 }
 0xc87   :  { %23069 = vmatprep.mubr.msk.f32.mxu0 %vm271_vm0, %v30501_v25  ;;  %v33754_v25 = vrot.slane %v31035_v2, 1 }
 0xc8a   :  { %23070 = vmatmul.mubr.msk.f32.gmra.mrb[72].mxu0 %vm271_vm0, %v30494_v52  ;;  %v33753_v52 = vld [vmem:[#allocation46_spill] sm:$0xff] }
 0xc8b   :  { %23072 = vmatprep.mubr.msk.f32.mxu0 %vm271_vm0, %v30518_v57  ;;  %v33755_v57 = vld [vmem:[#allocation94_spill] sm:$0xff] }
 0xc8e   :  { %23073 = vmatmul.mubr.msk.f32.gmra.mrb[74].mxu0 %vm271_vm0, %v30509_v20 }
 0xc8f   :  { %23075 = vmatprep.mubr.msk.f32.mxu0 %vm271_vm0, %v30536_v4  ;;  %v33757_v4 = vld [vmem:[#allocation86_spill] sm:$0xff] }
 0xc92   :  { %23076 = vmatmul.mubr.msk.f32.gmra.mrb[76].mxu0 %vm271_vm0, %v30527_v33  ;;  %v33756_v33 = vld [vmem:[#allocation91_spill] sm:$0xff] }
 0xc93   :  { %23078 = vmatprep.mubr.msk.f32.mxu0 %vm271_vm0, %v30554_v50  ;;  %v33749_v50 = vld [vmem:[#allocation80_spill] sm:$0xff] }
 0xc96   :  { %23079 = vmatmul.mubr.msk.f32.gmra.mrb[78].mxu0 %vm271_vm0, %v30545_v27  ;;  %v33758_v27 = vld [vmem:[#allocation10_spill] sm:$0xff] }
 0xc97   :  { %23081 = vmatprep.mubr.msk.f32.mxu0 %vm271_vm0, %v30572_v6 }
 0xc9a   :  { %23082 = vmatmul.mubr.msk.f32.gmra.mrb[80].mxu0 %vm271_vm0, %v30563_v56  ;;  %v33759_v56 = vld [vmem:[#allocation3_spill] sm:$0xff] }
 0xc9b   :  { %23084 = vmatprep.mubr.msk.f32.mxu0 %vm271_vm0, %v30591_v55  ;;  %v33760_v55 = vld [vmem:[#allocation44_spill] sm:$0xff] }
 0xc9e   :  { %23085 = vmatmul.mubr.msk.f32.gmra.mrb[82].mxu0 %vm271_vm0, %v30583_v19  ;;  %v33761_v19 = vld [vmem:[#allocation73_spill] sm:$0xff] }
 0xc9f   :  { %23087 = vmatprep.mubr.msk.f32.mxu0 %vm271_vm0, %v30610_v11  ;;  %v14283_v11 = vrot.slane %v31187_v21, 2 }
 0xca2   :  { %23088 = vmatmul.mubr.msk.f32.gmra.mrb[84].mxu0 %vm271_vm0, %v30956_v63  ;;  %v33765_v63 = vld [vmem:[#allocation4_spill] sm:$0xff] }
 0xca3   :  { %23090 = vmatprep.mubr.msk.f32.mxu0 %vm271_vm0, %v31035_v2 }
 0xca6   :  { %23091 = vmatmul.mubr.msk.f32.gmra.mrb[86].mxu0 %vm271_vm0, %v31222_v43 }
 0xca7   :  { %23095 = vmatprep.mubr.msk.f32.mxu0 %vm271_vm0, %v30366_v37  ;;  %v14010_v37 = vrot.slane %v31187_v21, 1 }
 0xcaa   :  { %23096 = vmatmul.mubr.msk.f32.vlgmr.msra.gmra.mrb[56].mxu0 %vm271_vm0, %v30381_v35  ;;  %v33741_v35 = vrot.slane %v30987_v12, 1 }
 0xcab   :  { %23098 = vmatprep.mubr.msk.f32.mxu0 %vm271_vm0, %v30384_v13  ;;  %23144 = vmatpush3.msra.mxu0 %v18614_v23  ;;  %v33763_v23 = vld [vmem:[#allocation7_spill] sm:$0xff] }
 0xcac   :  { %23193 = vmatprep.subr.mxu0 %v18648_v32  ;;  %v14011_v13 = vsel %vm154_vm2, %v33741_v35, %v14010_v37 }
 0xcae   :  { %23099 = vmatmul.mubr.msk.f32.gmra.mrb[58].mxu0 %vm271_vm0, %v30399_v3  ;;  %v33742_v3 = vld [vmem:[#allocation9_spill] sm:$0xff] }
 0xcaf   :  { %23101 = vmatprep.mubr.msk.f32.mxu0 %vm271_vm0, %v30402_v58  ;;  %v14012_v58 = vsel %vm154_vm2, %v14010_v37, %v33742_v3 }
 0xcb2   :  { %23102 = vmatmul.mubr.msk.f32.gmra.mrb[60].mxu0 %vm271_vm0, %v30417_v30  ;;  %v33743_v30 = vld [vmem:[#allocation74_spill] sm:$0xff] }
 0xcb3   :  { %23104 = vmatprep.mubr.msk.f32.mxu0 %vm271_vm0, %v30420_v29  ;;  %v33744_v29 = vld [vmem:[#allocation36_spill] sm:$0xff] }
 0xcb6   :  { %23105 = vmatmul.mubr.msk.f32.gmra.mrb[62].mxu0 %vm271_vm0, %v30436_v59  ;;  %v33746_v59 = vld [vmem:[#allocation37_spill] sm:$0xff] }
 0xcb7   :  { %23107 = vmatprep.mubr.msk.f32.mxu0 %vm271_vm0, %v30439_v36  ;;  %v33747_v36 = vld [vmem:[#allocation78_spill] sm:$0xff] }
 0xcba   :  { %23108 = vmatmul.mubr.msk.f32.gmra.mrb[64].mxu0 %vm271_vm0, %v30455_v8  ;;  %v33750_v8 = vld [vmem:[#allocation85_spill] sm:$0xff] }
 0xcbb   :  { %23110 = vmatprep.mubr.msk.f32.mxu0 %vm271_vm0, %v30458_v60  ;;  %v14013_v60 = vrot.slane %v31222_v43, 1 }
 0xcbd   :  { %v14014_v20 = vsel %vm154_vm2, %v33754_v25, %v14013_v60  ;;  %v14015_v6 = vsel %vm154_vm2, %v14013_v60, %v33742_v3 }
 0xcbe   :  { %23111 = vmatmul.mubr.msk.f32.gmra.mrb[66].mxu0 %vm271_vm0, %v30471_v62  ;;  %v33752_v62 = vld [vmem:[#allocation16_spill] sm:$0xff] }
 0xcbf   :  { %23113 = vmatprep.mubr.msk.f32.mxu0 %vm271_vm0, %v31000_v5  ;;  %v33766_v5 = vrot.slane %v30987_v12, 2  ;;  %v33768_v12 = vld [vmem:[#allocation66_spill] sm:$0xff] }
 0xcc2   :  { %23114 = vmatmul.mubr.msk.f32.gmra.mrb[68].mxu0 %vm271_vm0, %v31007_v49  ;;  %v14284_v49 = vsel %vm1186_vm1, %v33766_v5, %v14283_v11 }
 0xcc3   :  { %23116 = vmatprep.mubr.msk.f32.mxu0 %vm271_vm0, %v14011_v13 }
 0xcc6   :  { %23117 = vmatmul.mubr.msk.f32.gmra.mrb[70].mxu0 %vm271_vm0, %v14012_v58 }
 0xcc7   :  { %23119 = vmatprep.mubr.msk.f32.mxu0 %vm271_vm0, %v33743_v30 }
 0xcca   :  { %23120 = vmatmul.mubr.msk.f32.gmra.mrb[72].mxu0 %vm271_vm0, %v33703_v9  ;;  %v33767_v9 = vld [vmem:[#allocation12_spill] sm:$0xff] }
 0xccb   :  { %23122 = vmatprep.mubr.msk.f32.mxu0 %vm271_vm0, %v33744_v29 }
 0xcce   :  { %23123 = vmatmul.mubr.msk.f32.gmra.mrb[74].mxu0 %vm271_vm0, %v33745_v31 }
 0xccf   :  { %23125 = vmatprep.mubr.msk.f32.mxu0 %vm271_vm0, %v33746_v59 }
 0xcd2   :  { %23126 = vmatmul.mubr.msk.f32.gmra.mrb[76].mxu0 %vm271_vm0, %v33747_v36 }
 0xcd3   :  { %23128 = vmatprep.mubr.msk.f32.mxu0 %vm271_vm0, %v33748_v17 }
 0xcd6   :  { %23129 = vmatmul.mubr.msk.f32.gmra.mrb[78].mxu0 %vm271_vm0, %v33749_v50 }
 0xcd7   :  { %23131 = vmatprep.mubr.msk.f32.mxu0 %vm271_vm0, %v33709_v10  ;;  %v14285_v10 = vsel %vm1186_vm1, %v14283_v11, %v33767_v9 }
 0xcda   :  { %23132 = vmatmul.mubr.msk.f32.gmra.mrb[80].mxu0 %vm271_vm0, %v30605_v48  ;;  %v33762_v48 = vld [vmem:[#allocation77_spill] sm:$0xff] }
 0xcdb   :  { %23134 = vmatprep.mubr.msk.f32.mxu0 %vm271_vm0, %v33750_v8 }
 0xcde   :  { %23135 = vmatmul.mubr.msk.f32.gmra.mrb[82].mxu0 %vm271_vm0, %v33751_v26 }
 0xcdf   :  { %23137 = vmatprep.mubr.msk.f32.mxu0 %vm271_vm0, %v33752_v62 }
 0xce2   :  { %23138 = vmatmul.mubr.msk.f32.gmra.mrb[84].mxu0 %vm271_vm0, %v33753_v52 }
 0xce3   :  { %23140 = vmatprep.mubr.msk.f32.mxu0 %vm271_vm0, %v14014_v20 }
 0xce6   :  { %23141 = vmatmul.mubr.msk.f32.gmra.mrb[86].mxu0 %vm271_vm0, %v14015_v6  ;;  %v31418_v6 = vld [vmem:[%s32405_s6 + $0x10] sm:$0xff] }
 0xce7   :  { %23145 = vmatprep.mubr.msk.f32.mxu0 %vm271_vm0, %v33717_v24  ;;  %v33770_v24 = vld [vmem:[#allocation88_spill] sm:$0xff] }
 0xcea   :  { %23146 = vmatmul.mubr.msk.f32.vlgmr.msra.gmra.mrb[56].mxu0 %vm271_vm0, %v33718_v46  ;;  %v33772_v46 = vld [vmem:[#allocation15_spill] sm:$0xff] }
 0xceb   :  { %23148 = vmatprep.mubr.msk.f32.mxu0 %vm271_vm0, %v33755_v57  ;;  %23194 = vmatpush3.msra.mxu0 %v18648_v32 }
 0xcee   :  { %23149 = vmatmul.mubr.msk.f32.gmra.mrb[58].mxu0 %vm271_vm0, %v33756_v33 }
 0xcef   :  { %23151 = vmatprep.mubr.msk.f32.mxu0 %vm271_vm0, %v33757_v4 }
 0xcf2   :  { %23152 = vmatmul.mubr.msk.f32.gmra.mrb[60].mxu0 %vm271_vm0, %v33758_v27 }
 0xcf3   :  { %23154 = vmatprep.mubr.msk.f32.mxu0 %vm271_vm0, %v33759_v56 }
 0xcf6   :  { %23155 = vmatmul.mubr.msk.f32.gmra.mrb[62].mxu0 %vm271_vm0, %v33760_v55 }
 0xcf7   :  { %23157 = vmatprep.mubr.msk.f32.mxu0 %vm271_vm0, %v33724_v61 }
 0xcfa   :  { %23158 = vmatmul.mubr.msk.f32.gmra.mrb[64].mxu0 %vm271_vm0, %v33761_v19 }
 0xcfb   :  { %23160 = vmatprep.mubr.msk.f32.mxu0 %vm271_vm0, %v33762_v48 }
 0xcfe   :  { %23161 = vmatmul.mubr.msk.f32.gmra.mrb[66].mxu0 %vm271_vm0, %v33763_v23 }
 0xcff   :  { %23163 = vmatprep.mubr.msk.f32.mxu0 %vm271_vm0, %v33764_v38 }
 0xd02   :  { %23164 = vmatmul.mubr.msk.f32.gmra.mrb[68].mxu0 %vm271_vm0, %v33765_v63 }
 0xd03   :  { %23166 = vmatprep.mubr.msk.f32.mxu0 %vm271_vm0, %v14284_v49 }
 0xd06   :  { %23167 = vmatmul.mubr.msk.f32.gmra.mrb[70].mxu0 %vm271_vm0, %v14285_v10 }
 0xd07   :  { %23169 = vmatprep.mubr.msk.f32.mxu0 %vm271_vm0, %v33731_v42  ;;  %v33771_v42 = vld [vmem:[#allocation62_spill] sm:$0xff] }
 0xd0a   :  { %23170 = vmatmul.mubr.msk.f32.gmra.mrb[72].mxu0 %vm271_vm0, %v33732_v18 }
 0xd0b   :  { %23172 = vmatprep.mubr.msk.f32.mxu0 %vm271_vm0, %v33733_v40  ;;  %v14286_v40 = vrot.slane %v31222_v43, 2 }
 0xd0e   :  { %23173 = vmatmul.mubr.msk.f32.gmra.mrb[74].mxu0 %vm271_vm0, %v33734_v44 }
 0xd0f   :  { %23175 = vmatprep.mubr.msk.f32.mxu0 %vm271_vm0, %v33768_v12 }
 0xd12   :  { %23176 = vmatmul.mubr.msk.f32.gmra.mrb[76].mxu0 %vm271_vm0, %v33736_v15  ;;  %v14287_v15 = vsel %vm1186_vm1, %v13472_v39, %v14286_v40 }
 0xd13   :  { %23178 = vmatprep.mubr.msk.f32.mxu0 %vm271_vm0, %v33769_v0 }
 0xd16   :  { %23179 = vmatmul.mubr.msk.f32.gmra.mrb[78].mxu0 %vm271_vm0, %v33770_v24 }
 0xd17   :  { %23181 = vmatprep.mubr.msk.f32.mxu0 %vm271_vm0, %v30861_v1  ;;  %v14288_v1 = vsel %vm1186_vm1, %v14286_v40, %v33767_v9 }
 0xd1a   :  { %23182 = vmatmul.mubr.msk.f32.gmra.mrb[80].mxu0 %vm271_vm0, %v33771_v42 }
 0xd1b   :  { %23184 = vmatprep.mubr.msk.f32.mxu0 %vm271_vm0, %v30873_v16  ;;  %v14689_v16 = vld [vmem:[%s32405_s6] sm:$0xff] }
 0xd1c   :  { %23231 = vmatprep.subr.mxu0 %v14689_v16 }
 0xd1e   :  { %23185 = vmatmul.mubr.msk.f32.gmra.mrb[82].mxu0 %vm271_vm0, %v33772_v46 }
 0xd1f   :  { %23187 = vmatprep.mubr.msk.f32.mxu0 %vm271_vm0, %v31139_v54  ;;  %v31379_v54 = vld [vmem:[%s32402_s7 + $0x3] ss:$0 sm:$0xff] }
 0xd22   :  { %23188 = vmatmul.mubr.msk.f32.gmra.mrb[84].mxu0 %vm271_vm0, %v31146_v41 }
 0xd23   :  { %23190 = vmatprep.mubr.msk.f32.mxu0 %vm271_vm0, %v14287_v15 }
 0xd26   :  { %23191 = vmatmul.mubr.msk.f32.gmra.mrb[86].mxu0 %vm271_vm0, %v14288_v1 }
 0xdbd   :  { %v23147_v41 = vpop.f32.mrb[56].mxu0 }
 0xdbe   :  { %v14562_v2 = vadd.f32 %v23147_v41, %v31379_v54  ;;  %v14365_v39 = vpop.f32.mrb[57].mxu0 }
 0xdbf   :  { %v14561_v61 = vadd.f32 %v31379_v54, %v14365_v39 }
 0xdc0   :  { %vm14594_vm9 = vcmp.ge.f32.partialorder %v14562_v2, 0.0  ;;  %v14626_v18 = vmul.f32 0.2, %v14562_v2 }
 0xdc1   :  { %vm14593_vm10 = vcmp.ge.f32.partialorder %v14561_v61, 0.0  ;;  %v14625_v44 = vmul.f32 0.2, %v14561_v61  ;;  %v23150_v45 = vpop.f32.mrb[58].mxu0 }
 0xdc2   :  { %v31383_v7 = vsel %vm14594_vm9, %v14562_v2, %v14626_v18  ;;  %v14564_v14 = vadd.f32 %v23150_v45, %v31379_v54  ;;  %v14375_v28 = vpop.f32.mrb[59].mxu0 }
 0xdc3   :  { %v14717_v47 = vrot.slane %v31383_v7, 1  ;;  %v32944_v22 = vrot.slane %v31383_v7, 2  ;;  %v31388_v21 = vsel %vm14593_vm10, %v14561_v61, %v14625_v44  ;;  %v14563_v53 = vadd.f32 %v31379_v54, %v14375_v28 }
 0xdc4   :  { %v14716_v51 = vrot.slane %v31388_v21, 1  ;;  %v15234_v34 = vrot.slane %v31388_v21, 2  ;;  %vm14596_vm11 = vcmp.ge.f32.partialorder %v14564_v14, 0.0  ;;  %v14628_v43 = vmul.f32 0.2, %v14564_v14 }
 0xdc5   :  { %vm14595_vm12 = vcmp.ge.f32.partialorder %v14563_v53, 0.0  ;;  %v14627_v32 = vmul.f32 0.2, %v14563_v53  ;;  %v23153_v37 = vpop.f32.mrb[60].mxu0 }
 0xdc6   :  { %v31393_v35 = vsel %vm14596_vm11, %v14564_v14, %v14628_v43  ;;  %v14566_v13 = vadd.f32 %v23153_v37, %v31379_v54  ;;  %v14385_v58 = vpop.f32.mrb[61].mxu0  ;;  %v14718_v30 = vsel %vm154_vm2, %v14716_v51, %v14717_v47  ;;  %v31400_v29 = vsel %vm1186_vm1, %v15234_v34, %v32944_v22 }
 0xdc7   :  { %v31402_v31 = vsel %vm14595_vm12, %v14563_v53, %v14627_v32  ;;  %v14565_v59 = vadd.f32 %v31379_v54, %v14385_v58  ;;  %23195 = vmatprep.mubr.msk.f32.mxu0 %vm271_vm0, %v14718_v30  ;;  %v14721_v36 = vrot.slane %v31393_v35, 1 }
 0xdc8   :  { %v14719_v17 = vrot.slane %v31402_v31, 1  ;;  %vm14598_vm13 = vcmp.ge.f32.partialorder %v14566_v13, 0.0  ;;  %v14630_v50 = vmul.f32 0.2, %v14566_v13 }
 0xdc9   :  { %vm14597_vm5 = vcmp.ge.f32.partialorder %v14565_v59, 0.0  ;;  %v14629_v8 = vmul.f32 0.2, %v14565_v59  ;;  %v23156_v60 = vpop.f32.mrb[62].mxu0 }
 0xdca   :  { %v31408_v26 = vsel %vm14598_vm13, %v14566_v13, %v14630_v50  ;;  %v14568_v62 = vadd.f32 %v23156_v60, %v31379_v54  ;;  %v14395_v52 = vpop.f32.mrb[63].mxu0  ;;  %v14720_v25 = vsel %vm154_vm2, %v14717_v47, %v14719_v17  ;;  %v31413_v20 = vsel %vm154_vm2, %v14719_v17, %v14721_v36 }
 0xdcb   :  { %v31420_v57 = vsel %vm14597_vm5, %v14565_v59, %v14629_v8  ;;  %v14567_v33 = vadd.f32 %v31379_v54, %v14395_v52  ;;  %23196 = vmatmul.mubr.msk.f32.vlgmr.msra.gmra.mrb[88].mxu0 %vm271_vm0, %v14720_v25  ;;  %v14725_v4 = vrot.slane %v31408_v26, 1 }
 0xdcc   :  { %vm14600_vm14 = vcmp.ge.f32.partialorder %v14568_v62, 0.0  ;;  %v14632_v27 = vmul.f32 0.2, %v14568_v62  ;;  %23198 = vmatprep.mubr.msk.f32.mxu0 %vm271_vm0, %v31413_v20  ;;  %v14723_v56 = vrot.slane %v31420_v57, 1  ;;  %23232 = vmatpush3.msra.mxu0 %v14689_v16 }
 0xdcd   :  { %vm14599_vm15 = vcmp.ge.f32.partialorder %v14567_v33, 0.0  ;;  %v14631_v55 = vmul.f32 0.2, %v14567_v33  ;;  %v23159_v19 = vpop.f32.mrb[64].mxu0  ;;  %23269 = vmatprep.subr.mxu0 %v31418_v6 }
 0xdce   :  { %v31429_v48 = vsel %vm14600_vm14, %v14568_v62, %v14632_v27  ;;  %v14570_v11 = vadd.f32 %v23159_v19, %v31379_v54  ;;  %v14405_v23 = vpop.f32.mrb[65].mxu0  ;;  %v31433_v38 = vsel %vm154_vm2, %v14721_v36, %v14723_v56  ;;  %v31436_v63 = vsel %vm154_vm2, %v14723_v56, %v14725_v4 }
 0xdcf   :  { %v31438_v5 = vsel %vm14599_vm15, %v14567_v33, %v14631_v55  ;;  %v14569_v49 = vadd.f32 %v31379_v54, %v14405_v23  ;;  %23199 = vmatmul.mubr.msk.f32.gmra.mrb[90].mxu0 %vm271_vm0, %v31433_v38  ;;  %v14729_v10 = vrot.slane %v31429_v48, 1 }
 0xdd0   :  { %vm14602_vm3 = vcmp.ge.f32.partialorder %v14570_v11, 0.0  ;;  %v14634_v12 = vmul.f32 0.2, %v14570_v11  ;;  %23201 = vmatprep.mubr.msk.f32.mxu0 %vm271_vm0, %v31436_v63  ;;  %v14727_v0 = vrot.slane %v31438_v5, 1 }
 0xdd1   :  { %vm14601_vm4 = vcmp.ge.f32.partialorder %v14569_v49, 0.0  ;;  %v14633_v24 = vmul.f32 0.2, %v14569_v49  ;;  %v23162_v42 = vpop.f32.mrb[66].mxu0 }
 0xdd2   :  { %v31447_v40 = vsel %vm14602_vm3, %v14570_v11, %v14634_v12  ;;  %v14572_v46 = vadd.f32 %v23162_v42, %v31379_v54  ;;  %v14415_v15 = vpop.f32.mrb[67].mxu0  ;;  %v31451_v1 = vsel %vm154_vm2, %v14725_v4, %v14727_v0  ;;  %v31454_v16 = vsel %vm154_vm2, %v14727_v0, %v14729_v10 }
 0xdd3   :  { %v31456_v41 = vsel %vm14601_vm4, %v14569_v49, %v14633_v24  ;;  %v14571_v2 = vadd.f32 %v31379_v54, %v14415_v15  ;;  %23202 = vmatmul.mubr.msk.f32.gmra.mrb[92].mxu0 %vm271_vm0, %v31451_v1  ;;  %v14733_v39 = vrot.slane %v31447_v40, 1 }
 0xdd4   :  { %vm14604_vm6 = vcmp.ge.f32.partialorder %v14572_v46, 0.0  ;;  %v14636_v61 = vmul.f32 0.2, %v14572_v46  ;;  %23204 = vmatprep.mubr.msk.f32.mxu0 %vm271_vm0, %v31454_v16  ;;  %v14731_v18 = vrot.slane %v31456_v41, 1 }
 0xdd5   :  { %vm14603_vm7 = vcmp.ge.f32.partialorder %v14571_v2, 0.0  ;;  %v14635_v44 = vmul.f32 0.2, %v14571_v2  ;;  %v23165_v45 = vpop.f32.mrb[68].mxu0 }
 0xdd6   :  { %v31465_v14 = vsel %vm14604_vm6, %v14572_v46, %v14636_v61  ;;  %v31468_v28 = vadd.f32 %v23165_v45, %v31379_v54  ;;  %v14425_v47 = vpop.f32.mrb[69].mxu0  ;;  %v31471_v53 = vsel %vm154_vm2, %v14729_v10, %v14731_v18  ;;  %v31474_v51 = vsel %vm154_vm2, %v14731_v18, %v14733_v39 }
 0xdd7   :  { %v31476_v34 = vsel %vm14603_vm7, %v14571_v2, %v14635_v44  ;;  %v14573_v43 = vadd.f32 %v31379_v54, %v14425_v47  ;;  %23205 = vmatmul.mubr.msk.f32.gmra.mrb[94].mxu0 %vm271_vm0, %v31471_v53  ;;  %v14737_v32 = vrot.slane %v31465_v14, 1  ;;  %v15255_v3 = vrot.slane %v31465_v14, 2 }
 0xdd8   :  { %23207 = vmatprep.mubr.msk.f32.mxu0 %vm271_vm0, %v31474_v51  ;;  %v14735_v37 = vrot.slane %v31476_v34, 1  ;;  %v15253_v9 = vrot.slane %v31476_v34, 2 }
 0xdd9   :  { %vm14605_vm8 = vcmp.ge.f32.partialorder %v14573_v43, 0.0  ;;  %v14637_v13 = vmul.f32 0.2, %v14573_v43  ;;  %v23168_v58 = vpop.f32.mrb[70].mxu0 }
 0xdda   :  { %v31486_v30 = vadd.f32 %v23168_v58, %v31379_v54  ;;  %v14435_v59 = vpop.f32.mrb[71].mxu0  ;;  %v31489_v36 = vsel %vm154_vm2, %v14733_v39, %v14735_v37  ;;  %v31492_v17 = vsel %vm154_vm2, %v14735_v37, %v14737_v32 }
 0xddb   :  { %v31494_v50 = vsel %vm14605_vm8, %v14573_v43, %v14637_v13  ;;  %v31497_v8 = vadd.f32 %v31379_v54, %v14435_v59  ;;  %23208 = vmatmul.mubr.msk.f32.gmra.mrb[96].mxu0 %vm271_vm0, %v31489_v36 }
 0xddc   :  { %33773 = vst [vmem:[#allocation28_spill] sm:$0xff] %v31486_v30  ;;  %23210 = vmatprep.mubr.msk.f32.mxu0 %vm271_vm0, %v31492_v17  ;;  %v32942_v60 = vrot.slane %v31494_v50, 1 }
 0xddd   :  { %v23171_v62 = vpop.f32.mrb[72].mxu0 }
 0xdde   :  { %v14578_v52 = vadd.f32 %v23171_v62, %v31379_v54  ;;  %v14445_v25 = vpop.f32.mrb[73].mxu0  ;;  %v31508_v33 = vsel %vm154_vm2, %v14737_v32, %v32942_v60 }
 0xddf   :  { %v14577_v4 = vadd.f32 %v31379_v54, %v14445_v25  ;;  %23211 = vmatmul.mubr.msk.f32.gmra.mrb[98].mxu0 %vm271_vm0, %v31508_v33 }
 0xde0   :  { %vm14610_vm9 = vcmp.ge.f32.partialorder %v14578_v52, 0.0  ;;  %v14642_v27 = vmul.f32 0.2, %v14578_v52 }
 0xde1   :  { %vm14609_vm10 = vcmp.ge.f32.partialorder %v14577_v4, 0.0  ;;  %v14641_v56 = vmul.f32 0.2, %v14577_v4  ;;  %v23174_v55 = vpop.f32.mrb[74].mxu0 }
 0xde2   :  { %v31513_v19 = vsel %vm14610_vm9, %v14578_v52, %v14642_v27  ;;  %v14580_v11 = vadd.f32 %v23174_v55, %v31379_v54  ;;  %v14455_v23 = vpop.f32.mrb[75].mxu0  ;;  %vm14606_vm9 = vcmp.ge.f32.partialorder %v31468_v28, 0.0 }
 0xde3   :  { %v14742_v49 = vrot.slane %v31513_v19, 1  ;;  %v32943_v10 = vrot.slane %v31513_v19, 2  ;;  %v31518_v12 = vsel %vm14609_vm10, %v14577_v4, %v14641_v56  ;;  %v14579_v0 = vadd.f32 %v31379_v54, %v14455_v23 }
 0xde4   :  { %v14741_v24 = vrot.slane %v31518_v12, 1  ;;  %v15259_v42 = vrot.slane %v31518_v12, 2  ;;  %vm14612_vm11 = vcmp.ge.f32.partialorder %v14580_v11, 0.0  ;;  %v14644_v46 = vmul.f32 0.2, %v14580_v11 }
 0xde5   :  { %vm14611_vm12 = vcmp.ge.f32.partialorder %v14579_v0, 0.0  ;;  %v14643_v15 = vmul.f32 0.2, %v14579_v0  ;;  %v23177_v2 = vpop.f32.mrb[76].mxu0 }
 0xde6   :  { %v31523_v39 = vsel %vm14612_vm11, %v14580_v11, %v14644_v46  ;;  %v14582_v61 = vadd.f32 %v23177_v2, %v31379_v54  ;;  %v14465_v18 = vpop.f32.mrb[77].mxu0  ;;  %v14743_v44 = vsel %vm154_vm2, %v14741_v24, %v14742_v49  ;;  %v31530_v45 = vsel %vm1186_vm1, %v15259_v42, %v32943_v10 }
 0xde7   :  { %v31532_v47 = vsel %vm14611_vm12, %v14579_v0, %v14643_v15  ;;  %v14581_v43 = vadd.f32 %v31379_v54, %v14465_v18  ;;  %23213 = vmatprep.mubr.msk.f32.mxu0 %vm271_vm0, %v14743_v44  ;;  %v14746_v32 = vrot.slane %v31523_v39, 1  ;;  %vm14607_vm11 = vcmp.ge.f32.partialorder %v31497_v8, 0.0 }
 0xde8   :  { %vm14614_vm13 = vcmp.ge.f32.partialorder %v14582_v61, 0.0  ;;  %v14646_v37 = vmul.f32 0.2, %v14582_v61  ;;  %v14744_v13 = vrot.slane %v31532_v47, 1  ;;  %v15262_v30 = vrot.slane %v31532_v47, 2 }
 0xde9   :  { %vm14613_vm5 = vcmp.ge.f32.partialorder %v14581_v43, 0.0  ;;  %v14645_v58 = vmul.f32 0.2, %v14581_v43  ;;  %v23180_v59 = vpop.f32.mrb[78].mxu0 }
 0xdea   :  { %v31538_v62 = vsel %vm14614_vm13, %v14582_v61, %v14646_v37  ;;  %v14584_v52 = vadd.f32 %v23180_v59, %v31379_v54  ;;  %v14475_v25 = vpop.f32.mrb[79].mxu0  ;;  %v14745_v4 = vsel %vm154_vm2, %v14742_v49, %v14744_v13  ;;  %v31543_v27 = vsel %vm154_vm2, %v14744_v13, %v14746_v32 }
 0xdeb   :  { %v31545_v56 = vsel %vm14613_vm5, %v14581_v43, %v14645_v58  ;;  %v14583_v55 = vadd.f32 %v31379_v54, %v14475_v25  ;;  %23214 = vmatmul.mubr.msk.f32.gmra.mrb[100].mxu0 %vm271_vm0, %v14745_v4  ;;  %v14750_v11 = vrot.slane %v31538_v62, 1 }
 0xdec   :  { %vm14616_vm14 = vcmp.ge.f32.partialorder %v14584_v52, 0.0  ;;  %v14648_v23 = vmul.f32 0.2, %v14584_v52  ;;  %23216 = vmatprep.mubr.msk.f32.mxu0 %vm271_vm0, %v31543_v27  ;;  %v14748_v0 = vrot.slane %v31545_v56, 1 }
 0xded   :  { %vm14615_vm15 = vcmp.ge.f32.partialorder %v14583_v55, 0.0  ;;  %v14647_v49 = vmul.f32 0.2, %v14583_v55  ;;  %v23183_v24 = vpop.f32.mrb[80].mxu0 }
 0xdee   :  { %v31553_v42 = vsel %vm14616_vm14, %v14584_v52, %v14648_v23  ;;  %v14586_v46 = vadd.f32 %v23183_v24, %v31379_v54  ;;  %v14485_v15 = vpop.f32.mrb[81].mxu0  ;;  %v31557_v2 = vsel %vm154_vm2, %v14746_v32, %v14748_v0  ;;  %v31560_v61 = vsel %vm154_vm2, %v14748_v0, %v14750_v11 }
 0xdef   :  { %v31562_v18 = vsel %vm14615_vm15, %v14583_v55, %v14647_v49  ;;  %v14585_v44 = vadd.f32 %v31379_v54, %v14485_v15  ;;  %23217 = vmatmul.mubr.msk.f32.gmra.mrb[102].mxu0 %vm271_vm0, %v31557_v2  ;;  %v14754_v43 = vrot.slane %v31553_v42, 1 }
 0xdf0   :  { %vm14618_vm3 = vcmp.ge.f32.partialorder %v14586_v46, 0.0  ;;  %v14650_v37 = vmul.f32 0.2, %v14586_v46  ;;  %23219 = vmatprep.mubr.msk.f32.mxu0 %vm271_vm0, %v31560_v61  ;;  %v14752_v32 = vrot.slane %v31562_v18, 1 }
 0xdf1   :  { %vm14617_vm4 = vcmp.ge.f32.partialorder %v14585_v44, 0.0  ;;  %v14649_v13 = vmul.f32 0.2, %v14585_v44  ;;  %v23186_v58 = vpop.f32.mrb[82].mxu0 }
 0xdf2   :  { %v31571_v59 = vsel %vm14618_vm3, %v14586_v46, %v14650_v37  ;;  %v14588_v52 = vadd.f32 %v23186_v58, %v31379_v54  ;;  %v14495_v25 = vpop.f32.mrb[83].mxu0  ;;  %v31575_v4 = vsel %vm154_vm2, %v14750_v11, %v14752_v32  ;;  %v31578_v55 = vsel %vm154_vm2, %v14752_v32, %v14754_v43 }
 0xdf3   :  { %v31580_v23 = vsel %vm14617_vm4, %v14585_v44, %v14649_v13  ;;  %v14587_v0 = vadd.f32 %v31379_v54, %v14495_v25  ;;  %23220 = vmatmul.mubr.msk.f32.gmra.mrb[104].mxu0 %vm271_vm0, %v31575_v4  ;;  %v14758_v49 = vrot.slane %v31571_v59, 1 }
 0xdf4   :  { %vm14620_vm6 = vcmp.ge.f32.partialorder %v14588_v52, 0.0  ;;  %v14652_v24 = vmul.f32 0.2, %v14588_v52  ;;  %23222 = vmatprep.mubr.msk.f32.mxu0 %vm271_vm0, %v31578_v55  ;;  %v14756_v11 = vrot.slane %v31580_v23, 1 }
 0xdf5   :  { %vm14619_vm7 = vcmp.ge.f32.partialorder %v14587_v0, 0.0  ;;  %v14651_v46 = vmul.f32 0.2, %v14587_v0  ;;  %v23189_v15 = vpop.f32.mrb[84].mxu0 }
 0xdf6   :  { %v31589_v37 = vsel %vm14620_vm6, %v14588_v52, %v14652_v24  ;;  %v31592_v44 = vadd.f32 %v23189_v15, %v31379_v54  ;;  %v14505_v32 = vpop.f32.mrb[85].mxu0  ;;  %v31595_v13 = vsel %vm154_vm2, %v14754_v43, %v14756_v11  ;;  %v31598_v58 = vsel %vm154_vm2, %v14756_v11, %v14758_v49 }
 0xdf7   :  { %v31600_v25 = vsel %vm14619_vm7, %v14587_v0, %v14651_v46  ;;  %v14589_v60 = vadd.f32 %v31379_v54, %v14505_v32  ;;  %23223 = vmatmul.mubr.msk.f32.gmra.mrb[106].mxu0 %vm271_vm0, %v31595_v13  ;;  %v14762_v52 = vrot.slane %v31589_v37, 1 }
 0xdf8   :  { %23225 = vmatprep.mubr.msk.f32.mxu0 %vm271_vm0, %v31598_v58  ;;  %v14760_v24 = vrot.slane %v31600_v25, 1  ;;  %vm14622_vm10 = vcmp.ge.f32.partialorder %v31592_v44, 0.0 }
 0xdf9   :  { %vm14621_vm8 = vcmp.ge.f32.partialorder %v14589_v60, 0.0  ;;  %v14653_v43 = vmul.f32 0.2, %v14589_v60  ;;  %v23192_v15 = vpop.f32.mrb[86].mxu0 }
 0xdfa   :  { %v31610_v11 = vadd.f32 %v23192_v15, %v31379_v54  ;;  %v14515_v0 = vpop.f32.mrb[87].mxu0  ;;  %v31613_v46 = vsel %vm154_vm2, %v14758_v49, %v14760_v24  ;;  %v31616_v32 = vsel %vm154_vm2, %v14760_v24, %v14762_v52  ;;  %v31698_v24 = vld [vmem:[%s32405_s6 + $0x20] sm:$0xff] }
 0xdfb   :  { %v31618_v10 = vsel %vm14621_vm8, %v14589_v60, %v14653_v43  ;;  %v31621_v22 = vadd.f32 %v31379_v54, %v14515_v0  ;;  %23226 = vmatmul.mubr.msk.f32.gmra.mrb[108].mxu0 %vm271_vm0, %v31613_v46  ;;  %v18722_v54 = vld [vmem:[%s32405_s6 + $0x18] sm:$0xff]  ;;  %v33775_v60 = vrot.slane %v31383_v7, 2  ;;  %v15243_v0 = vrot.slane %v31408_v26, 2 }
 0xdfc   :  { %33774 = vst [vmem:[#allocation34_spill] sm:$0xff] %v31610_v11  ;;  %23228 = vmatprep.mubr.msk.f32.mxu0 %vm271_vm0, %v31616_v32  ;;  %v32945_v15 = vrot.slane %v31618_v10, 1  ;;  %v32954_v11 = vrot.slane %v31494_v50, 2 }
 0xdfd   :  { %vm14623_vm12 = vcmp.ge.f32.partialorder %v31621_v22, 0.0 }
 0xdfe   :  { %v31631_v49 = vsel %vm154_vm2, %v14762_v52, %v32945_v15  ;;  %v15241_v52 = vrot.slane %v31420_v57, 2  ;;  %v15251_v15 = vrot.slane %v31447_v40, 2 }
 0xdff   :  { %23229 = vmatmul.mubr.msk.f32.gmra.mrb[110].mxu0 %vm271_vm0, %v31631_v49 }
 0xe00   :  { %23233 = vmatprep.mubr.msk.f32.mxu0 %vm271_vm0, %v31388_v21  ;;  %v15237_v21 = vrot.slane %v31402_v31, 2 }
 0xe03   :  { %23234 = vmatmul.mubr.msk.f32.vlgmr.msra.gmra.mrb[88].mxu0 %vm271_vm0, %v31383_v7 }
 0xe04   :  { %23236 = vmatprep.mubr.msk.f32.mxu0 %vm271_vm0, %v31402_v31  ;;  %23270 = vmatpush3.msra.mxu0 %v31418_v6  ;;  %v15239_v6 = vrot.slane %v31393_v35, 2 }
 0xe05   :  { %23307 = vmatprep.subr.mxu0 %v18722_v54 }
 0xe06   :  { %v31702_v43 = vsel %vm1186_vm1, %v15237_v21, %v15239_v6  ;;  %v31709_v7 = vsel %vm1186_vm1, %v15239_v6, %v15241_v52 }
 0xe07   :  { %23237 = vmatmul.mubr.msk.f32.gmra.mrb[90].mxu0 %vm271_vm0, %v31393_v35 }
 0xe08   :  { %23239 = vmatprep.mubr.msk.f32.mxu0 %vm271_vm0, %v31420_v57 }
 0xe0b   :  { %23240 = vmatmul.mubr.msk.f32.gmra.mrb[92].mxu0 %vm271_vm0, %v31408_v26 }
 0xe0c   :  { %23242 = vmatprep.mubr.msk.f32.mxu0 %vm271_vm0, %v31438_v5 }
 0xe0f   :  { %23243 = vmatmul.mubr.msk.f32.gmra.mrb[94].mxu0 %vm271_vm0, %v31429_v48 }
 0xe10   :  { %23245 = vmatprep.mubr.msk.f32.mxu0 %vm271_vm0, %v31456_v41 }
 0xe13   :  { %23246 = vmatmul.mubr.msk.f32.gmra.mrb[96].mxu0 %vm271_vm0, %v31447_v40 }
 0xe14   :  { %23248 = vmatprep.mubr.msk.f32.mxu0 %vm271_vm0, %v31476_v34 }
 0xe17   :  { %23249 = vmatmul.mubr.msk.f32.gmra.mrb[98].mxu0 %vm271_vm0, %v31465_v14 }
 0xe18   :  { %23251 = vmatprep.mubr.msk.f32.mxu0 %vm271_vm0, %v31518_v12  ;;  %v15238_v12 = vsel %vm1186_vm1, %v33775_v60, %v15237_v21  ;;  %v31715_v60 = vsel %vm1186_vm1, %v15241_v52, %v15243_v0  ;;  %v15247_v21 = vrot.slane %v31429_v48, 2 }
 0xe1b   :  { %23252 = vmatmul.mubr.msk.f32.gmra.mrb[100].mxu0 %vm271_vm0, %v31513_v19 }
 0xe1c   :  { %23254 = vmatprep.mubr.msk.f32.mxu0 %vm271_vm0, %v31532_v47 }
 0xe1f   :  { %23255 = vmatmul.mubr.msk.f32.gmra.mrb[102].mxu0 %vm271_vm0, %v31523_v39 }
 0xe20   :  { %23257 = vmatprep.mubr.msk.f32.mxu0 %vm271_vm0, %v31545_v56 }
 0xe23   :  { %23258 = vmatmul.mubr.msk.f32.gmra.mrb[104].mxu0 %vm271_vm0, %v31538_v62 }
 0xe24   :  { %23260 = vmatprep.mubr.msk.f32.mxu0 %vm271_vm0, %v31562_v18 }
 0xe27   :  { %23261 = vmatmul.mubr.msk.f32.gmra.mrb[106].mxu0 %vm271_vm0, %v31553_v42 }
 0xe28   :  { %23263 = vmatprep.mubr.msk.f32.mxu0 %vm271_vm0, %v31580_v23 }
 0xe2b   :  { %23264 = vmatmul.mubr.msk.f32.gmra.mrb[108].mxu0 %vm271_vm0, %v31571_v59 }
 0xe2c   :  { %23266 = vmatprep.mubr.msk.f32.mxu0 %vm271_vm0, %v31600_v25 }
 0xe2f   :  { %23267 = vmatmul.mubr.msk.f32.gmra.mrb[110].mxu0 %vm271_vm0, %v31589_v37 }
 0xe30   :  { %23271 = vmatprep.mubr.msk.f32.mxu0 %vm271_vm0, %v31400_v29  ;;  %v15245_v29 = vrot.slane %v31438_v5, 2 }
 0xe32   :  { %v31727_v6 = vsel %vm1186_vm1, %v15245_v29, %v15247_v21 }
 0xe33   :  { %23272 = vmatmul.mubr.msk.f32.vlgmr.msra.gmra.mrb[88].mxu0 %vm271_vm0, %v15238_v12  ;;  %v15249_v12 = vrot.slane %v31456_v41, 2 }
 0xe34   :  { %23274 = vmatprep.mubr.msk.f32.mxu0 %vm271_vm0, %v31702_v43  ;;  %23308 = vmatpush3.msra.mxu0 %v18722_v54  ;;  %v31721_v54 = vsel %vm1186_vm1, %v15243_v0, %v15245_v29  ;;  %v31745_v29 = vsel %vm1186_vm1, %v15251_v15, %v15253_v9 }
 0xe35   :  { %23345 = vmatprep.subr.mxu0 %v31698_v24  ;;  %v31733_v52 = vsel %vm1186_vm1, %v15247_v21, %v15249_v12  ;;  %v31739_v0 = vsel %vm1186_vm1, %v15249_v12, %v15251_v15  ;;  %33776 = vst [vmem:[#allocation82_spill] sm:$0xff] %v31745_v29  ;;  %v31751_v21 = vsel %vm1186_vm1, %v15253_v9, %v15255_v3  ;;  %v15264_v15 = vrot.slane %v31523_v39, 2 }
 0xe36   :  { %33777 = vst [vmem:[#allocation84_spill] sm:$0xff] %v31751_v21  ;;  %v31758_v12 = vsel %vm1186_vm1, %v15255_v3, %v32954_v11  ;;  %v33779_v9 = vrot.slane %v31513_v19, 2  ;;  %v15268_v11 = vrot.slane %v31538_v62, 2 }
 0xe37   :  { %23275 = vmatmul.mubr.msk.f32.gmra.mrb[90].mxu0 %vm271_vm0, %v31709_v7  ;;  %33778 = vst [vmem:[#allocation31_spill] sm:$0xff] %v31758_v12  ;;  %v31772_v3 = vsel %vm1186_vm1, %v15262_v30, %v15264_v15 }
 0xe38   :  { %23277 = vmatprep.mubr.msk.f32.mxu0 %vm271_vm0, %v31715_v60 }
 0xe3b   :  { %23278 = vmatmul.mubr.msk.f32.gmra.mrb[92].mxu0 %vm271_vm0, %v31721_v54 }
 0xe3c   :  { %23280 = vmatprep.mubr.msk.f32.mxu0 %vm271_vm0, %v31727_v6 }
 0xe3f   :  { %23281 = vmatmul.mubr.msk.f32.gmra.mrb[94].mxu0 %vm271_vm0, %v31733_v52 }
 0xe40   :  { %23283 = vmatprep.mubr.msk.f32.mxu0 %vm271_vm0, %v31739_v0 }
 0xe43   :  { %23284 = vmatmul.mubr.msk.f32.gmra.mrb[96].mxu0 %vm271_vm0, %v31745_v29  ;;  %v15263_v29 = vsel %vm1186_vm1, %v33779_v9, %v15262_v30  ;;  %v15274_v9 = vrot.slane %v31580_v23, 2 }
 0xe44   :  { %23286 = vmatprep.mubr.msk.f32.mxu0 %vm271_vm0, %v31751_v21  ;;  %v15266_v21 = vrot.slane %v31545_v56, 2 }
 0xe46   :  { %v31784_v19 = vsel %vm1186_vm1, %v15266_v21, %v15268_v11 }
 0xe47   :  { %23287 = vmatmul.mubr.msk.f32.gmra.mrb[98].mxu0 %vm271_vm0, %v31758_v12  ;;  %v31778_v12 = vsel %vm1186_vm1, %v15264_v15, %v15266_v21  ;;  %33781 = vst [vmem:[#allocation67_spill] sm:$0xff] %v31784_v19 }
 0xe48   :  { %23289 = vmatprep.mubr.msk.f32.mxu0 %vm271_vm0, %v31530_v45  ;;  %33780 = vst [vmem:[#allocation40_spill] sm:$0xff] %v31778_v12  ;;  %v15270_v45 = vrot.slane %v31562_v18, 2 }
 0xe4a   :  { %v31790_v30 = vsel %vm1186_vm1, %v15268_v11, %v15270_v45 }
 0xe4b   :  { %23290 = vmatmul.mubr.msk.f32.gmra.mrb[100].mxu0 %vm271_vm0, %v15263_v29  ;;  %v15272_v29 = vrot.slane %v31553_v42, 2  ;;  %33782 = vst [vmem:[#allocation68_spill] sm:$0xff] %v31790_v30 }
 0xe4c   :  { %23292 = vmatprep.mubr.msk.f32.mxu0 %vm271_vm0, %v31772_v3 }
 0xe4d   :  { %v31796_v15 = vsel %vm1186_vm1, %v15270_v45, %v15272_v29  ;;  %v31802_v21 = vsel %vm1186_vm1, %v15272_v29, %v15274_v9 }
 0xe4e   :  { %33783 = vst [vmem:[#allocation45_spill] sm:$0xff] %v31796_v15 }
 0xe4f   :  { %23293 = vmatmul.mubr.msk.f32.gmra.mrb[102].mxu0 %vm271_vm0, %v31778_v12  ;;  %v15276_v12 = vrot.slane %v31571_v59, 2 }
 0xe50   :  { %23295 = vmatprep.mubr.msk.f32.mxu0 %vm271_vm0, %v31784_v19  ;;  %v15278_v19 = vrot.slane %v31600_v25, 2 }
 0xe51   :  { %v31808_v11 = vsel %vm1186_vm1, %v15274_v9, %v15276_v12 }
 0xe52   :  { %v31814_v45 = vsel %vm1186_vm1, %v15276_v12, %v15278_v19  ;;  %v18772_v12 = vld [vmem:[%s32405_s6 + $0x28] sm:$0xff] }
 0xe53   :  { %23296 = vmatmul.mubr.msk.f32.gmra.mrb[104].mxu0 %vm271_vm0, %v31790_v30  ;;  %v15280_v30 = vrot.slane %v31589_v37, 2  ;;  %33784 = vst [vmem:[#allocation42_spill] sm:$0xff] %v31814_v45 }
 0xe54   :  { %23298 = vmatprep.mubr.msk.f32.mxu0 %vm271_vm0, %v31796_v15  ;;  %v32966_v15 = vrot.slane %v31618_v10, 2 }
 0xe55   :  { %v31820_v29 = vsel %vm1186_vm1, %v15278_v19, %v15280_v30  ;;  %v33786_v19 = vrot.slane %v31494_v50, 1 }
 0xe56   :  { %v31827_v9 = vsel %vm1186_vm1, %v15280_v30, %v32966_v15  ;;  %v33794_v15 = vld [vmem:[#allocation67_spill] sm:$0xff] }
 0xe57   :  { %23299 = vmatmul.mubr.msk.f32.gmra.mrb[106].mxu0 %vm271_vm0, %v31802_v21  ;;  %33785 = vst [vmem:[#allocation69_spill] sm:$0xff] %v31827_v9 }
 0xe58   :  { %23301 = vmatprep.mubr.msk.f32.mxu0 %vm271_vm0, %v31808_v11 }
 0xe5b   :  { %23302 = vmatmul.mubr.msk.f32.gmra.mrb[108].mxu0 %vm271_vm0, %v31814_v45 }
 0xe5c   :  { %23304 = vmatprep.mubr.msk.f32.mxu0 %vm271_vm0, %v31820_v29 }
 0xe5f   :  { %23305 = vmatmul.mubr.msk.f32.gmra.mrb[110].mxu0 %vm271_vm0, %v31827_v9 }
 0xe60   :  { %23309 = vmatprep.mubr.msk.f32.mxu0 %vm271_vm0, %v31402_v31 }
 0xe63   :  { %23310 = vmatmul.mubr.msk.f32.vlgmr.msra.gmra.mrb[88].mxu0 %vm271_vm0, %v31393_v35  ;;  %v14638_v35 = vmul.f32 0.2, %v31468_v28 }
 0xe64   :  { %23312 = vmatprep.mubr.msk.f32.mxu0 %vm271_vm0, %v31420_v57  ;;  %23346 = vmatpush3.msra.mxu0 %v31698_v24 }
 0xe65   :  { %23383 = vmatprep.subr.mxu0 %v18772_v12  ;;  %v31860_v31 = vsel %vm14606_vm9, %v31468_v28, %v14638_v35  ;;  %v14654_v28 = vmul.f32 0.2, %v31592_v44 }
 0xe67   :  { %23313 = vmatmul.mubr.msk.f32.gmra.mrb[90].mxu0 %vm271_vm0, %v31408_v26 }
 0xe68   :  { %23315 = vmatprep.mubr.msk.f32.mxu0 %vm271_vm0, %v31438_v5 }
 0xe6b   :  { %23316 = vmatmul.mubr.msk.f32.gmra.mrb[92].mxu0 %vm271_vm0, %v31429_v48 }
 0xe6c   :  { %23318 = vmatprep.mubr.msk.f32.mxu0 %vm271_vm0, %v31456_v41 }
 0xe6f   :  { %23319 = vmatmul.mubr.msk.f32.gmra.mrb[94].mxu0 %vm271_vm0, %v31447_v40 }
 0xe70   :  { %23321 = vmatprep.mubr.msk.f32.mxu0 %vm271_vm0, %v31476_v34 }
 0xe73   :  { %23322 = vmatmul.mubr.msk.f32.gmra.mrb[96].mxu0 %vm271_vm0, %v31465_v14 }
 0xe74   :  { %23324 = vmatprep.mubr.msk.f32.mxu0 %vm271_vm0, %v31494_v50 }
 0xe77   :  { %23325 = vmatmul.mubr.msk.f32.gmra.mrb[98].mxu0 %vm271_vm0, %v31860_v31 }
 0xe78   :  { %23327 = vmatprep.mubr.msk.f32.mxu0 %vm271_vm0, %v31532_v47  ;;  %v18797_v47 = vld [vmem:[%s32405_s6 + $0x30] sm:$0xff] }
 0xe7b   :  { %23328 = vmatmul.mubr.msk.f32.gmra.mrb[100].mxu0 %vm271_vm0, %v31523_v39  ;;  %v31889_v39 = vsel %vm14622_vm10, %v31592_v44, %v14654_v28  ;;  %v15766_v44 = vrot.slane %v31860_v31, 1  ;;  %v33787_v28 = vrot.slane %v31618_v10, 1 }
 0xe7c   :  { %23330 = vmatprep.mubr.msk.f32.mxu0 %vm271_vm0, %v31545_v56 }
 0xe7d   :  { %v31926_v30 = vsel %vm154_vm2, %v33786_v19, %v15766_v44  ;;  %v33789_v19 = vld [vmem:[#allocation84_spill] sm:$0xff] }
 0xe7f   :  { %23331 = vmatmul.mubr.msk.f32.gmra.mrb[102].mxu0 %vm271_vm0, %v31538_v62 }
 0xe80   :  { %23333 = vmatprep.mubr.msk.f32.mxu0 %vm271_vm0, %v31562_v18 }
 0xe83   :  { %23334 = vmatmul.mubr.msk.f32.gmra.mrb[104].mxu0 %vm271_vm0, %v31553_v42 }
 0xe84   :  { %23336 = vmatprep.mubr.msk.f32.mxu0 %vm271_vm0, %v31580_v23 }
 0xe87   :  { %23337 = vmatmul.mubr.msk.f32.gmra.mrb[106].mxu0 %vm271_vm0, %v31571_v59 }
 0xe88   :  { %23339 = vmatprep.mubr.msk.f32.mxu0 %vm271_vm0, %v31600_v25 }
 0xe8b   :  { %23340 = vmatmul.mubr.msk.f32.gmra.mrb[108].mxu0 %vm271_vm0, %v31589_v37 }
 0xe8c   :  { %23342 = vmatprep.mubr.msk.f32.mxu0 %vm271_vm0, %v31618_v10 }
 0xe8f   :  { %23343 = vmatmul.mubr.msk.f32.gmra.mrb[110].mxu0 %vm271_vm0, %v31889_v39 }
 0xe90   :  { %23347 = vmatprep.mubr.msk.f32.mxu0 %vm271_vm0, %v31413_v20  ;;  %v14639_v20 = vmul.f32 0.2, %v31497_v8 }
 0xe93   :  { %23348 = vmatmul.mubr.msk.f32.vlgmr.msra.gmra.mrb[88].mxu0 %vm271_vm0, %v31433_v38  ;;  %v31913_v38 = vsel %vm14607_vm11, %v31497_v8, %v14639_v20 }
 0xe94   :  { %23350 = vmatprep.mubr.msk.f32.mxu0 %vm271_vm0, %v31436_v63  ;;  %23384 = vmatpush3.msra.mxu0 %v18772_v12  ;;  %v32965_v24 = vrot.slane %v31913_v38, 1  ;;  %v14655_v12 = vmul.f32 0.2, %v31621_v22 }
 0xe95   :  { %23421 = vmatprep.subr.mxu0 %v18797_v47 }
 0xe96   :  { %v31933_v8 = vsel %vm154_vm2, %v15766_v44, %v32965_v24  ;;  %v18822_v44 = vld [vmem:[%s32405_s6 + $0x38] sm:$0xff]  ;;  %v33793_v24 = vld [vmem:[#allocation40_spill] sm:$0xff] }
 0xe97   :  { %23351 = vmatmul.mubr.msk.f32.gmra.mrb[90].mxu0 %vm271_vm0, %v31451_v1 }
 0xe98   :  { %23353 = vmatprep.mubr.msk.f32.mxu0 %vm271_vm0, %v31454_v16 }
 0xe9b   :  { %23354 = vmatmul.mubr.msk.f32.gmra.mrb[92].mxu0 %vm271_vm0, %v31471_v53 }
 0xe9c   :  { %23356 = vmatprep.mubr.msk.f32.mxu0 %vm271_vm0, %v31474_v51 }
 0xe9f   :  { %23357 = vmatmul.mubr.msk.f32.gmra.mrb[94].mxu0 %vm271_vm0, %v31489_v36 }
 0xea0   :  { %23359 = vmatprep.mubr.msk.f32.mxu0 %vm271_vm0, %v31492_v17 }
 0xea3   :  { %23360 = vmatmul.mubr.msk.f32.gmra.mrb[96].mxu0 %vm271_vm0, %v31508_v33 }
 0xea4   :  { %23362 = vmatprep.mubr.msk.f32.mxu0 %vm271_vm0, %v31926_v30 }
 0xea7   :  { %23363 = vmatmul.mubr.msk.f32.gmra.mrb[98].mxu0 %vm271_vm0, %v31933_v8 }
 0xea8   :  { %23365 = vmatprep.mubr.msk.f32.mxu0 %vm271_vm0, %v31543_v27  ;;  %v31954_v27 = vsel %vm14623_vm12, %v31621_v22, %v14655_v12  ;;  %v33790_v12 = vld [vmem:[#allocation31_spill] sm:$0xff] }
 0xea9   :  { %v32964_v35 = vrot.slane %v31954_v27, 1 }
 0xeab   :  { %23366 = vmatmul.mubr.msk.f32.gmra.mrb[100].mxu0 %vm271_vm0, %v31557_v2  ;;  %v15770_v2 = vrot.slane %v31889_v39, 1 }
 0xeac   :  { %23368 = vmatprep.mubr.msk.f32.mxu0 %vm271_vm0, %v31560_v61 }
 0xead   :  { %v31967_v20 = vsel %vm154_vm2, %v33787_v28, %v15770_v2  ;;  %v31974_v22 = vsel %vm154_vm2, %v15770_v2, %v32964_v35  ;;  %v33791_v2 = vrot.slane %v31494_v50, 2 }
 0xeaf   :  { %23369 = vmatmul.mubr.msk.f32.gmra.mrb[102].mxu0 %vm271_vm0, %v31575_v4 }
 0xeb0   :  { %23371 = vmatprep.mubr.msk.f32.mxu0 %vm271_vm0, %v31578_v55 }
 0xeb3   :  { %23372 = vmatmul.mubr.msk.f32.gmra.mrb[104].mxu0 %vm271_vm0, %v31595_v13 }
 0xeb4   :  { %23374 = vmatprep.mubr.msk.f32.mxu0 %vm271_vm0, %v31598_v58 }
 0xeb7   :  { %23375 = vmatmul.mubr.msk.f32.gmra.mrb[106].mxu0 %vm271_vm0, %v31613_v46 }
 0xeb8   :  { %23377 = vmatprep.mubr.msk.f32.mxu0 %vm271_vm0, %v31616_v32 }
 0xebb   :  { %23378 = vmatmul.mubr.msk.f32.gmra.mrb[108].mxu0 %vm271_vm0, %v31631_v49 }
 0xebc   :  { %23380 = vmatprep.mubr.msk.f32.mxu0 %vm271_vm0, %v31967_v20 }
 0xebf   :  { %23381 = vmatmul.mubr.msk.f32.gmra.mrb[110].mxu0 %vm271_vm0, %v31974_v22 }
 0xec0   :  { %23385 = vmatprep.mubr.msk.f32.mxu0 %vm271_vm0, %v31702_v43  ;;  %v15993_v43 = vrot.slane %v31860_v31, 2 }
 0xec2   :  { %v32006_v28 = vsel %vm1186_vm1, %v33791_v2, %v15993_v43  ;;  %v33795_v2 = vld [vmem:[#allocation68_spill] sm:$0xff] }
 0xec3   :  { %23386 = vmatmul.mubr.msk.f32.vlgmr.msra.gmra.mrb[88].mxu0 %vm271_vm0, %v31709_v7  ;;  %v33788_v7 = vld [vmem:[#allocation82_spill] sm:$0xff]  ;;  %33792 = vst [vmem:[#allocation75_spill] sm:$0xff] %v32006_v28 }
 0xec4   :  { %23388 = vmatprep.mubr.msk.f32.mxu0 %vm271_vm0, %v31715_v60  ;;  %23422 = vmatpush3.msra.mxu0 %v18797_v47  ;;  %v32968_v47 = vrot.slane %v31913_v38, 2 }
 0xec5   :  { %23459 = vmatprep.subr.mxu0 %v18822_v44 }
 0xec6   :  { %v32013_v35 = vsel %vm1186_vm1, %v15993_v43, %v32968_v47  ;;  %v33797_v43 = vrot.slane %v31618_v10, 2 }
 0xec7   :  { %23389 = vmatmul.mubr.msk.f32.gmra.mrb[90].mxu0 %vm271_vm0, %v31721_v54 }
 0xec8   :  { %23391 = vmatprep.mubr.msk.f32.mxu0 %vm271_vm0, %v31727_v6 }
 0xecb   :  { %23392 = vmatmul.mubr.msk.f32.gmra.mrb[92].mxu0 %vm271_vm0, %v31733_v52 }
 0xecc   :  { %23394 = vmatprep.mubr.msk.f32.mxu0 %vm271_vm0, %v31739_v0 }
 0xecf   :  { %23395 = vmatmul.mubr.msk.f32.gmra.mrb[94].mxu0 %vm271_vm0, %v33788_v7 }
 0xed0   :  { %23397 = vmatprep.mubr.msk.f32.mxu0 %vm271_vm0, %v33789_v19 }
 0xed3   :  { %23398 = vmatmul.mubr.msk.f32.gmra.mrb[96].mxu0 %vm271_vm0, %v33790_v12 }
 0xed4   :  { %23400 = vmatprep.mubr.msk.f32.mxu0 %vm271_vm0, %v32006_v28  ;;  %v33796_v28 = vld [vmem:[#allocation45_spill] sm:$0xff] }
 0xed7   :  { %23401 = vmatmul.mubr.msk.f32.gmra.mrb[98].mxu0 %vm271_vm0, %v32013_v35 }
 0xed8   :  { %23403 = vmatprep.mubr.msk.f32.mxu0 %vm271_vm0, %v31772_v3  ;;  %v15997_v3 = vrot.slane %v31889_v39, 2 }
 0xeda   :  { %v32042_v47 = vsel %vm1186_vm1, %v33797_v43, %v15997_v3 }
 0xedb   :  { %23404 = vmatmul.mubr.msk.f32.gmra.mrb[100].mxu0 %vm271_vm0, %v33793_v24  ;;  %v15999_v24 = vrot.slane %v31954_v27, 2 }
 0xedc   :  { %23406 = vmatprep.mubr.msk.f32.mxu0 %vm271_vm0, %v33794_v15 }
 0xedf   :  { %23407 = vmatmul.mubr.msk.f32.gmra.mrb[102].mxu0 %vm271_vm0, %v33795_v2 }
 0xee0   :  { %23409 = vmatprep.mubr.msk.f32.mxu0 %vm271_vm0, %v33796_v28 }
 0xee3   :  { %23410 = vmatmul.mubr.msk.f32.gmra.mrb[104].mxu0 %vm271_vm0, %v31802_v21 }
 0xee4   :  { %23412 = vmatprep.mubr.msk.f32.mxu0 %vm271_vm0, %v31808_v11 }
 0xee7   :  { %23413 = vmatmul.mubr.msk.f32.gmra.mrb[106].mxu0 %vm271_vm0, %v31814_v45  ;;  %v32049_v45 = vsel %vm1186_vm1, %v15997_v3, %v15999_v24 }
 0xee8   :  { %23415 = vmatprep.mubr.msk.f32.mxu0 %vm271_vm0, %v31820_v29 }
 0xeeb   :  { %23416 = vmatmul.mubr.msk.f32.gmra.mrb[108].mxu0 %vm271_vm0, %v31827_v9  ;;  %v18847_v9 = vld [vmem:[%s32405_s6 + $0x40] sm:$0xff] }
 0xeec   :  { %23418 = vmatprep.mubr.msk.f32.mxu0 %vm271_vm0, %v32042_v47 }
 0xeef   :  { %23419 = vmatmul.mubr.msk.f32.gmra.mrb[110].mxu0 %vm271_vm0, %v32049_v45 }
 0xef0   :  { %23423 = vmatprep.mubr.msk.f32.mxu0 %vm271_vm0, %v31420_v57 }
 0xef3   :  { %23424 = vmatmul.mubr.msk.f32.vlgmr.msra.gmra.mrb[88].mxu0 %vm271_vm0, %v31408_v26  ;;  %v33798_v26 = vld [vmem:[#allocation28_spill] sm:$0xff] }
 0xef4   :  { %23426 = vmatprep.mubr.msk.f32.mxu0 %vm271_vm0, %v31438_v5  ;;  %23460 = vmatpush3.msra.mxu0 %v18822_v44  ;;  %v14640_v57 = vmul.f32 0.2, %v33798_v26  ;;  %vm14608_vm13 = vcmp.ge.f32.partialorder %v33798_v26, 0.0  ;;  %v33799_v5 = vld [vmem:[#allocation34_spill] sm:$0xff] }
 0xef5   :  { %23497 = vmatprep.subr.mxu0 %v18847_v9  ;;  %vm14624_vm5 = vcmp.ge.f32.partialorder %v33799_v5, 0.0 }
 0xef7   :  { %23427 = vmatmul.mubr.msk.f32.gmra.mrb[90].mxu0 %vm271_vm0, %v31429_v48  ;;  %v32081_v48 = vsel %vm14608_vm13, %v33798_v26, %v14640_v57 }
 0xef8   :  { %23429 = vmatprep.mubr.msk.f32.mxu0 %vm271_vm0, %v31456_v41 }
 0xefb   :  { %23430 = vmatmul.mubr.msk.f32.gmra.mrb[92].mxu0 %vm271_vm0, %v31447_v40  ;;  %v14656_v40 = vmul.f32 0.2, %v33799_v5 }
 0xefc   :  { %23432 = vmatprep.mubr.msk.f32.mxu0 %vm271_vm0, %v31476_v34  ;;  %v33802_v34 = vrot.slane %v31954_v27, 1 }
 0xefd   :  { %v32110_v41 = vsel %vm14624_vm5, %v33799_v5, %v14656_v40 }
 0xeff   :  { %23433 = vmatmul.mubr.msk.f32.gmra.mrb[94].mxu0 %vm271_vm0, %v31465_v14  ;;  %v33801_v14 = vld [vmem:[#allocation9_spill] sm:$0xff] }
 0xf00   :  { %23435 = vmatprep.mubr.msk.f32.mxu0 %vm271_vm0, %v31494_v50  ;;  %v16666_v50 = vrot.slane %v32081_v48, 2 }
 0xf03   :  { %23436 = vmatmul.mubr.msk.f32.gmra.mrb[96].mxu0 %vm271_vm0, %v31860_v31 }
 0xf04   :  { %23438 = vmatprep.mubr.msk.f32.mxu0 %vm271_vm0, %v31913_v38 }
 0xf07   :  { %23439 = vmatmul.mubr.msk.f32.gmra.mrb[98].mxu0 %vm271_vm0, %v32081_v48 }
 0xf08   :  { %23441 = vmatprep.mubr.msk.f32.mxu0 %vm271_vm0, %v31545_v56  ;;  %v33805_v56 = vld [vmem:[#allocation12_spill] sm:$0xff] }
 0xf0b   :  { %23442 = vmatmul.mubr.msk.f32.gmra.mrb[100].mxu0 %vm271_vm0, %v31538_v62 }
 0xf0c   :  { %23444 = vmatprep.mubr.msk.f32.mxu0 %vm271_vm0, %v31562_v18  ;;  %v16669_v18 = vrot.slane %v32110_v41, 2 }
 0xf0f   :  { %23445 = vmatmul.mubr.msk.f32.gmra.mrb[102].mxu0 %vm271_vm0, %v31553_v42  ;;  %v16668_v42 = vsel %vm1186_vm1, %v16666_v50, %v33805_v56 }
 0xf10   :  { %23447 = vmatprep.mubr.msk.f32.mxu0 %vm271_vm0, %v31580_v23  ;;  %v32229_v23 = vld [vmem:[%s32402_s7 + $0x4] ss:$0 sm:$0xff] }
 0xf13   :  { %23448 = vmatmul.mubr.msk.f32.gmra.mrb[104].mxu0 %vm271_vm0, %v31571_v59  ;;  %v33807_v59 = vld [vmem:[#allocation69_spill] sm:$0xff] }
 0xf14   :  { %23450 = vmatprep.mubr.msk.f32.mxu0 %vm271_vm0, %v31600_v25 }
 0xf17   :  { %23451 = vmatmul.mubr.msk.f32.gmra.mrb[106].mxu0 %vm271_vm0, %v31589_v37 }
 0xf18   :  { %23453 = vmatprep.mubr.msk.f32.mxu0 %vm271_vm0, %v31618_v10  ;;  %v33804_v10 = vrot.slane %v31913_v38, 2 }
 0xf1a   :  { %v16667_v62 = vsel %vm1186_vm1, %v33804_v10, %v16666_v50  ;;  %v16953_v50 = vld [vmem:[%s32406_s1 + $0x48] sm:$0xff] }
 0xf1b   :  { %23454 = vmatmul.mubr.msk.f32.gmra.mrb[108].mxu0 %vm271_vm0, %v31889_v39 }
 0xf1c   :  { %23456 = vmatprep.mubr.msk.f32.mxu0 %vm271_vm0, %v31954_v27  ;;  %v16946_v27 = vld [vmem:[%s32406_s1 + $0x10] sm:$0xff] }
 0xf1f   :  { %23457 = vmatmul.mubr.msk.f32.gmra.mrb[110].mxu0 %vm271_vm0, %v32110_v41 }
 0xf20   :  { %23461 = vmatprep.mubr.msk.f32.mxu0 %vm271_vm0, %v31436_v63  ;;  %v16441_v63 = vrot.slane %v32081_v48, 1 }
 0xf23   :  { %23462 = vmatmul.mubr.msk.f32.vlgmr.msra.gmra.mrb[88].mxu0 %vm271_vm0, %v31451_v1  ;;  %v33800_v1 = vrot.slane %v31913_v38, 1 }
 0xf24   :  { %23464 = vmatprep.mubr.msk.f32.mxu0 %vm271_vm0, %v31454_v16  ;;  %23498 = vmatpush3.msra.mxu0 %v18847_v9 }
 0xf25   :  { %v16442_v16 = vsel %vm154_vm2, %v33800_v1, %v16441_v63 }
 0xf27   :  { %23465 = vmatmul.mubr.msk.f32.gmra.mrb[90].mxu0 %vm271_vm0, %v31471_v53  ;;  %v16443_v53 = vsel %vm154_vm2, %v16441_v63, %v33801_v14  ;;  %v16950_v63 = vld [vmem:[%s32406_s1 + $0x30] sm:$0xff] }
 0xf28   :  { %23467 = vmatprep.mubr.msk.f32.mxu0 %vm271_vm0, %v31474_v51  ;;  %v16444_v51 = vrot.slane %v32110_v41, 1  ;;  %v16951_v41 = vld [vmem:[%s32406_s1 + $0x38] sm:$0xff] }
 0xf2b   :  { %23468 = vmatmul.mubr.msk.f32.gmra.mrb[92].mxu0 %vm271_vm0, %v31489_v36  ;;  %v16445_v36 = vsel %vm154_vm2, %v33802_v34, %v16444_v51 }
 0xf2c   :  { %23470 = vmatprep.mubr.msk.f32.mxu0 %vm271_vm0, %v31492_v17  ;;  %v16446_v17 = vsel %vm154_vm2, %v16444_v51, %v33801_v14 }
 0xf2f   :  { %23471 = vmatmul.mubr.msk.f32.gmra.mrb[94].mxu0 %vm271_vm0, %v31508_v33  ;;  %v33803_v33 = vld [vmem:[#allocation75_spill] sm:$0xff] }
 0xf30   :  { %23473 = vmatprep.mubr.msk.f32.mxu0 %vm271_vm0, %v31926_v30 }
 0xf33   :  { %23474 = vmatmul.mubr.msk.f32.gmra.mrb[96].mxu0 %vm271_vm0, %v31933_v8  ;;  %v16947_v8 = vld [vmem:[%s32406_s1 + $0x18] sm:$0xff] }
 0xf34   :  { %23476 = vmatprep.mubr.msk.f32.mxu0 %vm271_vm0, %v16442_v16 }
 0xf37   :  { %23477 = vmatmul.mubr.msk.f32.gmra.mrb[98].mxu0 %vm271_vm0, %v16443_v53 }
 0xf38   :  { %23479 = vmatprep.mubr.msk.f32.mxu0 %vm271_vm0, %v31560_v61  ;;  %v33806_v61 = vld [vmem:[#allocation42_spill] sm:$0xff] }
 0xf3b   :  { %23480 = vmatmul.mubr.msk.f32.gmra.mrb[100].mxu0 %vm271_vm0, %v31575_v4  ;;  %v16670_v4 = vsel %vm1186_vm1, %v15999_v24, %v16669_v18 }
 0xf3c   :  { %23482 = vmatprep.mubr.msk.f32.mxu0 %vm271_vm0, %v31578_v55  ;;  %v16671_v55 = vsel %vm1186_vm1, %v16669_v18, %v33805_v56 }
 0xf3f   :  { %23483 = vmatmul.mubr.msk.f32.gmra.mrb[102].mxu0 %vm271_vm0, %v31595_v13 }
 0xf40   :  { %23485 = vmatprep.mubr.msk.f32.mxu0 %vm271_vm0, %v31598_v58 }
 0xf43   :  { %23486 = vmatmul.mubr.msk.f32.gmra.mrb[104].mxu0 %vm271_vm0, %v31613_v46 }
 0xf44   :  { %23488 = vmatprep.mubr.msk.f32.mxu0 %vm271_vm0, %v31616_v32 }
 0xf47   :  { %23489 = vmatmul.mubr.msk.f32.gmra.mrb[106].mxu0 %vm271_vm0, %v31631_v49 }
 0xf48   :  { %23491 = vmatprep.mubr.msk.f32.mxu0 %vm271_vm0, %v31967_v20 }
 0xf4b   :  { %23492 = vmatmul.mubr.msk.f32.gmra.mrb[108].mxu0 %vm271_vm0, %v31974_v22 }
 0xf4c   :  { %23494 = vmatprep.mubr.msk.f32.mxu0 %vm271_vm0, %v16445_v36 }
 0xf4f   :  { %23495 = vmatmul.mubr.msk.f32.gmra.mrb[110].mxu0 %vm271_vm0, %v16446_v17 }
 0xf50   :  { %23499 = vmatprep.mubr.msk.f32.mxu0 %vm271_vm0, %v31715_v60 }
 0xf53   :  { %23500 = vmatmul.mubr.msk.f32.vlgmr.msra.gmra.mrb[88].mxu0 %vm271_vm0, %v31721_v54 }
 0xf54   :  { %23502 = vmatprep.mubr.msk.f32.mxu0 %vm271_vm0, %v31727_v6 }
 0xf57   :  { %23503 = vmatmul.mubr.msk.f32.gmra.mrb[90].mxu0 %vm271_vm0, %v31733_v52 }
 0xf58   :  { %23505 = vmatprep.mubr.msk.f32.mxu0 %vm271_vm0, %v31739_v0 }
 0xf5b   :  { %23506 = vmatmul.mubr.msk.f32.gmra.mrb[92].mxu0 %vm271_vm0, %v33788_v7 }
 0xf5c   :  { %23508 = vmatprep.mubr.msk.f32.mxu0 %vm271_vm0, %v33789_v19 }
 0xf5f   :  { %23509 = vmatmul.mubr.msk.f32.gmra.mrb[94].mxu0 %vm271_vm0, %v33790_v12 }
 0xf60   :  { %23511 = vmatprep.mubr.msk.f32.mxu0 %vm271_vm0, %v33803_v33  ;;  %v16952_v33 = vld [vmem:[%s32406_s1 + $0x40] sm:$0xff] }
 0xf63   :  { %23512 = vmatmul.mubr.msk.f32.gmra.mrb[96].mxu0 %vm271_vm0, %v32013_v35 }
 0xf64   :  { %23514 = vmatprep.mubr.msk.f32.mxu0 %vm271_vm0, %v16667_v62 }
 0xf67   :  { %23515 = vmatmul.mubr.msk.f32.gmra.mrb[98].mxu0 %vm271_vm0, %v16668_v42 }
 0xf68   :  { %23517 = vmatprep.mubr.msk.f32.mxu0 %vm271_vm0, %v33794_v15  ;;  %v16945_v15 = vld [vmem:[%s32406_s1 + $0x8] sm:$0xff] }
 0xf6b   :  { %23518 = vmatmul.mubr.msk.f32.gmra.mrb[100].mxu0 %vm271_vm0, %v33795_v2  ;;  %v16948_v2 = vld [vmem:[%s32406_s1 + $0x20] sm:$0xff] }
 0xf6c   :  { %23520 = vmatprep.mubr.msk.f32.mxu0 %vm271_vm0, %v33796_v28  ;;  %v16949_v28 = vld [vmem:[%s32406_s1 + $0x28] sm:$0xff] }
 0xf6f   :  { %23521 = vmatmul.mubr.msk.f32.gmra.mrb[102].mxu0 %vm271_vm0, %v31802_v21  ;;  %v16944_v21 = vld [vmem:[%s32406_s1] sm:$0xff] }
 0xf70   :  { %23523 = vmatprep.mubr.msk.f32.mxu0 %vm271_vm0, %v31808_v11 }
 0xf73   :  { %23524 = vmatmul.mubr.msk.f32.gmra.mrb[104].mxu0 %vm271_vm0, %v33806_v61 }
 0xf74   :  { %23526 = vmatprep.mubr.msk.f32.mxu0 %vm271_vm0, %v31820_v29 }
 0xf77   :  { %23527 = vmatmul.mubr.msk.f32.gmra.mrb[106].mxu0 %vm271_vm0, %v33807_v59 }
 0xf78   :  { %23529 = vmatprep.mubr.msk.f32.mxu0 %vm271_vm0, %v32042_v47 }
 0xf7b   :  { %23530 = vmatmul.mubr.msk.f32.gmra.mrb[108].mxu0 %vm271_vm0, %v32049_v45 }
 0xf7c   :  { %23532 = vmatprep.mubr.msk.f32.mxu0 %vm271_vm0, %v16670_v4 }
 0xf7f   :  { %23533 = vmatmul.mubr.msk.f32.gmra.mrb[110].mxu0 %vm271_vm0, %v16671_v55  ;;  %v16955_v55 = vld [vmem:[%s32406_s1 + $0x58] sm:$0xff] }
0x1026   :  { %v23501_v37 = vpop.f32.mrb[88].mxu0 }
0x1027   :  { %v16897_v13 = vadd.f32 %v23501_v37, %v32229_v23  ;;  %v16748_v58 = vpop.f32.mrb[89].mxu0  ;;  %v16954_v37 = vld [vmem:[%s32406_s1 + $0x50] sm:$0xff] }
0x1028   :  { %v16896_v25 = vadd.f32 %v32229_v23, %v16748_v58 }
0x1029   :  { %25174 = vtanh.f32 %v16897_v13 }
0x102a   :  { %25176 = vtanh.f32 %v16896_v25  ;;  %v23504_v46 = vpop.f32.mrb[90].mxu0 }
0x102b   :  { %v16899_v32 = vadd.f32 %v23504_v46, %v32229_v23  ;;  %v16758_v49 = vpop.f32.mrb[91].mxu0 }
0x102c   :  { %v16898_v60 = vadd.f32 %v32229_v23, %v16758_v49 }
0x102d   :  { %25178 = vtanh.f32 %v16899_v32 }
0x102e   :  { %25180 = vtanh.f32 %v16898_v60  ;;  %v23507_v54 = vpop.f32.mrb[92].mxu0 }
0x102f   :  { %v16901_v6 = vadd.f32 %v23507_v54, %v32229_v23  ;;  %v16768_v52 = vpop.f32.mrb[93].mxu0 }
0x1030   :  { %v16900_v0 = vadd.f32 %v32229_v23, %v16768_v52  ;;  %v16956_v52 = vld [vmem:[%s32406_s1 + $0x60] sm:$0xff] }
0x1031   :  { %25182 = vtanh.f32 %v16901_v6  ;;  %v16957_v6 = vld [vmem:[%s32406_s1 + $0x68] sm:$0xff] }
0x1032   :  { %25184 = vtanh.f32 %v16900_v0  ;;  %v23510_v11 = vpop.f32.mrb[94].mxu0 }
0x1033   :  { %v25175_v45 = vpop.eup %25174  ;;  %v16903_v29 = vadd.f32 %v23510_v11, %v32229_v23  ;;  %v16778_v9 = vpop.f32.mrb[95].mxu0 }
0x1034   :  { %v25177_v31 = vpop.eup %25176  ;;  %v16969_v39 = vadd.f32 %v25175_v45, %v16945_v15  ;;  %v16902_v38 = vadd.f32 %v32229_v23, %v16778_v9 }
0x1035   :  { %v16968_v30 = vadd.f32 %v25177_v31, %v16944_v21  ;;  %25186 = vtanh.f32 %v16903_v29 }
0x1036   :  { %16993 = vst [vmem:[%s32407_s8 + $0x8] sm:$0xff] %v16969_v39  ;;  %25188 = vtanh.f32 %v16902_v38  ;;  %v23513_v35 = vpop.f32.mrb[96].mxu0  ;;  %v16959_v39 = vld [vmem:[%s32406_s1 + $0x78] sm:$0xff]  ;;  %v16958_v38 = vld [vmem:[%s32406_s1 + $0x70] sm:$0xff] }
0x1037   :  { %v25179_v20 = vpop.eup %25178  ;;  %16992 = vst [vmem:[%s32407_s8] sm:$0xff] %v16968_v30  ;;  %v16905_v22 = vadd.f32 %v23513_v35, %v32229_v23  ;;  %v16788_v44 = vpop.f32.mrb[97].mxu0 }
0x1038   :  { %v25181_v7 = vpop.eup %25180  ;;  %v16971_v19 = vadd.f32 %v25179_v20, %v16947_v8  ;;  %v16904_v47 = vadd.f32 %v32229_v23, %v16788_v44 }
0x1039   :  { %v16970_v12 = vadd.f32 %v25181_v7, %v16946_v27  ;;  %25190 = vtanh.f32 %v16905_v22 }
0x103a   :  { %16995 = vst [vmem:[%s32407_s8 + $0x18] sm:$0xff] %v16971_v19  ;;  %25192 = vtanh.f32 %v16904_v47  ;;  %v23516_v3 = vpop.f32.mrb[98].mxu0  ;;  %v16961_v19 = vld [vmem:[%s32406_s1 + $0x88] sm:$0xff]  ;;  %v16960_v47 = vld [vmem:[%s32406_s1 + $0x80] sm:$0xff] }
0x103b   :  { %v25183_v24 = vpop.eup %25182  ;;  %16994 = vst [vmem:[%s32407_s8 + $0x10] sm:$0xff] %v16970_v12  ;;  %v16907_v43 = vadd.f32 %v23516_v3, %v32229_v23  ;;  %v16798_v26 = vpop.f32.mrb[99].mxu0 }
0x103c   :  { %v25185_v57 = vpop.eup %25184  ;;  %v16973_v48 = vadd.f32 %v25183_v24, %v16949_v28  ;;  %v16906_v5 = vadd.f32 %v32229_v23, %v16798_v26 }
0x103d   :  { %v16972_v40 = vadd.f32 %v25185_v57, %v16948_v2  ;;  %25194 = vtanh.f32 %v16907_v43 }
0x103e   :  { %16997 = vst [vmem:[%s32407_s8 + $0x28] sm:$0xff] %v16973_v48  ;;  %25196 = vtanh.f32 %v16906_v5  ;;  %v23519_v1 = vpop.f32.mrb[100].mxu0  ;;  %v16963_v48 = vld [vmem:[%s32406_s1 + $0x98] sm:$0xff]  ;;  %v16962_v5 = vld [vmem:[%s32406_s1 + $0x90] sm:$0xff] }
0x103f   :  { %v25187_v16 = vpop.eup %25186  ;;  %16996 = vst [vmem:[%s32407_s8 + $0x20] sm:$0xff] %v16972_v40  ;;  %v16909_v14 = vadd.f32 %v23519_v1, %v32229_v23  ;;  %v16808_v53 = vpop.f32.mrb[101].mxu0  ;;  %v16965_v1 = vld [vmem:[%s32406_s1 + $0xa8] sm:$0xff] }
0x1040   :  { %v25189_v51 = vpop.eup %25188  ;;  %v16975_v34 = vadd.f32 %v25187_v16, %v16951_v41  ;;  %v16908_v36 = vadd.f32 %v32229_v23, %v16808_v53  ;;  %v16964_v16 = vld [vmem:[%s32406_s1 + $0xa0] sm:$0xff] }
0x1041   :  { %v16974_v17 = vadd.f32 %v25189_v51, %v16950_v63  ;;  %25198 = vtanh.f32 %v16909_v14 }
0x1042   :  { %16999 = vst [vmem:[%s32407_s8 + $0x38] sm:$0xff] %v16975_v34  ;;  %25200 = vtanh.f32 %v16908_v36  ;;  %v23522_v10 = vpop.f32.mrb[102].mxu0  ;;  %v16967_v36 = vld [vmem:[%s32406_s1 + $0xb8] sm:$0xff] }
0x1043   :  { %v25191_v62 = vpop.eup %25190  ;;  %16998 = vst [vmem:[%s32407_s8 + $0x30] sm:$0xff] %v16974_v17  ;;  %v16911_v56 = vadd.f32 %v23522_v10, %v32229_v23  ;;  %v16818_v42 = vpop.f32.mrb[103].mxu0  ;;  %v16966_v17 = vld [vmem:[%s32406_s1 + $0xb0] sm:$0xff] }
0x1044   :  { %v25193_v61 = vpop.eup %25192  ;;  %v16977_v18 = vadd.f32 %v25191_v62, %v16953_v50  ;;  %v16910_v59 = vadd.f32 %v32229_v23, %v16818_v42 }
0x1045   :  { %v16976_v4 = vadd.f32 %v25193_v61, %v16952_v33  ;;  %25202 = vtanh.f32 %v16911_v56 }
0x1046   :  { %17001 = vst [vmem:[%s32407_s8 + $0x48] sm:$0xff] %v16977_v18  ;;  %25204 = vtanh.f32 %v16910_v59  ;;  %v23525_v13 = vpop.f32.mrb[104].mxu0 }
0x1047   :  { %v25195_v58 = vpop.eup %25194  ;;  %17000 = vst [vmem:[%s32407_s8 + $0x40] sm:$0xff] %v16976_v4  ;;  %v16913_v25 = vadd.f32 %v23525_v13, %v32229_v23  ;;  %v16828_v46 = vpop.f32.mrb[105].mxu0 }
0x1048   :  { %v25197_v32 = vpop.eup %25196  ;;  %v16979_v49 = vadd.f32 %v25195_v58, %v16955_v55  ;;  %v16912_v60 = vadd.f32 %v32229_v23, %v16828_v46 }
0x1049   :  { %v16978_v54 = vadd.f32 %v25197_v32, %v16954_v37  ;;  %25206 = vtanh.f32 %v16913_v25 }
0x104a   :  { %17003 = vst [vmem:[%s32407_s8 + $0x58] sm:$0xff] %v16979_v49  ;;  %25208 = vtanh.f32 %v16912_v60  ;;  %v23528_v0 = vpop.f32.mrb[106].mxu0 }
0x104b   :  { %v25199_v15 = vpop.eup %25198  ;;  %17002 = vst [vmem:[%s32407_s8 + $0x50] sm:$0xff] %v16978_v54  ;;  %v16915_v21 = vadd.f32 %v23528_v0, %v32229_v23  ;;  %v16838_v11 = vpop.f32.mrb[107].mxu0 }
0x104c   :  { %v25201_v45 = vpop.eup %25200  ;;  %v16981_v29 = vadd.f32 %v25199_v15, %v16957_v6  ;;  %v16914_v9 = vadd.f32 %v32229_v23, %v16838_v11 }
0x104d   :  { %v16980_v31 = vadd.f32 %v25201_v45, %v16956_v52  ;;  %25210 = vtanh.f32 %v16915_v21 }
0x104e   :  { %17005 = vst [vmem:[%s32407_s8 + $0x68] sm:$0xff] %v16981_v29  ;;  %25212 = vtanh.f32 %v16914_v9  ;;  %v23531_v30 = vpop.f32.mrb[108].mxu0 }
0x104f   :  { %v25203_v8 = vpop.eup %25202  ;;  %17004 = vst [vmem:[%s32407_s8 + $0x60] sm:$0xff] %v16980_v31  ;;  %v16917_v27 = vadd.f32 %v23531_v30, %v32229_v23  ;;  %v16848_v35 = vpop.f32.mrb[109].mxu0 }
0x1050   :  { %v25205_v20 = vpop.eup %25204  ;;  %v16983_v22 = vadd.f32 %v25203_v8, %v16959_v39  ;;  %v16916_v44 = vadd.f32 %v32229_v23, %v16848_v35 }
0x1051   :  { %v16982_v7 = vadd.f32 %v25205_v20, %v16958_v38  ;;  %25214 = vtanh.f32 %v16917_v27 }
0x1052   :  { %17007 = vst [vmem:[%s32407_s8 + $0x78] sm:$0xff] %v16983_v22  ;;  %25216 = vtanh.f32 %v16916_v44  ;;  %v23534_v12 = vpop.f32.mrb[110].mxu0 }
0x1053   :  { %v25207_v28 = vpop.eup %25206  ;;  %17006 = vst [vmem:[%s32407_s8 + $0x70] sm:$0xff] %v16982_v7  ;;  %v16919_v2 = vadd.f32 %v23534_v12, %v32229_v23  ;;  %v16858_v3 = vpop.f32.mrb[111].mxu0 }
0x1054   :  { %v25209_v24 = vpop.eup %25208  ;;  %v16985_v43 = vadd.f32 %v25207_v28, %v16961_v19  ;;  %v16918_v26 = vadd.f32 %v32229_v23, %v16858_v3 }
0x1055   :  { %v16984_v57 = vadd.f32 %v25209_v24, %v16960_v47  ;;  %25218 = vtanh.f32 %v16919_v2 }
0x1056   :  { %17009 = vst [vmem:[%s32407_s8 + $0x88] sm:$0xff] %v16985_v43  ;;  %25220 = vtanh.f32 %v16918_v26 }
0x1057   :  { %v25211_v40 = vpop.eup %25210  ;;  %17008 = vst [vmem:[%s32407_s8 + $0x80] sm:$0xff] %v16984_v57 }
0x1058   :  { %v25213_v23 = vpop.eup %25212  ;;  %v16987_v41 = vadd.f32 %v25211_v40, %v16963_v48 }
0x1059   :  { %v16986_v63 = vadd.f32 %v25213_v23, %v16962_v5 }
0x105a   :  { %17011 = vst [vmem:[%s32407_s8 + $0x98] sm:$0xff] %v16987_v41 }
0x105b   :  { %v25215_v14 = vpop.eup %25214  ;;  %17010 = vst [vmem:[%s32407_s8 + $0x90] sm:$0xff] %v16986_v63 }
0x105c   :  { %v25217_v53 = vpop.eup %25216  ;;  %v16989_v51 = vadd.f32 %v25215_v14, %v16965_v1 }
0x105d   :  { %v16988_v34 = vadd.f32 %v25217_v53, %v16964_v16 }
0x105e   :  { %17013 = vst [vmem:[%s32407_s8 + $0xa8] sm:$0xff] %v16989_v51 }
0x105f   :  { %v25219_v50 = vpop.eup %25218  ;;  %17012 = vst [vmem:[%s32407_s8 + $0xa0] sm:$0xff] %v16988_v34 }
0x1060   :  { %v25221_v33 = vpop.eup %25220  ;;  %v16991_v10 = vadd.f32 %v25219_v50, %v16967_v36 }
0x1061   :  { %v16990_v62 = vadd.f32 %v25221_v33, %v16966_v17 }
0x1062   :  { %17015 = vst [vmem:[%s32407_s8 + $0xb8] sm:$0xff] %v16991_v10 }
0x1063   :  { %17014 = vst [vmem:[%s32407_s8 + $0xb0] sm:$0xff] %v16990_v62 }

</bundles_post_ra>
